<compile_context>
chip_gen: v5e
topology: v5e:2x2
jax: 0.10.0
libtpu: 0.0.40
codegen_flags: <defaults>
</compile_context>

<pallas_src>
import functools

import numpy as np
import jax
import jax.numpy as jnp
from jax import lax
from jax.experimental import pallas as pl
from jax.experimental.pallas import tpu as pltpu


def _bytes(shape, dtype):
    return int(np.prod(shape)) * jnp.dtype(dtype).itemsize


def _pick_tile(total, granule, target):
    """Largest multiple of `granule` dividing `total`, at most `target`."""
    if total <= target:
        return total
    best = granule
    t = granule
    while t <= target:
        if total % t == 0:
            best = t
        t += granule
    return best


# ----------------------------------------------------------------------------
# In-kernel GRU recurrence helper (traced inside the fused recurrence kernel)
# ----------------------------------------------------------------------------
def _gru_steps(T, B, H, gates_ref, whh_bf16, bhh_n_bcast, mask_ref, h0,
               hall_ref=None):
    """Run T GRU steps (torch.nn.GRU gate math) with precomputed input gates.

    gates_ref  : VMEM ref (>= T*B, 3H) bf16; rows [t*B, t*B+B) hold
                 x_t @ W_ih + (b_ih + [b_hh_r | b_hh_z | 0])   (gate order r|z|n)
    whh_bf16   : (H, 3H) bf16 hidden weights
    bhh_n_bcast: (B, H) f32 - b_hh[n] broadcast, hoisted out of the loop
    mask_ref   : VMEM ref (T*B, 1) f32, 1.0 where t < length[b]
    h0         : (B, H) f32 initial hidden
    hall_ref   : optional bf16 ref (T*B, H) to store every step's hidden

        r = sigmoid(gi_r + gh_r); z = sigmoid(gi_z + gh_z)
        n = tanh(gi_n + r * (gh_n + b_hh_n)); h' = (1 - z) * n + z * h
    Packed-sequence semantics: h only advances where mask == 1 (mask is
    monotone per row, so the value at t = T-1 is each row's last valid hidden).
    """
    f32 = jnp.float32

    # TODO(synk): a further latency win would keep W_hh resident in the MXU via
    # pltpu.matmul_push_rhs / matmul_acc_lhs / matmul_pop (same RHS every step);
    # left as jnp.dot for portability.
    def step(t, h):
        row0 = t * B if isinstance(t, int) else pl.multiple_of(t * B, 8)
        gi = gates_ref[pl.ds(row0, B), :].astype(f32)              # (B, 3H)
        gh = jnp.dot(h.astype(jnp.bfloat16), whh_bf16,
                     preferred_element_type=f32)                   # (B, 3H)
        r = jax.nn.sigmoid(gi[:, 0:H] + gh[:, 0:H])
        z = jax.nn.sigmoid(gi[:, H:2 * H] + gh[:, H:2 * H])
        n = jnp.tanh(gi[:, 2 * H:3 * H] + r * (gh[:, 2 * H:3 * H] + bhh_n_bcast))
        h_new = (1.0 - z) * n + z * h
        m = mask_ref[pl.ds(row0, B), :]                            # (B, 1) in {0,1}
        h = jnp.where(m > 0.0, h_new, h)                           # freeze padded steps
        if hall_ref is not None:
            hall_ref[pl.ds(row0, B), :] = h.astype(hall_ref.dtype)
        return h

    if T <= 16:                      # small static T: fully unroll
        h = h0
        for t in range(T):
            h = step(t, h)
        return h
    # larger T: bound code size / live ranges
    return lax.fori_loop(0, T, step, h0)


# ----------------------------------------------------------------------------
# Kernel 1: encoder GRU + hid_to_hid + projections + decoder GRU (VMEM resident)
# ----------------------------------------------------------------------------
def nmt_recurrence_kernel(
        # inputs
        x_src_ref, m_src_ref, x_trg_ref, m_trg_ref,
        enc_wih_ref, enc_whh_ref, enc_bih_ref, enc_bhhn_ref,
        h2h_w_ref, h2h_b_ref,
        p1_w_ref, p1_b_ref, p2_w_ref, p2_b_ref,
        dec_wih_ref, dec_whh_ref, dec_bih_ref, dec_bhhn_ref,
        # output
        hall_ref,
        # scratch
        gates_scr,
        # static config
        *, B, Ts, Tt, H, unit_norm, proj):
    f32 = jnp.float32
    bf16 = jnp.bfloat16

    # -------------------- encoder GRU --------------------
    # Hoisted input-gate matmul for ALL timesteps at once: (Ts*B, E) @ (E, 3H).
    gi_src = (jnp.dot(x_src_ref[...], enc_wih_ref[...],
                      preferred_element_type=f32) + enc_bih_ref[...])
    gates_scr[pl.ds(0, Ts * B), :] = gi_src.astype(bf16)
    enc_bhhn_b = jnp.broadcast_to(enc_bhhn_ref[...], (B, H))   # hoisted broadcast
    h = jnp.zeros((B, H), f32)
    h = _gru_steps(Ts, B, H, gates_scr, enc_whh_ref[...], enc_bhhn_b,
                   m_src_ref, h)

    # -------------------- hid_to_hid (+ unit_norm) + residual projections ----
    # Small one-shot (B,H)@(H,H) matmuls, kept f32 for fidelity with the
    # PyTorch fp32 linears (off the per-step critical path, negligible cost).
    enc_hid = (jnp.dot(h, h2h_w_ref[...], preferred_element_type=f32)
               + h2h_b_ref[...])
    if unit_norm:
        nrm = jnp.sqrt(jnp.sum(enc_hid * enc_hid, axis=1, keepdims=True)) + 1e-9
        enc_hid = enc_hid / nrm
    if proj:
        enc_hid = enc_hid + (jnp.dot(enc_hid, p1_w_ref[...],
                                     preferred_element_type=f32) + p1_b_ref[...])
        enc_hid = enc_hid + (jnp.dot(enc_hid, p2_w_ref[...],
                                     preferred_element_type=f32) + p2_b_ref[...])
    # TODO(synk): dropout layers are identity (p = 0.0 / eval mode); stochastic
    # training-mode dropout is not reproduced.

    # -------------------- decoder GRU --------------------
    gi_trg = (jnp.dot(x_trg_ref[...], dec_wih_ref[...],
                      preferred_element_type=f32) + dec_bih_ref[...])
    gates_scr[pl.ds(0, Tt * B), :] = gi_trg.astype(bf16)
    dec_bhhn_b = jnp.broadcast_to(dec_bhhn_ref[...], (B, H))
    _gru_steps(Tt, B, H, gates_scr, dec_whh_ref[...], dec_bhhn_b,
               m_trg_ref, enc_hid, hall_ref=hall_ref)


# ----------------------------------------------------------------------------
# Kernel 2: hid_to_voc projection over a 2-D parallel (row_tile, vocab_tile) grid
# ----------------------------------------------------------------------------
def h2v_kernel(hall_ref, w_ref, b_ref, out_ref):
    out_ref[...] = (jnp.dot(hall_ref[...], w_ref[...],
                            preferred_element_type=jnp.float32) + b_ref[...])


# ----------------------------------------------------------------------------
# Glue: NMT.forward
# ----------------------------------------------------------------------------
def packed_indices(lens, T, B_pad):
    """Row indices (into time-major flattened (T*B_pad, .)) in PackedSequence
    order: for each t, every batch row with length > t, in batch order."""
    idx = []
    for t in range(T):
        for b, L in enumerate(lens):
            if L > t:
                idx.append(t * B_pad + b)
    return np.asarray(idx, dtype=np.int32)


def nmt_forward(params, src_caps_in, src_lens, trg_sorted_idx,
                trg_caps_in, trg_lens, unit_norm=False, proj=True):
    B_real, Ts = src_caps_in.shape
    _, Tt = trg_caps_in.shape
    H = params["h2h_w"].shape[0]
    E = params["src_embed"].shape[1]
    V = params["h2v_w"].shape[1]

    # pad batch to a multiple of 16 (bf16 sublane-pair aligned row blocks);
    # padded rows have mask == 0.
    B = ((B_real + 15) // 16) * 16

    # index_select(enc_hid, 0, trg_sorted_idx) commutes with the per-row
    # encoder: permute the source side up front instead of gathering enc_hid.
    perm = np.asarray(trg_sorted_idx)
    src_ids_p = jnp.take(src_caps_in, jnp.asarray(perm, jnp.int32), axis=0)
    src_lens_p = [int(src_lens[i]) for i in perm]

    def pack_inputs(ids, lens, table, T):
        emb = jnp.take(table, ids, axis=0)                       # (B_real, T, E)
        x = jnp.transpose(emb, (1, 0, 2))                        # (T, B_real, E)
        x = jnp.pad(x, ((0, 0), (0, B - B_real), (0, 0)))        # (T, B, E)
        x = x.reshape(T * B, E).astype(jnp.bfloat16)             # time-major rows
        m = (np.arange(T)[:, None] < np.asarray(lens)[None, :]).astype(np.float32)
        m = np.pad(m, ((0, 0), (0, B - B_real)))                 # (T, B)
        return x, jnp.asarray(m.reshape(T * B, 1))

    x_src, m_src = pack_inputs(src_ids_p, src_lens_p, params["src_embed"], Ts)
    x_trg, m_trg = pack_inputs(trg_caps_in, trg_lens, params["trg_embed"], Tt)

    # Fold b_hh[r], b_hh[z] into the precomputed input-gate bias; only b_hh[n]
    # must stay inside the r*(.) term of the recurrence (trims the per-step chain).
    def fold_bias(bih, bhh):
        folded = bih + jnp.concatenate(
            [bhh[:, :2 * H], jnp.zeros((1, H), bhh.dtype)], axis=1)
        return folded, bhh[:, 2 * H:3 * H]

    enc_bih_f, enc_bhh_n = fold_bias(params["enc_bih"], params["enc_bhh"])
    dec_bih_f, dec_bhh_n = fold_bias(params["dec_bih"], params["dec_bhh"])

    Tmax = max(Ts, Tt)
    kernel1 = functools.partial(nmt_recurrence_kernel, B=B, Ts=Ts, Tt=Tt, H=H,
                                unit_norm=unit_norm, proj=proj)

    args1 = (x_src, m_src, x_trg, m_trg,
             params["enc_wih"], params["enc_whh"], enc_bih_f, enc_bhh_n,
             params["h2h_w"], params["h2h_b"],
             params["proj1_w"], params["proj1_b"],
             params["proj2_w"], params["proj2_b"],
             params["dec_wih"], params["dec_whh"], dec_bih_f, dec_bhh_n)

    # Explicit VMEM budget for the resident recurrence kernel (capped at 64 MiB
    # so the request is valid on v5e/v6e/v7x alike).
    resident = sum(_bytes(a.shape, a.dtype) for a in args1)
    resident += _bytes((Tt * B, H), jnp.bfloat16)             # hall output
    resident += _bytes((Tmax * B, 3 * H), jnp.bfloat16)       # gates scratch
    vmem1 = min(max(int(resident * 1.5) + (8 << 20), 32 << 20), 64 << 20)

    hall = pl.pallas_call(
        kernel1,
        out_shape=jax.ShapeDtypeStruct((Tt * B, H), jnp.bfloat16),
        scratch_shapes=[pltpu.VMEM((Tmax * B, 3 * H), jnp.bfloat16)],
        compiler_params=pltpu.CompilerParams(vmem_limit_bytes=vmem1),
    )(*args1)

    # -------------------- hid_to_voc: tiled 2-D parallel grid ----------------
    R = Tt * B
    V_pad = ((V + 127) // 128) * 128
    h2v_w, h2v_b = params["h2v_w"], params["h2v_b"]
    if V_pad != V:
        h2v_w = jnp.pad(h2v_w, ((0, 0), (0, V_pad - V)))
        h2v_b = jnp.pad(h2v_b, ((0, 0), (0, V_pad - V)))

    tR = _pick_tile(R, 8, 512)        # row tile (multiple of 8 sublanes)
    tV = _pick_tile(V_pad, 128, 1024)  # vocab tile (lane-dense, >= 512 when possible)

    per_step = (_bytes((tR, H), jnp.bfloat16) + _bytes((H, tV), jnp.bfloat16)
                + _bytes((1, tV), jnp.float32) + _bytes((tR, tV), jnp.float32))
    vmem2 = min(max(2 * per_step + (8 << 20), 32 << 20), 64 << 20)

    logits_all = pl.pallas_call(
        h2v_kernel,
        out_shape=jax.ShapeDtypeStruct((R, V_pad), jnp.float32),
        grid=(R // tR, V_pad // tV),
        in_specs=[
            pl.BlockSpec((tR, H), lambda i, j: (i, 0)),
            pl.BlockSpec((H, tV), lambda i, j: (0, j)),
            pl.BlockSpec((1, tV), lambda i, j: (0, j)),
        ],
        out_specs=pl.BlockSpec((tR, tV), lambda i, j: (i, j)),
        compiler_params=pltpu.CompilerParams(
            dimension_semantics=("parallel", "parallel"),
            vmem_limit_bytes=vmem2),
    )(hall, h2v_w, h2v_b)

    if V_pad != V:
        logits_all = logits_all[:, :V]

    # PackedSequence.data ordering (lengths sorted descending, batch_first=True)
    pidx = jnp.asarray(packed_indices(trg_lens, Tt, B))
    return jnp.take(logits_all, pidx, axis=0)                    # (sum(lens), V)


# ----------------------------------------------------------------------------
# Parameter init + example run
# ----------------------------------------------------------------------------
def init_params(key, vocab_src, vocab_trg, D_emb, D_hid):
    ks = jax.random.split(key, 16)

    def nrm(k, shape, scale=0.1, dtype=jnp.float32):
        return (scale * jax.random.normal(k, shape)).astype(dtype)

    bf = jnp.bfloat16
    return {
        "src_embed": nrm(ks[0], (vocab_src, D_emb)),
        "trg_embed": nrm(ks[1], (vocab_trg, D_emb)),
        # GRU weights: gate-stacked (r|z|n) along the last (lane) axis,
        # input-major (in_dim, 3H) so the hot path is always x @ W on the MXU.
        "enc_wih": nrm(ks[2], (D_emb, 3 * D_hid), dtype=bf),
        "enc_whh": nrm(ks[3], (D_hid, 3 * D_hid), dtype=bf),
        "enc_bih": nrm(ks[4], (1, 3 * D_hid)),
        "enc_bhh": nrm(ks[5], (1, 3 * D_hid)),
        "dec_wih": nrm(ks[6], (D_emb, 3 * D_hid), dtype=bf),
        "dec_whh": nrm(ks[7], (D_hid, 3 * D_hid), dtype=bf),
        "dec_bih": nrm(ks[8], (1, 3 * D_hid)),
        "dec_bhh": nrm(ks[9], (1, 3 * D_hid)),
        # linears
        "h2h_w": nrm(ks[10], (D_hid, D_hid)),
        "h2h_b": nrm(ks[11], (1, D_hid)),
        "proj1_w": nrm(ks[12], (D_hid, D_hid)),
        "proj1_b": jnp.zeros((1, D_hid), jnp.float32),
        "proj2_w": nrm(ks[13], (D_hid, D_hid)),
        "proj2_b": jnp.zeros((1, D_hid), jnp.float32),
        "h2v_w": nrm(ks[14], (D_hid, vocab_trg), dtype=bf),
        "h2v_b": nrm(ks[15], (1, vocab_trg)),
    }


if __name__ == "__main__":
    B = 4
    T_src, T_trg = 8, 8
    D_emb, D_hid = 64, 128            # H multiple of 128 -> lane-dense gates
    vocab_src, vocab_trg = 256, 256   # V multiple of 128 -> lane-dense logits

    key = jax.random.PRNGKey(0)
    kp, k1, k2 = jax.random.split(key, 3)
    params = init_params(kp, vocab_src, vocab_trg, D_emb, D_hid)

    # lengths sorted descending (pack_padded_sequence contract)
    src_lens = [8, 6, 5, 3]
    trg_lens = [8, 7, 4, 2]
    trg_sorted_idx = jnp.asarray([2, 0, 3, 1], dtype=jnp.int32)

    src_ids = jax.random.randint(k1, (B, T_src), 1, vocab_src, dtype=jnp.int32)
    trg_ids = jax.random.randint(k2, (B, T_trg), 1, vocab_trg, dtype=jnp.int32)
    # zero-pad beyond lengths (padding_idx = 0)
    src_pad = (np.arange(T_src)[None, :] < np.asarray(src_lens)[:, None])
    trg_pad = (np.arange(T_trg)[None, :] < np.asarray(trg_lens)[:, None])
    src_ids = src_ids * jnp.asarray(src_pad, jnp.int32)
    trg_ids = trg_ids * jnp.asarray(trg_pad, jnp.int32)

    dec_logits = nmt_forward(params, src_ids, src_lens, trg_sorted_idx,
                             trg_ids, trg_lens, unit_norm=False, proj=True)
    dec_logits = jax.block_until_ready(dec_logits)

    assert dec_logits.shape == (sum(trg_lens), vocab_trg), dec_logits.shape
    assert bool(jnp.all(jnp.isfinite(dec_logits)))
    print("KERNEL_OK")
</pallas_src>

<mosaic_0001>
module attributes {stable_mosaic.version = 11 : i64} {
  func.func @nmt_recurrence_kernel(%arg0: memref<128x64xbf16, #tpu.memory_space<vmem>>, %arg1: memref<128x1xf32, #tpu.memory_space<vmem>>, %arg2: memref<128x64xbf16, #tpu.memory_space<vmem>>, %arg3: memref<128x1xf32, #tpu.memory_space<vmem>>, %arg4: memref<64x384xbf16, #tpu.memory_space<vmem>>, %arg5: memref<128x384xbf16, #tpu.memory_space<vmem>>, %arg6: memref<1x384xf32, #tpu.memory_space<vmem>>, %arg7: memref<1x128xf32, #tpu.memory_space<vmem>>, %arg8: memref<128x128xf32, #tpu.memory_space<vmem>>, %arg9: memref<1x128xf32, #tpu.memory_space<vmem>>, %arg10: memref<128x128xf32, #tpu.memory_space<vmem>>, %arg11: memref<1x128xf32, #tpu.memory_space<vmem>>, %arg12: memref<128x128xf32, #tpu.memory_space<vmem>>, %arg13: memref<1x128xf32, #tpu.memory_space<vmem>>, %arg14: memref<64x384xbf16, #tpu.memory_space<vmem>>, %arg15: memref<128x384xbf16, #tpu.memory_space<vmem>>, %arg16: memref<1x384xf32, #tpu.memory_space<vmem>>, %arg17: memref<1x128xf32, #tpu.memory_space<vmem>>, %arg18: memref<128x128xbf16, #tpu.memory_space<vmem>>, %arg19: memref<128x384xbf16, #tpu.memory_space<vmem>>) attributes {dimension_semantics = [], scalar_prefetch = 0 : i64, scratch_operands = 1 : i64, tpu.core_type = #tpu.core_type<tc>} {
    %c0 = arith.constant 0 : index
    %c0_0 = arith.constant 0 : index
    %0 = vector.load %arg0[%c0, %c0_0] : memref<128x64xbf16, #tpu.memory_space<vmem>>, vector<128x64xbf16>
    %c0_1 = arith.constant 0 : index
    %c0_2 = arith.constant 0 : index
    %1 = vector.load %arg4[%c0_1, %c0_2] : memref<64x384xbf16, #tpu.memory_space<vmem>>, vector<64x384xbf16>
    %cst = arith.constant dense<0.000000e+00> : vector<128x384xf32>
    %2 = tpu.matmul %0, %1, %cst {dimension_numbers = #tpu.dot_dimension_numbers<[1], [0], [0], [1], [0, 0, 1, 1], [], []>} : vector<128x64xbf16>, vector<64x384xbf16>, vector<128x384xf32> -> vector<128x384xf32>
    %c0_3 = arith.constant 0 : index
    %c0_4 = arith.constant 0 : index
    %3 = vector.load %arg6[%c0_3, %c0_4] : memref<1x384xf32, #tpu.memory_space<vmem>>, vector<1x384xf32>
    %4 = vector.broadcast %3 : vector<1x384xf32> to vector<128x384xf32>
    %5 = arith.addf %2, %4 : vector<128x384xf32>
    %6 = arith.truncf %5 : vector<128x384xf32> to vector<128x384xbf16>
    %c0_5 = arith.constant 0 : index
    %c0_6 = arith.constant 0 : index
    %7 = vector.load %arg19[%c0_5, %c0_6] : memref<128x384xbf16, #tpu.memory_space<vmem>>, vector<128x384xbf16>
    tpu.vector_store %arg19[%c0_5, %c0_6], %6 {strides = array<i32>} : memref<128x384xbf16, #tpu.memory_space<vmem>>, vector<128x384xbf16>,
    %c0_7 = arith.constant 0 : index
    %c0_8 = arith.constant 0 : index
    %8 = vector.load %arg7[%c0_7, %c0_8] : memref<1x128xf32, #tpu.memory_space<vmem>>, vector<1x128xf32>
    %9 = vector.shape_cast %8 : vector<1x128xf32> to vector<1x128xf32>
    %10 = vector.broadcast %9 : vector<1x128xf32> to vector<16x128xf32>
    %cst_9 = arith.constant 0.000000e+00 : f32
    %11 = vector.broadcast %cst_9 : f32 to vector<16x128xf32>
    %c0_10 = arith.constant 0 : index
    %c0_11 = arith.constant 0 : index
    %12 = vector.load %arg5[%c0_10, %c0_11] : memref<128x384xbf16, #tpu.memory_space<vmem>>, vector<128x384xbf16>
    %c0_12 = arith.constant 0 : index
    %c0_13 = arith.constant 0 : index
    %13 = vector.load %arg19[%c0_12, %c0_13] : memref<128x384xbf16, #tpu.memory_space<vmem>>, vector<16x384xbf16>
    %14 = arith.extf %13 : vector<16x384xbf16> to vector<16x384xf32>
    %15 = arith.truncf %11 : vector<16x128xf32> to vector<16x128xbf16>
    %cst_14 = arith.constant dense<0.000000e+00> : vector<16x384xf32>
    %16 = tpu.matmul %15, %12, %cst_14 {dimension_numbers = #tpu.dot_dimension_numbers<[1], [0], [0], [1], [0, 0, 1, 1], [], []>} : vector<16x128xbf16>, vector<128x384xbf16>, vector<16x384xf32> -> vector<16x384xf32>
    %17 = vector.extract_strided_slice %14 {offsets = [0, 0], sizes = [16, 128], strides = [1, 1]} : vector<16x384xf32> to vector<16x128xf32>
    %18 = vector.extract_strided_slice %16 {offsets = [0, 0], sizes = [16, 128], strides = [1, 1]} : vector<16x384xf32> to vector<16x128xf32>
    %19 = arith.addf %17, %18 : vector<16x128xf32>
    %20 = arith.negf %19 : vector<16x128xf32>
    %21 = math.exp %20 : vector<16x128xf32>
    %cst_15 = arith.constant 1.000000e+00 : f32
    %22 = vector.broadcast %cst_15 : f32 to vector<16x128xf32>
    %23 = arith.addf %22, %21 : vector<16x128xf32>
    %24 = arith.divf %22, %23 : vector<16x128xf32>
    %25 = vector.extract_strided_slice %14 {offsets = [0, 128], sizes = [16, 128], strides = [1, 1]} : vector<16x384xf32> to vector<16x128xf32>
    %26 = vector.extract_strided_slice %16 {offsets = [0, 128], sizes = [16, 128], strides = [1, 1]} : vector<16x384xf32> to vector<16x128xf32>
    %27 = arith.addf %25, %26 : vector<16x128xf32>
    %28 = arith.negf %27 : vector<16x128xf32>
    %29 = math.exp %28 : vector<16x128xf32>
    %cst_16 = arith.constant 1.000000e+00 : f32
    %30 = vector.broadcast %cst_16 : f32 to vector<16x128xf32>
    %31 = arith.addf %30, %29 : vector<16x128xf32>
    %32 = arith.divf %30, %31 : vector<16x128xf32>
    %33 = vector.extract_strided_slice %14 {offsets = [0, 256], sizes = [16, 128], strides = [1, 1]} : vector<16x384xf32> to vector<16x128xf32>
    %34 = vector.extract_strided_slice %16 {offsets = [0, 256], sizes = [16, 128], strides = [1, 1]} : vector<16x384xf32> to vector<16x128xf32>
    %35 = arith.addf %34, %10 : vector<16x128xf32>
    %36 = arith.mulf %24, %35 : vector<16x128xf32>
    %37 = arith.addf %33, %36 : vector<16x128xf32>
    %38 = math.tanh %37 : vector<16x128xf32>
    %cst_17 = arith.constant 1.000000e+00 : f32
    %39 = vector.broadcast %cst_17 : f32 to vector<16x128xf32>
    %40 = arith.subf %39, %32 : vector<16x128xf32>
    %41 = arith.mulf %40, %38 : vector<16x128xf32>
    %42 = arith.mulf %32, %11 : vector<16x128xf32>
    %43 = arith.addf %41, %42 : vector<16x128xf32>
    %c0_18 = arith.constant 0 : index
    %c0_19 = arith.constant 0 : index
    %44 = vector.load %arg1[%c0_18, %c0_19] : memref<128x1xf32, #tpu.memory_space<vmem>>, vector<16x1xf32>
    %cst_20 = arith.constant 0.000000e+00 : f32
    %45 = vector.broadcast %cst_20 : f32 to vector<16x1xf32>
    %46 = arith.cmpf ogt, %44, %45 : vector<16x1xf32>
    %47 = vector.shape_cast %46 : vector<16x1xi1> to vector<16x1xi1>
    %48 = vector.broadcast %47 : vector<16x1xi1> to vector<16x128xi1>
    %49 = arith.select %48, %43, %11 : vector<16x128xi1>, vector<16x128xf32>
    %c16 = arith.constant 16 : index
    %c0_21 = arith.constant 0 : index
    %50 = vector.load %arg19[%c16, %c0_21] : memref<128x384xbf16, #tpu.memory_space<vmem>>, vector<16x384xbf16>
    %51 = arith.extf %50 : vector<16x384xbf16> to vector<16x384xf32>
    %52 = arith.truncf %49 : vector<16x128xf32> to vector<16x128xbf16>
    %cst_22 = arith.constant dense<0.000000e+00> : vector<16x384xf32>
    %53 = tpu.matmul %52, %12, %cst_22 {dimension_numbers = #tpu.dot_dimension_numbers<[1], [0], [0], [1], [0, 0, 1, 1], [], []>} : vector<16x128xbf16>, vector<128x384xbf16>, vector<16x384xf32> -> vector<16x384xf32>
    %54 = vector.extract_strided_slice %51 {offsets = [0, 0], sizes = [16, 128], strides = [1, 1]} : vector<16x384xf32> to vector<16x128xf32>
    %55 = vector.extract_strided_slice %53 {offsets = [0, 0], sizes = [16, 128], strides = [1, 1]} : vector<16x384xf32> to vector<16x128xf32>
    %56 = arith.addf %54, %55 : vector<16x128xf32>
    %57 = arith.negf %56 : vector<16x128xf32>
    %58 = math.exp %57 : vector<16x128xf32>
    %cst_23 = arith.constant 1.000000e+00 : f32
    %59 = vector.broadcast %cst_23 : f32 to vector<16x128xf32>
    %60 = arith.addf %59, %58 : vector<16x128xf32>
    %61 = arith.divf %59, %60 : vector<16x128xf32>
    %62 = vector.extract_strided_slice %51 {offsets = [0, 128], sizes = [16, 128], strides = [1, 1]} : vector<16x384xf32> to vector<16x128xf32>
    %63 = vector.extract_strided_slice %53 {offsets = [0, 128], sizes = [16, 128], strides = [1, 1]} : vector<16x384xf32> to vector<16x128xf32>
    %64 = arith.addf %62, %63 : vector<16x128xf32>
    %65 = arith.negf %64 : vector<16x128xf32>
    %66 = math.exp %65 : vector<16x128xf32>
    %cst_24 = arith.constant 1.000000e+00 : f32
    %67 = vector.broadcast %cst_24 : f32 to vector<16x128xf32>
    %68 = arith.addf %67, %66 : vector<16x128xf32>
    %69 = arith.divf %67, %68 : vector<16x128xf32>
    %70 = vector.extract_strided_slice %51 {offsets = [0, 256], sizes = [16, 128], strides = [1, 1]} : vector<16x384xf32> to vector<16x128xf32>
    %71 = vector.extract_strided_slice %53 {offsets = [0, 256], sizes = [16, 128], strides = [1, 1]} : vector<16x384xf32> to vector<16x128xf32>
    %72 = arith.addf %71, %10 : vector<16x128xf32>
    %73 = arith.mulf %61, %72 : vector<16x128xf32>
    %74 = arith.addf %70, %73 : vector<16x128xf32>
    %75 = math.tanh %74 : vector<16x128xf32>
    %cst_25 = arith.constant 1.000000e+00 : f32
    %76 = vector.broadcast %cst_25 : f32 to vector<16x128xf32>
    %77 = arith.subf %76, %69 : vector<16x128xf32>
    %78 = arith.mulf %77, %75 : vector<16x128xf32>
    %79 = arith.mulf %69, %49 : vector<16x128xf32>
    %80 = arith.addf %78, %79 : vector<16x128xf32>
    %c16_26 = arith.constant 16 : index
    %c0_27 = arith.constant 0 : index
    %81 = vector.load %arg1[%c16_26, %c0_27] : memref<128x1xf32, #tpu.memory_space<vmem>>, vector<16x1xf32>
    %cst_28 = arith.constant 0.000000e+00 : f32
    %82 = vector.broadcast %cst_28 : f32 to vector<16x1xf32>
    %83 = arith.cmpf ogt, %81, %82 : vector<16x1xf32>
    %84 = vector.shape_cast %83 : vector<16x1xi1> to vector<16x1xi1>
    %85 = vector.broadcast %84 : vector<16x1xi1> to vector<16x128xi1>
    %86 = arith.select %85, %80, %49 : vector<16x128xi1>, vector<16x128xf32>
    %c32 = arith.constant 32 : index
    %c0_29 = arith.constant 0 : index
    %87 = vector.load %arg19[%c32, %c0_29] : memref<128x384xbf16, #tpu.memory_space<vmem>>, vector<16x384xbf16>
    %88 = arith.extf %87 : vector<16x384xbf16> to vector<16x384xf32>
    %89 = arith.truncf %86 : vector<16x128xf32> to vector<16x128xbf16>
    %cst_30 = arith.constant dense<0.000000e+00> : vector<16x384xf32>
    %90 = tpu.matmul %89, %12, %cst_30 {dimension_numbers = #tpu.dot_dimension_numbers<[1], [0], [0], [1], [0, 0, 1, 1], [], []>} : vector<16x128xbf16>, vector<128x384xbf16>, vector<16x384xf32> -> vector<16x384xf32>
    %91 = vector.extract_strided_slice %88 {offsets = [0, 0], sizes = [16, 128], strides = [1, 1]} : vector<16x384xf32> to vector<16x128xf32>
    %92 = vector.extract_strided_slice %90 {offsets = [0, 0], sizes = [16, 128], strides = [1, 1]} : vector<16x384xf32> to vector<16x128xf32>
    %93 = arith.addf %91, %92 : vector<16x128xf32>
    %94 = arith.negf %93 : vector<16x128xf32>
    %95 = math.exp %94 : vector<16x128xf32>
    %cst_31 = arith.constant 1.000000e+00 : f32
    %96 = vector.broadcast %cst_31 : f32 to vector<16x128xf32>
    %97 = arith.addf %96, %95 : vector<16x128xf32>
    %98 = arith.divf %96, %97 : vector<16x128xf32>
    %99 = vector.extract_strided_slice %88 {offsets = [0, 128], sizes = [16, 128], strides = [1, 1]} : vector<16x384xf32> to vector<16x128xf32>
    %100 = vector.extract_strided_slice %90 {offsets = [0, 128], sizes = [16, 128], strides = [1, 1]} : vector<16x384xf32> to vector<16x128xf32>
    %101 = arith.addf %99, %100 : vector<16x128xf32>
    %102 = arith.negf %101 : vector<16x128xf32>
    %103 = math.exp %102 : vector<16x128xf32>
    %cst_32 = arith.constant 1.000000e+00 : f32
    %104 = vector.broadcast %cst_32 : f32 to vector<16x128xf32>
    %105 = arith.addf %104, %103 : vector<16x128xf32>
    %106 = arith.divf %104, %105 : vector<16x128xf32>
    %107 = vector.extract_strided_slice %88 {offsets = [0, 256], sizes = [16, 128], strides = [1, 1]} : vector<16x384xf32> to vector<16x128xf32>
    %108 = vector.extract_strided_slice %90 {offsets = [0, 256], sizes = [16, 128], strides = [1, 1]} : vector<16x384xf32> to vector<16x128xf32>
    %109 = arith.addf %108, %10 : vector<16x128xf32>
    %110 = arith.mulf %98, %109 : vector<16x128xf32>
    %111 = arith.addf %107, %110 : vector<16x128xf32>
    %112 = math.tanh %111 : vector<16x128xf32>
    %cst_33 = arith.constant 1.000000e+00 : f32
    %113 = vector.broadcast %cst_33 : f32 to vector<16x128xf32>
    %114 = arith.subf %113, %106 : vector<16x128xf32>
    %115 = arith.mulf %114, %112 : vector<16x128xf32>
    %116 = arith.mulf %106, %86 : vector<16x128xf32>
    %117 = arith.addf %115, %116 : vector<16x128xf32>
    %c32_34 = arith.constant 32 : index
    %c0_35 = arith.constant 0 : index
    %118 = vector.load %arg1[%c32_34, %c0_35] : memref<128x1xf32, #tpu.memory_space<vmem>>, vector<16x1xf32>
    %cst_36 = arith.constant 0.000000e+00 : f32
    %119 = vector.broadcast %cst_36 : f32 to vector<16x1xf32>
    %120 = arith.cmpf ogt, %118, %119 : vector<16x1xf32>
    %121 = vector.shape_cast %120 : vector<16x1xi1> to vector<16x1xi1>
    %122 = vector.broadcast %121 : vector<16x1xi1> to vector<16x128xi1>
    %123 = arith.select %122, %117, %86 : vector<16x128xi1>, vector<16x128xf32>
    %c48 = arith.constant 48 : index
    %c0_37 = arith.constant 0 : index
    %124 = vector.load %arg19[%c48, %c0_37] : memref<128x384xbf16, #tpu.memory_space<vmem>>, vector<16x384xbf16>
    %125 = arith.extf %124 : vector<16x384xbf16> to vector<16x384xf32>
    %126 = arith.truncf %123 : vector<16x128xf32> to vector<16x128xbf16>
    %cst_38 = arith.constant dense<0.000000e+00> : vector<16x384xf32>
    %127 = tpu.matmul %126, %12, %cst_38 {dimension_numbers = #tpu.dot_dimension_numbers<[1], [0], [0], [1], [0, 0, 1, 1], [], []>} : vector<16x128xbf16>, vector<128x384xbf16>, vector<16x384xf32> -> vector<16x384xf32>
    %128 = vector.extract_strided_slice %125 {offsets = [0, 0], sizes = [16, 128], strides = [1, 1]} : vector<16x384xf32> to vector<16x128xf32>
    %129 = vector.extract_strided_slice %127 {offsets = [0, 0], sizes = [16, 128], strides = [1, 1]} : vector<16x384xf32> to vector<16x128xf32>
    %130 = arith.addf %128, %129 : vector<16x128xf32>
    %131 = arith.negf %130 : vector<16x128xf32>
    %132 = math.exp %131 : vector<16x128xf32>
    %cst_39 = arith.constant 1.000000e+00 : f32
    %133 = vector.broadcast %cst_39 : f32 to vector<16x128xf32>
    %134 = arith.addf %133, %132 : vector<16x128xf32>
    %135 = arith.divf %133, %134 : vector<16x128xf32>
    %136 = vector.extract_strided_slice %125 {offsets = [0, 128], sizes = [16, 128], strides = [1, 1]} : vector<16x384xf32> to vector<16x128xf32>
    %137 = vector.extract_strided_slice %127 {offsets = [0, 128], sizes = [16, 128], strides = [1, 1]} : vector<16x384xf32> to vector<16x128xf32>
    %138 = arith.addf %136, %137 : vector<16x128xf32>
    %139 = arith.negf %138 : vector<16x128xf32>
    %140 = math.exp %139 : vector<16x128xf32>
    %cst_40 = arith.constant 1.000000e+00 : f32
    %141 = vector.broadcast %cst_40 : f32 to vector<16x128xf32>
    %142 = arith.addf %141, %140 : vector<16x128xf32>
    %143 = arith.divf %141, %142 : vector<16x128xf32>
    %144 = vector.extract_strided_slice %125 {offsets = [0, 256], sizes = [16, 128], strides = [1, 1]} : vector<16x384xf32> to vector<16x128xf32>
    %145 = vector.extract_strided_slice %127 {offsets = [0, 256], sizes = [16, 128], strides = [1, 1]} : vector<16x384xf32> to vector<16x128xf32>
    %146 = arith.addf %145, %10 : vector<16x128xf32>
    %147 = arith.mulf %135, %146 : vector<16x128xf32>
    %148 = arith.addf %144, %147 : vector<16x128xf32>
    %149 = math.tanh %148 : vector<16x128xf32>
    %cst_41 = arith.constant 1.000000e+00 : f32
    %150 = vector.broadcast %cst_41 : f32 to vector<16x128xf32>
    %151 = arith.subf %150, %143 : vector<16x128xf32>
    %152 = arith.mulf %151, %149 : vector<16x128xf32>
    %153 = arith.mulf %143, %123 : vector<16x128xf32>
    %154 = arith.addf %152, %153 : vector<16x128xf32>
    %c48_42 = arith.constant 48 : index
    %c0_43 = arith.constant 0 : index
    %155 = vector.load %arg1[%c48_42, %c0_43] : memref<128x1xf32, #tpu.memory_space<vmem>>, vector<16x1xf32>
    %cst_44 = arith.constant 0.000000e+00 : f32
    %156 = vector.broadcast %cst_44 : f32 to vector<16x1xf32>
    %157 = arith.cmpf ogt, %155, %156 : vector<16x1xf32>
    %158 = vector.shape_cast %157 : vector<16x1xi1> to vector<16x1xi1>
    %159 = vector.broadcast %158 : vector<16x1xi1> to vector<16x128xi1>
    %160 = arith.select %159, %154, %123 : vector<16x128xi1>, vector<16x128xf32>
    %c64 = arith.constant 64 : index
    %c0_45 = arith.constant 0 : index
    %161 = vector.load %arg19[%c64, %c0_45] : memref<128x384xbf16, #tpu.memory_space<vmem>>, vector<16x384xbf16>
    %162 = arith.extf %161 : vector<16x384xbf16> to vector<16x384xf32>
    %163 = arith.truncf %160 : vector<16x128xf32> to vector<16x128xbf16>
    %cst_46 = arith.constant dense<0.000000e+00> : vector<16x384xf32>
    %164 = tpu.matmul %163, %12, %cst_46 {dimension_numbers = #tpu.dot_dimension_numbers<[1], [0], [0], [1], [0, 0, 1, 1], [], []>} : vector<16x128xbf16>, vector<128x384xbf16>, vector<16x384xf32> -> vector<16x384xf32>
    %165 = vector.extract_strided_slice %162 {offsets = [0, 0], sizes = [16, 128], strides = [1, 1]} : vector<16x384xf32> to vector<16x128xf32>
    %166 = vector.extract_strided_slice %164 {offsets = [0, 0], sizes = [16, 128], strides = [1, 1]} : vector<16x384xf32> to vector<16x128xf32>
    %167 = arith.addf %165, %166 : vector<16x128xf32>
    %168 = arith.negf %167 : vector<16x128xf32>
    %169 = math.exp %168 : vector<16x128xf32>
    %cst_47 = arith.constant 1.000000e+00 : f32
    %170 = vector.broadcast %cst_47 : f32 to vector<16x128xf32>
    %171 = arith.addf %170, %169 : vector<16x128xf32>
    %172 = arith.divf %170, %171 : vector<16x128xf32>
    %173 = vector.extract_strided_slice %162 {offsets = [0, 128], sizes = [16, 128], strides = [1, 1]} : vector<16x384xf32> to vector<16x128xf32>
    %174 = vector.extract_strided_slice %164 {offsets = [0, 128], sizes = [16, 128], strides = [1, 1]} : vector<16x384xf32> to vector<16x128xf32>
    %175 = arith.addf %173, %174 : vector<16x128xf32>
    %176 = arith.negf %175 : vector<16x128xf32>
    %177 = math.exp %176 : vector<16x128xf32>
    %cst_48 = arith.constant 1.000000e+00 : f32
    %178 = vector.broadcast %cst_48 : f32 to vector<16x128xf32>
    %179 = arith.addf %178, %177 : vector<16x128xf32>
    %180 = arith.divf %178, %179 : vector<16x128xf32>
    %181 = vector.extract_strided_slice %162 {offsets = [0, 256], sizes = [16, 128], strides = [1, 1]} : vector<16x384xf32> to vector<16x128xf32>
    %182 = vector.extract_strided_slice %164 {offsets = [0, 256], sizes = [16, 128], strides = [1, 1]} : vector<16x384xf32> to vector<16x128xf32>
    %183 = arith.addf %182, %10 : vector<16x128xf32>
    %184 = arith.mulf %172, %183 : vector<16x128xf32>
    %185 = arith.addf %181, %184 : vector<16x128xf32>
    %186 = math.tanh %185 : vector<16x128xf32>
    %cst_49 = arith.constant 1.000000e+00 : f32
    %187 = vector.broadcast %cst_49 : f32 to vector<16x128xf32>
    %188 = arith.subf %187, %180 : vector<16x128xf32>
    %189 = arith.mulf %188, %186 : vector<16x128xf32>
    %190 = arith.mulf %180, %160 : vector<16x128xf32>
    %191 = arith.addf %189, %190 : vector<16x128xf32>
    %c64_50 = arith.constant 64 : index
    %c0_51 = arith.constant 0 : index
    %192 = vector.load %arg1[%c64_50, %c0_51] : memref<128x1xf32, #tpu.memory_space<vmem>>, vector<16x1xf32>
    %cst_52 = arith.constant 0.000000e+00 : f32
    %193 = vector.broadcast %cst_52 : f32 to vector<16x1xf32>
    %194 = arith.cmpf ogt, %192, %193 : vector<16x1xf32>
    %195 = vector.shape_cast %194 : vector<16x1xi1> to vector<16x1xi1>
    %196 = vector.broadcast %195 : vector<16x1xi1> to vector<16x128xi1>
    %197 = arith.select %196, %191, %160 : vector<16x128xi1>, vector<16x128xf32>
    %c80 = arith.constant 80 : index
    %c0_53 = arith.constant 0 : index
    %198 = vector.load %arg19[%c80, %c0_53] : memref<128x384xbf16, #tpu.memory_space<vmem>>, vector<16x384xbf16>
    %199 = arith.extf %198 : vector<16x384xbf16> to vector<16x384xf32>
    %200 = arith.truncf %197 : vector<16x128xf32> to vector<16x128xbf16>
    %cst_54 = arith.constant dense<0.000000e+00> : vector<16x384xf32>
    %201 = tpu.matmul %200, %12, %cst_54 {dimension_numbers = #tpu.dot_dimension_numbers<[1], [0], [0], [1], [0, 0, 1, 1], [], []>} : vector<16x128xbf16>, vector<128x384xbf16>, vector<16x384xf32> -> vector<16x384xf32>
    %202 = vector.extract_strided_slice %199 {offsets = [0, 0], sizes = [16, 128], strides = [1, 1]} : vector<16x384xf32> to vector<16x128xf32>
    %203 = vector.extract_strided_slice %201 {offsets = [0, 0], sizes = [16, 128], strides = [1, 1]} : vector<16x384xf32> to vector<16x128xf32>
    %204 = arith.addf %202, %203 : vector<16x128xf32>
    %205 = arith.negf %204 : vector<16x128xf32>
    %206 = math.exp %205 : vector<16x128xf32>
    %cst_55 = arith.constant 1.000000e+00 : f32
    %207 = vector.broadcast %cst_55 : f32 to vector<16x128xf32>
    %208 = arith.addf %207, %206 : vector<16x128xf32>
    %209 = arith.divf %207, %208 : vector<16x128xf32>
    %210 = vector.extract_strided_slice %199 {offsets = [0, 128], sizes = [16, 128], strides = [1, 1]} : vector<16x384xf32> to vector<16x128xf32>
    %211 = vector.extract_strided_slice %201 {offsets = [0, 128], sizes = [16, 128], strides = [1, 1]} : vector<16x384xf32> to vector<16x128xf32>
    %212 = arith.addf %210, %211 : vector<16x128xf32>
    %213 = arith.negf %212 : vector<16x128xf32>
    %214 = math.exp %213 : vector<16x128xf32>
    %cst_56 = arith.constant 1.000000e+00 : f32
    %215 = vector.broadcast %cst_56 : f32 to vector<16x128xf32>
    %216 = arith.addf %215, %214 : vector<16x128xf32>
    %217 = arith.divf %215, %216 : vector<16x128xf32>
    %218 = vector.extract_strided_slice %199 {offsets = [0, 256], sizes = [16, 128], strides = [1, 1]} : vector<16x384xf32> to vector<16x128xf32>
    %219 = vector.extract_strided_slice %201 {offsets = [0, 256], sizes = [16, 128], strides = [1, 1]} : vector<16x384xf32> to vector<16x128xf32>
    %220 = arith.addf %219, %10 : vector<16x128xf32>
    %221 = arith.mulf %209, %220 : vector<16x128xf32>
    %222 = arith.addf %218, %221 : vector<16x128xf32>
    %223 = math.tanh %222 : vector<16x128xf32>
    %cst_57 = arith.constant 1.000000e+00 : f32
    %224 = vector.broadcast %cst_57 : f32 to vector<16x128xf32>
    %225 = arith.subf %224, %217 : vector<16x128xf32>
    %226 = arith.mulf %225, %223 : vector<16x128xf32>
    %227 = arith.mulf %217, %197 : vector<16x128xf32>
    %228 = arith.addf %226, %227 : vector<16x128xf32>
    %c80_58 = arith.constant 80 : index
    %c0_59 = arith.constant 0 : index
    %229 = vector.load %arg1[%c80_58, %c0_59] : memref<128x1xf32, #tpu.memory_space<vmem>>, vector<16x1xf32>
    %cst_60 = arith.constant 0.000000e+00 : f32
    %230 = vector.broadcast %cst_60 : f32 to vector<16x1xf32>
    %231 = arith.cmpf ogt, %229, %230 : vector<16x1xf32>
    %232 = vector.shape_cast %231 : vector<16x1xi1> to vector<16x1xi1>
    %233 = vector.broadcast %232 : vector<16x1xi1> to vector<16x128xi1>
    %234 = arith.select %233, %228, %197 : vector<16x128xi1>, vector<16x128xf32>
    %c96 = arith.constant 96 : index
    %c0_61 = arith.constant 0 : index
    %235 = vector.load %arg19[%c96, %c0_61] : memref<128x384xbf16, #tpu.memory_space<vmem>>, vector<16x384xbf16>
    %236 = arith.extf %235 : vector<16x384xbf16> to vector<16x384xf32>
    %237 = arith.truncf %234 : vector<16x128xf32> to vector<16x128xbf16>
    %cst_62 = arith.constant dense<0.000000e+00> : vector<16x384xf32>
    %238 = tpu.matmul %237, %12, %cst_62 {dimension_numbers = #tpu.dot_dimension_numbers<[1], [0], [0], [1], [0, 0, 1, 1], [], []>} : vector<16x128xbf16>, vector<128x384xbf16>, vector<16x384xf32> -> vector<16x384xf32>
    %239 = vector.extract_strided_slice %236 {offsets = [0, 0], sizes = [16, 128], strides = [1, 1]} : vector<16x384xf32> to vector<16x128xf32>
    %240 = vector.extract_strided_slice %238 {offsets = [0, 0], sizes = [16, 128], strides = [1, 1]} : vector<16x384xf32> to vector<16x128xf32>
    %241 = arith.addf %239, %240 : vector<16x128xf32>
    %242 = arith.negf %241 : vector<16x128xf32>
    %243 = math.exp %242 : vector<16x128xf32>
    %cst_63 = arith.constant 1.000000e+00 : f32
    %244 = vector.broadcast %cst_63 : f32 to vector<16x128xf32>
    %245 = arith.addf %244, %243 : vector<16x128xf32>
    %246 = arith.divf %244, %245 : vector<16x128xf32>
    %247 = vector.extract_strided_slice %236 {offsets = [0, 128], sizes = [16, 128], strides = [1, 1]} : vector<16x384xf32> to vector<16x128xf32>
    %248 = vector.extract_strided_slice %238 {offsets = [0, 128], sizes = [16, 128], strides = [1, 1]} : vector<16x384xf32> to vector<16x128xf32>
    %249 = arith.addf %247, %248 : vector<16x128xf32>
    %250 = arith.negf %249 : vector<16x128xf32>
    %251 = math.exp %250 : vector<16x128xf32>
    %cst_64 = arith.constant 1.000000e+00 : f32
    %252 = vector.broadcast %cst_64 : f32 to vector<16x128xf32>
    %253 = arith.addf %252, %251 : vector<16x128xf32>
    %254 = arith.divf %252, %253 : vector<16x128xf32>
    %255 = vector.extract_strided_slice %236 {offsets = [0, 256], sizes = [16, 128], strides = [1, 1]} : vector<16x384xf32> to vector<16x128xf32>
    %256 = vector.extract_strided_slice %238 {offsets = [0, 256], sizes = [16, 128], strides = [1, 1]} : vector<16x384xf32> to vector<16x128xf32>
    %257 = arith.addf %256, %10 : vector<16x128xf32>
    %258 = arith.mulf %246, %257 : vector<16x128xf32>
    %259 = arith.addf %255, %258 : vector<16x128xf32>
    %260 = math.tanh %259 : vector<16x128xf32>
    %cst_65 = arith.constant 1.000000e+00 : f32
    %261 = vector.broadcast %cst_65 : f32 to vector<16x128xf32>
    %262 = arith.subf %261, %254 : vector<16x128xf32>
    %263 = arith.mulf %262, %260 : vector<16x128xf32>
    %264 = arith.mulf %254, %234 : vector<16x128xf32>
    %265 = arith.addf %263, %264 : vector<16x128xf32>
    %c96_66 = arith.constant 96 : index
    %c0_67 = arith.constant 0 : index
    %266 = vector.load %arg1[%c96_66, %c0_67] : memref<128x1xf32, #tpu.memory_space<vmem>>, vector<16x1xf32>
    %cst_68 = arith.constant 0.000000e+00 : f32
    %267 = vector.broadcast %cst_68 : f32 to vector<16x1xf32>
    %268 = arith.cmpf ogt, %266, %267 : vector<16x1xf32>
    %269 = vector.shape_cast %268 : vector<16x1xi1> to vector<16x1xi1>
    %270 = vector.broadcast %269 : vector<16x1xi1> to vector<16x128xi1>
    %271 = arith.select %270, %265, %234 : vector<16x128xi1>, vector<16x128xf32>
    %c112 = arith.constant 112 : index
    %c0_69 = arith.constant 0 : index
    %272 = vector.load %arg19[%c112, %c0_69] : memref<128x384xbf16, #tpu.memory_space<vmem>>, vector<16x384xbf16>
    %273 = arith.extf %272 : vector<16x384xbf16> to vector<16x384xf32>
    %274 = arith.truncf %271 : vector<16x128xf32> to vector<16x128xbf16>
    %cst_70 = arith.constant dense<0.000000e+00> : vector<16x384xf32>
    %275 = tpu.matmul %274, %12, %cst_70 {dimension_numbers = #tpu.dot_dimension_numbers<[1], [0], [0], [1], [0, 0, 1, 1], [], []>} : vector<16x128xbf16>, vector<128x384xbf16>, vector<16x384xf32> -> vector<16x384xf32>
    %276 = vector.extract_strided_slice %273 {offsets = [0, 0], sizes = [16, 128], strides = [1, 1]} : vector<16x384xf32> to vector<16x128xf32>
    %277 = vector.extract_strided_slice %275 {offsets = [0, 0], sizes = [16, 128], strides = [1, 1]} : vector<16x384xf32> to vector<16x128xf32>
    %278 = arith.addf %276, %277 : vector<16x128xf32>
    %279 = arith.negf %278 : vector<16x128xf32>
    %280 = math.exp %279 : vector<16x128xf32>
    %cst_71 = arith.constant 1.000000e+00 : f32
    %281 = vector.broadcast %cst_71 : f32 to vector<16x128xf32>
    %282 = arith.addf %281, %280 : vector<16x128xf32>
    %283 = arith.divf %281, %282 : vector<16x128xf32>
    %284 = vector.extract_strided_slice %273 {offsets = [0, 128], sizes = [16, 128], strides = [1, 1]} : vector<16x384xf32> to vector<16x128xf32>
    %285 = vector.extract_strided_slice %275 {offsets = [0, 128], sizes = [16, 128], strides = [1, 1]} : vector<16x384xf32> to vector<16x128xf32>
    %286 = arith.addf %284, %285 : vector<16x128xf32>
    %287 = arith.negf %286 : vector<16x128xf32>
    %288 = math.exp %287 : vector<16x128xf32>
    %cst_72 = arith.constant 1.000000e+00 : f32
    %289 = vector.broadcast %cst_72 : f32 to vector<16x128xf32>
    %290 = arith.addf %289, %288 : vector<16x128xf32>
    %291 = arith.divf %289, %290 : vector<16x128xf32>
    %292 = vector.extract_strided_slice %273 {offsets = [0, 256], sizes = [16, 128], strides = [1, 1]} : vector<16x384xf32> to vector<16x128xf32>
    %293 = vector.extract_strided_slice %275 {offsets = [0, 256], sizes = [16, 128], strides = [1, 1]} : vector<16x384xf32> to vector<16x128xf32>
    %294 = arith.addf %293, %10 : vector<16x128xf32>
    %295 = arith.mulf %283, %294 : vector<16x128xf32>
    %296 = arith.addf %292, %295 : vector<16x128xf32>
    %297 = math.tanh %296 : vector<16x128xf32>
    %cst_73 = arith.constant 1.000000e+00 : f32
    %298 = vector.broadcast %cst_73 : f32 to vector<16x128xf32>
    %299 = arith.subf %298, %291 : vector<16x128xf32>
    %300 = arith.mulf %299, %297 : vector<16x128xf32>
    %301 = arith.mulf %291, %271 : vector<16x128xf32>
    %302 = arith.addf %300, %301 : vector<16x128xf32>
    %c112_74 = arith.constant 112 : index
    %c0_75 = arith.constant 0 : index
    %303 = vector.load %arg1[%c112_74, %c0_75] : memref<128x1xf32, #tpu.memory_space<vmem>>, vector<16x1xf32>
    %cst_76 = arith.constant 0.000000e+00 : f32
    %304 = vector.broadcast %cst_76 : f32 to vector<16x1xf32>
    %305 = arith.cmpf ogt, %303, %304 : vector<16x1xf32>
    %306 = vector.shape_cast %305 : vector<16x1xi1> to vector<16x1xi1>
    %307 = vector.broadcast %306 : vector<16x1xi1> to vector<16x128xi1>
    %308 = arith.select %307, %302, %271 : vector<16x128xi1>, vector<16x128xf32>
    %c0_77 = arith.constant 0 : index
    %c0_78 = arith.constant 0 : index
    %309 = vector.load %arg8[%c0_77, %c0_78] : memref<128x128xf32, #tpu.memory_space<vmem>>, vector<128x128xf32>
    %cst_79 = arith.constant dense<0.000000e+00> : vector<16x128xf32>
    %310 = tpu.matmul %308, %309, %cst_79 {dimension_numbers = #tpu.dot_dimension_numbers<[1], [0], [0], [1], [0, 0, 1, 1], [], []>} : vector<16x128xf32>, vector<128x128xf32>, vector<16x128xf32> -> vector<16x128xf32>
    %c0_80 = arith.constant 0 : index
    %c0_81 = arith.constant 0 : index
    %311 = vector.load %arg9[%c0_80, %c0_81] : memref<1x128xf32, #tpu.memory_space<vmem>>, vector<1x128xf32>
    %312 = vector.broadcast %311 : vector<1x128xf32> to vector<16x128xf32>
    %313 = arith.addf %310, %312 : vector<16x128xf32>
    %c0_82 = arith.constant 0 : index
    %c0_83 = arith.constant 0 : index
    %314 = vector.load %arg10[%c0_82, %c0_83] : memref<128x128xf32, #tpu.memory_space<vmem>>, vector<128x128xf32>
    %cst_84 = arith.constant dense<0.000000e+00> : vector<16x128xf32>
    %315 = tpu.matmul %313, %314, %cst_84 {dimension_numbers = #tpu.dot_dimension_numbers<[1], [0], [0], [1], [0, 0, 1, 1], [], []>} : vector<16x128xf32>, vector<128x128xf32>, vector<16x128xf32> -> vector<16x128xf32>
    %c0_85 = arith.constant 0 : index
    %c0_86 = arith.constant 0 : index
    %316 = vector.load %arg11[%c0_85, %c0_86] : memref<1x128xf32, #tpu.memory_space<vmem>>, vector<1x128xf32>
    %317 = vector.broadcast %316 : vector<1x128xf32> to vector<16x128xf32>
    %318 = arith.addf %315, %317 : vector<16x128xf32>
    %319 = arith.addf %313, %318 : vector<16x128xf32>
    %c0_87 = arith.constant 0 : index
    %c0_88 = arith.constant 0 : index
    %320 = vector.load %arg12[%c0_87, %c0_88] : memref<128x128xf32, #tpu.memory_space<vmem>>, vector<128x128xf32>
    %cst_89 = arith.constant dense<0.000000e+00> : vector<16x128xf32>
    %321 = tpu.matmul %319, %320, %cst_89 {dimension_numbers = #tpu.dot_dimension_numbers<[1], [0], [0], [1], [0, 0, 1, 1], [], []>} : vector<16x128xf32>, vector<128x128xf32>, vector<16x128xf32> -> vector<16x128xf32>
    %c0_90 = arith.constant 0 : index
    %c0_91 = arith.constant 0 : index
    %322 = vector.load %arg13[%c0_90, %c0_91] : memref<1x128xf32, #tpu.memory_space<vmem>>, vector<1x128xf32>
    %323 = vector.broadcast %322 : vector<1x128xf32> to vector<16x128xf32>
    %324 = arith.addf %321, %323 : vector<16x128xf32>
    %325 = arith.addf %319, %324 : vector<16x128xf32>
    %c0_92 = arith.constant 0 : index
    %c0_93 = arith.constant 0 : index
    %326 = vector.load %arg2[%c0_92, %c0_93] : memref<128x64xbf16, #tpu.memory_space<vmem>>, vector<128x64xbf16>
    %c0_94 = arith.constant 0 : index
    %c0_95 = arith.constant 0 : index
    %327 = vector.load %arg14[%c0_94, %c0_95] : memref<64x384xbf16, #tpu.memory_space<vmem>>, vector<64x384xbf16>
    %cst_96 = arith.constant dense<0.000000e+00> : vector<128x384xf32>
    %328 = tpu.matmul %326, %327, %cst_96 {dimension_numbers = #tpu.dot_dimension_numbers<[1], [0], [0], [1], [0, 0, 1, 1], [], []>} : vector<128x64xbf16>, vector<64x384xbf16>, vector<128x384xf32> -> vector<128x384xf32>
    %c0_97 = arith.constant 0 : index
    %c0_98 = arith.constant 0 : index
    %329 = vector.load %arg16[%c0_97, %c0_98] : memref<1x384xf32, #tpu.memory_space<vmem>>, vector<1x384xf32>
    %330 = vector.broadcast %329 : vector<1x384xf32> to vector<128x384xf32>
    %331 = arith.addf %328, %330 : vector<128x384xf32>
    %332 = arith.truncf %331 : vector<128x384xf32> to vector<128x384xbf16>
    %c0_99 = arith.constant 0 : index
    %c0_100 = arith.constant 0 : index
    %333 = vector.load %arg19[%c0_99, %c0_100] : memref<128x384xbf16, #tpu.memory_space<vmem>>, vector<128x384xbf16>
    tpu.vector_store %arg19[%c0_99, %c0_100], %332 {strides = array<i32>} : memref<128x384xbf16, #tpu.memory_space<vmem>>, vector<128x384xbf16>,
    %c0_101 = arith.constant 0 : index
    %c0_102 = arith.constant 0 : index
    %334 = vector.load %arg17[%c0_101, %c0_102] : memref<1x128xf32, #tpu.memory_space<vmem>>, vector<1x128xf32>
    %335 = vector.shape_cast %334 : vector<1x128xf32> to vector<1x128xf32>
    %336 = vector.broadcast %335 : vector<1x128xf32> to vector<16x128xf32>
    %c0_103 = arith.constant 0 : index
    %c0_104 = arith.constant 0 : index
    %337 = vector.load %arg15[%c0_103, %c0_104] : memref<128x384xbf16, #tpu.memory_space<vmem>>, vector<128x384xbf16>
    %c0_105 = arith.constant 0 : index
    %c0_106 = arith.constant 0 : index
    %338 = vector.load %arg19[%c0_105, %c0_106] : memref<128x384xbf16, #tpu.memory_space<vmem>>, vector<16x384xbf16>
    %339 = arith.extf %338 : vector<16x384xbf16> to vector<16x384xf32>
    %340 = arith.truncf %325 : vector<16x128xf32> to vector<16x128xbf16>
    %cst_107 = arith.constant dense<0.000000e+00> : vector<16x384xf32>
    %341 = tpu.matmul %340, %337, %cst_107 {dimension_numbers = #tpu.dot_dimension_numbers<[1], [0], [0], [1], [0, 0, 1, 1], [], []>} : vector<16x128xbf16>, vector<128x384xbf16>, vector<16x384xf32> -> vector<16x384xf32>
    %342 = vector.extract_strided_slice %339 {offsets = [0, 0], sizes = [16, 128], strides = [1, 1]} : vector<16x384xf32> to vector<16x128xf32>
    %343 = vector.extract_strided_slice %341 {offsets = [0, 0], sizes = [16, 128], strides = [1, 1]} : vector<16x384xf32> to vector<16x128xf32>
    %344 = arith.addf %342, %343 : vector<16x128xf32>
    %345 = arith.negf %344 : vector<16x128xf32>
    %346 = math.exp %345 : vector<16x128xf32>
    %cst_108 = arith.constant 1.000000e+00 : f32
    %347 = vector.broadcast %cst_108 : f32 to vector<16x128xf32>
    %348 = arith.addf %347, %346 : vector<16x128xf32>
    %349 = arith.divf %347, %348 : vector<16x128xf32>
    %350 = vector.extract_strided_slice %339 {offsets = [0, 128], sizes = [16, 128], strides = [1, 1]} : vector<16x384xf32> to vector<16x128xf32>
    %351 = vector.extract_strided_slice %341 {offsets = [0, 128], sizes = [16, 128], strides = [1, 1]} : vector<16x384xf32> to vector<16x128xf32>
    %352 = arith.addf %350, %351 : vector<16x128xf32>
    %353 = arith.negf %352 : vector<16x128xf32>
    %354 = math.exp %353 : vector<16x128xf32>
    %cst_109 = arith.constant 1.000000e+00 : f32
    %355 = vector.broadcast %cst_109 : f32 to vector<16x128xf32>
    %356 = arith.addf %355, %354 : vector<16x128xf32>
    %357 = arith.divf %355, %356 : vector<16x128xf32>
    %358 = vector.extract_strided_slice %339 {offsets = [0, 256], sizes = [16, 128], strides = [1, 1]} : vector<16x384xf32> to vector<16x128xf32>
    %359 = vector.extract_strided_slice %341 {offsets = [0, 256], sizes = [16, 128], strides = [1, 1]} : vector<16x384xf32> to vector<16x128xf32>
    %360 = arith.addf %359, %336 : vector<16x128xf32>
    %361 = arith.mulf %349, %360 : vector<16x128xf32>
    %362 = arith.addf %358, %361 : vector<16x128xf32>
    %363 = math.tanh %362 : vector<16x128xf32>
    %cst_110 = arith.constant 1.000000e+00 : f32
    %364 = vector.broadcast %cst_110 : f32 to vector<16x128xf32>
    %365 = arith.subf %364, %357 : vector<16x128xf32>
    %366 = arith.mulf %365, %363 : vector<16x128xf32>
    %367 = arith.mulf %357, %325 : vector<16x128xf32>
    %368 = arith.addf %366, %367 : vector<16x128xf32>
    %c0_111 = arith.constant 0 : index
    %c0_112 = arith.constant 0 : index
    %369 = vector.load %arg3[%c0_111, %c0_112] : memref<128x1xf32, #tpu.memory_space<vmem>>, vector<16x1xf32>
    %cst_113 = arith.constant 0.000000e+00 : f32
    %370 = vector.broadcast %cst_113 : f32 to vector<16x1xf32>
    %371 = arith.cmpf ogt, %369, %370 : vector<16x1xf32>
    %372 = vector.shape_cast %371 : vector<16x1xi1> to vector<16x1xi1>
    %373 = vector.broadcast %372 : vector<16x1xi1> to vector<16x128xi1>
    %374 = arith.select %373, %368, %325 : vector<16x128xi1>, vector<16x128xf32>
    %375 = arith.truncf %374 : vector<16x128xf32> to vector<16x128xbf16>
    %c0_114 = arith.constant 0 : index
    %c0_115 = arith.constant 0 : index
    %376 = vector.load %arg18[%c0_114, %c0_115] : memref<128x128xbf16, #tpu.memory_space<vmem>>, vector<16x128xbf16>
    tpu.vector_store %arg18[%c0_114, %c0_115], %375 {strides = array<i32>} : memref<128x128xbf16, #tpu.memory_space<vmem>>, vector<16x128xbf16>,
    %c16_116 = arith.constant 16 : index
    %c0_117 = arith.constant 0 : index
    %377 = vector.load %arg19[%c16_116, %c0_117] : memref<128x384xbf16, #tpu.memory_space<vmem>>, vector<16x384xbf16>
    %378 = arith.extf %377 : vector<16x384xbf16> to vector<16x384xf32>
    %379 = arith.truncf %374 : vector<16x128xf32> to vector<16x128xbf16>
    %cst_118 = arith.constant dense<0.000000e+00> : vector<16x384xf32>
    %380 = tpu.matmul %379, %337, %cst_118 {dimension_numbers = #tpu.dot_dimension_numbers<[1], [0], [0], [1], [0, 0, 1, 1], [], []>} : vector<16x128xbf16>, vector<128x384xbf16>, vector<16x384xf32> -> vector<16x384xf32>
    %381 = vector.extract_strided_slice %378 {offsets = [0, 0], sizes = [16, 128], strides = [1, 1]} : vector<16x384xf32> to vector<16x128xf32>
    %382 = vector.extract_strided_slice %380 {offsets = [0, 0], sizes = [16, 128], strides = [1, 1]} : vector<16x384xf32> to vector<16x128xf32>
    %383 = arith.addf %381, %382 : vector<16x128xf32>
    %384 = arith.negf %383 : vector<16x128xf32>
    %385 = math.exp %384 : vector<16x128xf32>
    %cst_119 = arith.constant 1.000000e+00 : f32
    %386 = vector.broadcast %cst_119 : f32 to vector<16x128xf32>
    %387 = arith.addf %386, %385 : vector<16x128xf32>
    %388 = arith.divf %386, %387 : vector<16x128xf32>
    %389 = vector.extract_strided_slice %378 {offsets = [0, 128], sizes = [16, 128], strides = [1, 1]} : vector<16x384xf32> to vector<16x128xf32>
    %390 = vector.extract_strided_slice %380 {offsets = [0, 128], sizes = [16, 128], strides = [1, 1]} : vector<16x384xf32> to vector<16x128xf32>
    %391 = arith.addf %389, %390 : vector<16x128xf32>
    %392 = arith.negf %391 : vector<16x128xf32>
    %393 = math.exp %392 : vector<16x128xf32>
    %cst_120 = arith.constant 1.000000e+00 : f32
    %394 = vector.broadcast %cst_120 : f32 to vector<16x128xf32>
    %395 = arith.addf %394, %393 : vector<16x128xf32>
    %396 = arith.divf %394, %395 : vector<16x128xf32>
    %397 = vector.extract_strided_slice %378 {offsets = [0, 256], sizes = [16, 128], strides = [1, 1]} : vector<16x384xf32> to vector<16x128xf32>
    %398 = vector.extract_strided_slice %380 {offsets = [0, 256], sizes = [16, 128], strides = [1, 1]} : vector<16x384xf32> to vector<16x128xf32>
    %399 = arith.addf %398, %336 : vector<16x128xf32>
    %400 = arith.mulf %388, %399 : vector<16x128xf32>
    %401 = arith.addf %397, %400 : vector<16x128xf32>
    %402 = math.tanh %401 : vector<16x128xf32>
    %cst_121 = arith.constant 1.000000e+00 : f32
    %403 = vector.broadcast %cst_121 : f32 to vector<16x128xf32>
    %404 = arith.subf %403, %396 : vector<16x128xf32>
    %405 = arith.mulf %404, %402 : vector<16x128xf32>
    %406 = arith.mulf %396, %374 : vector<16x128xf32>
    %407 = arith.addf %405, %406 : vector<16x128xf32>
    %c16_122 = arith.constant 16 : index
    %c0_123 = arith.constant 0 : index
    %408 = vector.load %arg3[%c16_122, %c0_123] : memref<128x1xf32, #tpu.memory_space<vmem>>, vector<16x1xf32>
    %cst_124 = arith.constant 0.000000e+00 : f32
    %409 = vector.broadcast %cst_124 : f32 to vector<16x1xf32>
    %410 = arith.cmpf ogt, %408, %409 : vector<16x1xf32>
    %411 = vector.shape_cast %410 : vector<16x1xi1> to vector<16x1xi1>
    %412 = vector.broadcast %411 : vector<16x1xi1> to vector<16x128xi1>
    %413 = arith.select %412, %407, %374 : vector<16x128xi1>, vector<16x128xf32>
    %414 = arith.truncf %413 : vector<16x128xf32> to vector<16x128xbf16>
    %c16_125 = arith.constant 16 : index
    %c0_126 = arith.constant 0 : index
    %415 = vector.load %arg18[%c16_125, %c0_126] : memref<128x128xbf16, #tpu.memory_space<vmem>>, vector<16x128xbf16>
    tpu.vector_store %arg18[%c16_125, %c0_126], %414 {strides = array<i32>} : memref<128x128xbf16, #tpu.memory_space<vmem>>, vector<16x128xbf16>,
    %c32_127 = arith.constant 32 : index
    %c0_128 = arith.constant 0 : index
    %416 = vector.load %arg19[%c32_127, %c0_128] : memref<128x384xbf16, #tpu.memory_space<vmem>>, vector<16x384xbf16>
    %417 = arith.extf %416 : vector<16x384xbf16> to vector<16x384xf32>
    %418 = arith.truncf %413 : vector<16x128xf32> to vector<16x128xbf16>
    %cst_129 = arith.constant dense<0.000000e+00> : vector<16x384xf32>
    %419 = tpu.matmul %418, %337, %cst_129 {dimension_numbers = #tpu.dot_dimension_numbers<[1], [0], [0], [1], [0, 0, 1, 1], [], []>} : vector<16x128xbf16>, vector<128x384xbf16>, vector<16x384xf32> -> vector<16x384xf32>
    %420 = vector.extract_strided_slice %417 {offsets = [0, 0], sizes = [16, 128], strides = [1, 1]} : vector<16x384xf32> to vector<16x128xf32>
    %421 = vector.extract_strided_slice %419 {offsets = [0, 0], sizes = [16, 128], strides = [1, 1]} : vector<16x384xf32> to vector<16x128xf32>
    %422 = arith.addf %420, %421 : vector<16x128xf32>
    %423 = arith.negf %422 : vector<16x128xf32>
    %424 = math.exp %423 : vector<16x128xf32>
    %cst_130 = arith.constant 1.000000e+00 : f32
    %425 = vector.broadcast %cst_130 : f32 to vector<16x128xf32>
    %426 = arith.addf %425, %424 : vector<16x128xf32>
    %427 = arith.divf %425, %426 : vector<16x128xf32>
    %428 = vector.extract_strided_slice %417 {offsets = [0, 128], sizes = [16, 128], strides = [1, 1]} : vector<16x384xf32> to vector<16x128xf32>
    %429 = vector.extract_strided_slice %419 {offsets = [0, 128], sizes = [16, 128], strides = [1, 1]} : vector<16x384xf32> to vector<16x128xf32>
    %430 = arith.addf %428, %429 : vector<16x128xf32>
    %431 = arith.negf %430 : vector<16x128xf32>
    %432 = math.exp %431 : vector<16x128xf32>
    %cst_131 = arith.constant 1.000000e+00 : f32
    %433 = vector.broadcast %cst_131 : f32 to vector<16x128xf32>
    %434 = arith.addf %433, %432 : vector<16x128xf32>
    %435 = arith.divf %433, %434 : vector<16x128xf32>
    %436 = vector.extract_strided_slice %417 {offsets = [0, 256], sizes = [16, 128], strides = [1, 1]} : vector<16x384xf32> to vector<16x128xf32>
    %437 = vector.extract_strided_slice %419 {offsets = [0, 256], sizes = [16, 128], strides = [1, 1]} : vector<16x384xf32> to vector<16x128xf32>
    %438 = arith.addf %437, %336 : vector<16x128xf32>
    %439 = arith.mulf %427, %438 : vector<16x128xf32>
    %440 = arith.addf %436, %439 : vector<16x128xf32>
    %441 = math.tanh %440 : vector<16x128xf32>
    %cst_132 = arith.constant 1.000000e+00 : f32
    %442 = vector.broadcast %cst_132 : f32 to vector<16x128xf32>
    %443 = arith.subf %442, %435 : vector<16x128xf32>
    %444 = arith.mulf %443, %441 : vector<16x128xf32>
    %445 = arith.mulf %435, %413 : vector<16x128xf32>
    %446 = arith.addf %444, %445 : vector<16x128xf32>
    %c32_133 = arith.constant 32 : index
    %c0_134 = arith.constant 0 : index
    %447 = vector.load %arg3[%c32_133, %c0_134] : memref<128x1xf32, #tpu.memory_space<vmem>>, vector<16x1xf32>
    %cst_135 = arith.constant 0.000000e+00 : f32
    %448 = vector.broadcast %cst_135 : f32 to vector<16x1xf32>
    %449 = arith.cmpf ogt, %447, %448 : vector<16x1xf32>
    %450 = vector.shape_cast %449 : vector<16x1xi1> to vector<16x1xi1>
    %451 = vector.broadcast %450 : vector<16x1xi1> to vector<16x128xi1>
    %452 = arith.select %451, %446, %413 : vector<16x128xi1>, vector<16x128xf32>
    %453 = arith.truncf %452 : vector<16x128xf32> to vector<16x128xbf16>
    %c32_136 = arith.constant 32 : index
    %c0_137 = arith.constant 0 : index
    %454 = vector.load %arg18[%c32_136, %c0_137] : memref<128x128xbf16, #tpu.memory_space<vmem>>, vector<16x128xbf16>
    tpu.vector_store %arg18[%c32_136, %c0_137], %453 {strides = array<i32>} : memref<128x128xbf16, #tpu.memory_space<vmem>>, vector<16x128xbf16>,
    %c48_138 = arith.constant 48 : index
    %c0_139 = arith.constant 0 : index
    %455 = vector.load %arg19[%c48_138, %c0_139] : memref<128x384xbf16, #tpu.memory_space<vmem>>, vector<16x384xbf16>
    %456 = arith.extf %455 : vector<16x384xbf16> to vector<16x384xf32>
    %457 = arith.truncf %452 : vector<16x128xf32> to vector<16x128xbf16>
    %cst_140 = arith.constant dense<0.000000e+00> : vector<16x384xf32>
    %458 = tpu.matmul %457, %337, %cst_140 {dimension_numbers = #tpu.dot_dimension_numbers<[1], [0], [0], [1], [0, 0, 1, 1], [], []>} : vector<16x128xbf16>, vector<128x384xbf16>, vector<16x384xf32> -> vector<16x384xf32>
    %459 = vector.extract_strided_slice %456 {offsets = [0, 0], sizes = [16, 128], strides = [1, 1]} : vector<16x384xf32> to vector<16x128xf32>
    %460 = vector.extract_strided_slice %458 {offsets = [0, 0], sizes = [16, 128], strides = [1, 1]} : vector<16x384xf32> to vector<16x128xf32>
    %461 = arith.addf %459, %460 : vector<16x128xf32>
    %462 = arith.negf %461 : vector<16x128xf32>
    %463 = math.exp %462 : vector<16x128xf32>
    %cst_141 = arith.constant 1.000000e+00 : f32
    %464 = vector.broadcast %cst_141 : f32 to vector<16x128xf32>
    %465 = arith.addf %464, %463 : vector<16x128xf32>
    %466 = arith.divf %464, %465 : vector<16x128xf32>
    %467 = vector.extract_strided_slice %456 {offsets = [0, 128], sizes = [16, 128], strides = [1, 1]} : vector<16x384xf32> to vector<16x128xf32>
    %468 = vector.extract_strided_slice %458 {offsets = [0, 128], sizes = [16, 128], strides = [1, 1]} : vector<16x384xf32> to vector<16x128xf32>
    %469 = arith.addf %467, %468 : vector<16x128xf32>
    %470 = arith.negf %469 : vector<16x128xf32>
    %471 = math.exp %470 : vector<16x128xf32>
    %cst_142 = arith.constant 1.000000e+00 : f32
    %472 = vector.broadcast %cst_142 : f32 to vector<16x128xf32>
    %473 = arith.addf %472, %471 : vector<16x128xf32>
    %474 = arith.divf %472, %473 : vector<16x128xf32>
    %475 = vector.extract_strided_slice %456 {offsets = [0, 256], sizes = [16, 128], strides = [1, 1]} : vector<16x384xf32> to vector<16x128xf32>
    %476 = vector.extract_strided_slice %458 {offsets = [0, 256], sizes = [16, 128], strides = [1, 1]} : vector<16x384xf32> to vector<16x128xf32>
    %477 = arith.addf %476, %336 : vector<16x128xf32>
    %478 = arith.mulf %466, %477 : vector<16x128xf32>
    %479 = arith.addf %475, %478 : vector<16x128xf32>
    %480 = math.tanh %479 : vector<16x128xf32>
    %cst_143 = arith.constant 1.000000e+00 : f32
    %481 = vector.broadcast %cst_143 : f32 to vector<16x128xf32>
    %482 = arith.subf %481, %474 : vector<16x128xf32>
    %483 = arith.mulf %482, %480 : vector<16x128xf32>
    %484 = arith.mulf %474, %452 : vector<16x128xf32>
    %485 = arith.addf %483, %484 : vector<16x128xf32>
    %c48_144 = arith.constant 48 : index
    %c0_145 = arith.constant 0 : index
    %486 = vector.load %arg3[%c48_144, %c0_145] : memref<128x1xf32, #tpu.memory_space<vmem>>, vector<16x1xf32>
    %cst_146 = arith.constant 0.000000e+00 : f32
    %487 = vector.broadcast %cst_146 : f32 to vector<16x1xf32>
    %488 = arith.cmpf ogt, %486, %487 : vector<16x1xf32>
    %489 = vector.shape_cast %488 : vector<16x1xi1> to vector<16x1xi1>
    %490 = vector.broadcast %489 : vector<16x1xi1> to vector<16x128xi1>
    %491 = arith.select %490, %485, %452 : vector<16x128xi1>, vector<16x128xf32>
    %492 = arith.truncf %491 : vector<16x128xf32> to vector<16x128xbf16>
    %c48_147 = arith.constant 48 : index
    %c0_148 = arith.constant 0 : index
    %493 = vector.load %arg18[%c48_147, %c0_148] : memref<128x128xbf16, #tpu.memory_space<vmem>>, vector<16x128xbf16>
    tpu.vector_store %arg18[%c48_147, %c0_148], %492 {strides = array<i32>} : memref<128x128xbf16, #tpu.memory_space<vmem>>, vector<16x128xbf16>,
    %c64_149 = arith.constant 64 : index
    %c0_150 = arith.constant 0 : index
    %494 = vector.load %arg19[%c64_149, %c0_150] : memref<128x384xbf16, #tpu.memory_space<vmem>>, vector<16x384xbf16>
    %495 = arith.extf %494 : vector<16x384xbf16> to vector<16x384xf32>
    %496 = arith.truncf %491 : vector<16x128xf32> to vector<16x128xbf16>
    %cst_151 = arith.constant dense<0.000000e+00> : vector<16x384xf32>
    %497 = tpu.matmul %496, %337, %cst_151 {dimension_numbers = #tpu.dot_dimension_numbers<[1], [0], [0], [1], [0, 0, 1, 1], [], []>} : vector<16x128xbf16>, vector<128x384xbf16>, vector<16x384xf32> -> vector<16x384xf32>
    %498 = vector.extract_strided_slice %495 {offsets = [0, 0], sizes = [16, 128], strides = [1, 1]} : vector<16x384xf32> to vector<16x128xf32>
    %499 = vector.extract_strided_slice %497 {offsets = [0, 0], sizes = [16, 128], strides = [1, 1]} : vector<16x384xf32> to vector<16x128xf32>
    %500 = arith.addf %498, %499 : vector<16x128xf32>
    %501 = arith.negf %500 : vector<16x128xf32>
    %502 = math.exp %501 : vector<16x128xf32>
    %cst_152 = arith.constant 1.000000e+00 : f32
    %503 = vector.broadcast %cst_152 : f32 to vector<16x128xf32>
    %504 = arith.addf %503, %502 : vector<16x128xf32>
    %505 = arith.divf %503, %504 : vector<16x128xf32>
    %506 = vector.extract_strided_slice %495 {offsets = [0, 128], sizes = [16, 128], strides = [1, 1]} : vector<16x384xf32> to vector<16x128xf32>
    %507 = vector.extract_strided_slice %497 {offsets = [0, 128], sizes = [16, 128], strides = [1, 1]} : vector<16x384xf32> to vector<16x128xf32>
    %508 = arith.addf %506, %507 : vector<16x128xf32>
    %509 = arith.negf %508 : vector<16x128xf32>
    %510 = math.exp %509 : vector<16x128xf32>
    %cst_153 = arith.constant 1.000000e+00 : f32
    %511 = vector.broadcast %cst_153 : f32 to vector<16x128xf32>
    %512 = arith.addf %511, %510 : vector<16x128xf32>
    %513 = arith.divf %511, %512 : vector<16x128xf32>
    %514 = vector.extract_strided_slice %495 {offsets = [0, 256], sizes = [16, 128], strides = [1, 1]} : vector<16x384xf32> to vector<16x128xf32>
    %515 = vector.extract_strided_slice %497 {offsets = [0, 256], sizes = [16, 128], strides = [1, 1]} : vector<16x384xf32> to vector<16x128xf32>
    %516 = arith.addf %515, %336 : vector<16x128xf32>
    %517 = arith.mulf %505, %516 : vector<16x128xf32>
    %518 = arith.addf %514, %517 : vector<16x128xf32>
    %519 = math.tanh %518 : vector<16x128xf32>
    %cst_154 = arith.constant 1.000000e+00 : f32
    %520 = vector.broadcast %cst_154 : f32 to vector<16x128xf32>
    %521 = arith.subf %520, %513 : vector<16x128xf32>
    %522 = arith.mulf %521, %519 : vector<16x128xf32>
    %523 = arith.mulf %513, %491 : vector<16x128xf32>
    %524 = arith.addf %522, %523 : vector<16x128xf32>
    %c64_155 = arith.constant 64 : index
    %c0_156 = arith.constant 0 : index
    %525 = vector.load %arg3[%c64_155, %c0_156] : memref<128x1xf32, #tpu.memory_space<vmem>>, vector<16x1xf32>
    %cst_157 = arith.constant 0.000000e+00 : f32
    %526 = vector.broadcast %cst_157 : f32 to vector<16x1xf32>
    %527 = arith.cmpf ogt, %525, %526 : vector<16x1xf32>
    %528 = vector.shape_cast %527 : vector<16x1xi1> to vector<16x1xi1>
    %529 = vector.broadcast %528 : vector<16x1xi1> to vector<16x128xi1>
    %530 = arith.select %529, %524, %491 : vector<16x128xi1>, vector<16x128xf32>
    %531 = arith.truncf %530 : vector<16x128xf32> to vector<16x128xbf16>
    %c64_158 = arith.constant 64 : index
    %c0_159 = arith.constant 0 : index
    %532 = vector.load %arg18[%c64_158, %c0_159] : memref<128x128xbf16, #tpu.memory_space<vmem>>, vector<16x128xbf16>
    tpu.vector_store %arg18[%c64_158, %c0_159], %531 {strides = array<i32>} : memref<128x128xbf16, #tpu.memory_space<vmem>>, vector<16x128xbf16>,
    %c80_160 = arith.constant 80 : index
    %c0_161 = arith.constant 0 : index
    %533 = vector.load %arg19[%c80_160, %c0_161] : memref<128x384xbf16, #tpu.memory_space<vmem>>, vector<16x384xbf16>
    %534 = arith.extf %533 : vector<16x384xbf16> to vector<16x384xf32>
    %535 = arith.truncf %530 : vector<16x128xf32> to vector<16x128xbf16>
    %cst_162 = arith.constant dense<0.000000e+00> : vector<16x384xf32>
    %536 = tpu.matmul %535, %337, %cst_162 {dimension_numbers = #tpu.dot_dimension_numbers<[1], [0], [0], [1], [0, 0, 1, 1], [], []>} : vector<16x128xbf16>, vector<128x384xbf16>, vector<16x384xf32> -> vector<16x384xf32>
    %537 = vector.extract_strided_slice %534 {offsets = [0, 0], sizes = [16, 128], strides = [1, 1]} : vector<16x384xf32> to vector<16x128xf32>
    %538 = vector.extract_strided_slice %536 {offsets = [0, 0], sizes = [16, 128], strides = [1, 1]} : vector<16x384xf32> to vector<16x128xf32>
    %539 = arith.addf %537, %538 : vector<16x128xf32>
    %540 = arith.negf %539 : vector<16x128xf32>
    %541 = math.exp %540 : vector<16x128xf32>
    %cst_163 = arith.constant 1.000000e+00 : f32
    %542 = vector.broadcast %cst_163 : f32 to vector<16x128xf32>
    %543 = arith.addf %542, %541 : vector<16x128xf32>
    %544 = arith.divf %542, %543 : vector<16x128xf32>
    %545 = vector.extract_strided_slice %534 {offsets = [0, 128], sizes = [16, 128], strides = [1, 1]} : vector<16x384xf32> to vector<16x128xf32>
    %546 = vector.extract_strided_slice %536 {offsets = [0, 128], sizes = [16, 128], strides = [1, 1]} : vector<16x384xf32> to vector<16x128xf32>
    %547 = arith.addf %545, %546 : vector<16x128xf32>
    %548 = arith.negf %547 : vector<16x128xf32>
    %549 = math.exp %548 : vector<16x128xf32>
    %cst_164 = arith.constant 1.000000e+00 : f32
    %550 = vector.broadcast %cst_164 : f32 to vector<16x128xf32>
    %551 = arith.addf %550, %549 : vector<16x128xf32>
    %552 = arith.divf %550, %551 : vector<16x128xf32>
    %553 = vector.extract_strided_slice %534 {offsets = [0, 256], sizes = [16, 128], strides = [1, 1]} : vector<16x384xf32> to vector<16x128xf32>
    %554 = vector.extract_strided_slice %536 {offsets = [0, 256], sizes = [16, 128], strides = [1, 1]} : vector<16x384xf32> to vector<16x128xf32>
    %555 = arith.addf %554, %336 : vector<16x128xf32>
    %556 = arith.mulf %544, %555 : vector<16x128xf32>
    %557 = arith.addf %553, %556 : vector<16x128xf32>
    %558 = math.tanh %557 : vector<16x128xf32>
    %cst_165 = arith.constant 1.000000e+00 : f32
    %559 = vector.broadcast %cst_165 : f32 to vector<16x128xf32>
    %560 = arith.subf %559, %552 : vector<16x128xf32>
    %561 = arith.mulf %560, %558 : vector<16x128xf32>
    %562 = arith.mulf %552, %530 : vector<16x128xf32>
    %563 = arith.addf %561, %562 : vector<16x128xf32>
    %c80_166 = arith.constant 80 : index
    %c0_167 = arith.constant 0 : index
    %564 = vector.load %arg3[%c80_166, %c0_167] : memref<128x1xf32, #tpu.memory_space<vmem>>, vector<16x1xf32>
    %cst_168 = arith.constant 0.000000e+00 : f32
    %565 = vector.broadcast %cst_168 : f32 to vector<16x1xf32>
    %566 = arith.cmpf ogt, %564, %565 : vector<16x1xf32>
    %567 = vector.shape_cast %566 : vector<16x1xi1> to vector<16x1xi1>
    %568 = vector.broadcast %567 : vector<16x1xi1> to vector<16x128xi1>
    %569 = arith.select %568, %563, %530 : vector<16x128xi1>, vector<16x128xf32>
    %570 = arith.truncf %569 : vector<16x128xf32> to vector<16x128xbf16>
    %c80_169 = arith.constant 80 : index
    %c0_170 = arith.constant 0 : index
    %571 = vector.load %arg18[%c80_169, %c0_170] : memref<128x128xbf16, #tpu.memory_space<vmem>>, vector<16x128xbf16>
    tpu.vector_store %arg18[%c80_169, %c0_170], %570 {strides = array<i32>} : memref<128x128xbf16, #tpu.memory_space<vmem>>, vector<16x128xbf16>,
    %c96_171 = arith.constant 96 : index
    %c0_172 = arith.constant 0 : index
    %572 = vector.load %arg19[%c96_171, %c0_172] : memref<128x384xbf16, #tpu.memory_space<vmem>>, vector<16x384xbf16>
    %573 = arith.extf %572 : vector<16x384xbf16> to vector<16x384xf32>
    %574 = arith.truncf %569 : vector<16x128xf32> to vector<16x128xbf16>
    %cst_173 = arith.constant dense<0.000000e+00> : vector<16x384xf32>
    %575 = tpu.matmul %574, %337, %cst_173 {dimension_numbers = #tpu.dot_dimension_numbers<[1], [0], [0], [1], [0, 0, 1, 1], [], []>} : vector<16x128xbf16>, vector<128x384xbf16>, vector<16x384xf32> -> vector<16x384xf32>
    %576 = vector.extract_strided_slice %573 {offsets = [0, 0], sizes = [16, 128], strides = [1, 1]} : vector<16x384xf32> to vector<16x128xf32>
    %577 = vector.extract_strided_slice %575 {offsets = [0, 0], sizes = [16, 128], strides = [1, 1]} : vector<16x384xf32> to vector<16x128xf32>
    %578 = arith.addf %576, %577 : vector<16x128xf32>
    %579 = arith.negf %578 : vector<16x128xf32>
    %580 = math.exp %579 : vector<16x128xf32>
    %cst_174 = arith.constant 1.000000e+00 : f32
    %581 = vector.broadcast %cst_174 : f32 to vector<16x128xf32>
    %582 = arith.addf %581, %580 : vector<16x128xf32>
    %583 = arith.divf %581, %582 : vector<16x128xf32>
    %584 = vector.extract_strided_slice %573 {offsets = [0, 128], sizes = [16, 128], strides = [1, 1]} : vector<16x384xf32> to vector<16x128xf32>
    %585 = vector.extract_strided_slice %575 {offsets = [0, 128], sizes = [16, 128], strides = [1, 1]} : vector<16x384xf32> to vector<16x128xf32>
    %586 = arith.addf %584, %585 : vector<16x128xf32>
    %587 = arith.negf %586 : vector<16x128xf32>
    %588 = math.exp %587 : vector<16x128xf32>
    %cst_175 = arith.constant 1.000000e+00 : f32
    %589 = vector.broadcast %cst_175 : f32 to vector<16x128xf32>
    %590 = arith.addf %589, %588 : vector<16x128xf32>
    %591 = arith.divf %589, %590 : vector<16x128xf32>
    %592 = vector.extract_strided_slice %573 {offsets = [0, 256], sizes = [16, 128], strides = [1, 1]} : vector<16x384xf32> to vector<16x128xf32>
    %593 = vector.extract_strided_slice %575 {offsets = [0, 256], sizes = [16, 128], strides = [1, 1]} : vector<16x384xf32> to vector<16x128xf32>
    %594 = arith.addf %593, %336 : vector<16x128xf32>
    %595 = arith.mulf %583, %594 : vector<16x128xf32>
    %596 = arith.addf %592, %595 : vector<16x128xf32>
    %597 = math.tanh %596 : vector<16x128xf32>
    %cst_176 = arith.constant 1.000000e+00 : f32
    %598 = vector.broadcast %cst_176 : f32 to vector<16x128xf32>
    %599 = arith.subf %598, %591 : vector<16x128xf32>
    %600 = arith.mulf %599, %597 : vector<16x128xf32>
    %601 = arith.mulf %591, %569 : vector<16x128xf32>
    %602 = arith.addf %600, %601 : vector<16x128xf32>
    %c96_177 = arith.constant 96 : index
    %c0_178 = arith.constant 0 : index
    %603 = vector.load %arg3[%c96_177, %c0_178] : memref<128x1xf32, #tpu.memory_space<vmem>>, vector<16x1xf32>
    %cst_179 = arith.constant 0.000000e+00 : f32
    %604 = vector.broadcast %cst_179 : f32 to vector<16x1xf32>
    %605 = arith.cmpf ogt, %603, %604 : vector<16x1xf32>
    %606 = vector.shape_cast %605 : vector<16x1xi1> to vector<16x1xi1>
    %607 = vector.broadcast %606 : vector<16x1xi1> to vector<16x128xi1>
    %608 = arith.select %607, %602, %569 : vector<16x128xi1>, vector<16x128xf32>
    %609 = arith.truncf %608 : vector<16x128xf32> to vector<16x128xbf16>
    %c96_180 = arith.constant 96 : index
    %c0_181 = arith.constant 0 : index
    %610 = vector.load %arg18[%c96_180, %c0_181] : memref<128x128xbf16, #tpu.memory_space<vmem>>, vector<16x128xbf16>
    tpu.vector_store %arg18[%c96_180, %c0_181], %609 {strides = array<i32>} : memref<128x128xbf16, #tpu.memory_space<vmem>>, vector<16x128xbf16>,
    %c112_182 = arith.constant 112 : index
    %c0_183 = arith.constant 0 : index
    %611 = vector.load %arg19[%c112_182, %c0_183] : memref<128x384xbf16, #tpu.memory_space<vmem>>, vector<16x384xbf16>
    %612 = arith.extf %611 : vector<16x384xbf16> to vector<16x384xf32>
    %613 = arith.truncf %608 : vector<16x128xf32> to vector<16x128xbf16>
    %cst_184 = arith.constant dense<0.000000e+00> : vector<16x384xf32>
    %614 = tpu.matmul %613, %337, %cst_184 {dimension_numbers = #tpu.dot_dimension_numbers<[1], [0], [0], [1], [0, 0, 1, 1], [], []>} : vector<16x128xbf16>, vector<128x384xbf16>, vector<16x384xf32> -> vector<16x384xf32>
    %615 = vector.extract_strided_slice %612 {offsets = [0, 0], sizes = [16, 128], strides = [1, 1]} : vector<16x384xf32> to vector<16x128xf32>
    %616 = vector.extract_strided_slice %614 {offsets = [0, 0], sizes = [16, 128], strides = [1, 1]} : vector<16x384xf32> to vector<16x128xf32>
    %617 = arith.addf %615, %616 : vector<16x128xf32>
    %618 = arith.negf %617 : vector<16x128xf32>
    %619 = math.exp %618 : vector<16x128xf32>
    %cst_185 = arith.constant 1.000000e+00 : f32
    %620 = vector.broadcast %cst_185 : f32 to vector<16x128xf32>
    %621 = arith.addf %620, %619 : vector<16x128xf32>
    %622 = arith.divf %620, %621 : vector<16x128xf32>
    %623 = vector.extract_strided_slice %612 {offsets = [0, 128], sizes = [16, 128], strides = [1, 1]} : vector<16x384xf32> to vector<16x128xf32>
    %624 = vector.extract_strided_slice %614 {offsets = [0, 128], sizes = [16, 128], strides = [1, 1]} : vector<16x384xf32> to vector<16x128xf32>
    %625 = arith.addf %623, %624 : vector<16x128xf32>
    %626 = arith.negf %625 : vector<16x128xf32>
    %627 = math.exp %626 : vector<16x128xf32>
    %cst_186 = arith.constant 1.000000e+00 : f32
    %628 = vector.broadcast %cst_186 : f32 to vector<16x128xf32>
    %629 = arith.addf %628, %627 : vector<16x128xf32>
    %630 = arith.divf %628, %629 : vector<16x128xf32>
    %631 = vector.extract_strided_slice %612 {offsets = [0, 256], sizes = [16, 128], strides = [1, 1]} : vector<16x384xf32> to vector<16x128xf32>
    %632 = vector.extract_strided_slice %614 {offsets = [0, 256], sizes = [16, 128], strides = [1, 1]} : vector<16x384xf32> to vector<16x128xf32>
    %633 = arith.addf %632, %336 : vector<16x128xf32>
    %634 = arith.mulf %622, %633 : vector<16x128xf32>
    %635 = arith.addf %631, %634 : vector<16x128xf32>
    %636 = math.tanh %635 : vector<16x128xf32>
    %cst_187 = arith.constant 1.000000e+00 : f32
    %637 = vector.broadcast %cst_187 : f32 to vector<16x128xf32>
    %638 = arith.subf %637, %630 : vector<16x128xf32>
    %639 = arith.mulf %638, %636 : vector<16x128xf32>
    %640 = arith.mulf %630, %608 : vector<16x128xf32>
    %641 = arith.addf %639, %640 : vector<16x128xf32>
    %c112_188 = arith.constant 112 : index
    %c0_189 = arith.constant 0 : index
    %642 = vector.load %arg3[%c112_188, %c0_189] : memref<128x1xf32, #tpu.memory_space<vmem>>, vector<16x1xf32>
    %cst_190 = arith.constant 0.000000e+00 : f32
    %643 = vector.broadcast %cst_190 : f32 to vector<16x1xf32>
    %644 = arith.cmpf ogt, %642, %643 : vector<16x1xf32>
    %645 = vector.shape_cast %644 : vector<16x1xi1> to vector<16x1xi1>
    %646 = vector.broadcast %645 : vector<16x1xi1> to vector<16x128xi1>
    %647 = arith.select %646, %641, %608 : vector<16x128xi1>, vector<16x128xf32>
    %648 = arith.truncf %647 : vector<16x128xf32> to vector<16x128xbf16>
    %c112_191 = arith.constant 112 : index
    %c0_192 = arith.constant 0 : index
    %649 = vector.load %arg18[%c112_191, %c0_192] : memref<128x128xbf16, #tpu.memory_space<vmem>>, vector<16x128xbf16>
    tpu.vector_store %arg18[%c112_191, %c0_192], %648 {strides = array<i32>} : memref<128x128xbf16, #tpu.memory_space<vmem>>, vector<16x128xbf16>,
    return
  }
}

</mosaic_0001>

<bundles_post_ra>
// kernel: tpu_custom_call.1
= control target key start
LH: loop header
LB: loop body
LE: loop exit
PB: predicated region body
PF: predicated region fallthrough
CT: control target
= control target key end

     0   :  { %s7066_s0 = inlined_call_operand.vmem [shape: bf16[128,64], index: 0, kind: input, shape index: {}]   ;;  %s7067_s1 = inlined_call_operand.vmem [shape: f32[128,1], index: 1, kind: input, shape index: {}]   ;;  %s7068_s2 = inlined_call_operand.vmem [shape: bf16[128,64], index: 2, kind: input, shape index: {}]   ;;  %s7069_s3 = inlined_call_operand.vmem [shape: f32[128,1], index: 3, kind: input, shape index: {}]   ;;  %s7070_s4 = inlined_call_operand.hbm [shape: bf16[64,384], index: 4, kind: input, shape index: {}]   ;;  %s7071_s5 = inlined_call_operand.vmem [shape: bf16[128,384], index: 5, kind: input, shape index: {}]   ;;  %s7072_s6 = inlined_call_operand.vmem [shape: f32[1,384], index: 6, kind: input, shape index: {}]   ;;  %s7073_s7 = inlined_call_operand.vmem [shape: f32[1,128], index: 7, kind: input, shape index: {}]   ;;  %s7074_s8 = inlined_call_operand.vmem [shape: f32[128,128], index: 8, kind: input, shape index: {}]   ;;  %s7075_s9 = inlined_call_operand.vmem [shape: f32[1,128], index: 9, kind: input, shape index: {}]   ;;  %s7076_s10 = inlined_call_operand.hbm [shape: f32[128,128], index: 10, kind: input, shape index: {}]   ;;  %s7077_s11 = inlined_call_operand.vmem [shape: f32[1,128], index: 11, kind: input, shape index: {}]   ;;  %s7078_s12 = inlined_call_operand.hbm [shape: f32[128,128], index: 12, kind: input, shape index: {}]   ;;  %s7079_s13 = inlined_call_operand.vmem [shape: f32[1,128], index: 13, kind: input, shape index: {}]   ;;  %s7080_s14 = inlined_call_operand.hbm [shape: bf16[64,384], index: 14, kind: input, shape index: {}]   ;;  %s7081_s15 = inlined_call_operand.hbm [shape: bf16[128,384], index: 15, kind: input, shape index: {}]   ;;  %s7082_s16 = inlined_call_operand.vmem [shape: f32[1,384], index: 16, kind: input, shape index: {}]   ;;  %s7083_s17 = inlined_call_operand.vmem [shape: f32[1,128], index: 17, kind: input, shape index: {}]   ;;  %s7084_s18 = inlined_call_operand.hbm [shape: bf16[128,128], index: 18, kind: output, shape index: {}]  }
   0x1   :  { %7092 = sst [smem:[#allocation19_spill]] %s7066_s0 }
   0x2   :  { %7093 = sst [smem:[#allocation20_spill]] %s7067_s1 }
   0x3   :  { %7094 = sst [smem:[#allocation21_spill]] %s7068_s2 }
   0x4   :  { %7095 = sst [smem:[#allocation22_spill]] %s7084_s18 }
   0x5   :  { %23 = vsyncpa [#allocation4], 0 }
   0x6   :  { %24 = vsyncpa [#allocation7], 0 }
   0x7   :  { %25 = vsyncpa [#allocation10], 0  ;;  %s62_s29 = sshll.u32 %s7076_s10, 4  ;;  %s63_s29 = int_to_ptr.hbm [resolvable:$true] %s62_s29 }
   0x8   :  { %26 = vsyncpa [#allocation5], 0  ;;  %s5191_s30 = smov [#allocation6]   ;;  %s5192_s19 = smov 128  }
   0x9   :  { %s64_s0 = sshll.u32 %s5191_s30, 4  ;;  %s5193_s1 = smov 8   ;;  %s65_s0 = int_to_ptr.vmem [resolvable:$true] %s64_s0 }
   0xa   :  { %70 = dma.hbm_to_vmem [thread:$0]  %s63_s29, 2048, %s65_s0, [#allocation7], %s5192_s19, %s5192_s19, %s5193_s1  }
   0xb   :  { %s92_s22 = sshll.u32 %s7080_s14, 4  ;;  %s5194_s2 = smov [#allocation9]   ;;  %s93_s22 = int_to_ptr.hbm [resolvable:$true] %s92_s22 }
   0xc   :  { %s94_s23 = sshll.u32 %s5194_s2, 4  ;;  %s39_s26 = sshll.u32 %s7070_s4, 4  ;;  %s95_s23 = int_to_ptr.vmem [resolvable:$true] %s94_s23  ;;  %s40_s26 = int_to_ptr.hbm [resolvable:$true] %s39_s26 }
   0xd   :  { %s5195_s10 = smov 192   ;;  %s5196_s27 = smov 12  }
   0xe   :  { %100 = dma.hbm_to_vmem [thread:$0]  %s93_s22, 1536, %s95_s23, [#allocation10], %s5195_s10, %s5195_s10, %s5196_s27  }
   0xf   :  { %s77_s29 = sshll.u32 %s7078_s12, 4  ;;  %s5197_s0 = smov [#allocation3]   ;;  %s78_s29 = int_to_ptr.hbm [resolvable:$true] %s77_s29 }
  0x10   :  { %s41_s18 = sshll.u32 %s5197_s0, 4  ;;  %s5198_s14 = smov [#allocation8]   ;;  %s42_s18 = int_to_ptr.vmem [resolvable:$true] %s41_s18 }
  0x11   :  { %47 = dma.hbm_to_vmem [thread:$0]  %s40_s26, 1536, %s42_s18, [#allocation4], %s5195_s10, %s5195_s10, %s5196_s27  }
  0x12   :  { %s79_s20 = sshll.u32 %s5198_s14, 4  ;;  %s105_s4 = sshll.u32 %s7081_s15, 4  ;;  %s80_s20 = int_to_ptr.vmem [resolvable:$true] %s79_s20  ;;  %s106_s4 = int_to_ptr.hbm [resolvable:$true] %s105_s4 }
  0x13   :  { %85 = dma.hbm_to_vmem [thread:$0]  %s78_s29, 2048, %s80_s20, [#allocation7], %s5192_s19, %s5192_s19, %s5193_s1  }
  0x14   :  { %s5199_s24 = smov [#allocation11]  }
  0x15   :  { %s107_s22 = sshll.u32 %s5199_s24, 4  ;;  %s108_s22 = int_to_ptr.vmem [resolvable:$true] %s107_s22 }
  0x16   :  { %113 = dma.hbm_to_vmem [thread:$0]  %s106_s4, 3072, %s108_s22, [#allocation10], %s5195_s10, %s5195_s10, %s5196_s27  }
  0x17   :  { %5183 = dma.done.wait [#allocation4], 1536  }
  0x18   :  { %5184 = vsyncadd [#allocation4], 4294965760 }
  0x19   :  { %5185 = dma.done.wait [#allocation7], 4096  }
  0x1a   :  { %5186 = vsyncadd [#allocation7], 4294963200 }
  0x1b   :  { %5187 = dma.done.wait [#allocation10], 4608  }
  0x1c   :  { %5188 = vsyncadd [#allocation10], 4294962688  ;;  %v4276_v0 = vld [vmem:[%s7071_s5 + $0xa8] sm:$0xf]  ;;  %v4601_v1 = vld [vmem:[%s7071_s5 + $0xb0] sm:$0xf0] }
  0x1d   :  { %v4264_v2 = vld [vmem:[%s7071_s5 + $0x90] sm:$0xf]  ;;  %v5323_v3 = vor.u32 %v4601_v1, %v4276_v0  ;;  %v4598_v4 = vld [vmem:[%s7071_s5 + $0x98] sm:$0xf0]  ;;  %v4156_v5 = vld [vmem:[#allocation3 + $0x48] sm:$0xf] }
  0x1e   :  { %v4577_v6 = vld [vmem:[#allocation3 + $0x50] sm:$0xf0]  ;;  %v4576_v7 = vld [vmem:[#allocation3 + $0x4c] sm:$0xf]  ;;  %v5329_v8 = vor.u32 %v4598_v4, %v4264_v2  ;;  %v4252_v9 = vld [vmem:[%s7071_s5 + $0x78] sm:$0xf] }
  0x1f   :  { %693 = vmatpush.bf16.msra.mxu3 %v5323_v3  ;;  %v4595_v10 = vld [vmem:[%s7071_s5 + $0x80] sm:$0xf0]  ;;  %v4157_v11 = vor.u32 %v4577_v6, %v4156_v5  ;;  %v4158_v12 = vld [vmem:[#allocation3 + $0x54] sm:$0xf0]  ;;  %v4144_v14 = vld [vmem:[#allocation3 + $0x30] sm:$0xf] }
  0x20   :  { %v4161_v13 = vor.u32 %v4576_v7, %v4158_v12  ;;  %v4574_v15 = vld [vmem:[#allocation3 + $0x38] sm:$0xf0]  ;;  %v4573_v16 = vld [vmem:[#allocation3 + $0x34] sm:$0xf]  ;;  %v4146_v18 = vld [vmem:[#allocation3 + $0x3c] sm:$0xf0]  ;;  %v5338_v22 = vor.u32 %v4595_v10, %v4252_v9 }
  0x21   :  { %312 = vmatpush.bf16.msra.mxu0 %v4157_v11  ;;  %v4145_v17 = vor.u32 %v4574_v15, %v4144_v14  ;;  %v4149_v19 = vor.u32 %v4573_v16, %v4146_v18  ;;  %v4132_v20 = vld [vmem:[#allocation3 + $0x18] sm:$0xf]  ;;  %v4571_v21 = vld [vmem:[#allocation3 + $0x20] sm:$0xf0]  ;;  %v4570_v23 = vld [vmem:[#allocation3 + $0x1c] sm:$0xf] }
  0x22   :  { %361 = vmatpush.bf16.msra.mxu1 %v4161_v13  ;;  %v4134_v24 = vld [vmem:[#allocation3 + $0x24] sm:$0xf0]  ;;  %v4240_v25 = vld [vmem:[%s7071_s5 + $0x60] sm:$0xf]  ;;  %v4592_v26 = vld [vmem:[%s7071_s5 + $0x68] sm:$0xf0]  ;;  %v4133_v27 = vor.u32 %v4571_v21, %v4132_v20 }
  0x23   :  { %694 = vmatpush.bf16.msra.mxu3 %v5329_v8  ;;  %v4137_v28 = vor.u32 %v4570_v23, %v4134_v24  ;;  %v4120_v29 = vld [vmem:[#allocation3] sm:$0xf]  ;;  %v4568_v30 = vld [vmem:[#allocation3 + $0x8] sm:$0xf0]  ;;  %v5347_v31 = vor.u32 %v4592_v26, %v4240_v25  ;;  %v4567_v32 = vld [vmem:[#allocation3 + $0x4] sm:$0xf] }
  0x24   :  { %v4122_v33 = vld [vmem:[#allocation3 + $0xc] sm:$0xf0]  ;;  %v7088_v34 = vmov 0   ;;  %v4228_v35 = vld [vmem:[%s7071_s5 + $0x48] sm:$0xf]  ;;  %v4121_v37 = vor.u32 %v4568_v30, %v4120_v29  ;;  %s7096_s19 = sld [smem:[#allocation20_spill]] }
  0x25   :  { %313 = vmatpush.bf16.msra.mxu0 %v4145_v17  ;;  %4707 = vset.pattern.permute.xlu0 %v7088_v34  ;;  %v4589_v36 = vld [vmem:[%s7071_s5 + $0x50] sm:$0xf0]  ;;  %v4600_v38 = vld [vmem:[%s7071_s5 + $0xac] sm:$0xf]  ;;  %v4278_v39 = vld [vmem:[%s7071_s5 + $0xb4] sm:$0xf0]  ;;  %v4125_v43 = vor.u32 %v4567_v32, %v4122_v33 }
  0x26   :  { %362 = vmatpush.bf16.msra.mxu1 %v4149_v19  ;;  %4708 = vset.pattern.permute.xlu1 %v7088_v34  ;;  %v4216_v41 = vld [vmem:[%s7071_s5 + $0x30] sm:$0xf]  ;;  %v4586_v42 = vld [vmem:[%s7071_s5 + $0x38] sm:$0xf0]  ;;  %v5374_v44 = vor.u32 %v4589_v36, %v4228_v35  ;;  %s7097_s29 = sld [smem:[#allocation19_spill]]  ;;  %vm283_vm1 = vcmask 523264   ;;  %v5382_v47 = vor.u32 %v4600_v38, %v4278_v39 }
  0x27   :  { %695 = vmatpush.bf16.msra.mxu3 %v5338_v22  ;;  %4709 = vset.pattern.permute.xlu2 %v7088_v34  ;;  %v4597_v48 = vld [vmem:[%s7071_s5 + $0x94] sm:$0xf]  ;;  %v4266_v49 = vld [vmem:[%s7071_s5 + $0x9c] sm:$0xf0]  ;;  %v5392_v50 = vor.u32 %v4586_v42, %v4216_v41  ;;  %v4204_v52 = vld [vmem:[%s7071_s5 + $0x18] sm:$0xf] }
  0x28   :  { %v4583_v53 = vld [vmem:[%s7071_s5 + $0x20] sm:$0xf0]  ;;  %v5405_v54 = vor.u32 %v4597_v48, %v4266_v49  ;;  %v4594_v55 = vld [vmem:[%s7071_s5 + $0x7c] sm:$0xf]  ;;  %v4254_v56 = vld [vmem:[%s7071_s5 + $0x84] sm:$0xf0] }
  0x29   :  { %314 = vmatpush.bf16.msra.mxu0 %v4133_v27  ;;  %v5418_v58 = vor.u32 %v4583_v53, %v4204_v52  ;;  %v4192_v59 = vld [vmem:[%s7071_s5] sm:$0xf]  ;;  %v4580_v60 = vld [vmem:[%s7071_s5 + $0x8] sm:$0xf0]  ;;  %v5426_v61 = vor.u32 %v4594_v55, %v4254_v56  ;;  %v4164_v62 = vld [vmem:[#allocation3 + $0x50] sm:$0xf] }
  0x2a   :  { %v831_v40 = vld [vmem:[%s7096_s19] sm:$0xff]  ;;  %363 = vmatpush.bf16.msra.mxu1 %v4137_v28  ;;  %v832_v51 = vld [vmem:[%s7096_s19 + $0x8] sm:$0xff]  ;;  %v4578_v63 = vld [vmem:[#allocation3 + $0x58] sm:$0xf0]  ;;  %v5442_v6 = vor.u32 %v4580_v60, %v4192_v59  ;;  %s7123_s27 = sld [smem:[#allocation21_spill]] }
  0x2b   :  { %vm833_vm0 = vcmp.gt.f32.partialorder %v831_v40, 0.0  ;;  %696 = vmatpush.bf16.msra.mxu3 %v5347_v31  ;;  %vm834_vm2 = vcmp.gt.f32.partialorder %v832_v51, 0.0  ;;  %v4591_v0 = vld [vmem:[%s7071_s5 + $0x64] sm:$0xf]  ;;  %v4242_v1 = vld [vmem:[%s7071_s5 + $0x6c] sm:$0xf0]  ;;  %v4165_v2 = vor.u32 %v4578_v63, %v4164_v62 }
  0x2c   :  { %v835_v45 = vsel %vm833_vm0, 1, %v7088_v34  ;;  %v5380_v46 = vld [vmem:[%s7097_s29] sm:$0xff]  ;;  %v836_v57 = vsel %vm834_vm2, 1, %v7088_v34  ;;  %v4284_v4 = vld [vmem:[%s7071_s5 + $0xb0] sm:$0xf]  ;;  %v5449_v10 = vor.u32 %v4591_v0, %v4242_v1  ;;  %v1492_v33 = vld [vmem:[%s7096_s19 + $0x48] sm:$0xff] }
  0x2d   :  { %838 = vperm.xlu0 %4707, %v835_v45   ;;  %315 = vmatpush.bf16.msra.mxu0 %v4121_v37  ;;  %v4602_v5 = vld [vmem:[%s7071_s5 + $0xb8] sm:$0xf0]  ;;  %v1326_v9 = vld [vmem:[%s7096_s19 + $0x30] sm:$0xff]  ;;  %v4152_v11 = vld [vmem:[#allocation3 + $0x38] sm:$0xf]  ;;  %vm1494_vm4 = vcmp.gt.f32.partialorder %v1492_v33, 0.0 }
  0x2e   :  { %364 = vmatpush.bf16.msra.mxu1 %v4125_v43  ;;  %410 = vmatpush.bf16.msra.mxu2 %v4165_v2  ;;  %v5444_v7 = vor.u32 %v4602_v5, %v4284_v4  ;;  %vm1328_vm3 = vcmp.gt.f32.partialorder %v1326_v9, 0.0  ;;  %v4575_v12 = vld [vmem:[#allocation3 + $0x40] sm:$0xf0]  ;;  %v4588_v13 = vld [vmem:[%s7071_s5 + $0x4c] sm:$0xf]  ;;  %v1496_v38 = vsel %vm1494_vm4, 1, %v7088_v34 }
  0x2f   :  { %697 = vmatpush.bf16.msra.mxu3 %v5374_v44  ;;  %v4230_v14 = vld [vmem:[%s7071_s5 + $0x54] sm:$0xf0]  ;;  %v1330_v15 = vsel %vm1328_vm3, 1, %v7088_v34  ;;  %v4153_v16 = vor.u32 %v4575_v12, %v4152_v11  ;;  %v4599_v18 = vld [vmem:[%s7071_s5 + $0xa0] sm:$0xf0]  ;;  %v3001_v9 = vld [vmem:[%s7069_s3 + $0x10] sm:$0xff] }
  0x30   :  { %4166 = vmatmul.msk.bf16.vlgmr.msra.gmra.mxu0 %vm283_vm1, %v5380_v46  ;;  %v4272_v17 = vld [vmem:[%s7071_s5 + $0x98] sm:$0xf]  ;;  %v5470_v20 = vor.u32 %v4588_v13, %v4230_v14  ;;  %v4585_v21 = vld [vmem:[%s7071_s5 + $0x34] sm:$0xf]  ;;  %v4140_v23 = vld [vmem:[#allocation3 + $0x20] sm:$0xf] }
  0x31   :  { %872 = vmatpush.bf16.msrb.mxu0 %v5382_v47  ;;  %4174 = vmatmul.msk.bf16.vlgmr.msra.gmra.mxu1 %vm283_vm1, %v5380_v46  ;;  %v5467_v19 = vor.u32 %v4599_v18, %v4272_v17  ;;  %v4572_v24 = vld [vmem:[#allocation3 + $0x28] sm:$0xf0]  ;;  %v4218_v25 = vld [vmem:[%s7071_s5 + $0x3c] sm:$0xf0]  ;;  %v4582_v29 = vld [vmem:[%s7071_s5 + $0x1c] sm:$0xf] }
  0x32   :  { %886 = vmatpush.bf16.msrb.mxu1 %v5444_v7  ;;  %411 = vmatpush.bf16.msra.mxu2 %v4153_v16  ;;  %v4141_v26 = vor.u32 %v4572_v24, %v4140_v23  ;;  %v4260_v27 = vld [vmem:[%s7071_s5 + $0x80] sm:$0xf]  ;;  %v4596_v28 = vld [vmem:[%s7071_s5 + $0x88] sm:$0xf0]  ;;  %v4206_v30 = vld [vmem:[%s7071_s5 + $0x24] sm:$0xf0]  ;;  %v5499_v35 = vor.u32 %v4585_v21, %v4218_v25 }
  0x33   :  { %698 = vmatpush.bf16.msra.mxu3 %v5392_v50  ;;  %v5493_v32 = vor.u32 %v4596_v28, %v4260_v27  ;;  %v4128_v36 = vld [vmem:[#allocation3 + $0x8] sm:$0xf]  ;;  %v4569_v37 = vld [vmem:[#allocation3 + $0x10] sm:$0xf0]  ;;  %v5513_v43 = vor.u32 %v4582_v29, %v4206_v30  ;;  %v4579_v45 = vld [vmem:[%s7071_s5 + $0x4] sm:$0xf] }
  0x34   :  { %v4129_v39 = vor.u32 %v4569_v37, %v4128_v36  ;;  %v4248_v40 = vld [vmem:[%s7071_s5 + $0x68] sm:$0xf]  ;;  %v4593_v41 = vld [vmem:[%s7071_s5 + $0x70] sm:$0xf0]  ;;  %v4194_v48 = vld [vmem:[%s7071_s5 + $0xc] sm:$0xf0] }
  0x35   :  { %873 = vmatpush.bf16.msrb.mxu0 %v5405_v54  ;;  %841 = vperm.xlu0 %4707, %v836_v57   ;;  %v5510_v42 = vor.u32 %v4593_v41, %v4248_v40  ;;  %v4236_v49 = vld [vmem:[%s7071_s5 + $0x50] sm:$0xf]  ;;  %v4590_v51 = vld [vmem:[%s7071_s5 + $0x58] sm:$0xf0]  ;;  %v1821_v53 = vld [vmem:[%s7096_s19 + $0x60] sm:$0xff]  ;;  %v5538_v55 = vor.u32 %v4579_v45, %v4194_v48  ;;  %vm3003_vm7 = vcmp.gt.f32.partialorder %v3001_v9, 0.0 }
  0x36   :  { %887 = vmatpush.bf16.msrb.mxu1 %v5467_v19  ;;  %412 = vmatpush.bf16.msra.mxu2 %v4141_v26  ;;  %v5532_v52 = vor.u32 %v4590_v51, %v4236_v49  ;;  %vm1823_vm5 = vcmp.gt.f32.partialorder %v1821_v53, 0.0  ;;  %v4224_v57 = vld [vmem:[%s7071_s5 + $0x38] sm:$0xf]  ;;  %v4212_v60 = vld [vmem:[%s7071_s5 + $0x20] sm:$0xf]  ;;  %v3005_v11 = vsel %vm3003_vm7, 1, %v7088_v34 }
  0x37   :  { %699 = vmatpush.bf16.msra.mxu3 %v5418_v58  ;;  %v1825_v56 = vsel %vm1823_vm5, 1, %v7088_v34  ;;  %v4584_v62 = vld [vmem:[%s7071_s5 + $0x28] sm:$0xf0]  ;;  %v1987_v0 = vld [vmem:[%s7096_s19 + $0x78] sm:$0xff]  ;;  %v4200_v2 = vld [vmem:[%s7071_s5 + $0x8] sm:$0xf] }
  0x38   :  { %v5562_v63 = vor.u32 %v4584_v62, %v4212_v60  ;;  %vm1989_vm6 = vcmp.gt.f32.partialorder %v1987_v0, 0.0  ;;  %v4581_v4 = vld [vmem:[%s7071_s5 + $0x10] sm:$0xf0]  ;;  %v3176_v12 = vld [vmem:[%s7069_s3 + $0x28] sm:$0xff]  ;;  %v3698_v17 = vld [vmem:[%s7069_s3 + $0x58] sm:$0xff] }
  0x39   :  { %874 = vmatpush.bf16.msrb.mxu0 %v5426_v61  ;;  %v1991_v1 = vsel %vm1989_vm6, 1, %v7088_v34  ;;  %v5578_v5 = vor.u32 %v4581_v4, %v4200_v2  ;;  %v4560_v13 = vld [vmem:[%s7097_s29 + $0x8] sm:$0xff]  ;;  %vm3178_vm8 = vcmp.gt.f32.partialorder %v3176_v12, 0.0  ;;  %vm3700_vm10 = vcmp.gt.f32.partialorder %v3698_v17, 0.0  ;;  %v4045_v21 = vld [vmem:[%s7069_s3 + $0x70] sm:$0xff]  ;;  %v4562_v25 = vld [vmem:[%s7097_s29 + $0x18] sm:$0xff] }
  0x3a   :  { %888 = vmatpush.bf16.msrb.mxu1 %v5493_v32  ;;  %413 = vmatpush.bf16.msra.mxu2 %v4129_v39  ;;  %v3180_v14 = vsel %vm3178_vm8, 1, %v7088_v34  ;;  %v3702_v18 = vsel %vm3700_vm10, 1, %v7088_v34  ;;  %vm4047_vm11 = vcmp.gt.f32.partialorder %v4045_v21, 0.0  ;;  %v4561_v24 = vld [vmem:[%s7097_s29 + $0x10] sm:$0xff]  ;;  %v4563_v26 = vld [vmem:[%s7097_s29 + $0x20] sm:$0xff]  ;;  %v4564_v41 = vld [vmem:[%s7097_s29 + $0x28] sm:$0xff] }
  0x3b   :  { %700 = vmatpush.bf16.msra.mxu3 %v5442_v6  ;;  %v4049_v23 = vsel %vm4047_vm11, 1, %v7088_v34  ;;  %v171_v27 = vld [vmem:[%s7072_s6] sm:$0x7] }
  0x3c   :  { %v5682_v30 = vperm.slane %v171_v27, 0  ;;  %v5684_v33 = vperm.slane %v171_v27, 1  ;;  %v5696_v0 = vperm.slane %v171_v27, 2 }
  0x3d   :  { %875 = vmatpush.bf16.msrb.mxu0 %v5449_v10  ;;  %1333 = vperm.xlu0 %4707, %v1330_v15   ;;  %v3523_v15 = vld [vmem:[%s7069_s3 + $0x40] sm:$0xff] }
  0x3e   :  { %701 = vmatmul.bf16.vlgmr.msra.gmra.mxu3 %v7088_v34  ;;  %889 = vmatpush.bf16.msrb.mxu1 %v5510_v42  ;;  %vm3525_vm9 = vcmp.gt.f32.partialorder %v3523_v15, 0.0 }
  0x3f   :  { %707 = vmatpush.bf16.msrb.mxu3 %v5382_v47  ;;  %1023 = vmatpush.bf16.msrb.mxu2 %v5323_v3  ;;  %v3527_v16 = vsel %vm3525_vm9, 1, %v7088_v34 }
  0x40   :  { %4182 = vmatmul.msk.bf16.vlgmr.msra.gmra.mxu2 %vm283_vm1, %v5380_v46  ;;  %v4587_v46 = vld [vmem:[%s7071_s5 + $0x40] sm:$0xf0]  ;;  %4167 = vmatmul.msk.bf16.gmra.mxu0 %vm283_vm1, %v4560_v13 }
  0x41   :  { %876 = vmatpush.bf16.msrb.mxu0 %v5470_v20  ;;  %v5550_v59 = vor.u32 %v4587_v46, %v4224_v57  ;;  %4175 = vmatmul.msk.bf16.gmra.mxu1 %vm283_vm1, %v4560_v13 }
  0x42   :  { %890 = vmatpush.bf16.msrb.mxu1 %v5532_v52 }
  0x43   :  { %708 = vmatpush.bf16.msrb.mxu3 %v5405_v54  ;;  %1024 = vmatpush.bf16.msrb.mxu2 %v5329_v8 }
  0x45   :  { %877 = vmatpush.bf16.msrb.mxu0 %v5499_v35  ;;  %1501 = vperm.xlu0 %4707, %v1496_v38  }
  0x46   :  { %891 = vmatpush.bf16.msrb.mxu1 %v5550_v59 }
  0x47   :  { %709 = vmatpush.bf16.msrb.mxu3 %v5426_v61  ;;  %1025 = vmatpush.bf16.msrb.mxu2 %v5338_v22 }
  0x49   :  { %878 = vmatpush.bf16.msrb.mxu0 %v5513_v43 }
  0x4a   :  { %892 = vmatpush.bf16.msrb.mxu1 %v5562_v63 }
  0x4b   :  { %710 = vmatpush.bf16.msrb.mxu3 %v5449_v10  ;;  %1026 = vmatpush.bf16.msrb.mxu2 %v5347_v31 }
  0x4d   :  { %879 = vmatpush.bf16.msrb.mxu0 %v5538_v55  ;;  %1828 = vperm.xlu0 %4707, %v1825_v56  }
  0x4e   :  { %893 = vmatpush.bf16.msrb.mxu1 %v5578_v5 }
  0x4f   :  { %711 = vmatpush.bf16.msrb.mxu3 %v5470_v20  ;;  %1027 = vmatpush.bf16.msrb.mxu2 %v5374_v44 }
  0x50   :  { %4183 = vmatmul.msk.bf16.gmra.mxu2 %vm283_vm1, %v4560_v13  ;;  %4168 = vmatmul.msk.bf16.gmra.mxu0 %vm283_vm1, %v4561_v24  ;;  %v4565_v13 = vld [vmem:[%s7097_s29 + $0x30] sm:$0xff] }
  0x51   :  { %1051 = vmatpush.bf16.msra.mxu0 %v5444_v7  ;;  %4176 = vmatmul.msk.bf16.gmra.mxu1 %vm283_vm1, %v4561_v24 }
  0x52   :  { %1188 = vmatpush.bf16.msra.mxu1 %v5323_v3 }
  0x53   :  { %712 = vmatpush.bf16.msrb.mxu3 %v5499_v35  ;;  %1028 = vmatpush.bf16.msrb.mxu2 %v5392_v50 }
  0x55   :  { %1052 = vmatpush.bf16.msra.mxu0 %v5467_v19  ;;  %1996 = vperm.xlu0 %4707, %v1991_v1  }
  0x56   :  { %1189 = vmatpush.bf16.msra.mxu1 %v5329_v8 }
  0x57   :  { %713 = vmatpush.bf16.msrb.mxu3 %v5513_v43  ;;  %1029 = vmatpush.bf16.msrb.mxu2 %v5418_v58 }
  0x59   :  { %1053 = vmatpush.bf16.msra.mxu0 %v5493_v32 }
  0x5a   :  { %1190 = vmatpush.bf16.msra.mxu1 %v5338_v22 }
  0x5b   :  { %714 = vmatpush.bf16.msrb.mxu3 %v5538_v55  ;;  %1030 = vmatpush.bf16.msrb.mxu2 %v5442_v6 }
  0x5d   :  { %1054 = vmatpush.bf16.msra.mxu0 %v5510_v42  ;;  %3008 = vperm.xlu0 %4707, %v3005_v11  }
  0x5e   :  { %715 = vmatmul.bf16.vlgmr.msrb.gmra.mxu3 %v7088_v34  ;;  %1191 = vmatpush.bf16.msra.mxu1 %v5347_v31 }
  0x5f   :  { %721 = vmatpush.bf16.msra.mxu3 %v5444_v7  ;;  %1202 = vmatpush.bf16.msra.mxu2 %v5382_v47 }
  0x60   :  { %4184 = vmatmul.msk.bf16.gmra.mxu2 %vm283_vm1, %v4561_v24  ;;  %4169 = vmatmul.msk.bf16.gmra.mxu0 %vm283_vm1, %v4562_v25 }
  0x61   :  { %1055 = vmatpush.bf16.msra.mxu0 %v5532_v52  ;;  %4177 = vmatmul.msk.bf16.gmra.mxu1 %vm283_vm1, %v4562_v25 }
  0x62   :  { %1192 = vmatpush.bf16.msra.mxu1 %v5374_v44 }
  0x63   :  { %722 = vmatpush.bf16.msra.mxu3 %v5467_v19  ;;  %1203 = vmatpush.bf16.msra.mxu2 %v5405_v54 }
  0x65   :  { %1056 = vmatpush.bf16.msra.mxu0 %v5550_v59  ;;  %3185 = vperm.xlu0 %4707, %v3180_v14  }
  0x66   :  { %1193 = vmatpush.bf16.msra.mxu1 %v5392_v50 }
  0x67   :  { %723 = vmatpush.bf16.msra.mxu3 %v5493_v32  ;;  %1204 = vmatpush.bf16.msra.mxu2 %v5426_v61 }
  0x69   :  { %1057 = vmatpush.bf16.msra.mxu0 %v5562_v63 }
  0x6a   :  { %1194 = vmatpush.bf16.msra.mxu1 %v5418_v58 }
  0x6b   :  { %724 = vmatpush.bf16.msra.mxu3 %v5510_v42  ;;  %1205 = vmatpush.bf16.msra.mxu2 %v5449_v10 }
  0x6d   :  { %1058 = vmatpush.bf16.msra.mxu0 %v5578_v5  ;;  %3530 = vperm.xlu0 %4707, %v3527_v16  }
  0x6e   :  { %1195 = vmatpush.bf16.msra.mxu1 %v5442_v6 }
  0x6f   :  { %725 = vmatpush.bf16.msra.mxu3 %v5532_v52  ;;  %1206 = vmatpush.bf16.msra.mxu2 %v5470_v20 }
  0x70   :  { %4185 = vmatmul.msk.bf16.gmra.mxu2 %vm283_vm1, %v4562_v25  ;;  %4170 = vmatmul.msk.bf16.gmra.mxu0 %vm283_vm1, %v4563_v26  ;;  %v996_v25 = vld [vmem:[%s7096_s19 + $0x10] sm:$0xff] }
  0x71   :  { %4178 = vmatmul.msk.bf16.gmra.mxu1 %vm283_vm1, %v4563_v26  ;;  %vm998_vm12 = vcmp.gt.f32.partialorder %v996_v25, 0.0 }
  0x73   :  { %726 = vmatpush.bf16.msra.mxu3 %v5550_v59  ;;  %1207 = vmatpush.bf16.msra.mxu2 %v5499_v35 }
  0x75   :  { %3707 = vperm.xlu0 %4707, %v3702_v18  }
  0x77   :  { %727 = vmatpush.bf16.msra.mxu3 %v5562_v63  ;;  %1208 = vmatpush.bf16.msra.mxu2 %v5513_v43 }
  0x7b   :  { %728 = vmatpush.bf16.msra.mxu3 %v5578_v5  ;;  %1209 = vmatpush.bf16.msra.mxu2 %v5538_v55 }
  0x7d   :  { %4052 = vperm.xlu0 %4707, %v4049_v23  }
  0x7e   :  { %729 = vmatmul.bf16.vlgmr.msra.gmra.mxu3 %v7088_v34 }
  0x7f   :  { %858 = vmatpush.bf16.msrb.mxu3 %v5323_v3 }
  0x80   :  { %4186 = vmatmul.msk.bf16.gmra.mxu2 %vm283_vm1, %v4563_v26  ;;  %4171 = vmatmul.msk.bf16.gmra.mxu0 %vm283_vm1, %v4564_v41  ;;  %v1000_v26 = vsel %vm998_vm12, 1, %v7088_v34 }
  0x81   :  { %4179 = vmatmul.msk.bf16.gmra.mxu1 %vm283_vm1, %v4564_v41  ;;  %1003 = vperm.xlu1 %4708, %v1000_v26  }
  0x83   :  { %859 = vmatpush.bf16.msrb.mxu3 %v5329_v8 }
  0x87   :  { %860 = vmatpush.bf16.msrb.mxu3 %v5338_v22 }
  0x8b   :  { %861 = vmatpush.bf16.msrb.mxu3 %v5347_v31 }
  0x8f   :  { %862 = vmatpush.bf16.msrb.mxu3 %v5374_v44 }
  0x90   :  { %4187 = vmatmul.msk.bf16.gmra.mxu2 %vm283_vm1, %v4564_v41  ;;  %4172 = vmatmul.msk.bf16.gmra.mxu0 %vm283_vm1, %v4565_v13  ;;  %v997_v41 = vld [vmem:[%s7096_s19 + $0x18] sm:$0xff] }
  0x91   :  { %4180 = vmatmul.msk.bf16.gmra.mxu1 %vm283_vm1, %v4565_v13  ;;  %vm999_vm13 = vcmp.gt.f32.partialorder %v997_v41, 0.0 }
  0x93   :  { %863 = vmatpush.bf16.msrb.mxu3 %v5392_v50 }
  0x97   :  { %864 = vmatpush.bf16.msrb.mxu3 %v5418_v58 }
  0x9b   :  { %865 = vmatpush.bf16.msrb.mxu3 %v5442_v6 }
  0x9f   :  { %1037 = vmatpush.bf16.msra.mxu3 %v5382_v47 }
  0xa0   :  { %4188 = vmatmul.msk.bf16.gmra.mxu2 %vm283_vm1, %v4565_v13 }
  0xa3   :  { %1038 = vmatpush.bf16.msra.mxu3 %v5405_v54 }
  0xa7   :  { %1039 = vmatpush.bf16.msra.mxu3 %v5426_v61 }
  0xab   :  { %1040 = vmatpush.bf16.msra.mxu3 %v5449_v10 }
  0xad   :  { %v317_v28 = vpop.f32.mrf.mxu0 }
  0xae   :  { %v366_v29 = vpop.f32.mrf.mxu1  ;;  %v318_v36 = vadd.f32 %v317_v28, %v5682_v30 }
  0xaf   :  { %1041 = vmatpush.bf16.msra.mxu3 %v5470_v20  ;;  %v367_v37 = vadd.f32 %v366_v29, %v5684_v33  ;;  %v4566_v29 = vld [vmem:[%s7097_s29 + $0x38] sm:$0xff] }
  0xb0   :  { %4173 = vmatmul.msk.bf16.gmra.mxu0 %vm283_vm1, %v4566_v29  ;;  %4181 = vmatmul.msk.bf16.gmra.mxu1 %vm283_vm1, %v4566_v29 }
  0xb1   :  { %v455_v38 = vpack.c.bf16 %v367_v37, %v318_v36  ;;  %4189 = vmatmul.msk.bf16.gmra.mxu2 %vm283_vm1, %v4566_v29 }
  0xb3   :  { %1042 = vmatpush.bf16.msra.mxu3 %v5499_v35  ;;  %v559_v51 = vunpack.c.l.bf16 %v455_v38  ;;  %v560_v16 = vunpack.c.h.bf16 %v455_v38 }
  0xb5   :  { %v319_v39 = vpop.f32.mrf.mxu0 }
  0xb6   :  { %v368_v40 = vpop.f32.mrf.mxu1  ;;  %v320_v48 = vadd.f32 %v319_v39, %v5682_v30 }
  0xb7   :  { %1043 = vmatpush.bf16.msra.mxu3 %v5513_v43  ;;  %v369_v49 = vadd.f32 %v368_v40, %v5684_v33 }
  0xb9   :  { %v457_v56 = vpack.c.bf16 %v369_v49, %v320_v48  ;;  %v1001_v49 = vsel %vm999_vm13, 1, %v7088_v34 }
  0xba   :  { %1006 = vperm.xlu1 %4708, %v1001_v49  }
  0xbb   :  { %1044 = vmatpush.bf16.msra.mxu3 %v5538_v55  ;;  %v562_v46 = vunpack.c.l.bf16 %v457_v56  ;;  %v563_v28 = vunpack.c.h.bf16 %v457_v56 }
  0xc1   :  { %v702_v45 = vpop.f32.mrf.mxu3 }
  0xc2   :  { %v735_v57 = vadd.f32 %v702_v45, %v559_v51 }
  0xc3   :  { %v415_v53 = vpop.f32.mrf.mxu2 }
  0xc4   :  { %v4286_v60 = vmul.f32 -1.442695, %v735_v57  ;;  %v416_v2 = vadd.f32 %v415_v53, %v5696_v0 }
  0xc6   :  { %4715 = vpow2.f32 %v4286_v60  ;;  %v456_v11 = vpack.c.bf16 %v416_v2, %v416_v2 }
  0xc8   :  { %488 = vst [vmem:[#allocation2 + $0x8] sm:$0xf] %v456_v11 }
  0xc9   :  { %v704_v62 = vpop.f32.mrf.mxu3 }
  0xca   :  { %v736_v9 = vadd.f32 %v704_v62, %v562_v46  ;;  %v1327_v46 = vld [vmem:[%s7096_s19 + $0x38] sm:$0xff] }
  0xcb   :  { %v417_v1 = vpop.f32.mrf.mxu2  ;;  %vm1329_vm14 = vcmp.gt.f32.partialorder %v1327_v46, 0.0 }
  0xcc   :  { %v418_v4 = vadd.f32 %v417_v1, %v5696_v0  ;;  %v4287_v14 = vmul.f32 -1.442695, %v736_v9  ;;  %v4716_v15 = vpop.eup %4715  ;;  %v1331_v1 = vsel %vm1329_vm14, 1, %v7088_v34 }
  0xcd   :  { %v743_v17 = vadd.f32 1.0, %v4716_v15  ;;  %1336 = vperm.xlu1 %4708, %v1331_v1   ;;  %v5748_v15 = vld [vmem:[%s7073_s7] ss:$0 sm:$0xff] }
  0xce   :  { %v458_v12 = vpack.c.bf16 %v418_v4, %v418_v4  ;;  %4717 = vpow2.f32 %v4287_v14 }
  0xcf   :  { %4719 = vrcp.f32 %v743_v17  ;;  %vm750_vm15 = vweird.f32 %v743_v17  ;;  %v756_v4 = vand.u32 2147483648, %v743_v17 }
  0xd0   :  { %490 = vst [vmem:[#allocation2 + $0x14] sm:$0xf] %v458_v12  ;;  %v754_v12 = vand.u32 2147483647, %v743_v17 }
  0xd2   :  { %vm755_vm4 = vcmp.eq.f32.partialorder %v754_v12, 8.507059e+37 }
  0xd4   :  { %v4718_v23 = vpop.eup %4717 }
  0xd5   :  { %v5710_v27 = vadd.f32 1.0, %v4718_v23  ;;  %v4720_v37 = vpop.eup %4719 }
  0xd6   :  { %v746_v48 = vmul.f32 %v4720_v37, %v743_v17  ;;  %vm751_vm0 = vweird.f32 %v4720_v37 }
  0xd7   :  { %vm5741_vm2 = vmor %vm750_vm15, %vm751_vm0  ;;  %vm765_vm5 = vweird.f32 %v5710_v27 }
  0xd8   :  { %v747_v53 = vsub.f32 1.0, %v746_v48 }
  0xda   :  { %v748_v62 = vmul.f32 %v4720_v37, %v747_v53  ;;  %v769_v53 = vand.u32 2147483647, %v5710_v27 }
  0xdc   :  { %v749_v11 = vadd.f32 %v4720_v37, %v748_v62  ;;  %vm770_vm9 = vcmp.eq.f32.partialorder %v769_v53, 8.507059e+37 }
  0xde   :  { %v753_v23 = vsel %vm5741_vm2, %v4720_v37, %v749_v11  ;;  %v771_v37 = vand.u32 2147483648, %v5710_v27 }
  0xe0   :  { %v772_v1 = vor.u32 1.1754944e-38, %v771_v37 }
  0xe1   :  { %v716_v18 = vpop.f32.mrf.mxu3 }
  0xe2   :  { %v775_v21 = vadd.f32 %v716_v18, %v560_v16  ;;  %v1656_v16 = vld [vmem:[%s7096_s19 + $0x50] sm:$0xff]  ;;  %v757_v18 = vor.u32 1.1754944e-38, %v756_v4 }
  0xe3   :  { %vm1658_vm3 = vcmp.gt.f32.partialorder %v1656_v16, 0.0  ;;  %v2827_v16 = vld [vmem:[%s7069_s3] sm:$0xff] }
  0xe4   :  { %v4288_v24 = vmul.f32 -1.442695, %v775_v21  ;;  %v758_v48 = vsel %vm755_vm4, %v757_v18, %v753_v23  ;;  %vm2829_vm14 = vcmp.gt.f32.partialorder %v2827_v16, 0.0 }
  0xe6   :  { %4721 = vpow2.f32 %v4288_v24  ;;  %v1660_v24 = vsel %vm1658_vm3, 1, %v7088_v34 }
  0xe7   :  { %4723 = vrcp.f32 %v5710_v27  ;;  %1663 = vperm.xlu1 %4708, %v1660_v24  }
  0xe9   :  { %v718_v36 = vpop.f32.mrf.mxu3 }
  0xea   :  { %v776_v38 = vadd.f32 %v718_v36, %v563_v28  ;;  %v556_v28 = vld [vmem:[#allocation2 + $0x8] sm:$0xf] }
  0xeb   :  { %v1822_v36 = vld [vmem:[%s7096_s19 + $0x68] sm:$0xff] }
  0xec   :  { %v4722_v39 = vpop.eup %4721  ;;  %v4289_v40 = vmul.f32 -1.442695, %v776_v38  ;;  %vm1824_vm8 = vcmp.gt.f32.partialorder %v1822_v36, 0.0 }
  0xed   :  { %v5722_v45 = vadd.f32 1.0, %v4722_v39  ;;  %v5725_v51 = vpop.eup %4723  ;;  %v5768_v39 = vpop.f32.mrf.mxu0 }
  0xee   :  { %4725 = vpow2.f32 %v4289_v40  ;;  %v761_v57 = vmul.f32 %v5725_v51, %v5710_v27  ;;  %vm766_vm6 = vweird.f32 %v5725_v51  ;;  %v5770_v40 = vpop.f32.mrf.mxu1  ;;  %v1826_v27 = vsel %vm1824_vm8, 1, %v7088_v34 }
  0xef   :  { %4727 = vrcp.f32 %v5722_v45  ;;  %vm5774_vm7 = vmor %vm765_vm5, %vm766_vm6  ;;  %v796_v18 = vand.u32 2147483648, %v5722_v45  ;;  %1831 = vperm.xlu1 %4708, %v1826_v27   ;;  %vm790_vm11 = vweird.f32 %v5722_v45 }
  0xf0   :  { %v762_v9 = vsub.f32 1.0, %v761_v57 }
  0xf2   :  { %v763_v21 = vmul.f32 %v5725_v51, %v762_v9  ;;  %v558_v9 = vld [vmem:[#allocation2 + $0x14] sm:$0xf] }
  0xf4   :  { %v4726_v56 = vpop.eup %4725  ;;  %v764_v49 = vadd.f32 %v5725_v51, %v763_v21  ;;  %v564_v21 = vunpack.c.l.bf16 %v558_v9 }
  0xf5   :  { %v5733_v60 = vadd.f32 1.0, %v4726_v56  ;;  %v5736_v2 = vpop.eup %4727  ;;  %v561_v56 = vunpack.c.l.bf16 %v556_v28  ;;  %v5800_v36 = vpop.f32.mrf.mxu0 }
  0xf6   :  { %v786_v13 = vmul.f32 %v5736_v2, %v5722_v45  ;;  %v768_v11 = vsel %vm5774_vm7, %v5725_v51, %v764_v49  ;;  %vm791_vm10 = vweird.f32 %v5736_v2  ;;  %v794_v51 = vand.u32 2147483647, %v5722_v45 }
  0xf7   :  { %4729 = vrcp.f32 %v5733_v60  ;;  %v773_v23 = vsel %vm770_vm9, %v772_v1, %v768_v11  ;;  %vm5795_vm13 = vmor %vm790_vm11, %vm791_vm10  ;;  %v811_v28 = vand.u32 2147483648, %v5733_v60  ;;  %vm805_vm15 = vweird.f32 %v5733_v60 }
  0xf8   :  { %v787_v25 = vsub.f32 1.0, %v786_v13  ;;  %v809_v45 = vand.u32 2147483647, %v5733_v60  ;;  %vm795_vm2 = vcmp.eq.f32.partialorder %v794_v51, 8.507059e+37 }
  0xfa   :  { %v788_v62 = vmul.f32 %v5736_v2, %v787_v25  ;;  %vm810_vm3 = vcmp.eq.f32.partialorder %v809_v45, 8.507059e+37 }
  0xfc   :  { %v789_v13 = vadd.f32 %v5736_v2, %v788_v62 }
  0xfd   :  { %v5754_v17 = vpop.eup %4729 }
  0xfe   :  { %v801_v26 = vmul.f32 %v5754_v17, %v5733_v60  ;;  %vm806_vm12 = vweird.f32 %v5754_v17  ;;  %v793_v37 = vsel %vm5795_vm13, %v5736_v2, %v789_v13  ;;  %v3002_v60 = vld [vmem:[%s7069_s3 + $0x18] sm:$0xff] }
  0xff   :  { %vm807_vm0 = vmor %vm805_vm15, %vm806_vm12  ;;  %vm3004_vm4 = vcmp.gt.f32.partialorder %v3002_v60, 0.0 }
 0x100   :  { %v802_v41 = vsub.f32 1.0, %v801_v26  ;;  %v3349_v26 = vld [vmem:[%s7069_s3 + $0x30] sm:$0xff] }
 0x101   :  { %v730_v29 = vpop.f32.mrf.mxu3  ;;  %vm3351_vm8 = vcmp.gt.f32.partialorder %v3349_v26, 0.0 }
 0x102   :  { %v815_v38 = vadd.f32 %v5748_v15, %v730_v29  ;;  %v803_v4 = vmul.f32 %v5754_v17, %v802_v41  ;;  %v5809_v41 = vpop.permute.xlu0 %838 }
 0x103   :  { %vm843_vm5 = vcmp.eq.s32.totalorder %v5809_v41, 1 }
 0x104   :  { %v817_v57 = vmul.f32 %v815_v38, %v758_v48  ;;  %v804_v25 = vadd.f32 %v5754_v17, %v803_v4  ;;  %v5802_v38 = vpop.f32.mrf.mxu1  ;;  %v797_v48 = vor.u32 1.1754944e-38, %v796_v18 }
 0x106   :  { %v819_v12 = vadd.f32 %v817_v57, %v561_v56  ;;  %v808_v53 = vsel %vm807_vm0, %v5754_v17, %v804_v25  ;;  %v2831_v56 = vsel %vm2829_vm14, 1, %v7088_v34  ;;  %v812_v57 = vor.u32 1.1754944e-38, %v811_v28 }
 0x107   :  { %v798_v46 = vsel %vm795_vm2, %v797_v48, %v793_v37  ;;  %2834 = vperm.xlu1 %4708, %v2831_v56   ;;  %v3006_v17 = vsel %vm3004_vm4, 1, %v7088_v34  ;;  %v3524_v48 = vld [vmem:[%s7069_s3 + $0x48] sm:$0xff] }
 0x108   :  { %4731 = vtanh.f32 %v819_v12  ;;  %v813_v2 = vsel %vm810_vm3, %v812_v57, %v808_v53  ;;  %v823_v1 = vsub.f32 1.0, %v798_v46  ;;  %v827_v27 = vmul.f32 0.0, %v798_v46  ;;  %v327_v12 = vpop.f32.mrf.mxu0  ;;  %v3871_v53 = vld [vmem:[%s7069_s3 + $0x60] sm:$0xff] }
 0x109   :  { %v732_v14 = vpop.f32.mrf.mxu3  ;;  %v824_v9 = vsub.f32 1.0, %v813_v2  ;;  %v828_v16 = vmul.f32 0.0, %v813_v2  ;;  %v328_v18 = vadd.f32 %v327_v12, %v5682_v30  ;;  %vm3526_vm9 = vcmp.gt.f32.partialorder %v3524_v48, 0.0 }
 0x10a   :  { %v816_v24 = vadd.f32 %v5748_v15, %v732_v14  ;;  %vm3873_vm10 = vcmp.gt.f32.partialorder %v3871_v53, 0.0 }
 0x10b   :  { %v3875_v2 = vsel %vm3873_vm10, 1, %v7088_v34 }
 0x10c   :  { %v818_v29 = vmul.f32 %v816_v24, %v773_v23  ;;  %v376_v13 = vpop.f32.mrf.mxu1  ;;  %v5820_v23 = vpop.permute.xlu0 %841 }
 0x10d   :  { %vm844_vm6 = vcmp.eq.s32.totalorder %v5820_v23, 1 }
 0x10e   :  { %v820_v49 = vadd.f32 %v818_v29, %v564_v21  ;;  %v4732_v62 = vpop.eup %4731  ;;  %v377_v21 = vadd.f32 %v376_v13, %v5684_v33  ;;  %vm4290_vm7 = vmpackc.low %vm844_vm6, %vm843_vm5  ;;  %v3353_v29 = vsel %vm3351_vm8, 1, %v7088_v34 }
 0x10f   :  { %v825_v4 = vmul.f32 %v4732_v62, %v823_v1  ;;  %3011 = vperm.xlu1 %4708, %v3006_v17   ;;  %v4046_v1 = vld [vmem:[%s7069_s3 + $0x78] sm:$0xff] }
 0x110   :  { %4733 = vtanh.f32 %v820_v49  ;;  %v5827_v25 = vpack.c.bf16 %v377_v21, %v328_v18  ;;  %v5842_v45 = vpop.f32.mrf.mxu0  ;;  %v3528_v49 = vsel %vm3526_vm9, 1, %v7088_v34  ;;  %vm4048_vm11 = vcmp.gt.f32.partialorder %v4046_v1, 0.0 }
 0x111   :  { %v5823_v24 = vadd.f32 %v827_v27, %v825_v4  ;;  %v4050_v12 = vsel %vm4048_vm11, 1, %v7088_v34 }
 0x112   :  { %7104 = vst [vmem:[#allocation17_spill] sm:$0xff] %v5827_v25 }
 0x114   :  { %v5844_v37 = vpop.f32.mrf.mxu1 }
 0x116   :  { %v4734_v11 = vpop.eup %4733 }
 0x117   :  { %v826_v14 = vmul.f32 %v4734_v11, %v824_v9  ;;  %3356 = vperm.xlu1 %4708, %v3353_v29  }
 0x118   :  { %v332_v56 = vpop.f32.mrf.mxu0 }
 0x119   :  { %v5825_v51 = vadd.f32 %v828_v16, %v826_v14  ;;  %v333_v46 = vadd.f32 %v332_v56, %v5682_v30 }
 0x11b   :  { %v4291_v28 = vpack.c.bf16 %v5825_v51, %v5823_v24 }
 0x11c   :  { %v381_v57 = vpop.f32.mrf.mxu1 }
 0x11d   :  { %4292 = vmatmul.msk.bf16.vlgmr.msrb.gmra.mxu3 %vm4290_vm7, %v4291_v28  ;;  %4295 = vmatmul.msk.bf16.vlgmr.msrb.gmra.mxu0 %vm4290_vm7, %v4291_v28  ;;  %v382_v60 = vadd.f32 %v381_v57, %v5684_v33 }
 0x11e   :  { %4298 = vmatmul.msk.bf16.vlgmr.msrb.gmra.mxu1 %vm4290_vm7, %v4291_v28  ;;  %1216 = vmatpush.bf16.msrb.mxu3 %v5444_v7 }
 0x11f   :  { %1353 = vmatpush.bf16.msrb.mxu0 %v5323_v3  ;;  %1367 = vmatpush.bf16.msrb.mxu1 %v5382_v47  ;;  %v5864_v62 = vpack.c.bf16 %v382_v60, %v333_v46 }
 0x120   :  { %3533 = vperm.xlu1 %4708, %v3528_v49   ;;  %v334_v4 = vpop.f32.mrf.mxu0 }
 0x121   :  { %7105 = vst [vmem:[#allocation18_spill] sm:$0xff] %v5864_v62  ;;  %v335_v11 = vadd.f32 %v334_v4, %v5682_v30 }
 0x122   :  { %1217 = vmatpush.bf16.msrb.mxu3 %v5467_v19 }
 0x123   :  { %1354 = vmatpush.bf16.msrb.mxu0 %v5329_v8  ;;  %1368 = vmatpush.bf16.msrb.mxu1 %v5405_v54 }
 0x124   :  { %v383_v9 = vpop.f32.mrf.mxu1 }
 0x125   :  { %v384_v27 = vadd.f32 %v383_v9, %v5684_v33 }
 0x126   :  { %1218 = vmatpush.bf16.msrb.mxu3 %v5493_v32 }
 0x127   :  { %1355 = vmatpush.bf16.msrb.mxu0 %v5338_v22  ;;  %1369 = vmatpush.bf16.msrb.mxu1 %v5426_v61  ;;  %v469_v17 = vpack.c.bf16 %v384_v27, %v335_v11 }
 0x128   :  { %3878 = vperm.xlu1 %4708, %v3875_v2   ;;  %v337_v13 = vpop.f32.mrf.mxu0 }
 0x129   :  { %501 = vst [vmem:[#allocation2 + $0x54] sm:$0xff] %v469_v17  ;;  %v338_v16 = vadd.f32 %v337_v13, %v5682_v30 }
 0x12a   :  { %1219 = vmatpush.bf16.msrb.mxu3 %v5510_v42 }
 0x12b   :  { %1356 = vmatpush.bf16.msrb.mxu0 %v5347_v31  ;;  %1370 = vmatpush.bf16.msrb.mxu1 %v5449_v10 }
 0x12c   :  { %v386_v14 = vpop.f32.mrf.mxu1 }
 0x12d   :  { %v387_v18 = vadd.f32 %v386_v14, %v5684_v33 }
 0x12e   :  { %1220 = vmatpush.bf16.msrb.mxu3 %v5532_v52 }
 0x12f   :  { %1357 = vmatpush.bf16.msrb.mxu0 %v5374_v44  ;;  %1371 = vmatpush.bf16.msrb.mxu1 %v5470_v20  ;;  %v471_v21 = vpack.c.bf16 %v387_v18, %v338_v16 }
 0x130   :  { %4055 = vperm.xlu1 %4708, %v4050_v12   ;;  %v339_v26 = vpop.f32.mrf.mxu0 }
 0x131   :  { %503 = vst [vmem:[#allocation2 + $0x60] sm:$0xff] %v471_v21  ;;  %v340_v29 = vadd.f32 %v339_v26, %v5682_v30 }
 0x132   :  { %1221 = vmatpush.bf16.msrb.mxu3 %v5550_v59 }
 0x133   :  { %1358 = vmatpush.bf16.msrb.mxu0 %v5392_v50  ;;  %1372 = vmatpush.bf16.msrb.mxu1 %v5499_v35 }
 0x134   :  { %v388_v28 = vpop.f32.mrf.mxu1 }
 0x135   :  { %v389_v48 = vadd.f32 %v388_v28, %v5684_v33 }
 0x136   :  { %1222 = vmatpush.bf16.msrb.mxu3 %v5562_v63 }
 0x137   :  { %1359 = vmatpush.bf16.msrb.mxu0 %v5418_v58  ;;  %1373 = vmatpush.bf16.msrb.mxu1 %v5513_v43  ;;  %v473_v49 = vpack.c.bf16 %v389_v48, %v340_v29 }
 0x138   :  { %v342_v53 = vpop.f32.mrf.mxu0 }
 0x139   :  { %505 = vst [vmem:[#allocation2 + $0x6c] sm:$0xff] %v473_v49  ;;  %v343_v57 = vadd.f32 %v342_v53, %v5682_v30 }
 0x13a   :  { %1223 = vmatpush.bf16.msrb.mxu3 %v5578_v5 }
 0x13b   :  { %1360 = vmatpush.bf16.msrb.mxu0 %v5442_v6  ;;  %1374 = vmatpush.bf16.msrb.mxu1 %v5538_v55 }
 0x13c   :  { %v391_v56 = vpop.f32.mrf.mxu1 }
 0x13d   :  { %v392_v46 = vadd.f32 %v391_v56, %v5684_v33 }
 0x13f   :  { %v475_v60 = vpack.c.bf16 %v392_v46, %v343_v57 }
 0x140   :  { %v344_v2 = vpop.f32.mrf.mxu0 }
 0x141   :  { %507 = vst [vmem:[#allocation2 + $0x78] sm:$0xff] %v475_v60  ;;  %v345_v4 = vadd.f32 %v344_v2, %v5682_v30 }
 0x144   :  { %v393_v1 = vpop.f32.mrf.mxu1 }
 0x145   :  { %v394_v9 = vadd.f32 %v393_v1, %v5684_v33 }
 0x147   :  { %v477_v11 = vpack.c.bf16 %v394_v9, %v345_v4  ;;  %v420_v4 = vpop.f32.mrf.mxu2  ;;  %v323_v9 = vadd.f32 %v5768_v39, %v5682_v30 }
 0x148   :  { %v347_v27 = vpop.f32.mrf.mxu0 }
 0x149   :  { %509 = vst [vmem:[#allocation2 + $0x84] sm:$0xff] %v477_v11  ;;  %v348_v12 = vadd.f32 %v347_v27, %v5682_v30  ;;  %v372_v11 = vadd.f32 %v5770_v40, %v5684_v33 }
 0x14c   :  { %v396_v17 = vpop.f32.mrf.mxu1 }
 0x14d   :  { %v397_v13 = vadd.f32 %v396_v17, %v5684_v33  ;;  %v421_v17 = vadd.f32 %v420_v4, %v5696_v0 }
 0x14f   :  { %v479_v14 = vpack.c.bf16 %v397_v13, %v348_v12  ;;  %v422_v27 = vpop.f32.mrf.mxu2  ;;  %v459_v13 = vpack.c.bf16 %v372_v11, %v323_v9 }
 0x150   :  { %v349_v16 = vpop.f32.mrf.mxu0  ;;  %v423_v12 = vadd.f32 %v422_v27, %v5696_v0 }
 0x151   :  { %511 = vst [vmem:[#allocation2 + $0x90] sm:$0xff] %v479_v14  ;;  %v350_v21 = vadd.f32 %v349_v16, %v5682_v30  ;;  %v460_v14 = vpack.c.bf16 %v421_v17, %v421_v17 }
 0x152   :  { %v462_v16 = vpack.c.bf16 %v423_v12, %v423_v12 }
 0x153   :  { %492 = vst [vmem:[#allocation2 + $0x20] sm:$0xf] %v460_v14 }
 0x154   :  { %v398_v18 = vpop.f32.mrf.mxu1  ;;  %494 = vst [vmem:[#allocation2 + $0x2c] sm:$0xf] %v462_v16 }
 0x155   :  { %v399_v26 = vadd.f32 %v398_v18, %v5684_v33  ;;  %v325_v18 = vadd.f32 %v5800_v36, %v5682_v30 }
 0x157   :  { %v481_v28 = vpack.c.bf16 %v399_v26, %v350_v21  ;;  %v374_v21 = vadd.f32 %v5802_v38, %v5684_v33  ;;  %v852_v26 = vunpack.c.h.bf16 %v459_v13 }
 0x158   :  { %v352_v29 = vpop.f32.mrf.mxu0 }
 0x159   :  { %513 = vst [vmem:[#allocation2 + $0x9c] sm:$0xff] %v481_v28  ;;  %v353_v49 = vadd.f32 %v352_v29, %v5682_v30  ;;  %v461_v40 = vpack.c.bf16 %v374_v21, %v325_v18 }
 0x15c   :  { %v401_v48 = vpop.f32.mrf.mxu1 }
 0x15d   :  { %v402_v53 = vadd.f32 %v401_v48, %v5684_v33  ;;  %v851_v48 = vunpack.c.l.bf16 %v459_v13 }
 0x15f   :  { %v483_v56 = vpack.c.bf16 %v402_v53, %v353_v49 }
 0x160   :  { %v354_v57 = vpop.f32.mrf.mxu0 }
 0x161   :  { %515 = vst [vmem:[#allocation2 + $0xa8] sm:$0xff] %v483_v56  ;;  %v355_v60 = vadd.f32 %v354_v57, %v5682_v30  ;;  %v855_v56 = vunpack.c.h.bf16 %v461_v40 }
 0x164   :  { %v403_v46 = vpop.f32.mrf.mxu1 }
 0x165   :  { %v404_v2 = vadd.f32 %v403_v46, %v5684_v33 }
 0x167   :  { %v485_v1 = vpack.c.bf16 %v404_v2, %v355_v60 }
 0x169   :  { %517 = vst [vmem:[#allocation2 + $0xb4] sm:$0xff] %v485_v1  ;;  %v854_v1 = vunpack.c.l.bf16 %v461_v40 }
 0x19a   :  { %v881_v39 = vpop.f32.mrf.mxu0 }
 0x19b   :  { %v940_v28 = vadd.f32 %v881_v39, %v852_v26  ;;  %v895_v40 = vpop.f32.mrf.mxu1 }
 0x19d   :  { %v4301_v29 = vmul.f32 -1.442695, %v940_v28 }
 0x19f   :  { %4735 = vpow2.f32 %v4301_v29 }
 0x1a0   :  { %v867_v49 = vpop.f32.mrf.mxu3 }
 0x1a1   :  { %v900_v53 = vadd.f32 %v867_v49, %v851_v48 }
 0x1a2   :  { %v883_v57 = vpop.f32.mrf.mxu0 }
 0x1a3   :  { %v4299_v46 = vmul.f32 -1.442695, %v900_v53  ;;  %v941_v60 = vadd.f32 %v883_v57, %v855_v56  ;;  %v848_v56 = vld [vmem:[#allocation2 + $0x20] sm:$0xf]  ;;  %v897_v62 = vpop.f32.mrf.mxu1 }
 0x1a5   :  { %v4736_v2 = vpop.eup %4735  ;;  %4737 = vpow2.f32 %v4299_v46  ;;  %v4302_v36 = vmul.f32 -1.442695, %v941_v60  ;;  %v1161_v60 = vld [vmem:[%s7096_s19 + $0x20] sm:$0xff] }
 0x1a6   :  { %v5911_v38 = vadd.f32 1.0, %v4736_v2  ;;  %v425_v2 = vpop.f32.mrf.mxu2  ;;  %vm1163_vm14 = vcmp.gt.f32.partialorder %v1161_v60, 0.0 }
 0x1a7   :  { %4739 = vpow2.f32 %v4302_v36 }
 0x1a8   :  { %v869_v4 = vpop.f32.mrf.mxu3  ;;  %4741 = vrcp.f32 %v5911_v38  ;;  %vm955_vm8 = vweird.f32 %v5911_v38 }
 0x1a9   :  { %v901_v9 = vadd.f32 %v869_v4, %v854_v1  ;;  %v426_v1 = vadd.f32 %v425_v2, %v5696_v0 }
 0x1ab   :  { %v4738_v11 = vpop.eup %4737  ;;  %v4300_v27 = vmul.f32 -1.442695, %v901_v9  ;;  %v980_v9 = vadd.f32 %v5748_v15, %v895_v40 }
 0x1ac   :  { %v908_v17 = vadd.f32 1.0, %v4738_v11 }
 0x1ad   :  { %v4740_v12 = vpop.eup %4739  ;;  %4743 = vpow2.f32 %v4300_v27  ;;  %v853_v27 = vunpack.c.l.bf16 %v848_v56 }
 0x1ae   :  { %4745 = vrcp.f32 %v908_v17  ;;  %v5914_v13 = vadd.f32 1.0, %v4740_v12  ;;  %v5917_v14 = vpop.eup %4741  ;;  %v921_v48 = vand.u32 2147483648, %v908_v17  ;;  %v919_v53 = vand.u32 2147483647, %v908_v17 }
 0x1af   :  { %v951_v39 = vmul.f32 %v5917_v14, %v5911_v38  ;;  %vm915_vm13 = vweird.f32 %v908_v17  ;;  %v1165_v12 = vsel %vm1163_vm14, 1, %v7088_v34  ;;  %vm956_vm4 = vweird.f32 %v5917_v14 }
 0x1b0   :  { %4747 = vrcp.f32 %v5914_v13  ;;  %v922_v11 = vor.u32 1.1754944e-38, %v921_v48  ;;  %vm920_vm0 = vcmp.eq.f32.partialorder %v919_v53, 8.507059e+37  ;;  %1168 = vperm.xlu2 %4709, %v1165_v12   ;;  %v961_v12 = vand.u32 2147483648, %v5911_v38  ;;  %vm5956_vm11 = vmor %vm955_vm8, %vm956_vm4 }
 0x1b1   :  { %v952_v57 = vsub.f32 1.0, %v951_v39 }
 0x1b3   :  { %v4744_v16 = vpop.eup %4743 }
 0x1b4   :  { %v4746_v18 = vpop.eup %4745  ;;  %v5919_v21 = vadd.f32 1.0, %v4744_v16  ;;  %v1162_v16 = vld [vmem:[%s7096_s19 + $0x28] sm:$0xff] }
 0x1b5   :  { %v911_v26 = vmul.f32 %v4746_v18, %v908_v17  ;;  %vm916_vm12 = vweird.f32 %v4746_v18  ;;  %v850_v17 = vld [vmem:[#allocation2 + $0x2c] sm:$0xf]  ;;  %vm1164_vm2 = vcmp.gt.f32.partialorder %v1162_v16, 0.0 }
 0x1b6   :  { %4749 = vrcp.f32 %v5919_v21  ;;  %v5924_v28 = vpop.eup %4747  ;;  %vm917_vm15 = vmor %vm915_vm13, %vm916_vm12  ;;  %v936_v56 = vand.u32 2147483648, %v5919_v21  ;;  %v856_v34 = vunpack.c.l.bf16 %v850_v17  ;;  %vm930_vm7 = vweird.f32 %v5919_v21  ;;  %v1491_v17 = vld [vmem:[%s7096_s19 + $0x40] sm:$0xff] }
 0x1b7   :  { %v912_v29 = vsub.f32 1.0, %v911_v26  ;;  %v966_v46 = vmul.f32 %v5924_v28, %v5914_v13  ;;  %vm971_vm12 = vweird.f32 %v5924_v28  ;;  %vm1493_vm13 = vcmp.gt.f32.partialorder %v1491_v17, 0.0 }
 0x1b8   :  { %v846_v17 = vsel %vm844_vm6, %v5825_v51, 0.0 }
 0x1b9   :  { %v913_v49 = vmul.f32 %v4746_v18, %v912_v29  ;;  %v464_v29 = vpack.c.bf16 %v426_v1, %v426_v1  ;;  %v967_v40 = vsub.f32 1.0, %v966_v46  ;;  %v7106_v46 = vmov 0  }
 0x1ba   :  { %v1166_v1 = vsel %vm1164_vm2, 1, %v7106_v46 }
 0x1bb   :  { %v914_v36 = vadd.f32 %v4746_v18, %v913_v49  ;;  %v953_v49 = vmul.f32 %v5917_v14, %v952_v57  ;;  %496 = vst [vmem:[#allocation2 + $0x38] sm:$0xf] %v464_v29  ;;  %v968_v57 = vmul.f32 %v5924_v28, %v967_v40  ;;  %1171 = vperm.xlu2 %4709, %v1166_v1   ;;  %v976_v40 = vand.u32 2147483648, %v5914_v13 }
 0x1bc   :  { %v4750_v4 = vpop.eup %4749 }
 0x1bd   :  { %v918_v26 = vsel %vm917_vm15, %v4746_v18, %v914_v36  ;;  %v926_v39 = vmul.f32 %v4750_v4, %v5919_v21  ;;  %vm931_vm3 = vweird.f32 %v4750_v4  ;;  %v934_v18 = vand.u32 2147483647, %v5919_v21 }
 0x1be   :  { %v923_v60 = vsel %vm920_vm0, %v922_v11, %v918_v26  ;;  %v954_v36 = vadd.f32 %v5917_v14, %v953_v49  ;;  %vm932_vm9 = vmor %vm930_vm7, %vm931_vm3  ;;  %v937_v26 = vor.u32 1.1754944e-38, %v936_v56  ;;  %v969_v49 = vadd.f32 %v5924_v28, %v968_v57 }
 0x1bf   :  { %v982_v2 = vmul.f32 %v980_v9, %v923_v60  ;;  %v927_v48 = vsub.f32 1.0, %v926_v39  ;;  %v427_v9 = vpop.f32.mrf.mxu2  ;;  %v959_v39 = vand.u32 2147483647, %v5911_v38  ;;  %vm935_vm10 = vcmp.eq.f32.partialorder %v934_v18, 8.507059e+37  ;;  %v1004_v18 = vpop.permute.xlu1 %1003 }
 0x1c0   :  { %v428_v16 = vadd.f32 %v427_v9, %v5696_v0  ;;  %v958_v38 = vsel %vm5956_vm11, %v5917_v14, %v954_v36  ;;  %v962_v60 = vor.u32 1.1754944e-38, %v961_v12  ;;  %vm970_vm15 = vweird.f32 %v5914_v13 }
 0x1c1   :  { %v928_v25 = vmul.f32 %v4750_v4, %v927_v48  ;;  %v984_v53 = vadd.f32 %v982_v2, %v853_v27  ;;  %v981_v27 = vadd.f32 %v5748_v15, %v897_v62  ;;  %vm960_vm14 = vcmp.eq.f32.partialorder %v959_v39, 8.507059e+37  ;;  %vm972_vm0 = vmor %vm970_vm15, %vm971_vm12 }
 0x1c2   :  { %v466_v21 = vpack.c.bf16 %v428_v16, %v428_v16  ;;  %v974_v2 = vand.u32 2147483647, %v5914_v13  ;;  %v963_v48 = vsel %vm960_vm14, %v962_v60, %v958_v38  ;;  %v973_v14 = vsel %vm972_vm0, %v5924_v28, %v969_v49  ;;  %v1657_v13 = vld [vmem:[%s7096_s19 + $0x58] sm:$0xff] }
 0x1c3   :  { %v929_v11 = vadd.f32 %v4750_v4, %v928_v25  ;;  %4751 = vtanh.f32 %v984_v53  ;;  %v1495_v53 = vsel %vm1493_vm13, 1, %v7106_v46  ;;  %v977_v1 = vor.u32 1.1754944e-38, %v976_v40 }
 0x1c4   :  { %498 = vst [vmem:[#allocation2 + $0x44] sm:$0xf] %v466_v21  ;;  %vm975_vm2 = vcmp.eq.f32.partialorder %v974_v2, 8.507059e+37  ;;  %1498 = vperm.xlu2 %4709, %v1495_v53   ;;  %v845_v28 = vsel %vm843_vm5, %v5823_v24, 0.0  ;;  %vm1659_vm3 = vcmp.gt.f32.partialorder %v1657_v13, 0.0  ;;  %vm1008_vm4 = vcmp.eq.s32.totalorder %v1004_v18, 1 }
 0x1c5   :  { %v933_v29 = vsel %vm932_vm9, %v4750_v4, %v929_v11  ;;  %v988_v11 = vsub.f32 1.0, %v963_v48  ;;  %v978_v12 = vsel %vm975_vm2, %v977_v1, %v973_v14  ;;  %v2828_v18 = vld [vmem:[%s7069_s3 + $0x8] sm:$0xff]  ;;  %v3175_v1 = vld [vmem:[%s7069_s3 + $0x20] sm:$0xff] }
 0x1c6   :  { %v938_v62 = vsel %vm935_vm10, %v937_v26, %v933_v29  ;;  %v992_v26 = vmul.f32 %v963_v48, %v845_v28  ;;  %v993_v25 = vmul.f32 %v978_v12, %v846_v17  ;;  %vm2830_vm7 = vcmp.gt.f32.partialorder %v2828_v18, 0.0 }
 0x1c7   :  { %v983_v4 = vmul.f32 %v981_v27, %v938_v62  ;;  %v430_v36 = vpop.f32.mrf.mxu2  ;;  %v989_v27 = vsub.f32 1.0, %v978_v12  ;;  %v1661_v62 = vsel %vm1659_vm3, 1, %v7106_v46  ;;  %v1007_v41 = vpop.permute.xlu1 %1006  ;;  %v2832_v53 = vsel %vm2830_vm7, 1, %v7106_v46 }
 0x1c8   :  { %v431_v9 = vadd.f32 %v430_v36, %v5696_v0  ;;  %vm1009_vm5 = vcmp.eq.s32.totalorder %v1007_v41, 1  ;;  %vm3177_vm8 = vcmp.gt.f32.partialorder %v3175_v1, 0.0 }
 0x1c9   :  { %v985_v56 = vadd.f32 %v983_v4, %v856_v34  ;;  %v4752_v57 = vpop.eup %4751  ;;  %v1986_v4 = vld [vmem:[%s7096_s19 + $0x70] sm:$0xff]  ;;  %s5203_s19 = smov 4  }
 0x1ca   :  { %v468_v34 = vpack.c.bf16 %v431_v9, %v431_v9  ;;  %v990_v16 = vmul.f32 %v4752_v57, %v988_v11  ;;  %vm1988_vm6 = vcmp.gt.f32.partialorder %v1986_v4, 0.0  ;;  %v3179_v11 = vsel %vm3177_vm8, 1, %v7106_v46 }
 0x1cb   :  { %4753 = vtanh.f32 %v985_v56  ;;  %v1990_v2 = vsel %vm1988_vm6, 1, %v7106_v46 }
 0x1cc   :  { %500 = vst [vmem:[#allocation2 + $0x50] sm:$0xf] %v468_v34  ;;  %v994_v21 = vadd.f32 %v992_v26, %v990_v16  ;;  %1666 = vperm.xlu2 %4709, %v1661_v62   ;;  %v3350_v34 = vld [vmem:[%s7069_s3 + $0x38] sm:$0xff]  ;;  %v3872_v62 = vld [vmem:[%s7069_s3 + $0x68] sm:$0xff] }
 0x1cd   :  { %vm3352_vm9 = vcmp.gt.f32.partialorder %v3350_v34, 0.0  ;;  %vm3874_vm11 = vcmp.gt.f32.partialorder %v3872_v62, 0.0 }
 0x1ce   :  { %v5985_v23 = vsel %vm1008_vm4, %v994_v21, %v845_v28  ;;  %v3354_v28 = vsel %vm3352_vm9, 1, %v7106_v46 }
 0x1cf   :  { %v432_v38 = vpop.f32.mrf.mxu2 }
 0x1d0   :  { %v433_v49 = vadd.f32 %v432_v38, %v5696_v0 }
 0x1d1   :  { %v4754_v39 = vpop.eup %4753 }
 0x1d2   :  { %v991_v29 = vmul.f32 %v4754_v39, %v989_v27  ;;  %v470_v60 = vpack.c.bf16 %v433_v49, %v433_v49  ;;  %v3697_v39 = vld [vmem:[%s7069_s3 + $0x50] sm:$0xff]  ;;  %v3876_v49 = vsel %vm3874_vm11, 1, %v7106_v46 }
 0x1d3   :  { %vm3699_vm10 = vcmp.gt.f32.partialorder %v3697_v39, 0.0 }
 0x1d4   :  { %v995_v24 = vadd.f32 %v993_v25, %v991_v29  ;;  %502 = vst [vmem:[#allocation2 + $0x5c] sm:$0xf] %v470_v60  ;;  %1993 = vperm.xlu2 %4709, %v1990_v2   ;;  %v3701_v29 = vsel %vm3699_vm10, 1, %v7106_v46  ;;  %v379_v46 = vadd.f32 %v5844_v37, %v5684_v33 }
 0x1d6   :  { %v5987_v51 = vsel %vm1009_vm5, %v995_v24, %v846_v17 }
 0x1d7   :  { %v1022_v40 = vpack.c.bf16 %v5987_v51, %v5985_v23  ;;  %v435_v48 = vpop.f32.mrf.mxu2 }
 0x1d8   :  { %v436_v56 = vadd.f32 %v435_v48, %v5696_v0 }
 0x1d9   :  { %1031 = vmatmul.bf16.vlgmr.msrb.gmra.mxu2 %v1022_v40  ;;  %1045 = vmatmul.bf16.vlgmr.msra.gmra.mxu3 %v1022_v40 }
 0x1da   :  { %1059 = vmatmul.bf16.vlgmr.msra.gmra.mxu0 %v1022_v40  ;;  %1381 = vmatpush.bf16.msrb.mxu2 %v5444_v7  ;;  %v472_v14 = vpack.c.bf16 %v436_v56, %v436_v56 }
 0x1db   :  { %1518 = vmatpush.bf16.msra.mxu3 %v5323_v3  ;;  %1532 = vmatpush.bf16.msra.mxu0 %v5382_v47 }
 0x1dc   :  { %504 = vst [vmem:[#allocation2 + $0x68] sm:$0xf] %v472_v14  ;;  %2837 = vperm.xlu2 %4709, %v2832_v53   ;;  %v330_v14 = vadd.f32 %v5842_v45, %v5682_v30  ;;  %v7109_v53 = vld [vmem:[#allocation17_spill] sm:$0xff] }
 0x1de   :  { %1382 = vmatpush.bf16.msrb.mxu2 %v5467_v19 }
 0x1df   :  { %1519 = vmatpush.bf16.msra.mxu3 %v5329_v8  ;;  %1533 = vmatpush.bf16.msra.mxu0 %v5405_v54  ;;  %v437_v36 = vpop.f32.mrf.mxu2 }
 0x1e0   :  { %v438_v57 = vadd.f32 %v437_v36, %v5696_v0  ;;  %v1016_v36 = vunpack.c.l.bf16 %v7109_v53 }
 0x1e2   :  { %1383 = vmatpush.bf16.msrb.mxu2 %v5493_v32  ;;  %v474_v9 = vpack.c.bf16 %v438_v57, %v438_v57  ;;  %v1017_v57 = vunpack.c.h.bf16 %v7109_v53 }
 0x1e3   :  { %1520 = vmatpush.bf16.msra.mxu3 %v5338_v22  ;;  %1534 = vmatpush.bf16.msra.mxu0 %v5426_v61 }
 0x1e4   :  { %506 = vst [vmem:[#allocation2 + $0x74] sm:$0xf] %v474_v9  ;;  %3182 = vperm.xlu2 %4709, %v3179_v11  }
 0x1e6   :  { %1384 = vmatpush.bf16.msrb.mxu2 %v5510_v42 }
 0x1e7   :  { %1521 = vmatpush.bf16.msra.mxu3 %v5347_v31  ;;  %1535 = vmatpush.bf16.msra.mxu0 %v5449_v10  ;;  %v440_v13 = vpop.f32.mrf.mxu2 }
 0x1e8   :  { %v441_v12 = vadd.f32 %v440_v13, %v5696_v0 }
 0x1ea   :  { %1385 = vmatpush.bf16.msrb.mxu2 %v5532_v52  ;;  %v476_v16 = vpack.c.bf16 %v441_v12, %v441_v12  ;;  %v465_v12 = vpack.c.bf16 %v379_v46, %v330_v14 }
 0x1eb   :  { %1522 = vmatpush.bf16.msra.mxu3 %v5374_v44  ;;  %1536 = vmatpush.bf16.msra.mxu0 %v5470_v20 }
 0x1ec   :  { %508 = vst [vmem:[#allocation2 + $0x80] sm:$0xf] %v476_v16  ;;  %3359 = vperm.xlu2 %4709, %v3354_v28   ;;  %v1020_v28 = vunpack.c.h.bf16 %v465_v12 }
 0x1ee   :  { %1386 = vmatpush.bf16.msrb.mxu2 %v5550_v59 }
 0x1ef   :  { %1523 = vmatpush.bf16.msra.mxu3 %v5392_v50  ;;  %1537 = vmatpush.bf16.msra.mxu0 %v5499_v35  ;;  %v442_v27 = vpop.f32.mrf.mxu2 }
 0x1f0   :  { %v443_v26 = vadd.f32 %v442_v27, %v5696_v0 }
 0x1f2   :  { %1387 = vmatpush.bf16.msrb.mxu2 %v5562_v63  ;;  %v478_v17 = vpack.c.bf16 %v443_v26, %v443_v26 }
 0x1f3   :  { %1524 = vmatpush.bf16.msra.mxu3 %v5418_v58  ;;  %1538 = vmatpush.bf16.msra.mxu0 %v5513_v43 }
 0x1f4   :  { %510 = vst [vmem:[#allocation2 + $0x8c] sm:$0xf] %v478_v17  ;;  %3704 = vperm.xlu2 %4709, %v3701_v29  }
 0x1f6   :  { %1388 = vmatpush.bf16.msrb.mxu2 %v5578_v5 }
 0x1f7   :  { %1525 = vmatpush.bf16.msra.mxu3 %v5442_v6  ;;  %1539 = vmatpush.bf16.msra.mxu0 %v5538_v55  ;;  %v445_v25 = vpop.f32.mrf.mxu2 }
 0x1f8   :  { %v446_v21 = vadd.f32 %v445_v25, %v5696_v0 }
 0x1fa   :  { %v480_v38 = vpack.c.bf16 %v446_v21, %v446_v21 }
 0x1fc   :  { %512 = vst [vmem:[#allocation2 + $0x98] sm:$0xf] %v480_v38  ;;  %3881 = vperm.xlu2 %4709, %v3876_v49  }
 0x1ff   :  { %v447_v41 = vpop.f32.mrf.mxu2 }
 0x200   :  { %v448_v24 = vadd.f32 %v447_v41, %v5696_v0 }
 0x202   :  { %v482_v4 = vpack.c.bf16 %v448_v24, %v448_v24 }
 0x204   :  { %514 = vst [vmem:[#allocation2 + $0xa4] sm:$0xf] %v482_v4 }
 0x207   :  { %v450_v60 = vpop.f32.mrf.mxu2 }
 0x208   :  { %v451_v40 = vadd.f32 %v450_v60, %v5696_v0 }
 0x20a   :  { %v484_v2 = vpack.c.bf16 %v451_v40, %v451_v40 }
 0x20c   :  { %516 = vst [vmem:[#allocation2 + $0xb0] sm:$0xf] %v484_v2 }
 0x20f   :  { %v452_v48 = vpop.f32.mrf.mxu2 }
 0x210   :  { %v453_v56 = vadd.f32 %v452_v48, %v5696_v0  ;;  %v1019_v0 = vunpack.c.l.bf16 %v465_v12 }
 0x212   :  { %v486_v18 = vpack.c.bf16 %v453_v56, %v453_v56 }
 0x214   :  { %518 = vst [vmem:[#allocation2 + $0xbc] sm:$0xf] %v486_v18 }
 0x257   :  { %v1060_v2 = vpop.f32.mrf.mxu0 }
 0x25c   :  { %v1032_v1 = vpop.f32.mrf.mxu2  ;;  %v1046_v9 = vpop.f32.mrf.mxu3 }
 0x25d   :  { %v1065_v11 = vadd.f32 %v1032_v1, %v1016_v36  ;;  %v1105_v13 = vadd.f32 %v1046_v9, %v1017_v57  ;;  %v1013_v36 = vld [vmem:[#allocation2 + $0x38] sm:$0xf]  ;;  %v1145_v1 = vadd.f32 %v5748_v15, %v1060_v2 }
 0x25f   :  { %v4303_v34 = vmul.f32 -1.442695, %v1065_v11  ;;  %v4305_v16 = vmul.f32 -1.442695, %v1105_v13  ;;  %v1062_v15 = vpop.f32.mrf.mxu0 }
 0x261   :  { %4755 = vpow2.f32 %v4303_v34 }
 0x262   :  { %4757 = vpow2.f32 %v4305_v16  ;;  %v1018_v16 = vunpack.c.l.bf16 %v1013_v36 }
 0x264   :  { %v1034_v27 = vpop.f32.mrf.mxu2  ;;  %v1048_v30 = vpop.f32.mrf.mxu3 }
 0x265   :  { %v1066_v45 = vadd.f32 %v1034_v27, %v1019_v0  ;;  %v1106_v26 = vadd.f32 %v1048_v30, %v1020_v28 }
 0x267   :  { %v4756_v33 = vpop.eup %4755  ;;  %v4304_v37 = vmul.f32 -1.442695, %v1066_v45  ;;  %v4306_v29 = vmul.f32 -1.442695, %v1106_v26 }
 0x268   :  { %v4758_v39 = vpop.eup %4757  ;;  %v1073_v17 = vadd.f32 1.0, %v4756_v33 }
 0x269   :  { %v6050_v25 = vadd.f32 1.0, %v4758_v39  ;;  %4759 = vpow2.f32 %v4304_v37 }
 0x26a   :  { %4761 = vrcp.f32 %v1073_v17  ;;  %v1086_v48 = vand.u32 2147483648, %v1073_v17  ;;  %v1084_v18 = vand.u32 2147483647, %v1073_v17  ;;  %vm1080_vm13 = vweird.f32 %v1073_v17 }
 0x26b   :  { %4763 = vrcp.f32 %v6050_v25  ;;  %vm1120_vm4 = vweird.f32 %v6050_v25 }
 0x26c   :  { %4765 = vpow2.f32 %v4306_v29  ;;  %v1087_v57 = vor.u32 1.1754944e-38, %v1086_v48  ;;  %vm1085_vm15 = vcmp.eq.f32.partialorder %v1084_v18, 8.507059e+37 }
 0x26f   :  { %v4760_v21 = vpop.eup %4759 }
 0x270   :  { %v4762_v62 = vpop.eup %4761  ;;  %v1074_v38 = vadd.f32 1.0, %v4760_v21  ;;  %v1124_v21 = vand.u32 2147483647, %v6050_v25 }
 0x271   :  { %v6053_v49 = vpop.eup %4763  ;;  %v1076_v41 = vmul.f32 %v4762_v62, %v1073_v17  ;;  %vm1081_vm12 = vweird.f32 %v4762_v62  ;;  %v1126_v17 = vand.u32 2147483648, %v6050_v25 }
 0x272   :  { %v4766_v24 = vpop.eup %4765  ;;  %v1116_v4 = vmul.f32 %v6053_v49, %v6050_v25  ;;  %4767 = vrcp.f32 %v1074_v38  ;;  %vm1082_vm14 = vmor %vm1080_vm13, %vm1081_vm12  ;;  %v1101_v27 = vand.u32 2147483648, %v1074_v38  ;;  %v1099_v33 = vand.u32 2147483647, %v1074_v38 }
 0x273   :  { %v1077_v60 = vsub.f32 1.0, %v1076_v41  ;;  %v6057_v40 = vadd.f32 1.0, %v4766_v24  ;;  %vm1121_vm2 = vweird.f32 %v6053_v49  ;;  %vm1095_vm3 = vweird.f32 %v1074_v38 }
 0x274   :  { %v1117_v14 = vsub.f32 1.0, %v1116_v4  ;;  %v1102_v41 = vor.u32 1.1754944e-38, %v1101_v27  ;;  %vm6068_vm6 = vmor %vm1120_vm4, %vm1121_vm2  ;;  %vm1100_vm7 = vcmp.eq.f32.partialorder %v1099_v33, 8.507059e+37  ;;  %v1127_v18 = vor.u32 1.1754944e-38, %v1126_v17 }
 0x275   :  { %v1078_v56 = vmul.f32 %v4762_v62, %v1077_v60  ;;  %4769 = vrcp.f32 %v6057_v40  ;;  %v6075_v60 = vld [vmem:[%s7073_s7] ss:$0 sm:$0xff]  ;;  %v1141_v36 = vand.u32 2147483648, %v6057_v40  ;;  %vm1125_vm9 = vcmp.eq.f32.partialorder %v1124_v21, 8.507059e+37 }
 0x276   :  { %v1118_v12 = vmul.f32 %v6053_v49, %v1117_v14  ;;  %vm1135_vm10 = vweird.f32 %v6057_v40 }
 0x277   :  { %v1079_v46 = vadd.f32 %v4762_v62, %v1078_v56 }
 0x278   :  { %v4768_v53 = vpop.eup %4767  ;;  %v1119_v37 = vadd.f32 %v6053_v49, %v1118_v12 }
 0x279   :  { %v1083_v9 = vsel %vm1082_vm14, %v4762_v62, %v1079_v46  ;;  %v1091_v11 = vmul.f32 %v4768_v53, %v1074_v38  ;;  %vm1096_vm0 = vweird.f32 %v4768_v53  ;;  %v1015_v62 = vld [vmem:[#allocation2 + $0x44] sm:$0xf]  ;;  %v1146_v38 = vadd.f32 %v6075_v60, %v1062_v15 }
 0x27a   :  { %v1088_v13 = vsel %vm1085_vm15, %v1087_v57, %v1083_v9  ;;  %vm1097_vm5 = vmor %vm1095_vm3, %vm1096_vm0  ;;  %v1123_v25 = vsel %vm6068_vm6, %v6053_v49, %v1119_v37  ;;  %v1021_v14 = vunpack.c.l.bf16 %v1015_v62  ;;  %v1139_v57 = vand.u32 2147483647, %v6057_v40  ;;  %v1169_v9 = vpop.permute.xlu2 %1168  ;;  %v1179_v62 = vld [vmem:[#allocation2 + $0x54] sm:$0xff] }
 0x27b   :  { %v4770_v34 = vpop.eup %4769  ;;  %v1147_v0 = vmul.f32 %v1145_v1, %v1088_v13  ;;  %v1092_v28 = vsub.f32 1.0, %v1091_v11  ;;  %v1142_v49 = vor.u32 1.1754944e-38, %v1141_v36  ;;  %vm1173_vm13 = vcmp.eq.s32.totalorder %v1169_v9, 1 }
 0x27c   :  { %v1131_v30 = vmul.f32 %v4770_v34, %v6057_v40  ;;  %vm1136_vm8 = vweird.f32 %v4770_v34  ;;  %vm1140_vm12 = vcmp.eq.f32.partialorder %v1139_v57, 8.507059e+37 }
 0x27d   :  { %v1149_v45 = vadd.f32 %v1147_v0, %v1018_v16  ;;  %v1093_v26 = vmul.f32 %v4768_v53, %v1092_v28  ;;  %vm1137_vm11 = vmor %vm1135_vm10, %vm1136_vm8 }
 0x27e   :  { %v1132_v39 = vsub.f32 1.0, %v1131_v30 }
 0x27f   :  { %v1094_v29 = vadd.f32 %v4768_v53, %v1093_v26  ;;  %4771 = vtanh.f32 %v1149_v45 }
 0x280   :  { %v1133_v24 = vmul.f32 %v4770_v34, %v1132_v39 }
 0x281   :  { %v1098_v2 = vsel %vm1097_vm5, %v4768_v53, %v1094_v29  ;;  %v1128_v53 = vsel %vm1125_vm9, %v1127_v18, %v1123_v25 }
 0x282   :  { %v1103_v48 = vsel %vm1100_vm7, %v1102_v41, %v1098_v2  ;;  %v1134_v56 = vadd.f32 %v4770_v34, %v1133_v24  ;;  %v1153_v12 = vsub.f32 1.0, %v1128_v53  ;;  %v1157_v27 = vmul.f32 %v1128_v53, %v5985_v23  ;;  %v1172_v33 = vpop.permute.xlu2 %1171 }
 0x283   :  { %v1148_v46 = vmul.f32 %v1146_v38, %v1103_v48  ;;  %vm1174_vm14 = vcmp.eq.s32.totalorder %v1172_v33, 1  ;;  %v1184_v38 = vunpack.c.l.bf16 %v1179_v62 }
 0x284   :  { %v1138_v11 = vsel %vm1137_vm11, %v4770_v34, %v1134_v56 }
 0x285   :  { %v1150_v1 = vadd.f32 %v1148_v46, %v1021_v14  ;;  %v4772_v13 = vpop.eup %4771  ;;  %v1143_v16 = vsel %vm1140_vm12, %v1142_v49, %v1138_v11  ;;  %v1185_v46 = vunpack.c.h.bf16 %v1179_v62 }
 0x286   :  { %v1155_v0 = vmul.f32 %v4772_v13, %v1153_v12  ;;  %v1154_v28 = vsub.f32 1.0, %v1143_v16  ;;  %v1158_v26 = vmul.f32 %v1143_v16, %v5987_v51 }
 0x287   :  { %4773 = vtanh.f32 %v1150_v1 }
 0x288   :  { %v1159_v40 = vadd.f32 %v1157_v27, %v1155_v0 }
 0x28a   :  { %v6087_v34 = vsel %vm1173_vm13, %v1159_v40, %v5985_v23  ;;  %v7112_v23 = vld [vmem:[#allocation18_spill] sm:$0xff] }
 0x28b   :  { %v1182_v41 = vunpack.c.h.bf16 %v7112_v23 }
 0x28d   :  { %v4774_v30 = vpop.eup %4773 }
 0x28e   :  { %v1156_v45 = vmul.f32 %v4774_v30, %v1154_v28 }
 0x290   :  { %v1160_v37 = vadd.f32 %v1158_v26, %v1156_v45 }
 0x292   :  { %v6090_v15 = vsel %vm1174_vm14, %v1160_v37, %v5987_v51  ;;  %v1181_v51 = vunpack.c.l.bf16 %v7112_v23 }
 0x293   :  { %v1187_v39 = vpack.c.bf16 %v6090_v15, %v6087_v34 }
 0x295   :  { %1196 = vmatmul.bf16.vlgmr.msra.gmra.mxu1 %v1187_v39  ;;  %1210 = vmatmul.bf16.vlgmr.msra.gmra.mxu2 %v1187_v39 }
 0x296   :  { %1224 = vmatmul.bf16.vlgmr.msrb.gmra.mxu3 %v1187_v39  ;;  %1546 = vmatpush.bf16.msra.mxu1 %v5444_v7 }
 0x297   :  { %1683 = vmatpush.bf16.msra.mxu2 %v5323_v3  ;;  %1697 = vmatpush.bf16.msrb.mxu3 %v5382_v47 }
 0x29a   :  { %1547 = vmatpush.bf16.msra.mxu1 %v5467_v19 }
 0x29b   :  { %1684 = vmatpush.bf16.msra.mxu2 %v5329_v8  ;;  %1698 = vmatpush.bf16.msrb.mxu3 %v5405_v54 }
 0x29e   :  { %1548 = vmatpush.bf16.msra.mxu1 %v5493_v32 }
 0x29f   :  { %1685 = vmatpush.bf16.msra.mxu2 %v5338_v22  ;;  %1699 = vmatpush.bf16.msrb.mxu3 %v5426_v61 }
 0x2a2   :  { %1549 = vmatpush.bf16.msra.mxu1 %v5510_v42 }
 0x2a3   :  { %1686 = vmatpush.bf16.msra.mxu2 %v5347_v31  ;;  %1700 = vmatpush.bf16.msrb.mxu3 %v5449_v10 }
 0x2a6   :  { %1550 = vmatpush.bf16.msra.mxu1 %v5532_v52 }
 0x2a7   :  { %1687 = vmatpush.bf16.msra.mxu2 %v5374_v44  ;;  %1701 = vmatpush.bf16.msrb.mxu3 %v5470_v20 }
 0x2aa   :  { %1551 = vmatpush.bf16.msra.mxu1 %v5550_v59 }
 0x2ab   :  { %1688 = vmatpush.bf16.msra.mxu2 %v5392_v50  ;;  %1702 = vmatpush.bf16.msrb.mxu3 %v5499_v35 }
 0x2ae   :  { %1552 = vmatpush.bf16.msra.mxu1 %v5562_v63 }
 0x2af   :  { %1689 = vmatpush.bf16.msra.mxu2 %v5418_v58  ;;  %1703 = vmatpush.bf16.msrb.mxu3 %v5513_v43 }
 0x2b2   :  { %1553 = vmatpush.bf16.msra.mxu1 %v5578_v5 }
 0x2b3   :  { %1690 = vmatpush.bf16.msra.mxu2 %v5442_v6  ;;  %1704 = vmatpush.bf16.msrb.mxu3 %v5538_v55 }
 0x312   :  { %v1197_v17 = vpop.f32.mrf.mxu1 }
 0x313   :  { %v1230_v29 = vadd.f32 %v1197_v17, %v1181_v51  ;;  %v1178_v17 = vld [vmem:[#allocation2 + $0x50] sm:$0xf] }
 0x315   :  { %v4307_v21 = vmul.f32 -1.442695, %v1230_v29 }
 0x317   :  { %4775 = vpow2.f32 %v4307_v21 }
 0x318   :  { %v1211_v24 = vpop.f32.mrf.mxu2 }
 0x319   :  { %v1270_v4 = vadd.f32 %v1211_v24, %v1182_v41  ;;  %v1225_v27 = vpop.f32.mrf.mxu3 }
 0x31a   :  { %v1199_v2 = vpop.f32.mrf.mxu1  ;;  %v1310_v21 = vadd.f32 %v6075_v60, %v1225_v27 }
 0x31b   :  { %v4309_v25 = vmul.f32 -1.442695, %v1270_v4  ;;  %v1231_v48 = vadd.f32 %v1199_v2, %v1184_v38  ;;  %v1183_v38 = vunpack.c.l.bf16 %v1178_v17 }
 0x31d   :  { %v4776_v56 = vpop.eup %4775  ;;  %4777 = vpow2.f32 %v4309_v25  ;;  %v4308_v18 = vmul.f32 -1.442695, %v1231_v48 }
 0x31e   :  { %v1238_v14 = vadd.f32 1.0, %v4776_v56 }
 0x31f   :  { %4779 = vpow2.f32 %v4308_v18 }
 0x320   :  { %4781 = vrcp.f32 %v1238_v14  ;;  %v1213_v36 = vpop.f32.mrf.mxu2  ;;  %v1251_v0 = vand.u32 2147483648, %v1238_v14  ;;  %v1249_v45 = vand.u32 2147483647, %v1238_v14  ;;  %vm1245_vm0 = vweird.f32 %v1238_v14 }
 0x321   :  { %v1271_v57 = vadd.f32 %v1213_v36, %v1185_v46 }
 0x322   :  { %v1252_v39 = vor.u32 1.1754944e-38, %v1251_v0  ;;  %vm1250_vm3 = vcmp.eq.f32.partialorder %v1249_v45, 8.507059e+37 }
 0x323   :  { %v4778_v1 = vpop.eup %4777  ;;  %v4310_v53 = vmul.f32 -1.442695, %v1271_v57  ;;  %v1227_v57 = vpop.f32.mrf.mxu3 }
 0x324   :  { %v6120_v9 = vadd.f32 1.0, %v4778_v1  ;;  %v1311_v27 = vadd.f32 %v6075_v60, %v1227_v57 }
 0x325   :  { %v4780_v11 = vpop.eup %4779  ;;  %4783 = vpow2.f32 %v4310_v53 }
 0x326   :  { %v4782_v13 = vpop.eup %4781  ;;  %4785 = vrcp.f32 %v6120_v9  ;;  %v1239_v12 = vadd.f32 1.0, %v4780_v11  ;;  %v1291_v1 = vand.u32 2147483648, %v6120_v9  ;;  %vm1285_vm7 = vweird.f32 %v6120_v9 }
 0x327   :  { %v1241_v49 = vmul.f32 %v4782_v13, %v1238_v14  ;;  %vm1246_vm15 = vweird.f32 %v4782_v13  ;;  %v1289_v11 = vand.u32 2147483647, %v6120_v9 }
 0x328   :  { %4787 = vrcp.f32 %v1239_v12  ;;  %vm1247_vm2 = vmor %vm1245_vm0, %vm1246_vm15  ;;  %v1266_v25 = vand.u32 2147483648, %v1239_v12  ;;  %v1264_v14 = vand.u32 2147483647, %v1239_v12  ;;  %vm1260_vm6 = vweird.f32 %v1239_v12 }
 0x329   :  { %v1242_v16 = vsub.f32 1.0, %v1241_v49  ;;  %v1180_v49 = vld [vmem:[#allocation2 + $0x5c] sm:$0xf]  ;;  %vm1290_vm12 = vcmp.eq.f32.partialorder %v1289_v11, 8.507059e+37 }
 0x32a   :  { %vm1265_vm10 = vcmp.eq.f32.partialorder %v1264_v14, 8.507059e+37 }
 0x32b   :  { %v4784_v28 = vpop.eup %4783  ;;  %v1243_v30 = vmul.f32 %v4782_v13, %v1242_v16  ;;  %v1267_v16 = vor.u32 1.1754944e-38, %v1266_v25 }
 0x32c   :  { %v4786_v26 = vpop.eup %4785  ;;  %v6123_v40 = vadd.f32 1.0, %v4784_v28 }
 0x32d   :  { %v1281_v33 = vmul.f32 %v4786_v26, %v6120_v9  ;;  %v1244_v37 = vadd.f32 %v4782_v13, %v1243_v30  ;;  %vm1286_vm5 = vweird.f32 %v4786_v26  ;;  %v1292_v9 = vor.u32 1.1754944e-38, %v1291_v1 }
 0x32e   :  { %4789 = vrcp.f32 %v6123_v40  ;;  %v4788_v23 = vpop.eup %4787  ;;  %vm6132_vm9 = vmor %vm1285_vm7, %vm1286_vm5  ;;  %vm1300_vm13 = vweird.f32 %v6123_v40 }
 0x32f   :  { %v1282_v51 = vsub.f32 1.0, %v1281_v33  ;;  %v1248_v29 = vsel %vm1247_vm2, %v4782_v13, %v1244_v37  ;;  %v1256_v41 = vmul.f32 %v4788_v23, %v1239_v12  ;;  %vm1261_vm4 = vweird.f32 %v4788_v23 }
 0x330   :  { %v1253_v62 = vsel %vm1250_vm3, %v1252_v39, %v1248_v29  ;;  %vm1262_vm8 = vmor %vm1260_vm6, %vm1261_vm4  ;;  %v1306_v33 = vand.u32 2147483648, %v6123_v40  ;;  %v1186_v37 = vunpack.c.l.bf16 %v1180_v49 }
 0x331   :  { %v1283_v24 = vmul.f32 %v4786_v26, %v1282_v51  ;;  %v1312_v4 = vmul.f32 %v1310_v21, %v1253_v62  ;;  %v1257_v2 = vsub.f32 1.0, %v1256_v41 }
 0x333   :  { %v1314_v56 = vadd.f32 %v1312_v4, %v1183_v38  ;;  %v1258_v18 = vmul.f32 %v4788_v23, %v1257_v2  ;;  %v1284_v46 = vadd.f32 %v4786_v26, %v1283_v24 }
 0x334   :  { %v4790_v48 = vpop.eup %4789 }
 0x335   :  { %v1296_v36 = vmul.f32 %v4790_v48, %v6123_v40  ;;  %v1259_v53 = vadd.f32 %v4788_v23, %v1258_v18  ;;  %4791 = vtanh.f32 %v1314_v56  ;;  %v1288_v12 = vsel %vm6132_vm9, %v4786_v26, %v1284_v46  ;;  %v1337_v46 = vpop.permute.xlu1 %1336 }
 0x336   :  { %vm1301_vm11 = vweird.f32 %v4790_v48  ;;  %v1293_v17 = vsel %vm1290_vm12, %v1292_v9, %v1288_v12  ;;  %v1307_v26 = vor.u32 1.1754944e-38, %v1306_v33  ;;  %vm1339_vm2 = vcmp.eq.s32.totalorder %v1337_v46, 1 }
 0x337   :  { %v1297_v13 = vsub.f32 1.0, %v1296_v36  ;;  %v1263_v28 = vsel %vm1262_vm8, %v4788_v23, %v1259_v53  ;;  %v1304_v23 = vand.u32 2147483647, %v6123_v40  ;;  %vm1302_vm14 = vmor %vm1300_vm13, %vm1301_vm11  ;;  %v1318_v41 = vsub.f32 1.0, %v1293_v17  ;;  %v1334_v40 = vpop.permute.xlu0 %1333 }
 0x338   :  { %v1268_v45 = vsel %vm1265_vm10, %v1267_v16, %v1263_v28  ;;  %v1322_v38 = vmul.f32 %v1293_v17, %v6087_v34  ;;  %vm1338_vm0 = vcmp.eq.s32.totalorder %v1334_v40, 1 }
 0x339   :  { %v1298_v30 = vmul.f32 %v4790_v48, %v1297_v13  ;;  %v1313_v39 = vmul.f32 %v1311_v27, %v1268_v45  ;;  %vm1305_vm15 = vcmp.eq.f32.partialorder %v1304_v23, 8.507059e+37 }
 0x33b   :  { %v1299_v51 = vadd.f32 %v4790_v48, %v1298_v30  ;;  %v1315_v29 = vadd.f32 %v1313_v39, %v1186_v37  ;;  %v4792_v62 = vpop.eup %4791 }
 0x33c   :  { %v1320_v4 = vmul.f32 %v4792_v62, %v1318_v41  ;;  %v1343_v62 = vld [vmem:[#allocation2 + $0x68] sm:$0xf] }
 0x33d   :  { %v1303_v21 = vsel %vm1302_vm14, %v4790_v48, %v1299_v51  ;;  %4793 = vtanh.f32 %v1315_v29 }
 0x33e   :  { %v1308_v24 = vsel %vm1305_vm15, %v1307_v26, %v1303_v21  ;;  %v1324_v56 = vadd.f32 %v1322_v38, %v1320_v4 }
 0x33f   :  { %v1319_v2 = vsub.f32 1.0, %v1308_v24  ;;  %v1323_v14 = vmul.f32 %v1308_v24, %v6090_v15 }
 0x340   :  { %v6145_v48 = vsel %vm1338_vm0, %v1324_v56, %v6087_v34  ;;  %v1348_v56 = vunpack.c.l.bf16 %v1343_v62 }
 0x343   :  { %v4794_v25 = vpop.eup %4793 }
 0x344   :  { %v1321_v18 = vmul.f32 %v4794_v25, %v1319_v2 }
 0x346   :  { %v1325_v36 = vadd.f32 %v1323_v14, %v1321_v18 }
 0x348   :  { %v6148_v57 = vsel %vm1339_vm2, %v1325_v36, %v6090_v15 }
 0x349   :  { %v1352_v1 = vpack.c.bf16 %v6148_v57, %v6145_v48 }
 0x34b   :  { %1361 = vmatmul.bf16.vlgmr.msrb.gmra.mxu0 %v1352_v1  ;;  %1375 = vmatmul.bf16.vlgmr.msrb.gmra.mxu1 %v1352_v1 }
 0x34c   :  { %1389 = vmatmul.bf16.vlgmr.msrb.gmra.mxu2 %v1352_v1  ;;  %1711 = vmatpush.bf16.msrb.mxu0 %v5444_v7 }
 0x34d   :  { %1848 = vmatpush.bf16.msrb.mxu1 %v5323_v3  ;;  %1862 = vmatpush.bf16.msrb.mxu2 %v5382_v47  ;;  %v1342_v3 = vld [vmem:[#allocation2 + $0x60] sm:$0xff] }
 0x350   :  { %1712 = vmatpush.bf16.msrb.mxu0 %v5467_v19 }
 0x351   :  { %1849 = vmatpush.bf16.msrb.mxu1 %v5329_v8  ;;  %1863 = vmatpush.bf16.msrb.mxu2 %v5405_v54  ;;  %v1346_v8 = vunpack.c.l.bf16 %v1342_v3 }
 0x354   :  { %1713 = vmatpush.bf16.msrb.mxu0 %v5493_v32 }
 0x355   :  { %1850 = vmatpush.bf16.msrb.mxu1 %v5338_v22  ;;  %1864 = vmatpush.bf16.msrb.mxu2 %v5426_v61  ;;  %v1347_v22 = vunpack.c.h.bf16 %v1342_v3 }
 0x358   :  { %1714 = vmatpush.bf16.msrb.mxu0 %v5510_v42 }
 0x359   :  { %1851 = vmatpush.bf16.msrb.mxu1 %v5347_v31  ;;  %1865 = vmatpush.bf16.msrb.mxu2 %v5449_v10  ;;  %v1344_v10 = vld [vmem:[#allocation2 + $0x6c] sm:$0xff] }
 0x35c   :  { %1715 = vmatpush.bf16.msrb.mxu0 %v5532_v52 }
 0x35d   :  { %1852 = vmatpush.bf16.msrb.mxu1 %v5374_v44  ;;  %1866 = vmatpush.bf16.msrb.mxu2 %v5470_v20  ;;  %v1350_v20 = vunpack.c.h.bf16 %v1344_v10 }
 0x360   :  { %1716 = vmatpush.bf16.msrb.mxu0 %v5550_v59 }
 0x361   :  { %1853 = vmatpush.bf16.msrb.mxu1 %v5392_v50  ;;  %1867 = vmatpush.bf16.msrb.mxu2 %v5499_v35 }
 0x364   :  { %1717 = vmatpush.bf16.msrb.mxu0 %v5562_v63 }
 0x365   :  { %1854 = vmatpush.bf16.msrb.mxu1 %v5418_v58  ;;  %1868 = vmatpush.bf16.msrb.mxu2 %v5513_v43  ;;  %v1349_v58 = vunpack.c.l.bf16 %v1344_v10 }
 0x368   :  { %1718 = vmatpush.bf16.msrb.mxu0 %v5578_v5 }
 0x369   :  { %1855 = vmatpush.bf16.msrb.mxu1 %v5442_v6  ;;  %1869 = vmatpush.bf16.msrb.mxu2 %v5538_v55 }
 0x3c8   :  { %v1362_v31 = vpop.f32.mrf.mxu0  ;;  %v1376_v44 = vpop.f32.mrf.mxu1 }
 0x3c9   :  { %v1395_v47 = vadd.f32 %v1362_v31, %v1346_v8  ;;  %v1435_v50 = vadd.f32 %v1376_v44, %v1347_v22 }
 0x3cb   :  { %v4311_v54 = vmul.f32 -1.442695, %v1395_v47  ;;  %v4313_v61 = vmul.f32 -1.442695, %v1435_v50 }
 0x3cd   :  { %4795 = vpow2.f32 %v4311_v54 }
 0x3ce   :  { %4797 = vpow2.f32 %v4313_v61  ;;  %v1345_v61 = vld [vmem:[#allocation2 + $0x74] sm:$0xf] }
 0x3cf   :  { %v1390_v37 = vpop.f32.mrf.mxu2 }
 0x3d0   :  { %v1364_v35 = vpop.f32.mrf.mxu0  ;;  %v1378_v43 = vpop.f32.mrf.mxu1  ;;  %v1475_v24 = vadd.f32 %v6075_v60, %v1390_v37 }
 0x3d1   :  { %v1396_v34 = vadd.f32 %v1364_v35, %v1349_v58  ;;  %v1436_v6 = vadd.f32 %v1378_v43, %v1350_v20 }
 0x3d3   :  { %v4796_v15 = vpop.eup %4795  ;;  %v4312_v55 = vmul.f32 -1.442695, %v1396_v34  ;;  %v4314_v13 = vmul.f32 -1.442695, %v1436_v6 }
 0x3d4   :  { %v4798_v53 = vpop.eup %4797  ;;  %v1403_v11 = vadd.f32 1.0, %v4796_v15 }
 0x3d5   :  { %v6176_v49 = vadd.f32 1.0, %v4798_v53  ;;  %4799 = vpow2.f32 %v4312_v55  ;;  %v1351_v53 = vunpack.c.l.bf16 %v1345_v61 }
 0x3d6   :  { %4801 = vrcp.f32 %v1403_v11  ;;  %v1416_v39 = vand.u32 2147483648, %v1403_v11  ;;  %v1414_v23 = vand.u32 2147483647, %v1403_v11  ;;  %vm1410_vm4 = vweird.f32 %v1403_v11 }
 0x3d7   :  { %4803 = vrcp.f32 %v6176_v49  ;;  %v1392_v31 = vpop.f32.mrf.mxu2  ;;  %v1456_v44 = vand.u32 2147483648, %v6176_v49  ;;  %vm1450_vm10 = vweird.f32 %v6176_v49  ;;  %v1454_v50 = vand.u32 2147483647, %v6176_v49 }
 0x3d8   :  { %4805 = vpow2.f32 %v4314_v13  ;;  %v1417_v26 = vor.u32 1.1754944e-38, %v1416_v39  ;;  %vm1415_vm6 = vcmp.eq.f32.partialorder %v1414_v23, 8.507059e+37  ;;  %v1476_v35 = vadd.f32 %v6075_v60, %v1392_v31 }
 0x3d9   :  { %v1457_v15 = vor.u32 1.1754944e-38, %v1456_v44  ;;  %vm1455_vm15 = vcmp.eq.f32.partialorder %v1454_v50, 8.507059e+37 }
 0x3db   :  { %v4800_v16 = vpop.eup %4799 }
 0x3dc   :  { %v4802_v0 = vpop.eup %4801  ;;  %v1404_v28 = vadd.f32 1.0, %v4800_v16 }
 0x3dd   :  { %v6179_v27 = vpop.eup %4803  ;;  %v1406_v12 = vmul.f32 %v4802_v0, %v1403_v11  ;;  %vm1411_vm3 = vweird.f32 %v4802_v0 }
 0x3de   :  { %v4806_v30 = vpop.eup %4805  ;;  %v1446_v45 = vmul.f32 %v6179_v27, %v6176_v49  ;;  %4807 = vrcp.f32 %v1404_v28  ;;  %vm1412_vm5 = vmor %vm1410_vm4, %vm1411_vm3  ;;  %v1431_v46 = vand.u32 2147483648, %v1404_v28  ;;  %v1429_v3 = vand.u32 2147483647, %v1404_v28 }
 0x3df   :  { %v1407_v9 = vsub.f32 1.0, %v1406_v12  ;;  %v6183_v33 = vadd.f32 1.0, %v4806_v30  ;;  %vm1451_vm8 = vweird.f32 %v6179_v27  ;;  %vm1425_vm9 = vweird.f32 %v1404_v28 }
 0x3e0   :  { %v1447_v17 = vsub.f32 1.0, %v1446_v45  ;;  %v1432_v10 = vor.u32 1.1754944e-38, %v1431_v46  ;;  %vm6194_vm12 = vmor %vm1450_vm10, %vm1451_vm8  ;;  %vm1430_vm13 = vcmp.eq.f32.partialorder %v1429_v3, 8.507059e+37 }
 0x3e1   :  { %v1408_v51 = vmul.f32 %v4802_v0, %v1407_v9  ;;  %4809 = vrcp.f32 %v6183_v33  ;;  %v1471_v55 = vand.u32 2147483648, %v6183_v33  ;;  %vm1465_vm0 = vweird.f32 %v6183_v33 }
 0x3e2   :  { %v1448_v38 = vmul.f32 %v6179_v27, %v1447_v17  ;;  %v1469_v13 = vand.u32 2147483647, %v6183_v33 }
 0x3e3   :  { %v1409_v29 = vadd.f32 %v4802_v0, %v1408_v51  ;;  %v1472_v12 = vor.u32 1.1754944e-38, %v1471_v55 }
 0x3e4   :  { %v4808_v21 = vpop.eup %4807  ;;  %v1449_v8 = vadd.f32 %v6179_v27, %v1448_v38  ;;  %vm1470_vm3 = vcmp.eq.f32.partialorder %v1469_v13, 8.507059e+37 }
 0x3e5   :  { %v1413_v41 = vsel %vm1412_vm5, %v4802_v0, %v1409_v29  ;;  %v1421_v4 = vmul.f32 %v4808_v21, %v1404_v28  ;;  %vm1426_vm7 = vweird.f32 %v4808_v21  ;;  %v1499_v29 = vpop.permute.xlu2 %1498 }
 0x3e6   :  { %v1418_v2 = vsel %vm1415_vm6, %v1417_v26, %v1413_v41  ;;  %vm1427_vm11 = vmor %vm1425_vm9, %vm1426_vm7  ;;  %v1453_v43 = vsel %vm6194_vm12, %v6179_v27, %v1449_v8  ;;  %vm1503_vm5 = vcmp.eq.s32.totalorder %v1499_v29, 1 }
 0x3e7   :  { %v4810_v25 = vpop.eup %4809  ;;  %v1477_v18 = vmul.f32 %v1475_v24, %v1418_v2  ;;  %v1422_v14 = vsub.f32 1.0, %v1421_v4  ;;  %v1458_v49 = vsel %vm1455_vm15, %v1457_v15, %v1453_v43 }
 0x3e8   :  { %v1461_v40 = vmul.f32 %v4810_v25, %v6183_v33  ;;  %vm1466_vm14 = vweird.f32 %v4810_v25  ;;  %v1483_v27 = vsub.f32 1.0, %v1458_v49  ;;  %v1487_v9 = vmul.f32 %v1458_v49, %v6145_v48  ;;  %v1502_v33 = vpop.permute.xlu0 %1501 }
 0x3e9   :  { %v1479_v36 = vadd.f32 %v1477_v18, %v1348_v56  ;;  %v1423_v1 = vmul.f32 %v4808_v21, %v1422_v14  ;;  %vm1467_vm2 = vmor %vm1465_vm0, %vm1466_vm14  ;;  %vm1504_vm4 = vcmp.eq.s32.totalorder %v1502_v33, 1 }
 0x3ea   :  { %v1462_v22 = vsub.f32 1.0, %v1461_v40 }
 0x3eb   :  { %v1424_v47 = vadd.f32 %v4808_v21, %v1423_v1  ;;  %4811 = vtanh.f32 %v1479_v36 }
 0x3ec   :  { %v1463_v54 = vmul.f32 %v4810_v25, %v1462_v22 }
 0x3ed   :  { %v1428_v20 = vsel %vm1427_vm11, %v4808_v21, %v1424_v47 }
 0x3ee   :  { %v1464_v34 = vadd.f32 %v4810_v25, %v1463_v54  ;;  %v1433_v6 = vsel %vm1430_vm13, %v1432_v10, %v1428_v20 }
 0x3ef   :  { %v1478_v11 = vmul.f32 %v1476_v35, %v1433_v6 }
 0x3f0   :  { %v1468_v0 = vsel %vm1467_vm2, %v4810_v25, %v1464_v34 }
 0x3f1   :  { %v1480_v16 = vadd.f32 %v1478_v11, %v1351_v53  ;;  %v4812_v28 = vpop.eup %4811  ;;  %v1473_v30 = vsel %vm1470_vm3, %v1472_v12, %v1468_v0  ;;  %v1508_v53 = vld [vmem:[#allocation2 + $0x80] sm:$0xf] }
 0x3f2   :  { %v1485_v45 = vmul.f32 %v4812_v28, %v1483_v27  ;;  %v1484_v37 = vsub.f32 1.0, %v1473_v30  ;;  %v1488_v17 = vmul.f32 %v1473_v30, %v6148_v57  ;;  %v1513_v27 = vunpack.c.l.bf16 %v1508_v53 }
 0x3f3   :  { %4813 = vtanh.f32 %v1480_v16 }
 0x3f4   :  { %v1489_v51 = vadd.f32 %v1487_v9, %v1485_v45 }
 0x3f6   :  { %v6208_v62 = vsel %vm1503_vm5, %v1489_v51, %v6145_v48  ;;  %v1507_v48 = vld [vmem:[#allocation2 + $0x78] sm:$0xff] }
 0x3f9   :  { %v4814_v39 = vpop.eup %4813 }
 0x3fa   :  { %v1486_v23 = vmul.f32 %v4814_v39, %v1484_v37 }
 0x3fc   :  { %v1490_v21 = vadd.f32 %v1488_v17, %v1486_v23 }
 0x3fe   :  { %v6211_v26 = vsel %vm1504_vm4, %v1490_v21, %v6148_v57  ;;  %v1512_v57 = vunpack.c.h.bf16 %v1507_v48 }
 0x3ff   :  { %v1517_v41 = vpack.c.bf16 %v6211_v26, %v6208_v62 }
 0x401   :  { %1526 = vmatmul.bf16.vlgmr.msra.gmra.mxu3 %v1517_v41  ;;  %1540 = vmatmul.bf16.vlgmr.msra.gmra.mxu0 %v1517_v41 }
 0x402   :  { %1554 = vmatmul.bf16.vlgmr.msra.gmra.mxu1 %v1517_v41  ;;  %1876 = vmatpush.bf16.msra.mxu3 %v5444_v7  ;;  %v1509_v7 = vld [vmem:[#allocation2 + $0x84] sm:$0xff] }
 0x403   :  { %v1515_v25 = vunpack.c.h.bf16 %v1509_v7 }
 0x406   :  { %1877 = vmatpush.bf16.msra.mxu3 %v5467_v19  ;;  %v1511_v19 = vunpack.c.l.bf16 %v1507_v48  ;;  %v1510_v48 = vld [vmem:[#allocation2 + $0x8c] sm:$0xf] }
 0x40a   :  { %1878 = vmatpush.bf16.msra.mxu3 %v5493_v32 }
 0x40e   :  { %1879 = vmatpush.bf16.msra.mxu3 %v5510_v42 }
 0x412   :  { %1880 = vmatpush.bf16.msra.mxu3 %v5532_v52 }
 0x416   :  { %1881 = vmatpush.bf16.msra.mxu3 %v5550_v59 }
 0x41a   :  { %1882 = vmatpush.bf16.msra.mxu3 %v5562_v63  ;;  %v1514_v63 = vunpack.c.l.bf16 %v1509_v7 }
 0x41e   :  { %1883 = vmatpush.bf16.msra.mxu3 %v5578_v5 }
 0x47e   :  { %v1541_v24 = vpop.f32.mrf.mxu0 }
 0x47f   :  { %v1600_v4 = vadd.f32 %v1541_v24, %v1512_v57  ;;  %v1555_v58 = vpop.f32.mrf.mxu1 }
 0x480   :  { %v1640_v13 = vadd.f32 %v6075_v60, %v1555_v58  ;;  %v1672_v58 = vld [vmem:[#allocation2 + $0x90] sm:$0xff] }
 0x481   :  { %v4317_v38 = vmul.f32 -1.442695, %v1600_v4 }
 0x483   :  { %4815 = vpow2.f32 %v4317_v38 }
 0x484   :  { %v1527_v2 = vpop.f32.mrf.mxu3 }
 0x485   :  { %v1560_v32 = vadd.f32 %v1527_v2, %v1511_v19 }
 0x486   :  { %v1543_v42 = vpop.f32.mrf.mxu0 }
 0x487   :  { %v4315_v56 = vmul.f32 -1.442695, %v1560_v32  ;;  %v1601_v52 = vadd.f32 %v1543_v42, %v1515_v25  ;;  %v1557_v33 = vpop.f32.mrf.mxu1  ;;  %v1516_v42 = vunpack.c.l.bf16 %v1510_v48 }
 0x488   :  { %v1641_v4 = vadd.f32 %v6075_v60, %v1557_v33 }
 0x489   :  { %v4816_v18 = vpop.eup %4815  ;;  %4817 = vpow2.f32 %v4315_v56  ;;  %v4318_v59 = vmul.f32 -1.442695, %v1601_v52 }
 0x48a   :  { %v6223_v5 = vadd.f32 1.0, %v4816_v18 }
 0x48b   :  { %4819 = vpow2.f32 %v4318_v59 }
 0x48c   :  { %v1529_v14 = vpop.f32.mrf.mxu3  ;;  %4821 = vrcp.f32 %v6223_v5  ;;  %v1621_v29 = vand.u32 2147483648, %v6223_v5  ;;  %vm1615_vm13 = vweird.f32 %v6223_v5  ;;  %v1619_v41 = vand.u32 2147483647, %v6223_v5 }
 0x48d   :  { %v1561_v40 = vadd.f32 %v1529_v14, %v1514_v63 }
 0x48e   :  { %v1622_v32 = vor.u32 1.1754944e-38, %v1621_v29  ;;  %vm1620_vm3 = vcmp.eq.f32.partialorder %v1619_v41, 8.507059e+37 }
 0x48f   :  { %v4818_v46 = vpop.eup %4817  ;;  %v4316_v36 = vmul.f32 -1.442695, %v1561_v40 }
 0x490   :  { %v1568_v1 = vadd.f32 1.0, %v4818_v46 }
 0x491   :  { %v4820_v3 = vpop.eup %4819  ;;  %4823 = vpow2.f32 %v4316_v36 }
 0x492   :  { %4825 = vrcp.f32 %v1568_v1  ;;  %v6226_v8 = vadd.f32 1.0, %v4820_v3  ;;  %v6229_v22 = vpop.eup %4821  ;;  %v1581_v20 = vand.u32 2147483648, %v1568_v1  ;;  %v1579_v43 = vand.u32 2147483647, %v1568_v1 }
 0x493   :  { %v1611_v54 = vmul.f32 %v6229_v22, %v6223_v5  ;;  %vm1575_vm7 = vweird.f32 %v1568_v1  ;;  %vm1616_vm11 = vweird.f32 %v6229_v22 }
 0x494   :  { %4827 = vrcp.f32 %v6226_v8  ;;  %v1582_v11 = vor.u32 1.1754944e-38, %v1581_v20  ;;  %vm1580_vm9 = vcmp.eq.f32.partialorder %v1579_v43, 8.507059e+37  ;;  %vm6245_vm15 = vmor %vm1615_vm13, %vm1616_vm11  ;;  %v1636_v25 = vand.u32 2147483648, %v6226_v8 }
 0x495   :  { %v1612_v34 = vsub.f32 1.0, %v1611_v54  ;;  %vm1630_vm4 = vweird.f32 %v6226_v8  ;;  %v1634_v60 = vand.u32 2147483647, %v6226_v8  ;;  %v1676_v20 = vunpack.c.l.bf16 %v1672_v58 }
 0x496   :  { %v1637_v5 = vor.u32 1.1754944e-38, %v1636_v25  ;;  %v6282_v25 = vld [vmem:[%s7073_s7] ss:$0 sm:$0xff] }
 0x497   :  { %v4824_v31 = vpop.eup %4823  ;;  %v1613_v0 = vmul.f32 %v6229_v22, %v1612_v34 }
 0x498   :  { %v4826_v44 = vpop.eup %4825  ;;  %v1569_v47 = vadd.f32 1.0, %v4824_v31 }
 0x499   :  { %v1571_v50 = vmul.f32 %v4826_v44, %v1568_v1  ;;  %vm1576_vm6 = vweird.f32 %v4826_v44  ;;  %v1614_v23 = vadd.f32 %v6229_v22, %v1613_v0 }
 0x49a   :  { %4829 = vrcp.f32 %v1569_v47  ;;  %v6233_v61 = vpop.eup %4827  ;;  %vm1577_vm8 = vmor %vm1575_vm7, %vm1576_vm6  ;;  %v1596_v9 = vand.u32 2147483648, %v1569_v47  ;;  %v1594_v51 = vand.u32 2147483647, %v1569_v47  ;;  %vm1590_vm12 = vweird.f32 %v1569_v47 }
 0x49b   :  { %v1572_v10 = vsub.f32 1.0, %v1571_v50  ;;  %v1626_v6 = vmul.f32 %v6233_v61, %v6226_v8  ;;  %v1618_v7 = vsel %vm6245_vm15, %v6229_v22, %v1614_v23  ;;  %vm1631_vm2 = vweird.f32 %v6233_v61 }
 0x49c   :  { %v1597_v57 = vor.u32 1.1754944e-38, %v1596_v9  ;;  %vm1595_vm0 = vcmp.eq.f32.partialorder %v1594_v51, 8.507059e+37  ;;  %vm1632_vm5 = vmor %vm1630_vm4, %vm1631_vm2  ;;  %v1623_v18 = vsel %vm1620_vm3, %v1622_v32, %v1618_v7  ;;  %vm1635_vm6 = vcmp.eq.f32.partialorder %v1634_v60, 8.507059e+37 }
 0x49d   :  { %v1573_v35 = vmul.f32 %v4826_v44, %v1572_v10  ;;  %v1627_v12 = vsub.f32 1.0, %v1626_v6  ;;  %v1648_v14 = vsub.f32 1.0, %v1623_v18  ;;  %v1652_v1 = vmul.f32 %v1623_v18, %v6208_v62 }
 0x49f   :  { %v1574_v15 = vadd.f32 %v4826_v44, %v1573_v35  ;;  %v1628_v17 = vmul.f32 %v6233_v61, %v1627_v12  ;;  %v1677_v35 = vunpack.c.h.bf16 %v1672_v58 }
 0x4a0   :  { %v4830_v55 = vpop.eup %4829 }
 0x4a1   :  { %v1578_v49 = vsel %vm1577_vm8, %v4826_v44, %v1574_v15  ;;  %v1586_v16 = vmul.f32 %v4830_v55, %v1569_v47  ;;  %vm1591_vm10 = vweird.f32 %v4830_v55  ;;  %v1629_v19 = vadd.f32 %v6233_v61, %v1628_v17  ;;  %v1664_v44 = vpop.permute.xlu1 %1663  ;;  %v1667_v47 = vpop.permute.xlu2 %1666 }
 0x4a2   :  { %v1583_v28 = vsel %vm1580_vm9, %v1582_v11, %v1578_v49  ;;  %vm1592_vm14 = vmor %vm1590_vm12, %vm1591_vm10  ;;  %vm1668_vm7 = vcmp.eq.s32.totalorder %v1664_v44, 1  ;;  %vm1669_vm8 = vcmp.eq.s32.totalorder %v1667_v47, 1 }
 0x4a3   :  { %v1642_v30 = vmul.f32 %v1640_v13, %v1583_v28  ;;  %v1587_v45 = vsub.f32 1.0, %v1586_v16  ;;  %v1633_v59 = vsel %vm1632_vm5, %v6233_v61, %v1629_v19 }
 0x4a4   :  { %v1638_v40 = vsel %vm1635_vm6, %v1637_v5, %v1633_v59 }
 0x4a5   :  { %v1644_v37 = vadd.f32 %v1642_v30, %v1513_v27  ;;  %v1588_v39 = vmul.f32 %v4830_v55, %v1587_v45  ;;  %v1649_v36 = vsub.f32 1.0, %v1638_v40  ;;  %v1653_v31 = vmul.f32 %v1638_v40, %v6211_v26 }
 0x4a7   :  { %v1589_v21 = vadd.f32 %v4830_v55, %v1588_v39  ;;  %4831 = vtanh.f32 %v1644_v37 }
 0x4a9   :  { %v1593_v38 = vsel %vm1592_vm14, %v4830_v55, %v1589_v21 }
 0x4aa   :  { %v1598_v2 = vsel %vm1595_vm0, %v1597_v57, %v1593_v38 }
 0x4ab   :  { %v1643_v56 = vmul.f32 %v1641_v4, %v1598_v2  ;;  %v1673_v2 = vld [vmem:[#allocation2 + $0x98] sm:$0xf] }
 0x4ad   :  { %v1645_v52 = vadd.f32 %v1643_v56, %v1516_v42  ;;  %v4832_v63 = vpop.eup %4831 }
 0x4ae   :  { %v1650_v46 = vmul.f32 %v4832_v63, %v1648_v14  ;;  %v1678_v63 = vunpack.c.l.bf16 %v1673_v2 }
 0x4af   :  { %4833 = vtanh.f32 %v1645_v52 }
 0x4b0   :  { %v1654_v8 = vadd.f32 %v1652_v1, %v1650_v46 }
 0x4b2   :  { %v6262_v54 = vsel %vm1668_vm7, %v1654_v8, %v6208_v62  ;;  %v1674_v62 = vld [vmem:[#allocation2 + $0x9c] sm:$0xff] }
 0x4b3   :  { %v1680_v11 = vunpack.c.h.bf16 %v1674_v62 }
 0x4b5   :  { %v4834_v3 = vpop.eup %4833 }
 0x4b6   :  { %v1651_v22 = vmul.f32 %v4834_v3, %v1649_v36 }
 0x4b8   :  { %v1655_v50 = vadd.f32 %v1653_v31, %v1651_v22 }
 0x4ba   :  { %v6265_v61 = vsel %vm1669_vm8, %v1655_v50, %v6211_v26  ;;  %v1679_v26 = vunpack.c.l.bf16 %v1674_v62 }
 0x4bb   :  { %v1682_v10 = vpack.c.bf16 %v6265_v61, %v6262_v54 }
 0x4bd   :  { %1691 = vmatmul.bf16.vlgmr.msra.gmra.mxu2 %v1682_v10  ;;  %1705 = vmatmul.bf16.vlgmr.msrb.gmra.mxu3 %v1682_v10 }
 0x4be   :  { %1719 = vmatmul.bf16.vlgmr.msrb.gmra.mxu0 %v1682_v10  ;;  %v1675_v10 = vld [vmem:[#allocation2 + $0xa4] sm:$0xf] }
 0x4bf   :  { %v1681_v62 = vunpack.c.l.bf16 %v1675_v10  ;;  %v2004_v10 = vld [vmem:[%s7074_s8 + $0x10] sm:$0xff] }
 0x53b   :  { %v1720_v48 = vpop.f32.mrf.mxu0 }
 0x53c   :  { %v1805_v42 = vadd.f32 %v6282_v25, %v1720_v48 }
 0x540   :  { %v1692_v43 = vpop.f32.mrf.mxu2  ;;  %v1706_v34 = vpop.f32.mrf.mxu3 }
 0x541   :  { %v1725_v6 = vadd.f32 %v1692_v43, %v1676_v20  ;;  %v1765_v15 = vadd.f32 %v1706_v34, %v1677_v35 }
 0x543   :  { %v4319_v55 = vmul.f32 -1.442695, %v1725_v6  ;;  %v4321_v53 = vmul.f32 -1.442695, %v1765_v15  ;;  %v1722_v31 = vpop.f32.mrf.mxu0 }
 0x544   :  { %v1806_v43 = vadd.f32 %v6282_v25, %v1722_v31  ;;  %v2006_v31 = vld [vmem:[%s7074_s8 + $0x20] sm:$0xff] }
 0x545   :  { %4835 = vpow2.f32 %v4319_v55 }
 0x546   :  { %4837 = vpow2.f32 %v4321_v53 }
 0x548   :  { %v1694_v13 = vpop.f32.mrf.mxu2  ;;  %v1708_v49 = vpop.f32.mrf.mxu3 }
 0x549   :  { %v1726_v16 = vadd.f32 %v1694_v13, %v1679_v26  ;;  %v1766_v0 = vadd.f32 %v1708_v49, %v1680_v11 }
 0x54b   :  { %v4836_v28 = vpop.eup %4835  ;;  %v4320_v12 = vmul.f32 -1.442695, %v1726_v16  ;;  %v4322_v45 = vmul.f32 -1.442695, %v1766_v0 }
 0x54c   :  { %v4838_v27 = vpop.eup %4837  ;;  %v1733_v30 = vadd.f32 1.0, %v4836_v28 }
 0x54d   :  { %v6269_v9 = vadd.f32 1.0, %v4838_v27  ;;  %4839 = vpow2.f32 %v4320_v12 }
 0x54e   :  { %4841 = vrcp.f32 %v1733_v30  ;;  %v1746_v57 = vand.u32 2147483648, %v1733_v30  ;;  %v1744_v4 = vand.u32 2147483647, %v1733_v30  ;;  %vm1740_vm10 = vweird.f32 %v1733_v30 }
 0x54f   :  { %4843 = vrcp.f32 %v6269_v9  ;;  %v1786_v44 = vand.u32 2147483648, %v6269_v9  ;;  %vm1780_vm0 = vweird.f32 %v6269_v9  ;;  %v1784_v50 = vand.u32 2147483647, %v6269_v9 }
 0x550   :  { %4845 = vpow2.f32 %v4322_v45  ;;  %v1747_v32 = vor.u32 1.1754944e-38, %v1746_v57  ;;  %vm1745_vm12 = vcmp.eq.f32.partialorder %v1744_v4, 8.507059e+37  ;;  %v2016_v4 = vld [vmem:[%s7074_s8 + $0x70] sm:$0xff] }
 0x551   :  { %v1787_v53 = vor.u32 1.1754944e-38, %v1786_v44  ;;  %vm1785_vm6 = vcmp.eq.f32.partialorder %v1784_v50, 8.507059e+37 }
 0x553   :  { %v4840_v37 = vpop.eup %4839 }
 0x554   :  { %v4842_v39 = vpop.eup %4841  ;;  %v1734_v51 = vadd.f32 1.0, %v4840_v37 }
 0x555   :  { %v6272_v23 = vpop.eup %4843  ;;  %v1736_v17 = vmul.f32 %v4842_v39, %v1733_v30  ;;  %vm1741_vm9 = vweird.f32 %v4842_v39 }
 0x556   :  { %v4846_v33 = vpop.eup %4845  ;;  %v1776_v29 = vmul.f32 %v6272_v23, %v6269_v9  ;;  %4847 = vrcp.f32 %v1734_v51  ;;  %vm1742_vm11 = vmor %vm1740_vm10, %vm1741_vm9  ;;  %v1761_v40 = vand.u32 2147483648, %v1734_v51  ;;  %v1759_v3 = vand.u32 2147483647, %v1734_v51 }
 0x557   :  { %v1737_v21 = vsub.f32 1.0, %v1736_v17  ;;  %v6276_v41 = vadd.f32 1.0, %v4846_v33  ;;  %vm1781_vm14 = vweird.f32 %v6272_v23  ;;  %vm1755_vm15 = vweird.f32 %v1734_v51  ;;  %v1829_v33 = vpop.permute.xlu0 %1828 }
 0x558   :  { %v1777_v38 = vsub.f32 1.0, %v1776_v29  ;;  %v1762_v58 = vor.u32 1.1754944e-38, %v1761_v40  ;;  %vm6292_vm3 = vmor %vm1780_vm0, %vm1781_vm14  ;;  %vm1760_vm4 = vcmp.eq.f32.partialorder %v1759_v3, 8.507059e+37  ;;  %v1832_v29 = vpop.permute.xlu1 %1831  ;;  %vm1833_vm10 = vcmp.eq.s32.totalorder %v1829_v33, 1  ;;  %v2057_v33 = vld [vmem:[#allocation6 + $0x60] sm:$0xff] }
 0x559   :  { %v1738_v24 = vmul.f32 %v4842_v39, %v1737_v21  ;;  %4849 = vrcp.f32 %v6276_v41  ;;  %v1801_v11 = vand.u32 2147483648, %v6276_v41  ;;  %vm1795_vm7 = vweird.f32 %v6276_v41 }
 0x55a   :  { %v1778_v18 = vmul.f32 %v6272_v23, %v1777_v38  ;;  %v1799_v13 = vand.u32 2147483647, %v6276_v41  ;;  %v2013_v38 = vld [vmem:[%s7074_s8 + $0x58] sm:$0xff] }
 0x55b   :  { %v1739_v7 = vadd.f32 %v4842_v39, %v1738_v24  ;;  %v1802_v12 = vor.u32 1.1754944e-38, %v1801_v11  ;;  %v2017_v24 = vld [vmem:[%s7074_s8 + $0x78] sm:$0xff] }
 0x55c   :  { %v4848_v19 = vpop.eup %4847  ;;  %v1779_v22 = vadd.f32 %v6272_v23, %v1778_v18  ;;  %vm1800_vm9 = vcmp.eq.f32.partialorder %v1799_v13, 8.507059e+37  ;;  %2022 = vmatpush.msra.mxu0 %v2017_v24  ;;  %v2009_v18 = vld [vmem:[%s7074_s8 + $0x38] sm:$0xff] }
 0x55d   :  { %v1743_v56 = vsel %vm1742_vm11, %v4842_v39, %v1739_v7  ;;  %v1751_v60 = vmul.f32 %v4848_v19, %v1734_v51  ;;  %vm1756_vm13 = vweird.f32 %v4848_v19  ;;  %vm1834_vm11 = vcmp.eq.s32.totalorder %v1832_v29, 1  ;;  %v1837_v7 = vld [vmem:[#allocation2 + $0xa8] sm:$0xff] }
 0x55e   :  { %v1748_v52 = vsel %vm1745_vm12, %v1747_v32, %v1743_v56  ;;  %vm1757_vm2 = vmor %vm1755_vm15, %vm1756_vm13  ;;  %v1783_v6 = vsel %vm6292_vm3, %v6272_v23, %v1779_v22  ;;  %2023 = vmatpush.msra.mxu0 %v2016_v4  ;;  %v1841_v2 = vunpack.c.l.bf16 %v1837_v7  ;;  %v2011_v32 = vld [vmem:[%s7074_s8 + $0x48] sm:$0xff] }
 0x55f   :  { %v4850_v59 = vpop.eup %4849  ;;  %v1807_v5 = vmul.f32 %v1805_v42, %v1748_v52  ;;  %v1752_v14 = vsub.f32 1.0, %v1751_v60  ;;  %v1788_v49 = vsel %vm1785_vm6, %v1787_v53, %v1783_v6  ;;  %v2010_v60 = vld [vmem:[%s7074_s8 + $0x40] sm:$0xff] }
 0x560   :  { %v1791_v46 = vmul.f32 %v4850_v59, %v6276_v41  ;;  %vm1796_vm5 = vweird.f32 %v4850_v59  ;;  %v1813_v27 = vsub.f32 1.0, %v1788_v49  ;;  %v1817_v9 = vmul.f32 %v1788_v49, %v6262_v54 }
 0x561   :  { %v1809_v36 = vadd.f32 %v1807_v5, %v1678_v63  ;;  %v1753_v1 = vmul.f32 %v4848_v19, %v1752_v14  ;;  %vm1797_vm8 = vmor %vm1795_vm7, %vm1796_vm5  ;;  %v1842_v63 = vunpack.c.h.bf16 %v1837_v7  ;;  %v2008_v5 = vld [vmem:[%s7074_s8 + $0x30] sm:$0xff] }
 0x562   :  { %v1792_v8 = vsub.f32 1.0, %v1791_v46 }
 0x563   :  { %v1754_v47 = vadd.f32 %v4848_v19, %v1753_v1  ;;  %4851 = vtanh.f32 %v1809_v36  ;;  %v2007_v36 = vld [vmem:[%s7074_s8 + $0x28] sm:$0xff] }
 0x564   :  { %v1793_v20 = vmul.f32 %v4850_v59, %v1792_v8 }
 0x565   :  { %v1758_v34 = vsel %vm1757_vm2, %v4848_v19, %v1754_v47  ;;  %v2012_v19 = vld [vmem:[%s7074_s8 + $0x50] sm:$0xff]  ;;  %v2005_v47 = vld [vmem:[%s7074_s8 + $0x18] sm:$0xff] }
 0x566   :  { %v1763_v15 = vsel %vm1760_vm4, %v1762_v58, %v1758_v34  ;;  %v1794_v55 = vadd.f32 %v4850_v59, %v1793_v20  ;;  %v2003_v20 = vld [vmem:[%s7074_s8 + $0x8] sm:$0xff]  ;;  %v2002_v34 = vld [vmem:[%s7074_s8] sm:$0xff] }
 0x567   :  { %v1808_v26 = vmul.f32 %v1806_v43, %v1763_v15 }
 0x568   :  { %v1798_v0 = vsel %vm1797_vm8, %v4850_v59, %v1794_v55  ;;  %v1839_v59 = vld [vmem:[#allocation2 + $0xb4] sm:$0xff] }
 0x569   :  { %v1810_v16 = vadd.f32 %v1808_v26, %v1681_v62  ;;  %v4852_v28 = vpop.eup %4851  ;;  %v1803_v30 = vsel %vm1800_vm9, %v1802_v12, %v1798_v0  ;;  %v1844_v46 = vunpack.c.l.bf16 %v1839_v59  ;;  %v1845_v58 = vunpack.c.h.bf16 %v1839_v59  ;;  %v2059_v0 = vld [vmem:[#allocation6 + $0x70] sm:$0xff] }
 0x56a   :  { %v1815_v45 = vmul.f32 %v4852_v28, %v1813_v27  ;;  %v1814_v37 = vsub.f32 1.0, %v1803_v30  ;;  %v1818_v23 = vmul.f32 %v1803_v30, %v6265_v61 }
 0x56b   :  { %4853 = vtanh.f32 %v1810_v16  ;;  %v2060_v16 = vld [vmem:[#allocation6 + $0x78] sm:$0xff] }
 0x56c   :  { %v1819_v17 = vadd.f32 %v1817_v9, %v1815_v45  ;;  %2065 = vmatpush.msra.mxu1 %v2060_v16  ;;  %v2050_v16 = vld [vmem:[#allocation6 + $0x28] sm:$0xff] }
 0x56e   :  { %v6306_v41 = vsel %vm1833_vm10, %v1819_v17, %v6262_v54  ;;  %v2015_v54 = vld [vmem:[%s7074_s8 + $0x68] sm:$0xff]  ;;  %2066 = vmatpush.msra.mxu1 %v2059_v0 }
 0x56f   :  { %2024 = vmatpush.msra.mxu0 %v2015_v54 }
 0x571   :  { %v4854_v39 = vpop.eup %4853 }
 0x572   :  { %v1816_v51 = vmul.f32 %v4854_v39, %v1814_v37  ;;  %v2058_v37 = vld [vmem:[#allocation6 + $0x68] sm:$0xff] }
 0x573   :  { %2067 = vmatpush.msra.mxu1 %v2058_v37  ;;  %v2048_v37 = vld [vmem:[#allocation6 + $0x18] sm:$0xff] }
 0x574   :  { %v1820_v21 = vadd.f32 %v1818_v23, %v1816_v51  ;;  %v1838_v51 = vld [vmem:[#allocation2 + $0xb0] sm:$0xf] }
 0x575   :  { %v1843_v4 = vunpack.c.l.bf16 %v1838_v51  ;;  %2068 = vmatpush.msra.mxu1 %v2057_v33 }
 0x576   :  { %v6309_v48 = vsel %vm1834_vm11, %v1820_v21, %v6265_v61  ;;  %v2014_v61 = vld [vmem:[%s7074_s8 + $0x60] sm:$0xff] }
 0x577   :  { %v1847_v57 = vpack.c.bf16 %v6309_v48, %v6306_v41  ;;  %2025 = vmatpush.msra.mxu0 %v2014_v61 }
 0x579   :  { %1856 = vmatmul.bf16.vlgmr.msrb.gmra.mxu1 %v1847_v57  ;;  %1870 = vmatmul.bf16.vlgmr.msrb.gmra.mxu2 %v1847_v57 }
 0x57a   :  { %1884 = vmatmul.bf16.vlgmr.msra.gmra.mxu3 %v1847_v57  ;;  %2026 = vmatpush.msra.mxu0 %v2013_v38  ;;  %v2056_v38 = vld [vmem:[#allocation6 + $0x58] sm:$0xff] }
 0x57b   :  { %2069 = vmatpush.msra.mxu1 %v2056_v38  ;;  %v2102_v38 = vld [vmem:[#allocation8 + $0x60] sm:$0xff] }
 0x57c   :  { %2027 = vmatpush.msra.mxu0 %v2012_v19 }
 0x57e   :  { %2028 = vmatpush.msra.mxu0 %v2011_v32 }
 0x580   :  { %2029 = vmatpush.msra.mxu0 %v2010_v60 }
 0x582   :  { %2030 = vmatpush.msra.mxu0 %v2009_v18 }
 0x584   :  { %2031 = vmatpush.msra.mxu0 %v2008_v5 }
 0x586   :  { %2032 = vmatpush.msra.mxu0 %v2007_v36 }
 0x588   :  { %2033 = vmatpush.msra.mxu0 %v2006_v31  ;;  %v2053_v31 = vld [vmem:[#allocation6 + $0x40] sm:$0xff] }
 0x58a   :  { %2034 = vmatpush.msra.mxu0 %v2005_v47  ;;  %v1840_v47 = vld [vmem:[#allocation2 + $0xbc] sm:$0xf] }
 0x58c   :  { %2035 = vmatpush.msra.mxu0 %v2004_v10 }
 0x58e   :  { %2036 = vmatpush.msra.mxu0 %v2003_v20  ;;  %v2052_v20 = vld [vmem:[#allocation6 + $0x38] sm:$0xff] }
 0x590   :  { %2037 = vmatpush.msra.mxu0 %v2002_v34 }
 0x5f6   :  { %v1857_v42 = vpop.f32.mrf.mxu1 }
 0x5f7   :  { %v1890_v56 = vadd.f32 %v1857_v42, %v1841_v2 }
 0x5f9   :  { %v4323_v52 = vmul.f32 -1.442695, %v1890_v56  ;;  %v2055_v56 = vld [vmem:[#allocation6 + $0x50] sm:$0xff] }
 0x5fa   :  { %2070 = vmatpush.msra.mxu1 %v2055_v56  ;;  %v4711_v56 = vld [vmem:[%s7075_s9] ss:$0 sm:$0xff] }
 0x5fb   :  { %4855 = vpow2.f32 %v4323_v52 }
 0x5fc   :  { %v1871_v14 = vpop.f32.mrf.mxu2 }
 0x5fd   :  { %v1930_v40 = vadd.f32 %v1871_v14, %v1842_v63  ;;  %v1885_v12 = vpop.f32.mrf.mxu3  ;;  %v2093_v63 = vld [vmem:[#allocation8 + $0x18] sm:$0xff] }
 0x5fe   :  { %v1859_v1 = vpop.f32.mrf.mxu1  ;;  %v1970_v24 = vadd.f32 %v6282_v25, %v1885_v12 }
 0x5ff   :  { %v4325_v3 = vmul.f32 -1.442695, %v1930_v40  ;;  %v1891_v22 = vadd.f32 %v1859_v1, %v1844_v46  ;;  %v2054_v40 = vld [vmem:[#allocation6 + $0x48] sm:$0xff] }
 0x600   :  { %2071 = vmatpush.msra.mxu1 %v2054_v40  ;;  %v2092_v40 = vld [vmem:[#allocation8 + $0x10] sm:$0xff] }
 0x601   :  { %v4856_v8 = vpop.eup %4855  ;;  %4857 = vpow2.f32 %v4325_v3  ;;  %v4324_v44 = vmul.f32 -1.442695, %v1891_v22 }
 0x602   :  { %v1898_v50 = vadd.f32 1.0, %v4856_v8  ;;  %2072 = vmatpush.msra.mxu1 %v2053_v31 }
 0x603   :  { %4859 = vpow2.f32 %v4324_v44 }
 0x604   :  { %4861 = vrcp.f32 %v1898_v50  ;;  %v1873_v35 = vpop.f32.mrf.mxu2  ;;  %v1911_v49 = vand.u32 2147483648, %v1898_v50  ;;  %v1909_v30 = vand.u32 2147483647, %v1898_v50  ;;  %vm1905_vm13 = vweird.f32 %v1898_v50  ;;  %2073 = vmatpush.msra.mxu1 %v2052_v20 }
 0x605   :  { %v1931_v43 = vadd.f32 %v1873_v35, %v1845_v58  ;;  %v1887_v3 = vpop.f32.mrf.mxu3 }
 0x606   :  { %v1912_v17 = vor.u32 1.1754944e-38, %v1911_v49  ;;  %vm1910_vm15 = vcmp.eq.f32.partialorder %v1909_v30, 8.507059e+37  ;;  %v1971_v58 = vadd.f32 %v6282_v25, %v1887_v3  ;;  %v2049_v30 = vld [vmem:[#allocation6 + $0x20] sm:$0xff]  ;;  %v4645_v3 = vld [vmem:[#allocation11 + $0xb0] sm:$0xf0] }
 0x607   :  { %v4858_v6 = vpop.eup %4857  ;;  %v4326_v15 = vmul.f32 -1.442695, %v1931_v43 }
 0x608   :  { %v6361_v55 = vadd.f32 1.0, %v4858_v6  ;;  %v1846_v6 = vunpack.c.l.bf16 %v1840_v47  ;;  %v4493_v47 = vld [vmem:[#allocation11 + $0x78] sm:$0xf] }
 0x609   :  { %v4860_v53 = vpop.eup %4859  ;;  %4863 = vpow2.f32 %v4326_v15 }
 0x60a   :  { %v4862_v62 = vpop.eup %4861  ;;  %4865 = vrcp.f32 %v6361_v55  ;;  %v6364_v11 = vadd.f32 1.0, %v4860_v53  ;;  %v1951_v19 = vand.u32 2147483648, %v6361_v55  ;;  %v1949_v32 = vand.u32 2147483647, %v6361_v55  ;;  %v2051_v53 = vld [vmem:[#allocation6 + $0x30] sm:$0xff] }
 0x60b   :  { %v1901_v26 = vmul.f32 %v4862_v62, %v1898_v50  ;;  %vm1906_vm12 = vweird.f32 %v4862_v62  ;;  %vm1945_vm2 = vweird.f32 %v6361_v55  ;;  %2074 = vmatpush.msra.mxu1 %v2051_v53  ;;  %v4636_v53 = vld [vmem:[#allocation11 + $0x68] sm:$0xf0] }
 0x60c   :  { %4867 = vrcp.f32 %v6364_v11  ;;  %vm1907_vm14 = vmor %vm1905_vm13, %vm1906_vm12  ;;  %v1926_v18 = vand.u32 2147483648, %v6364_v11  ;;  %v1924_v14 = vand.u32 2147483647, %v6364_v11  ;;  %v1952_v46 = vor.u32 1.1754944e-38, %v1951_v19  ;;  %v2100_v19 = vld [vmem:[#allocation8 + $0x50] sm:$0xff] }
 0x60d   :  { %v1902_v13 = vsub.f32 1.0, %v1901_v26  ;;  %vm1950_vm5 = vcmp.eq.f32.partialorder %v1949_v32, 8.507059e+37  ;;  %vm1920_vm6 = vweird.f32 %v6364_v11  ;;  %2075 = vmatpush.msra.mxu1 %v2050_v16  ;;  %v2098_v32 = vld [vmem:[#allocation8 + $0x40] sm:$0xff] }
 0x60e   :  { %v1927_v50 = vor.u32 1.1754944e-38, %v1926_v18  ;;  %vm1925_vm8 = vcmp.eq.f32.partialorder %v1924_v14, 8.507059e+37  ;;  %v2094_v18 = vld [vmem:[#allocation8 + $0x20] sm:$0xff] }
 0x60f   :  { %v4864_v28 = vpop.eup %4863  ;;  %v1903_v27 = vmul.f32 %v4862_v62, %v1902_v13  ;;  %2076 = vmatpush.msra.mxu1 %v2049_v30  ;;  %v4633_v30 = vld [vmem:[#allocation11 + $0x50] sm:$0xf0] }
 0x610   :  { %v4866_v45 = vpop.eup %4865  ;;  %v6367_v9 = vadd.f32 1.0, %v4864_v28  ;;  %v1994_v28 = vpop.permute.xlu2 %1993 }
 0x611   :  { %v1941_v39 = vmul.f32 %v4866_v45, %v6361_v55  ;;  %v1904_v23 = vadd.f32 %v4862_v62, %v1903_v27  ;;  %vm1946_vm0 = vweird.f32 %v4866_v45  ;;  %vm1998_vm12 = vcmp.eq.s32.totalorder %v1994_v28, 1  ;;  %2077 = vmatpush.msra.mxu1 %v2048_v37  ;;  %v4614_v28 = vld [vmem:[#allocation9 + $0x1c] sm:$0xf]  ;;  %v4612_v37 = vld [vmem:[#allocation9 + $0x8] sm:$0xf0] }
 0x612   :  { %4869 = vrcp.f32 %v6367_v9  ;;  %v4868_v29 = vpop.eup %4867  ;;  %vm6377_vm3 = vmor %vm1945_vm2, %vm1946_vm0  ;;  %v1966_v55 = vand.u32 2147483648, %v6367_v9  ;;  %vm1960_vm10 = vweird.f32 %v6367_v9 }
 0x613   :  { %v1942_v21 = vsub.f32 1.0, %v1941_v39  ;;  %v1908_v57 = vsel %vm1907_vm14, %v4862_v62, %v1904_v23  ;;  %v1916_v61 = vmul.f32 %v4868_v29, %v6364_v11  ;;  %vm1921_vm4 = vweird.f32 %v4868_v29  ;;  %v2047_v39 = vld [vmem:[#allocation6 + $0x10] sm:$0xff] }
 0x614   :  { %v1913_v54 = vsel %vm1910_vm15, %v1912_v17, %v1908_v57  ;;  %vm1922_vm7 = vmor %vm1920_vm6, %vm1921_vm4  ;;  %v1964_v11 = vand.u32 2147483647, %v6367_v9  ;;  %v1967_v27 = vor.u32 1.1754944e-38, %v1966_v55  ;;  %2078 = vmatpush.msra.mxu1 %v2047_v39  ;;  %v4481_v55 = vld [vmem:[#allocation11 + $0x60] sm:$0xf] }
 0x615   :  { %v1943_v7 = vmul.f32 %v4866_v45, %v1942_v21  ;;  %v1972_v2 = vmul.f32 %v1970_v24, %v1913_v54  ;;  %v1917_v42 = vsub.f32 1.0, %v1916_v61  ;;  %v2046_v24 = vld [vmem:[#allocation6 + $0x8] sm:$0xff]  ;;  %v2104_v54 = vld [vmem:[#allocation8 + $0x70] sm:$0xff] }
 0x616   :  { %vm1965_vm13 = vcmp.eq.f32.partialorder %v1964_v11, 8.507059e+37  ;;  %2079 = vmatpush.msra.mxu1 %v2046_v24  ;;  %v2103_v61 = vld [vmem:[#allocation8 + $0x68] sm:$0xff]  ;;  %v4373_v11 = vld [vmem:[#allocation9 + $0x18] sm:$0xf] }
 0x617   :  { %v1944_v60 = vadd.f32 %v4866_v45, %v1943_v7  ;;  %v1974_v52 = vadd.f32 %v1972_v2, %v1843_v4  ;;  %v1918_v5 = vmul.f32 %v4868_v29, %v1917_v42  ;;  %v2105_v4 = vld [vmem:[#allocation8 + $0x78] sm:$0xff]  ;;  %v2099_v2 = vld [vmem:[#allocation8 + $0x48] sm:$0xff]  ;;  %v2096_v42 = vld [vmem:[#allocation8 + $0x30] sm:$0xff] }
 0x618   :  { %v4870_v59 = vpop.eup %4869  ;;  %2110 = vmatpush.msra.mxu2 %v2105_v4  ;;  %v2101_v7 = vld [vmem:[#allocation8 + $0x58] sm:$0xff] }
 0x619   :  { %v1948_v36 = vsel %vm6377_vm3, %v4866_v45, %v1944_v60  ;;  %4871 = vtanh.f32 %v1974_v52  ;;  %v1956_v1 = vmul.f32 %v4870_v59, %v6367_v9  ;;  %v1919_v22 = vadd.f32 %v4868_v29, %v1918_v5  ;;  %v2095_v60 = vld [vmem:[#allocation8 + $0x28] sm:$0xff] }
 0x61a   :  { %v1953_v8 = vsel %vm1950_vm5, %v1952_v46, %v1948_v36  ;;  %vm1961_vm9 = vweird.f32 %v4870_v59  ;;  %2111 = vmatpush.msra.mxu2 %v2104_v54  ;;  %v2091_v46 = vld [vmem:[#allocation8 + $0x8] sm:$0xff]  ;;  %v2090_v36 = vld [vmem:[#allocation8] sm:$0xff] }
 0x61b   :  { %v1957_v44 = vsub.f32 1.0, %v1956_v1  ;;  %v1923_v10 = vsel %vm1922_vm7, %v4868_v29, %v1919_v22  ;;  %v1978_v34 = vsub.f32 1.0, %v1953_v8  ;;  %v1982_v49 = vmul.f32 %v1953_v8, %v6306_v41  ;;  %vm1962_vm11 = vmor %vm1960_vm10, %vm1961_vm9  ;;  %v1997_v29 = vpop.permute.xlu0 %1996  ;;  %v4517_v1 = vld [vmem:[#allocation11 + $0xa8] sm:$0xf]  ;;  %v4505_v22 = vld [vmem:[#allocation11 + $0x90] sm:$0xf] }
 0x61c   :  { %v1928_v35 = vsel %vm1925_vm8, %v1927_v50, %v1923_v10  ;;  %vm1999_vm14 = vcmp.eq.s32.totalorder %v1997_v29, 1  ;;  %2112 = vmatpush.msra.mxu2 %v2103_v61  ;;  %v6405_v31 = vor.u32 %v4645_v3, %v4517_v1  ;;  %v4642_v8 = vld [vmem:[#allocation11 + $0x98] sm:$0xf0]  ;;  %v4639_v50 = vld [vmem:[#allocation11 + $0x80] sm:$0xf0] }
 0x61d   :  { %v1958_v43 = vmul.f32 %v4870_v59, %v1957_v44  ;;  %v1973_v15 = vmul.f32 %v1971_v58, %v1928_v35  ;;  %v6408_v44 = vor.u32 %v4642_v8, %v4505_v22  ;;  %v4397_v10 = vld [vmem:[#allocation9 + $0x48] sm:$0xf]  ;;  %v4621_v58 = vld [vmem:[#allocation9 + $0x50] sm:$0xf0]  ;;  %v4385_v35 = vld [vmem:[#allocation9 + $0x30] sm:$0xf] }
 0x61e   :  { %2113 = vmatpush.msra.mxu2 %v2102_v38  ;;  %v4398_v20 = vor.u32 %v4621_v58, %v4397_v10  ;;  %v4641_v61 = vld [vmem:[#allocation11 + $0x94] sm:$0xf]  ;;  %v4507_v38 = vld [vmem:[#allocation11 + $0x9c] sm:$0xf0]  ;;  %v4611_v3 = vld [vmem:[#allocation9 + $0x4] sm:$0xf] }
 0x61f   :  { %v4872_v62 = vpop.eup %4871  ;;  %v1959_v26 = vadd.f32 %v4870_v59, %v1958_v43  ;;  %v1975_v25 = vadd.f32 %v1973_v15, %v1846_v6  ;;  %v6411_v43 = vor.u32 %v4639_v50, %v4493_v47  ;;  %v4620_v6 = vld [vmem:[#allocation9 + $0x4c] sm:$0xf]  ;;  %v4399_v15 = vld [vmem:[#allocation9 + $0x54] sm:$0xf0]  ;;  %v4363_v22 = vld [vmem:[#allocation9 + $0xc] sm:$0xf0] }
 0x620   :  { %v1980_v13 = vmul.f32 %v4872_v62, %v1978_v34  ;;  %2114 = vmatpush.msra.mxu2 %v2101_v7  ;;  %v4618_v34 = vld [vmem:[#allocation9 + $0x38] sm:$0xf0]  ;;  %2307 = vmatpush.bf16.msrb.mxu3 %v4398_v20  ;;  %v4366_v8 = vor.u32 %v4611_v3, %v4363_v22  ;;  %v4632_v47 = vld [vmem:[#allocation11 + $0x4c] sm:$0xf]  ;;  %v4471_v50 = vld [vmem:[#allocation11 + $0x54] sm:$0xf0] }
 0x621   :  { %v1963_v0 = vsel %vm1962_vm11, %v4870_v59, %v1959_v26  ;;  %4873 = vtanh.f32 %v1975_v25  ;;  %v4386_v62 = vor.u32 %v4618_v34, %v4385_v35  ;;  %v4402_v26 = vor.u32 %v4620_v6, %v4399_v15  ;;  %v4617_v25 = vld [vmem:[#allocation9 + $0x34] sm:$0xf]  ;;  %v4459_v20 = vld [vmem:[#allocation11 + $0x3c] sm:$0xf0]  ;;  %v4626_v34 = vld [vmem:[#allocation11 + $0x1c] sm:$0xf] }
 0x622   :  { %v1984_v12 = vadd.f32 %v1982_v49, %v1980_v13  ;;  %v1968_v9 = vsel %vm1965_vm13, %v1967_v27, %v1963_v0  ;;  %2115 = vmatpush.msra.mxu2 %v2100_v19  ;;  %v4615_v13 = vld [vmem:[#allocation9 + $0x20] sm:$0xf0]  ;;  %v4387_v49 = vld [vmem:[#allocation9 + $0x3c] sm:$0xf0]  ;;  %v6414_v0 = vor.u32 %v4636_v53, %v4481_v55  ;;  %v4469_v27 = vld [vmem:[#allocation11 + $0x48] sm:$0xf]  ;;  %v6463_v58 = vor.u32 %v4632_v47, %v4471_v50 }
 0x623   :  { %v1979_v51 = vsub.f32 1.0, %v1968_v9  ;;  %v1983_v33 = vmul.f32 %v1968_v9, %v6309_v48  ;;  %2356 = vmatpush.bf16.msrb.mxu0 %v4402_v26  ;;  %v4390_v16 = vor.u32 %v4617_v25, %v4387_v49  ;;  %v4361_v9 = vld [vmem:[#allocation9] sm:$0xf]  ;;  %v4445_v19 = vld [vmem:[#allocation11 + $0x18] sm:$0xf] }
 0x624   :  { %v2000_v45 = vsel %vm1998_vm12, %v1984_v12, %v6306_v41  ;;  %v2045_v41 = vld [vmem:[#allocation6] sm:$0xff]  ;;  %2116 = vmatpush.msra.mxu2 %v2099_v2  ;;  %v4375_v12 = vld [vmem:[#allocation9 + $0x24] sm:$0xf0]  ;;  %2308 = vmatpush.bf16.msrb.mxu3 %v4386_v62  ;;  %v4362_v29 = vor.u32 %v4612_v37, %v4361_v9  ;;  %v4629_v10 = vld [vmem:[#allocation11 + $0x34] sm:$0xf] }
 0x625   :  { %2038 = vmatmul.f32.vlgmr.msra.gmra.mxu0 %v2000_v45  ;;  %2080 = vmatpush.msra.mxu1 %v2045_v41  ;;  %v4374_v45 = vor.u32 %v4615_v13, %v4373_v11  ;;  %v4378_v39 = vor.u32 %v4614_v28, %v4375_v12  ;;  %v4627_v2 = vld [vmem:[#allocation11 + $0x20] sm:$0xf0]  ;;  %v6466_v35 = vor.u32 %v4629_v10, %v4459_v20  ;;  %v4447_v6 = vld [vmem:[#allocation11 + $0x24] sm:$0xf0]  ;;  %v4435_v53 = vld [vmem:[#allocation11 + $0xc] sm:$0xf0] }
 0x626   :  { %2117 = vmatpush.msra.mxu2 %v2098_v32  ;;  %v6432_v32 = vor.u32 %v4641_v61, %v4507_v38  ;;  %v6473_v15 = vor.u32 %v4626_v34, %v4447_v6  ;;  %v4623_v55 = vld [vmem:[#allocation11 + $0x4] sm:$0xf]  ;;  %v4525_v62 = vld [vmem:[#allocation11 + $0xb0] sm:$0xf]  ;;  %v4646_v11 = vld [vmem:[#allocation11 + $0xb8] sm:$0xf0] }
 0x627   :  { %v4874_v23 = vpop.eup %4873  ;;  %2357 = vmatpush.bf16.msrb.mxu0 %v4390_v16  ;;  %v6477_v26 = vor.u32 %v4623_v55, %v4435_v53  ;;  %v6479_v13 = vor.u32 %v4646_v11, %v4525_v62  ;;  %v4513_v25 = vld [vmem:[#allocation11 + $0x98] sm:$0xf]  ;;  %v4643_v49 = vld [vmem:[#allocation11 + $0xa0] sm:$0xf0]  ;;  %v4405_v16 = vld [vmem:[#allocation9 + $0x50] sm:$0xf] }
 0x628   :  { %v1981_v17 = vmul.f32 %v4874_v23, %v1979_v51  ;;  %v4712_v51 = vld [vmem:[%s7077_s11] ss:$0 sm:$0xff]  ;;  %v6420_v23 = vor.u32 %v4633_v30, %v4469_v27  ;;  %2309 = vmatpush.bf16.msrb.mxu3 %v4374_v45  ;;  %v4622_v28 = vld [vmem:[#allocation9 + $0x58] sm:$0xf0]  ;;  %v6485_v12 = vor.u32 %v4643_v49, %v4513_v25  ;;  %v4640_v45 = vld [vmem:[#allocation11 + $0x88] sm:$0xf0] }
 0x629   :  { %v4406_v27 = vor.u32 %v4622_v28, %v4405_v16  ;;  %v4501_v30 = vld [vmem:[#allocation11 + $0x80] sm:$0xf]  ;;  %v4393_v9 = vld [vmem:[#allocation9 + $0x38] sm:$0xf]  ;;  %v4619_v37 = vld [vmem:[#allocation9 + $0x40] sm:$0xf0] }
 0x62a   :  { %v1985_v21 = vadd.f32 %v1983_v33, %v1981_v17  ;;  %v4644_v17 = vld [vmem:[#allocation11 + $0xac] sm:$0xf]  ;;  %v4519_v33 = vld [vmem:[#allocation11 + $0xb4] sm:$0xf0]  ;;  %v4477_v61 = vld [vmem:[#allocation11 + $0x50] sm:$0xf] }
 0x62b   :  { %2358 = vmatpush.bf16.msrb.mxu0 %v4378_v39  ;;  %v6423_v4 = vor.u32 %v4644_v17, %v4519_v33  ;;  %2405 = vmatpush.bf16.msrb.mxu1 %v4406_v27  ;;  %v6489_v39 = vor.u32 %v4640_v45, %v4501_v30  ;;  %v4489_v17 = vld [vmem:[#allocation11 + $0x68] sm:$0xf]  ;;  %v4637_v33 = vld [vmem:[#allocation11 + $0x70] sm:$0xf0]  ;;  %v4634_v38 = vld [vmem:[#allocation11 + $0x58] sm:$0xf0] }
 0x62c   :  { %v2001_v57 = vsel %vm1999_vm14, %v1985_v21, %v6309_v48  ;;  %v2097_v48 = vld [vmem:[#allocation8 + $0x38] sm:$0xff]  ;;  %v4457_v21 = vld [vmem:[#allocation11 + $0x30] sm:$0xf]  ;;  %2310 = vmatpush.bf16.msrb.mxu3 %v4362_v29  ;;  %v4381_v29 = vld [vmem:[#allocation9 + $0x20] sm:$0xf]  ;;  %s7140_s11 = sld [smem:[#allocation22_spill]] }
 0x62d   :  { %2041 = vmatmul.f32.gmra.mxu0 %v2001_v57  ;;  %2118 = vmatpush.msra.mxu2 %v2097_v48  ;;  %v4630_v57 = vld [vmem:[#allocation11 + $0x38] sm:$0xf0]  ;;  %v6435_v48 = vor.u32 %v4627_v2, %v4445_v19  ;;  %v4369_v19 = vld [vmem:[#allocation9 + $0x8] sm:$0xf]  ;;  %v4613_v2 = vld [vmem:[#allocation9 + $0x10] sm:$0xf0] }
 0x62e   :  { %v6425_v54 = vor.u32 %v4630_v57, %v4457_v21  ;;  %v4616_v21 = vld [vmem:[#allocation9 + $0x28] sm:$0xf0]  ;;  %v6493_v57 = vor.u32 %v4637_v33, %v4489_v17  ;;  %v4441_v50 = vld [vmem:[#allocation11 + $0x8] sm:$0xf]  ;;  %v4625_v10 = vld [vmem:[#allocation11 + $0x10] sm:$0xf0] }
 0x62f   :  { %2119 = vmatpush.msra.mxu2 %v2096_v42  ;;  %v4638_v42 = vld [vmem:[#allocation11 + $0x7c] sm:$0xf]  ;;  %2359 = vmatpush.bf16.msrb.mxu0 %v4366_v8  ;;  %v6525_v6 = vor.u32 %v4625_v10, %v4441_v50  ;;  %v2167_v53 = vld [vmem:[%s7082_s16] sm:$0x7] }
 0x630   :  { %2877 = vmatpush.bf16.msra.mxu3 %v6423_v4  ;;  %v4606_v55 = vld [vmem:[%s7123_s27 + $0x18] sm:$0xff]  ;;  %v6593_v62 = vperm.slane %v2167_v53, 1  ;;  %v6596_v11 = vperm.slane %v2167_v53, 0  ;;  %v4607_v17 = vld [vmem:[%s7123_s27 + $0x20] sm:$0xff] }
 0x631   :  { %2120 = vmatpush.msra.mxu2 %v2095_v60  ;;  %v4433_v60 = vld [vmem:[#allocation11] sm:$0xf] }
 0x632   :  { %s4071_s10 = sshll.u32 %s7140_s11, 4  ;;  %s4072_s10 = int_to_ptr.hbm [resolvable:$true] %s4071_s10 }
 0x633   :  { %2121 = vmatpush.msra.mxu2 %v2094_v18  ;;  %2891 = vmatpush.bf16.msra.mxu0 %v6479_v13 }
 0x634   :  { %2878 = vmatpush.bf16.msra.mxu3 %v6432_v32 }
 0x635   :  { %2122 = vmatpush.msra.mxu2 %v2093_v63 }
 0x637   :  { %2123 = vmatpush.msra.mxu2 %v2092_v40  ;;  %v4483_v40 = vld [vmem:[#allocation11 + $0x6c] sm:$0xf0]  ;;  %2892 = vmatpush.bf16.msra.mxu0 %v6485_v12 }
 0x639   :  { %2124 = vmatpush.msra.mxu2 %v2091_v46 }
 0x63b   :  { %2125 = vmatpush.msra.mxu2 %v2090_v36  ;;  %2893 = vmatpush.bf16.msra.mxu0 %v6489_v39 }
 0x63d   :  { %2689 = vmatpush.bf16.msrb.mxu2 %v6405_v31 }
 0x63f   :  { %2894 = vmatpush.bf16.msra.mxu0 %v6493_v57 }
 0x641   :  { %2690 = vmatpush.bf16.msrb.mxu2 %v6408_v44 }
 0x645   :  { %2691 = vmatpush.bf16.msrb.mxu2 %v6411_v43 }
 0x649   :  { %2692 = vmatpush.bf16.msrb.mxu2 %v6414_v0 }
 0x64d   :  { %2693 = vmatpush.bf16.msrb.mxu2 %v6420_v23 }
 0x651   :  { %2694 = vmatpush.bf16.msrb.mxu2 %v6425_v54 }
 0x655   :  { %2695 = vmatpush.bf16.msrb.mxu2 %v6435_v48 }
 0x6a2   :  { %v2039_v52 = vpop.f32.mrf.mxu0 }
 0x6a3   :  { %v6399_v59 = vadd.f32 %v4711_v56, %v2039_v52  ;;  %v4624_v52 = vld [vmem:[#allocation11 + $0x8] sm:$0xf0] }
 0x6a4   :  { %v6441_v46 = vor.u32 %v4624_v52, %v4433_v60  ;;  %v4465_v60 = vld [vmem:[#allocation11 + $0x38] sm:$0xf]  ;;  %v4631_v52 = vld [vmem:[#allocation11 + $0x40] sm:$0xf0] }
 0x6a5   :  { %2081 = vmatmul.f32.vlgmr.msra.gmra.mxu1 %v6399_v59 }
 0x6a6   :  { %2696 = vmatpush.bf16.msrb.mxu2 %v6441_v46 }
 0x6aa   :  { %v2042_v5 = vpop.f32.mrf.mxu0 }
 0x6ab   :  { %v6402_v14 = vadd.f32 %v4711_v56, %v2042_v5  ;;  %v4495_v56 = vld [vmem:[#allocation11 + $0x84] sm:$0xf0]  ;;  %v4635_v5 = vld [vmem:[#allocation11 + $0x64] sm:$0xf] }
 0x6ac   :  { %v6447_v1 = vor.u32 %v4635_v5, %v4483_v40  ;;  %v4453_v5 = vld [vmem:[#allocation11 + $0x20] sm:$0xf]  ;;  %v4628_v40 = vld [vmem:[#allocation11 + $0x28] sm:$0xf0] }
 0x6ad   :  { %2084 = vmatmul.f32.gmra.mxu1 %v6402_v14  ;;  %v6512_v47 = vor.u32 %v4628_v40, %v4453_v5  ;;  %v4609_v5 = vld [vmem:[%s7123_s27 + $0x30] sm:$0xff] }
 0x722   :  { %v2082_v24 = vpop.f32.mrf.mxu1 }
 0x723   :  { %v2083_v41 = vadd.f32 %v4712_v51, %v2082_v24  ;;  %v4382_v24 = vor.u32 %v4616_v21, %v4381_v29  ;;  %v4608_v29 = vld [vmem:[%s7123_s27 + $0x28] sm:$0xff]  ;;  %v6614_v21 = vperm.slane %v2167_v53, 2 }
 0x725   :  { %v6428_v7 = vadd.f32 %v2083_v41, %v6399_v59  ;;  %v6438_v59 = vor.u32 %v4638_v42, %v4495_v56  ;;  %v6497_v42 = vor.u32 %v4634_v38, %v4477_v61  ;;  %v4370_v56 = vor.u32 %v4613_v2, %v4369_v19 }
 0x727   :  { %2126 = vmatmul.f32.vlgmr.msra.gmra.mxu2 %v6428_v7  ;;  %2879 = vmatpush.bf16.msra.mxu3 %v6438_v59 }
 0x728   :  { %2703 = vmatpush.bf16.msra.mxu2 %v6423_v4  ;;  %2895 = vmatpush.bf16.msra.mxu0 %v6497_v42 }
 0x72a   :  { %v2085_v18 = vpop.f32.mrf.mxu1 }
 0x72b   :  { %v2086_v63 = vadd.f32 %v4712_v51, %v2085_v18  ;;  %2880 = vmatpush.bf16.msra.mxu3 %v6447_v1  ;;  %v4394_v51 = vor.u32 %v4619_v37, %v4393_v9  ;;  %v4713_v18 = vld [vmem:[%s7079_s13] ss:$0 sm:$0xff] }
 0x72c   :  { %2704 = vmatpush.bf16.msra.mxu2 %v6432_v32 }
 0x72d   :  { %v6445_v36 = vadd.f32 %v2086_v63, %v6402_v14  ;;  %v6459_v14 = vld [vmem:[%s7123_s27] sm:$0xff]  ;;  %2406 = vmatpush.bf16.msrb.mxu1 %v4394_v51  ;;  %v6505_v63 = vor.u32 %v4631_v52, %v4465_v60 }
 0x72e   :  { %4407 = vmatmul.msk.bf16.vlgmr.msrb.gmra.mxu3 %vm283_vm1, %v6459_v14  ;;  %4415 = vmatmul.msk.bf16.vlgmr.msrb.gmra.mxu0 %vm283_vm1, %v6459_v14 }
 0x72f   :  { %2129 = vmatmul.f32.gmra.mxu2 %v6445_v36  ;;  %2881 = vmatpush.bf16.msra.mxu3 %v6463_v58 }
 0x730   :  { %2705 = vmatpush.bf16.msra.mxu2 %v6438_v59  ;;  %2896 = vmatpush.bf16.msra.mxu0 %v6505_v63 }
 0x731   :  { %2407 = vmatpush.bf16.msrb.mxu1 %v4382_v24 }
 0x733   :  { %2882 = vmatpush.bf16.msra.mxu3 %v6466_v35 }
 0x734   :  { %2706 = vmatpush.bf16.msra.mxu2 %v6447_v1  ;;  %2897 = vmatpush.bf16.msra.mxu0 %v6512_v47 }
 0x735   :  { %2408 = vmatpush.bf16.msrb.mxu1 %v4370_v56 }
 0x737   :  { %2883 = vmatpush.bf16.msra.mxu3 %v6473_v15 }
 0x738   :  { %2707 = vmatpush.bf16.msra.mxu2 %v6463_v58  ;;  %4423 = vmatmul.msk.bf16.vlgmr.msrb.gmra.mxu1 %vm283_vm1, %v6459_v14 }
 0x739   :  { %3037 = vmatpush.bf16.msra.mxu1 %v6405_v31  ;;  %2898 = vmatpush.bf16.msra.mxu0 %v6525_v6 }
 0x73b   :  { %2884 = vmatpush.bf16.msra.mxu3 %v6477_v26 }
 0x73c   :  { %2708 = vmatpush.bf16.msra.mxu2 %v6466_v35 }
 0x73d   :  { %3038 = vmatpush.bf16.msra.mxu1 %v6408_v44  ;;  %3211 = vmatpush.bf16.msrb.mxu0 %v6405_v31 }
 0x73f   :  { %3065 = vmatpush.bf16.msrb.mxu3 %v6479_v13 }
 0x740   :  { %2709 = vmatpush.bf16.msra.mxu2 %v6473_v15 }
 0x741   :  { %3039 = vmatpush.bf16.msra.mxu1 %v6411_v43  ;;  %3212 = vmatpush.bf16.msrb.mxu0 %v6408_v44 }
 0x743   :  { %3066 = vmatpush.bf16.msrb.mxu3 %v6485_v12 }
 0x744   :  { %2710 = vmatpush.bf16.msra.mxu2 %v6477_v26 }
 0x745   :  { %3040 = vmatpush.bf16.msra.mxu1 %v6414_v0  ;;  %3213 = vmatpush.bf16.msrb.mxu0 %v6411_v43 }
 0x747   :  { %3067 = vmatpush.bf16.msrb.mxu3 %v6489_v39 }
 0x749   :  { %3041 = vmatpush.bf16.msra.mxu1 %v6420_v23  ;;  %3214 = vmatpush.bf16.msrb.mxu0 %v6414_v0 }
 0x74b   :  { %3068 = vmatpush.bf16.msrb.mxu3 %v6493_v57 }
 0x74d   :  { %3042 = vmatpush.bf16.msra.mxu1 %v6425_v54  ;;  %3215 = vmatpush.bf16.msrb.mxu0 %v6420_v23 }
 0x74f   :  { %3069 = vmatpush.bf16.msrb.mxu3 %v6497_v42 }
 0x751   :  { %3043 = vmatpush.bf16.msra.mxu1 %v6435_v48  ;;  %3216 = vmatpush.bf16.msrb.mxu0 %v6425_v54 }
 0x753   :  { %3070 = vmatpush.bf16.msrb.mxu3 %v6505_v63 }
 0x755   :  { %3044 = vmatpush.bf16.msra.mxu1 %v6441_v46  ;;  %3217 = vmatpush.bf16.msrb.mxu0 %v6435_v48 }
 0x757   :  { %3071 = vmatpush.bf16.msrb.mxu3 %v6512_v47 }
 0x759   :  { %3225 = vmatpush.bf16.msrb.mxu1 %v6423_v4  ;;  %3218 = vmatpush.bf16.msrb.mxu0 %v6441_v46 }
 0x75b   :  { %3072 = vmatpush.bf16.msrb.mxu3 %v6525_v6 }
 0x75d   :  { %3226 = vmatpush.bf16.msrb.mxu1 %v6432_v32 }
 0x761   :  { %3227 = vmatpush.bf16.msrb.mxu1 %v6438_v59 }
 0x765   :  { %3228 = vmatpush.bf16.msrb.mxu1 %v6447_v1 }
 0x769   :  { %3229 = vmatpush.bf16.msrb.mxu1 %v6463_v58 }
 0x76d   :  { %3230 = vmatpush.bf16.msrb.mxu1 %v6466_v35 }
 0x771   :  { %3231 = vmatpush.bf16.msrb.mxu1 %v6473_v15 }
 0x775   :  { %3232 = vmatpush.bf16.msrb.mxu1 %v6477_v26 }
 0x7aa   :  { %v2127_v41 = vpop.f32.mrf.mxu2 }
 0x7ab   :  { %v2128_v3 = vadd.f32 %v4713_v18, %v2127_v41  ;;  %v2361_v25 = vpop.f32.mrf.mxu0 }
 0x7ac   :  { %v2362_v49 = vadd.f32 %v2361_v25, %v6593_v62 }
 0x7ad   :  { %v6515_v20 = vadd.f32 %v2128_v3, %v6428_v7  ;;  %v4604_v7 = vld [vmem:[%s7123_s27 + $0x8] sm:$0xff] }
 0x7ae   :  { %4408 = vmatmul.msk.bf16.gmra.mxu3 %vm283_vm1, %v4604_v7  ;;  %4416 = vmatmul.msk.bf16.gmra.mxu0 %vm283_vm1, %v4604_v7 }
 0x7af   :  { %4424 = vmatmul.msk.bf16.gmra.mxu1 %vm283_vm1, %v4604_v7 }
 0x7b1   :  { %v2312_v16 = vpop.f32.mrf.mxu3 }
 0x7b2   :  { %v2130_v22 = vpop.f32.mrf.mxu2  ;;  %v2313_v28 = vadd.f32 %v2312_v16, %v6596_v11  ;;  %v4610_v16 = vld [vmem:[%s7123_s27 + $0x38] sm:$0xff] }
 0x7b3   :  { %v2131_v8 = vadd.f32 %v4713_v18, %v2130_v22  ;;  %v2363_v30 = vpop.f32.mrf.mxu0 }
 0x7b4   :  { %v2450_v27 = vpack.c.bf16 %v2362_v49, %v2313_v28  ;;  %v2364_v45 = vadd.f32 %v2363_v30, %v6593_v62 }
 0x7b5   :  { %v6518_v14 = vadd.f32 %v2131_v8, %v6445_v36  ;;  %v4605_v36 = vld [vmem:[%s7123_s27 + $0x10] sm:$0xff]  ;;  %v2410_v33 = vpop.f32.mrf.mxu1  ;;  %s5202_s27 = smov 64  }
 0x7b6   :  { %v2411_v24 = vadd.f32 %v2410_v33, %v6614_v21  ;;  %v2554_v38 = vunpack.c.l.bf16 %v2450_v27  ;;  %v2555_v10 = vunpack.c.h.bf16 %v2450_v27 }
 0x7b7   :  { %v2560_v34 = vpack.c.bf16 %v6518_v14, %v6515_v20 }
 0x7b8   :  { %v2451_v41 = vpack.c.bf16 %v2411_v24, %v2411_v24 }
 0x7b9   :  { %2697 = vmatmul.bf16.vlgmr.msrb.gmra.mxu2 %v2560_v34  ;;  %v2314_v9 = vpop.f32.mrf.mxu3 }
 0x7ba   :  { %2717 = vmatpush.bf16.msrb.mxu2 %v6479_v13  ;;  %v2315_v37 = vadd.f32 %v2314_v9, %v6596_v11  ;;  %2483 = vst [vmem:[#allocation2 + $0x8] sm:$0xf] %v2451_v41 }
 0x7bc   :  { %v2452_v51 = vpack.c.bf16 %v2364_v45, %v2315_v37 }
 0x7bd   :  { %v2412_v61 = vpop.f32.mrf.mxu1 }
 0x7be   :  { %2718 = vmatpush.bf16.msrb.mxu2 %v6485_v12  ;;  %4409 = vmatmul.msk.bf16.gmra.mxu3 %vm283_vm1, %v4605_v36  ;;  %v2413_v19 = vadd.f32 %v2412_v61, %v6614_v21  ;;  %v2557_v18 = vunpack.c.l.bf16 %v2452_v51  ;;  %v2558_v28 = vunpack.c.h.bf16 %v2452_v51  ;;  %v6634_v51 = vld [vmem:[%s7083_s17] ss:$0 sm:$0xff] }
 0x7bf   :  { %4417 = vmatmul.msk.bf16.gmra.mxu0 %vm283_vm1, %v4605_v36  ;;  %4425 = vmatmul.msk.bf16.gmra.mxu1 %vm283_vm1, %v4605_v36 }
 0x7c0   :  { %v2453_v2 = vpack.c.bf16 %v2413_v19, %v2413_v19 }
 0x7c1   :  { %v2551_v19 = vld [vmem:[#allocation2 + $0x8] sm:$0xf] }
 0x7c2   :  { %2719 = vmatpush.bf16.msrb.mxu2 %v6489_v39  ;;  %2485 = vst [vmem:[#allocation2 + $0x14] sm:$0xf] %v2453_v2 }
 0x7c6   :  { %2720 = vmatpush.bf16.msrb.mxu2 %v6493_v57 }
 0x7c9   :  { %2711 = vmatmul.bf16.vlgmr.msra.gmra.mxu2 %v2560_v34 }
 0x7ca   :  { %2721 = vmatpush.bf16.msrb.mxu2 %v6497_v42 }
 0x7ce   :  { %2722 = vmatpush.bf16.msrb.mxu2 %v6505_v63  ;;  %4410 = vmatmul.msk.bf16.gmra.mxu3 %vm283_vm1, %v4606_v55 }
 0x7cf   :  { %4418 = vmatmul.msk.bf16.gmra.mxu0 %vm283_vm1, %v4606_v55  ;;  %4426 = vmatmul.msk.bf16.gmra.mxu1 %vm283_vm1, %v4606_v55 }
 0x7d2   :  { %2723 = vmatpush.bf16.msrb.mxu2 %v6512_v47 }
 0x7d6   :  { %2724 = vmatpush.bf16.msrb.mxu2 %v6525_v6 }
 0x7d9   :  { %2725 = vmatmul.bf16.vlgmr.msrb.gmra.mxu2 %v2560_v34 }
 0x7da   :  { %2863 = vmatpush.bf16.msra.mxu2 %v6405_v31 }
 0x7de   :  { %2864 = vmatpush.bf16.msra.mxu2 %v6408_v44  ;;  %4411 = vmatmul.msk.bf16.gmra.mxu3 %vm283_vm1, %v4607_v17 }
 0x7df   :  { %4419 = vmatmul.msk.bf16.gmra.mxu0 %vm283_vm1, %v4607_v17  ;;  %4427 = vmatmul.msk.bf16.gmra.mxu1 %vm283_vm1, %v4607_v17 }
 0x7e2   :  { %2865 = vmatpush.bf16.msra.mxu2 %v6411_v43 }
 0x7e6   :  { %2866 = vmatpush.bf16.msra.mxu2 %v6414_v0 }
 0x7ea   :  { %2867 = vmatpush.bf16.msra.mxu2 %v6420_v23 }
 0x7ee   :  { %2868 = vmatpush.bf16.msra.mxu2 %v6425_v54  ;;  %4412 = vmatmul.msk.bf16.gmra.mxu3 %vm283_vm1, %v4608_v29 }
 0x7ef   :  { %4420 = vmatmul.msk.bf16.gmra.mxu0 %vm283_vm1, %v4608_v29  ;;  %4428 = vmatmul.msk.bf16.gmra.mxu1 %vm283_vm1, %v4608_v29 }
 0x7f2   :  { %2869 = vmatpush.bf16.msra.mxu2 %v6435_v48 }
 0x7f6   :  { %2870 = vmatpush.bf16.msra.mxu2 %v6441_v46 }
 0x7fa   :  { %3051 = vmatpush.bf16.msrb.mxu2 %v6423_v4 }
 0x7fe   :  { %3052 = vmatpush.bf16.msrb.mxu2 %v6432_v32  ;;  %4413 = vmatmul.msk.bf16.gmra.mxu3 %vm283_vm1, %v4609_v5 }
 0x7ff   :  { %4421 = vmatmul.msk.bf16.gmra.mxu0 %vm283_vm1, %v4609_v5  ;;  %4429 = vmatmul.msk.bf16.gmra.mxu1 %vm283_vm1, %v4609_v5 }
 0x802   :  { %3053 = vmatpush.bf16.msrb.mxu2 %v6438_v59 }
 0x806   :  { %3054 = vmatpush.bf16.msrb.mxu2 %v6447_v1 }
 0x80a   :  { %3055 = vmatpush.bf16.msrb.mxu2 %v6463_v58 }
 0x80e   :  { %3056 = vmatpush.bf16.msrb.mxu2 %v6466_v35  ;;  %4414 = vmatmul.msk.bf16.gmra.mxu3 %vm283_vm1, %v4610_v16 }
 0x80f   :  { %4422 = vmatmul.msk.bf16.gmra.mxu0 %vm283_vm1, %v4610_v16  ;;  %4430 = vmatmul.msk.bf16.gmra.mxu1 %vm283_vm1, %v4610_v16 }
 0x812   :  { %3057 = vmatpush.bf16.msrb.mxu2 %v6473_v15 }
 0x816   :  { %3058 = vmatpush.bf16.msrb.mxu2 %v6477_v26 }
 0x83c   :  { %v2698_v56 = vpop.f32.mrf.mxu2 }
 0x83d   :  { %v2731_v60 = vadd.f32 %v2698_v56, %v2554_v38 }
 0x83f   :  { %v4527_v52 = vmul.f32 -1.442695, %v2731_v60 }
 0x841   :  { %4875 = vpow2.f32 %v4527_v52 }
 0x844   :  { %v2700_v40 = vpop.f32.mrf.mxu2 }
 0x845   :  { %v2732_v3 = vadd.f32 %v2700_v40, %v2557_v18  ;;  %v2556_v40 = vunpack.c.l.bf16 %v2551_v19 }
 0x847   :  { %v4876_v22 = vpop.eup %4875  ;;  %v4528_v8 = vmul.f32 -1.442695, %v2732_v3 }
 0x848   :  { %v2739_v50 = vadd.f32 1.0, %v4876_v22 }
 0x849   :  { %4877 = vpow2.f32 %v4528_v8 }
 0x84a   :  { %4879 = vrcp.f32 %v2739_v50  ;;  %v2752_v41 = vand.u32 2147483648, %v2739_v50  ;;  %vm2746_vm0 = vweird.f32 %v2739_v50  ;;  %v2750_v61 = vand.u32 2147483647, %v2739_v50 }
 0x84c   :  { %v2712_v34 = vpop.f32.mrf.mxu2  ;;  %v2753_v52 = vor.u32 1.1754944e-38, %v2752_v41  ;;  %vm2751_vm2 = vcmp.eq.f32.partialorder %v2750_v61, 8.507059e+37  ;;  %v2553_v61 = vld [vmem:[#allocation2 + $0x14] sm:$0xf] }
 0x84d   :  { %v2771_v7 = vadd.f32 %v2712_v34, %v2555_v10 }
 0x84f   :  { %v4878_v36 = vpop.eup %4877  ;;  %v4529_v55 = vmul.f32 -1.442695, %v2771_v7 }
 0x850   :  { %v4880_v53 = vpop.eup %4879  ;;  %v2740_v25 = vadd.f32 1.0, %v4878_v36 }
 0x851   :  { %4881 = vpow2.f32 %v4529_v55  ;;  %v2742_v49 = vmul.f32 %v4880_v53, %v2739_v50  ;;  %vm2747_vm15 = vweird.f32 %v4880_v53 }
 0x852   :  { %4883 = vrcp.f32 %v2740_v25  ;;  %vm2748_vm1 = vmor %vm2746_vm0, %vm2747_vm15  ;;  %v2765_v7 = vand.u32 2147483647, %v2740_v25  ;;  %v2767_v36 = vand.u32 2147483648, %v2740_v25  ;;  %vm2761_vm4 = vweird.f32 %v2740_v25 }
 0x853   :  { %v2743_v30 = vsub.f32 1.0, %v2742_v49  ;;  %v2317_v49 = vpop.f32.mrf.mxu3 }
 0x854   :  { %v2714_v27 = vpop.f32.mrf.mxu2  ;;  %vm2766_vm6 = vcmp.eq.f32.partialorder %v2765_v7, 8.507059e+37 }
 0x855   :  { %v2772_v45 = vadd.f32 %v2714_v27, %v2558_v28  ;;  %v2744_v9 = vmul.f32 %v4880_v53, %v2743_v30 }
 0x857   :  { %v4882_v37 = vpop.eup %4881  ;;  %v4530_v17 = vmul.f32 -1.442695, %v2772_v45  ;;  %v2745_v33 = vadd.f32 %v4880_v53, %v2744_v9 }
 0x858   :  { %v4884_v29 = vpop.eup %4883  ;;  %v2779_v24 = vadd.f32 1.0, %v4882_v37 }
 0x859   :  { %4885 = vpow2.f32 %v4530_v17  ;;  %v2757_v38 = vmul.f32 %v4884_v29, %v2740_v25  ;;  %v2749_v2 = vsel %vm2748_vm1, %v4880_v53, %v2745_v33  ;;  %vm2762_vm3 = vweird.f32 %v4884_v29  ;;  %v2366_v53 = vpop.f32.mrf.mxu0 }
 0x85a   :  { %4887 = vrcp.f32 %v2779_v24  ;;  %v2754_v3 = vsel %vm2751_vm2, %v2753_v52, %v2749_v2  ;;  %vm6637_vm5 = vmor %vm2761_vm4, %vm2762_vm3  ;;  %v2367_v45 = vadd.f32 %v2366_v53, %v6593_v62  ;;  %v2792_v9 = vand.u32 2147483648, %v2779_v24 }
 0x85b   :  { %v2758_v56 = vsub.f32 1.0, %v2757_v38  ;;  %v2768_v17 = vor.u32 1.1754944e-38, %v2767_v36  ;;  %v2318_v25 = vadd.f32 %v2317_v49, %v6596_v11  ;;  %v2790_v41 = vand.u32 2147483647, %v2779_v24 }
 0x85c   :  { %v2726_v60 = vpop.f32.mrf.mxu2  ;;  %vm2786_vm8 = vweird.f32 %v2779_v24  ;;  %v2793_v52 = vor.u32 1.1754944e-38, %v2792_v9 }
 0x85d   :  { %v2811_v18 = vadd.f32 %v6634_v51, %v2726_v60  ;;  %v2759_v5 = vmul.f32 %v4884_v29, %v2758_v56  ;;  %v6646_v2 = vpack.c.bf16 %v2367_v45, %v2318_v25  ;;  %vm2791_vm10 = vcmp.eq.f32.partialorder %v2790_v41, 8.507059e+37 }
 0x85f   :  { %v4886_v22 = vpop.eup %4885  ;;  %v2813_v8 = vmul.f32 %v2811_v18, %v2754_v3  ;;  %v2760_v10 = vadd.f32 %v4884_v29, %v2759_v5  ;;  %v2559_v18 = vunpack.c.l.bf16 %v2553_v61 }
 0x860   :  { %v4888_v34 = vpop.eup %4887  ;;  %v2780_v50 = vadd.f32 1.0, %v4886_v22  ;;  %v2319_v22 = vpop.f32.mrf.mxu3 }
 0x861   :  { %v2782_v55 = vmul.f32 %v4888_v34, %v2779_v24  ;;  %v2815_v16 = vadd.f32 %v2813_v8, %v2556_v40  ;;  %v2764_v27 = vsel %vm6637_vm5, %v4884_v29, %v2760_v10  ;;  %vm2787_vm7 = vweird.f32 %v4888_v34  ;;  %v2368_v3 = vpop.f32.mrf.mxu0 }
 0x862   :  { %4889 = vrcp.f32 %v2780_v50  ;;  %v2769_v19 = vsel %vm2766_vm6, %v2768_v17, %v2764_v27  ;;  %vm2788_vm9 = vmor %vm2786_vm8, %vm2787_vm7  ;;  %v2369_v7 = vadd.f32 %v2368_v3, %v6593_v62  ;;  %v2320_v36 = vadd.f32 %v2319_v22, %v6596_v11 }
 0x863   :  { %v2783_v30 = vsub.f32 1.0, %v2782_v55  ;;  %4891 = vtanh.f32 %v2815_v16  ;;  %v2807_v24 = vand.u32 2147483648, %v2780_v50  ;;  %vm2801_vm12 = vweird.f32 %v2780_v50 }
 0x864   :  { %v2728_v37 = vpop.f32.mrf.mxu2  ;;  %v6650_v16 = vpack.c.bf16 %v2369_v7, %v2320_v36 }
 0x865   :  { %v2784_v33 = vmul.f32 %v4888_v34, %v2783_v30  ;;  %v2812_v38 = vadd.f32 %v6634_v51, %v2728_v37  ;;  %v2805_v30 = vand.u32 2147483647, %v2780_v50  ;;  %v2808_v9 = vor.u32 1.1754944e-38, %v2807_v24 }
 0x867   :  { %v2785_v56 = vadd.f32 %v4888_v34, %v2784_v33  ;;  %v2814_v29 = vmul.f32 %v2812_v38, %v2769_v19  ;;  %vm2806_vm14 = vcmp.eq.f32.partialorder %v2805_v30, 8.507059e+37  ;;  %v2835_v19 = vpop.permute.xlu1 %2834 }
 0x868   :  { %v4890_v60 = vpop.eup %4889  ;;  %v2322_v33 = vpop.f32.mrf.mxu3  ;;  %vm2839_vm15 = vcmp.eq.s32.totalorder %v2835_v19, 1 }
 0x869   :  { %v2797_v5 = vmul.f32 %v4890_v60, %v2780_v50  ;;  %v2789_v40 = vsel %vm2788_vm9, %v4888_v34, %v2785_v56  ;;  %v2816_v10 = vadd.f32 %v2814_v29, %v2559_v18  ;;  %v4892_v49 = vpop.eup %4891  ;;  %vm2802_vm11 = vweird.f32 %v4890_v60  ;;  %v2371_v25 = vpop.f32.mrf.mxu0 }
 0x86a   :  { %v2794_v8 = vsel %vm2791_vm10, %v2793_v52, %v2789_v40  ;;  %vm2803_vm13 = vmor %vm2801_vm12, %vm2802_vm11  ;;  %v2372_v61 = vadd.f32 %v2371_v25, %v6593_v62  ;;  %v2323_v38 = vadd.f32 %v2322_v33, %v6596_v11 }
 0x86b   :  { %v2798_v55 = vsub.f32 1.0, %v2797_v5  ;;  %v2819_v53 = vsub.f32 1.0, %v2794_v8  ;;  %4893 = vtanh.f32 %v2816_v10  ;;  %v2823_v45 = vmul.f32 %v2794_v8, %v6515_v20 }
 0x86c   :  { %v6655_v52 = vpack.c.bf16 %v2372_v61, %v2323_v38 }
 0x86d   :  { %v2799_v28 = vmul.f32 %v4890_v60, %v2798_v55  ;;  %v2821_v27 = vmul.f32 %v4892_v49, %v2819_v53 }
 0x86f   :  { %v2800_v34 = vadd.f32 %v4890_v60, %v2799_v28  ;;  %v2825_v37 = vadd.f32 %v2823_v45, %v2821_v27 }
 0x870   :  { %v2324_v10 = vpop.f32.mrf.mxu3 }
 0x871   :  { %v2804_v17 = vsel %vm2803_vm13, %v4890_v60, %v2800_v34  ;;  %v4894_v29 = vpop.eup %4893  ;;  %v6659_v5 = vsel %vm2839_vm15, %v2825_v37, %v6515_v20  ;;  %v2838_v60 = vpop.permute.xlu2 %2837  ;;  %v2325_v55 = vadd.f32 %v2324_v10, %v6596_v11 }
 0x872   :  { %v2809_v41 = vsel %vm2806_vm14, %v2808_v9, %v2804_v17  ;;  %vm2840_vm0 = vcmp.eq.s32.totalorder %v2838_v60, 1  ;;  %v2843_v3 = vpack.c.bf16 %v6659_v5, %v6659_v5  ;;  %v2373_v8 = vpop.f32.mrf.mxu0 }
 0x873   :  { %v2820_v56 = vsub.f32 1.0, %v2809_v41  ;;  %v2824_v18 = vmul.f32 %v2809_v41, %v6518_v14  ;;  %v2374_v20 = vadd.f32 %v2373_v8, %v6593_v62 }
 0x874   :  { %v2859_v53 = vunpack.c.l.b16 %v2843_v3 }
 0x875   :  { %v2822_v50 = vmul.f32 %v4894_v29, %v2820_v56  ;;  %v6672_v24 = vpack.c.bf16 %v2374_v20, %v2325_v55 }
 0x877   :  { %v2826_v40 = vadd.f32 %v2824_v18, %v2822_v50 }
 0x878   :  { %v2327_v30 = vpop.f32.mrf.mxu3 }
 0x879   :  { %v6664_v22 = vsel %vm2840_vm0, %v2826_v40, %v6518_v14  ;;  %v2328_v34 = vadd.f32 %v2327_v30, %v6596_v11 }
 0x87a   :  { %v2844_v7 = vpack.c.bf16 %v6664_v22, %v6664_v22  ;;  %v4650_v36 = vpack.c.bf16 %v6664_v22, %v6659_v5  ;;  %v2376_v14 = vpop.f32.mrf.mxu0 }
 0x87b   :  { %v2377_v27 = vadd.f32 %v2376_v14, %v6593_v62 }
 0x87c   :  { %4651 = vst [vmem:[#allocation12] sm:$0xff] %v4650_v36   ;;  %v2860_v49 = vunpack.c.l.b16 %v2844_v7 }
 0x87d   :  { %v6679_v45 = vpack.c.bf16 %v2377_v27, %v2328_v34 }
 0x87e   :  { %v2861_v28 = vpack.c.b16 %v2860_v49, %v2859_v53 }
 0x880   :  { %2871 = vmatmul.bf16.vlgmr.msra.gmra.mxu2 %v2861_v28  ;;  %2885 = vmatmul.bf16.vlgmr.msra.gmra.mxu3 %v2861_v28  ;;  %v2329_v37 = vpop.f32.mrf.mxu3 }
 0x881   :  { %2899 = vmatmul.bf16.vlgmr.msra.gmra.mxu0 %v2861_v28  ;;  %3239 = vmatpush.bf16.msra.mxu2 %v6479_v13  ;;  %v2330_v25 = vadd.f32 %v2329_v37, %v6596_v11 }
 0x882   :  { %3385 = vmatpush.bf16.msra.mxu3 %v6405_v31  ;;  %3399 = vmatpush.bf16.msra.mxu0 %v6423_v4  ;;  %v2378_v9 = vpop.f32.mrf.mxu0 }
 0x883   :  { %v2379_v17 = vadd.f32 %v2378_v9, %v6593_v62 }
 0x885   :  { %3240 = vmatpush.bf16.msra.mxu2 %v6485_v12  ;;  %v6689_v33 = vpack.c.bf16 %v2379_v17, %v2330_v25 }
 0x886   :  { %3386 = vmatpush.bf16.msra.mxu3 %v6408_v44  ;;  %3400 = vmatpush.bf16.msra.mxu0 %v6432_v32 }
 0x887   :  { %2496 = vst [vmem:[#allocation2 + $0x54] sm:$0xff] %v6689_v33 }
 0x888   :  { %v2332_v38 = vpop.f32.mrf.mxu3 }
 0x889   :  { %3241 = vmatpush.bf16.msra.mxu2 %v6489_v39  ;;  %v2333_v19 = vadd.f32 %v2332_v38, %v6596_v11 }
 0x88a   :  { %3387 = vmatpush.bf16.msra.mxu3 %v6411_v43  ;;  %3401 = vmatpush.bf16.msra.mxu0 %v6438_v59  ;;  %v2381_v41 = vpop.f32.mrf.mxu0 }
 0x88b   :  { %v2382_v61 = vadd.f32 %v2381_v41, %v6593_v62 }
 0x88d   :  { %3242 = vmatpush.bf16.msra.mxu2 %v6493_v57  ;;  %v2466_v29 = vpack.c.bf16 %v2382_v61, %v2333_v19 }
 0x88e   :  { %3388 = vmatpush.bf16.msra.mxu3 %v6414_v0  ;;  %3402 = vmatpush.bf16.msra.mxu0 %v6447_v1 }
 0x88f   :  { %2498 = vst [vmem:[#allocation2 + $0x60] sm:$0xff] %v2466_v29 }
 0x890   :  { %v2334_v18 = vpop.f32.mrf.mxu3 }
 0x891   :  { %3243 = vmatpush.bf16.msra.mxu2 %v6497_v42  ;;  %v2335_v60 = vadd.f32 %v2334_v18, %v6596_v11 }
 0x892   :  { %3389 = vmatpush.bf16.msra.mxu3 %v6420_v23  ;;  %3403 = vmatpush.bf16.msra.mxu0 %v6463_v58  ;;  %v2383_v56 = vpop.f32.mrf.mxu0 }
 0x893   :  { %v2384_v50 = vadd.f32 %v2383_v56, %v6593_v62 }
 0x895   :  { %3244 = vmatpush.bf16.msra.mxu2 %v6505_v63  ;;  %v2468_v3 = vpack.c.bf16 %v2384_v50, %v2335_v60 }
 0x896   :  { %3390 = vmatpush.bf16.msra.mxu3 %v6425_v54  ;;  %3404 = vmatpush.bf16.msra.mxu0 %v6466_v35 }
 0x897   :  { %2500 = vst [vmem:[#allocation2 + $0x6c] sm:$0xff] %v2468_v3 }
 0x898   :  { %v2337_v10 = vpop.f32.mrf.mxu3 }
 0x899   :  { %3245 = vmatpush.bf16.msra.mxu2 %v6512_v47  ;;  %v2338_v7 = vadd.f32 %v2337_v10, %v6596_v11  ;;  %v2415_v10 = vpop.f32.mrf.mxu1 }
 0x89a   :  { %3391 = vmatpush.bf16.msra.mxu3 %v6435_v48  ;;  %3405 = vmatpush.bf16.msra.mxu0 %v6473_v15  ;;  %v2386_v40 = vpop.f32.mrf.mxu0 }
 0x89b   :  { %v2387_v8 = vadd.f32 %v2386_v40, %v6593_v62 }
 0x89d   :  { %3246 = vmatpush.bf16.msra.mxu2 %v6525_v6  ;;  %v2470_v20 = vpack.c.bf16 %v2387_v8, %v2338_v7 }
 0x89e   :  { %3392 = vmatpush.bf16.msra.mxu3 %v6441_v46  ;;  %3406 = vmatpush.bf16.msra.mxu0 %v6477_v26 }
 0x89f   :  { %2502 = vst [vmem:[#allocation2 + $0x78] sm:$0xff] %v2470_v20 }
 0x8a0   :  { %v2339_v53 = vpop.f32.mrf.mxu3 }
 0x8a1   :  { %v2340_v49 = vadd.f32 %v2339_v53, %v6596_v11  ;;  %v2417_v7 = vpop.f32.mrf.mxu1 }
 0x8a2   :  { %v2388_v36 = vpop.f32.mrf.mxu0  ;;  %v2418_v20 = vadd.f32 %v2417_v7, %v6614_v21 }
 0x8a3   :  { %v2389_v55 = vadd.f32 %v2388_v36, %v6593_v62  ;;  %v2416_v36 = vadd.f32 %v2415_v10, %v6614_v21 }
 0x8a4   :  { %v2457_v53 = vpack.c.bf16 %v2418_v20, %v2418_v20 }
 0x8a5   :  { %v2472_v14 = vpack.c.bf16 %v2389_v55, %v2340_v49  ;;  %v2455_v55 = vpack.c.bf16 %v2416_v36, %v2416_v36  ;;  %v2851_v49 = vunpack.c.l.bf16 %v6646_v2 }
 0x8a6   :  { %2489 = vst [vmem:[#allocation2 + $0x2c] sm:$0xf] %v2457_v53 }
 0x8a7   :  { %2504 = vst [vmem:[#allocation2 + $0x84] sm:$0xff] %v2472_v14 }
 0x8a8   :  { %v2342_v27 = vpop.f32.mrf.mxu3  ;;  %2487 = vst [vmem:[#allocation2 + $0x20] sm:$0xf] %v2455_v55 }
 0x8a9   :  { %v2343_v34 = vadd.f32 %v2342_v27, %v6596_v11 }
 0x8aa   :  { %v2391_v28 = vpop.f32.mrf.mxu0 }
 0x8ab   :  { %v2392_v30 = vadd.f32 %v2391_v28, %v6593_v62  ;;  %v2852_v28 = vunpack.c.h.bf16 %v6646_v2 }
 0x8ad   :  { %v2474_v37 = vpack.c.bf16 %v2392_v30, %v2343_v34 }
 0x8af   :  { %2506 = vst [vmem:[#allocation2 + $0x90] sm:$0xff] %v2474_v37  ;;  %v2855_v37 = vunpack.c.h.bf16 %v6650_v16 }
 0x8b0   :  { %v2344_v25 = vpop.f32.mrf.mxu3 }
 0x8b1   :  { %v2345_v41 = vadd.f32 %v2344_v25, %v6596_v11 }
 0x8b2   :  { %v2393_v9 = vpop.f32.mrf.mxu0 }
 0x8b3   :  { %v2394_v17 = vadd.f32 %v2393_v9, %v6593_v62  ;;  %v2854_v9 = vunpack.c.l.bf16 %v6650_v16 }
 0x8b5   :  { %v2476_v61 = vpack.c.bf16 %v2394_v17, %v2345_v41 }
 0x8b7   :  { %2508 = vst [vmem:[#allocation2 + $0x9c] sm:$0xff] %v2476_v61 }
 0x8b8   :  { %v2347_v56 = vpop.f32.mrf.mxu3 }
 0x8b9   :  { %v2348_v29 = vadd.f32 %v2347_v56, %v6596_v11 }
 0x8ba   :  { %v2396_v38 = vpop.f32.mrf.mxu0 }
 0x8bb   :  { %v2397_v19 = vadd.f32 %v2396_v38, %v6593_v62 }
 0x8bd   :  { %v2478_v50 = vpack.c.bf16 %v2397_v19, %v2348_v29 }
 0x8bf   :  { %2510 = vst [vmem:[#allocation2 + $0xa8] sm:$0xff] %v2478_v50 }
 0x8c0   :  { %v2349_v40 = vpop.f32.mrf.mxu3 }
 0x8c1   :  { %v2350_v3 = vadd.f32 %v2349_v40, %v6596_v11 }
 0x8c2   :  { %v2398_v18 = vpop.f32.mrf.mxu0 }
 0x8c3   :  { %v2399_v60 = vadd.f32 %v2398_v18, %v6593_v62 }
 0x8c5   :  { %v2480_v8 = vpack.c.bf16 %v2399_v60, %v2350_v3 }
 0x8c7   :  { %2512 = vst [vmem:[#allocation2 + $0xb4] sm:$0xff] %v2480_v8 }
 0x8fe   :  { %v2900_v20 = vpop.f32.mrf.mxu0 }
 0x903   :  { %v2872_v62 = vpop.f32.mrf.mxu2  ;;  %v2886_v14 = vpop.f32.mrf.mxu3 }
 0x904   :  { %v2905_v30 = vadd.f32 %v2872_v62, %v2851_v49  ;;  %v2945_v11 = vadd.f32 %v2886_v14, %v2852_v28  ;;  %v2848_v14 = vld [vmem:[#allocation2 + $0x20] sm:$0xf] }
 0x906   :  { %v4531_v27 = vmul.f32 -1.442695, %v2905_v30  ;;  %v4533_v34 = vmul.f32 -1.442695, %v2945_v11 }
 0x908   :  { %4895 = vpow2.f32 %v4531_v27  ;;  %v2985_v27 = vadd.f32 %v6634_v51, %v2900_v20 }
 0x909   :  { %4897 = vpow2.f32 %v4533_v34 }
 0x90b   :  { %v2874_v17 = vpop.f32.mrf.mxu2  ;;  %v2888_v25 = vpop.f32.mrf.mxu3 }
 0x90c   :  { %v2906_v41 = vadd.f32 %v2874_v17, %v2854_v9  ;;  %v2946_v61 = vadd.f32 %v2888_v25, %v2855_v37  ;;  %v2853_v17 = vunpack.c.l.bf16 %v2848_v14 }
 0x90e   :  { %v4896_v38 = vpop.eup %4895  ;;  %v4532_v19 = vmul.f32 -1.442695, %v2906_v41  ;;  %v4534_v29 = vmul.f32 -1.442695, %v2946_v61  ;;  %v2420_v61 = vpop.f32.mrf.mxu1 }
 0x90f   :  { %v4898_v56 = vpop.eup %4897  ;;  %v2913_v2 = vadd.f32 1.0, %v4896_v38 }
 0x910   :  { %v2953_v50 = vadd.f32 1.0, %v4898_v56  ;;  %4899 = vpow2.f32 %v4532_v19 }
 0x911   :  { %4901 = vrcp.f32 %v2913_v2  ;;  %v2926_v55 = vand.u32 2147483648, %v2913_v2  ;;  %v2924_v28 = vand.u32 2147483647, %v2913_v2  ;;  %vm2920_vm2 = vweird.f32 %v2913_v2 }
 0x912   :  { %4903 = vrcp.f32 %v2953_v50  ;;  %vm2960_vm5 = vweird.f32 %v2953_v50  ;;  %v2966_v56 = vand.u32 2147483648, %v2953_v50 }
 0x913   :  { %4905 = vpow2.f32 %v4534_v29  ;;  %v2927_v34 = vor.u32 1.1754944e-38, %v2926_v55  ;;  %vm2925_vm4 = vcmp.eq.f32.partialorder %v2924_v28, 8.507059e+37 }
 0x916   :  { %v4900_v18 = vpop.eup %4899 }
 0x917   :  { %v4902_v60 = vpop.eup %4901  ;;  %v6729_v40 = vadd.f32 1.0, %v4900_v18  ;;  %v2964_v18 = vand.u32 2147483647, %v2953_v50 }
 0x918   :  { %v4904_v3 = vpop.eup %4903  ;;  %v2916_v16 = vmul.f32 %v4902_v60, %v2913_v2  ;;  %vm2921_vm1 = vweird.f32 %v4902_v60  ;;  %v2421_v2 = vadd.f32 %v2420_v61, %v6614_v21 }
 0x919   :  { %v4906_v8 = vpop.eup %4905  ;;  %v2956_v10 = vmul.f32 %v4904_v3, %v2953_v50  ;;  %4907 = vrcp.f32 %v6729_v40  ;;  %vm2922_vm3 = vmor %vm2920_vm2, %vm2921_vm1  ;;  %vm2961_vm6 = vweird.f32 %v4904_v3  ;;  %v2967_v50 = vor.u32 1.1754944e-38, %v2966_v56 }
 0x91a   :  { %v2917_v7 = vsub.f32 1.0, %v2916_v16  ;;  %v6732_v36 = vadd.f32 1.0, %v4906_v8  ;;  %v2939_v16 = vand.u32 2147483647, %v6729_v40  ;;  %vm6741_vm7 = vmor %vm2960_vm5, %vm2961_vm6  ;;  %v2459_v55 = vpack.c.bf16 %v2421_v2, %v2421_v2 }
 0x91b   :  { %v2957_v53 = vsub.f32 1.0, %v2956_v10  ;;  %vm2935_vm9 = vweird.f32 %v6729_v40  ;;  %vm2965_vm10 = vcmp.eq.f32.partialorder %v2964_v18, 8.507059e+37 }
 0x91c   :  { %v2918_v49 = vmul.f32 %v4902_v60, %v2917_v7  ;;  %4909 = vrcp.f32 %v6732_v36  ;;  %2491 = vst [vmem:[#allocation2 + $0x38] sm:$0xf] %v2459_v55  ;;  %vm2940_vm12 = vcmp.eq.f32.partialorder %v2939_v16, 8.507059e+37  ;;  %v2981_v61 = vand.u32 2147483648, %v6732_v36 }
 0x91d   :  { %v2958_v62 = vmul.f32 %v4904_v3, %v2957_v53  ;;  %vm2975_vm14 = vweird.f32 %v6732_v36 }
 0x91e   :  { %v2919_v30 = vadd.f32 %v4902_v60, %v2918_v49  ;;  %v2902_v49 = vpop.f32.mrf.mxu0 }
 0x91f   :  { %v4908_v11 = vpop.eup %4907  ;;  %v2959_v41 = vadd.f32 %v4904_v3, %v2958_v62 }
 0x920   :  { %v2923_v9 = vsel %vm2922_vm3, %v4902_v60, %v2919_v30  ;;  %v2931_v37 = vmul.f32 %v4908_v11, %v6729_v40  ;;  %v2941_v60 = vand.u32 2147483648, %v6729_v40  ;;  %vm2936_vm8 = vweird.f32 %v4908_v11 }
 0x921   :  { %v2928_v25 = vsel %vm2925_vm4, %v2927_v34, %v2923_v9  ;;  %v2963_v53 = vsel %vm6741_vm7, %v4904_v3, %v2959_v41  ;;  %vm2937_vm11 = vmor %vm2935_vm9, %vm2936_vm8  ;;  %v2986_v9 = vadd.f32 %v6634_v51, %v2902_v49  ;;  %v3009_v49 = vpop.permute.xlu0 %3008 }
 0x922   :  { %v4910_v38 = vpop.eup %4909  ;;  %v2987_v19 = vmul.f32 %v2985_v27, %v2928_v25  ;;  %v2932_v29 = vsub.f32 1.0, %v2931_v37  ;;  %v2942_v14 = vor.u32 1.1754944e-38, %v2941_v60  ;;  %v2850_v27 = vld [vmem:[#allocation2 + $0x2c] sm:$0xf]  ;;  %v2968_v34 = vsel %vm2965_vm10, %v2967_v50, %v2963_v53  ;;  %v2422_v25 = vpop.f32.mrf.mxu1 }
 0x923   :  { %v2971_v8 = vmul.f32 %v4910_v38, %v6732_v36  ;;  %vm2976_vm13 = vweird.f32 %v4910_v38  ;;  %v2856_v40 = vunpack.c.l.bf16 %v2850_v27  ;;  %v2993_v56 = vsub.f32 1.0, %v2968_v34 }
 0x924   :  { %v2933_v7 = vmul.f32 %v4908_v11, %v2932_v29  ;;  %v2989_v20 = vadd.f32 %v2987_v19, %v2853_v17  ;;  %v2423_v19 = vadd.f32 %v2422_v25, %v6614_v21  ;;  %v2979_v29 = vand.u32 2147483647, %v6732_v36  ;;  %vm2977_vm15 = vmor %vm2975_vm14, %vm2976_vm13 }
 0x925   :  { %v2972_v28 = vsub.f32 1.0, %v2971_v8  ;;  %v2982_v8 = vor.u32 1.1754944e-38, %v2981_v61  ;;  %v2997_v10 = vmul.f32 %v2968_v34, %v6659_v5  ;;  %vm3013_vm1 = vcmp.eq.s32.totalorder %v3009_v49, 1 }
 0x926   :  { %v2934_v62 = vadd.f32 %v4908_v11, %v2933_v7  ;;  %4911 = vtanh.f32 %v2989_v20  ;;  %vm2980_vm0 = vcmp.eq.f32.partialorder %v2979_v29, 8.507059e+37 }
 0x927   :  { %v2973_v30 = vmul.f32 %v4910_v38, %v2972_v28 }
 0x928   :  { %v2938_v37 = vsel %vm2937_vm11, %v4908_v11, %v2934_v62  ;;  %v2461_v11 = vpack.c.bf16 %v2423_v19, %v2423_v19 }
 0x929   :  { %v2943_v17 = vsel %vm2940_vm12, %v2942_v14, %v2938_v37  ;;  %v2974_v3 = vadd.f32 %v4910_v38, %v2973_v30  ;;  %v3012_v30 = vpop.permute.xlu1 %3011 }
 0x92a   :  { %v2988_v41 = vmul.f32 %v2986_v9, %v2943_v17  ;;  %2493 = vst [vmem:[#allocation2 + $0x44] sm:$0xf] %v2461_v11  ;;  %v2425_v55 = vpop.f32.mrf.mxu1  ;;  %vm3014_vm2 = vcmp.eq.s32.totalorder %v3012_v30, 1 }
 0x92b   :  { %v2978_v16 = vsel %vm2977_vm15, %v4910_v38, %v2974_v3  ;;  %v2426_v53 = vadd.f32 %v2425_v55, %v6614_v21 }
 0x92c   :  { %v4912_v2 = vpop.eup %4911  ;;  %v2990_v18 = vadd.f32 %v2988_v41, %v2856_v40  ;;  %v2983_v7 = vsel %vm2980_vm0, %v2982_v8, %v2978_v16 }
 0x92d   :  { %v2995_v60 = vmul.f32 %v4912_v2, %v2993_v56  ;;  %v2994_v28 = vsub.f32 1.0, %v2983_v7  ;;  %v2463_v50 = vpack.c.bf16 %v2426_v53, %v2426_v53  ;;  %v2998_v62 = vmul.f32 %v2983_v7, %v6664_v22 }
 0x92e   :  { %4913 = vtanh.f32 %v2990_v18 }
 0x92f   :  { %v2999_v20 = vadd.f32 %v2997_v10, %v2995_v60  ;;  %2495 = vst [vmem:[#allocation2 + $0x50] sm:$0xf] %v2463_v50 }
 0x931   :  { %v6757_v14 = vsel %vm3013_vm1, %v2999_v20, %v6659_v5 }
 0x932   :  { %v3017_v34 = vpack.c.bf16 %v6757_v14, %v6757_v14  ;;  %v2427_v37 = vpop.f32.mrf.mxu1 }
 0x933   :  { %v2428_v5 = vadd.f32 %v2427_v37, %v6614_v21  ;;  %v3025_v37 = vunpack.c.l.bf16 %v6655_v52 }
 0x934   :  { %v4914_v36 = vpop.eup %4913  ;;  %v3033_v25 = vunpack.c.l.b16 %v3017_v34 }
 0x935   :  { %v2996_v38 = vmul.f32 %v4914_v36, %v2994_v28  ;;  %v2465_v61 = vpack.c.bf16 %v2428_v5, %v2428_v5 }
 0x937   :  { %v3000_v27 = vadd.f32 %v2998_v62, %v2996_v38  ;;  %2497 = vst [vmem:[#allocation2 + $0x5c] sm:$0xf] %v2465_v61 }
 0x939   :  { %v6762_v9 = vsel %vm3014_vm2, %v3000_v27, %v6664_v22 }
 0x93a   :  { %v3018_v17 = vpack.c.bf16 %v6762_v9, %v6762_v9  ;;  %v4655_v3 = vpack.c.bf16 %v6762_v9, %v6757_v14  ;;  %v2430_v22 = vpop.f32.mrf.mxu1 }
 0x93b   :  { %v2431_v19 = vadd.f32 %v2430_v22, %v6614_v21 }
 0x93c   :  { %4687 = vst [vmem:[#allocation12 + $0x8] sm:$0xff] %v4655_v3   ;;  %v3034_v41 = vunpack.c.l.b16 %v3018_v17 }
 0x93d   :  { %v2467_v56 = vpack.c.bf16 %v2431_v19, %v2431_v19 }
 0x93e   :  { %v3035_v40 = vpack.c.b16 %v3034_v41, %v3033_v25  ;;  %v3026_v25 = vunpack.c.h.bf16 %v6655_v52 }
 0x93f   :  { %2499 = vst [vmem:[#allocation2 + $0x68] sm:$0xf] %v2467_v56 }
 0x940   :  { %3045 = vmatmul.bf16.vlgmr.msra.gmra.mxu1 %v3035_v40  ;;  %3059 = vmatmul.bf16.vlgmr.msrb.gmra.mxu2 %v3035_v40 }
 0x941   :  { %3073 = vmatmul.bf16.vlgmr.msrb.gmra.mxu3 %v3035_v40  ;;  %3413 = vmatpush.bf16.msra.mxu1 %v6479_v13  ;;  %v3028_v40 = vunpack.c.l.bf16 %v6672_v24 }
 0x942   :  { %3559 = vmatpush.bf16.msrb.mxu2 %v6405_v31  ;;  %3573 = vmatpush.bf16.msrb.mxu3 %v6423_v4  ;;  %v2432_v29 = vpop.f32.mrf.mxu1 }
 0x943   :  { %v2433_v2 = vadd.f32 %v2432_v29, %v6614_v21 }
 0x945   :  { %3414 = vmatpush.bf16.msra.mxu1 %v6485_v12  ;;  %v2469_v18 = vpack.c.bf16 %v2433_v2, %v2433_v2 }
 0x946   :  { %3560 = vmatpush.bf16.msrb.mxu2 %v6408_v44  ;;  %3574 = vmatpush.bf16.msrb.mxu3 %v6432_v32 }
 0x947   :  { %2501 = vst [vmem:[#allocation2 + $0x74] sm:$0xf] %v2469_v18  ;;  %v3029_v18 = vunpack.c.h.bf16 %v6672_v24 }
 0x949   :  { %3415 = vmatpush.bf16.msra.mxu1 %v6489_v39 }
 0x94a   :  { %3561 = vmatpush.bf16.msrb.mxu2 %v6411_v43  ;;  %3575 = vmatpush.bf16.msrb.mxu3 %v6438_v59  ;;  %v2435_v11 = vpop.f32.mrf.mxu1 }
 0x94b   :  { %v2436_v16 = vadd.f32 %v2435_v11, %v6614_v21 }
 0x94d   :  { %3416 = vmatpush.bf16.msra.mxu1 %v6493_v57  ;;  %v2471_v60 = vpack.c.bf16 %v2436_v16, %v2436_v16 }
 0x94e   :  { %3562 = vmatpush.bf16.msrb.mxu2 %v6414_v0  ;;  %3576 = vmatpush.bf16.msrb.mxu3 %v6447_v1 }
 0x94f   :  { %2503 = vst [vmem:[#allocation2 + $0x80] sm:$0xf] %v2471_v60 }
 0x951   :  { %3417 = vmatpush.bf16.msra.mxu1 %v6497_v42 }
 0x952   :  { %3563 = vmatpush.bf16.msrb.mxu2 %v6420_v23  ;;  %3577 = vmatpush.bf16.msrb.mxu3 %v6463_v58  ;;  %v2437_v8 = vpop.f32.mrf.mxu1 }
 0x953   :  { %v2438_v10 = vadd.f32 %v2437_v8, %v6614_v21 }
 0x955   :  { %3418 = vmatpush.bf16.msra.mxu1 %v6505_v63  ;;  %v2473_v7 = vpack.c.bf16 %v2438_v10, %v2438_v10 }
 0x956   :  { %3564 = vmatpush.bf16.msrb.mxu2 %v6425_v54  ;;  %3578 = vmatpush.bf16.msrb.mxu3 %v6466_v35 }
 0x957   :  { %2505 = vst [vmem:[#allocation2 + $0x8c] sm:$0xf] %v2473_v7 }
 0x959   :  { %3419 = vmatpush.bf16.msra.mxu1 %v6512_v47 }
 0x95a   :  { %3565 = vmatpush.bf16.msrb.mxu2 %v6435_v48  ;;  %3579 = vmatpush.bf16.msrb.mxu3 %v6473_v15  ;;  %v2440_v20 = vpop.f32.mrf.mxu1 }
 0x95b   :  { %v2441_v55 = vadd.f32 %v2440_v20, %v6614_v21 }
 0x95d   :  { %3420 = vmatpush.bf16.msra.mxu1 %v6525_v6  ;;  %v2475_v53 = vpack.c.bf16 %v2441_v55, %v2441_v55 }
 0x95e   :  { %3566 = vmatpush.bf16.msrb.mxu2 %v6441_v46  ;;  %3580 = vmatpush.bf16.msrb.mxu3 %v6477_v26 }
 0x95f   :  { %2507 = vst [vmem:[#allocation2 + $0x98] sm:$0xf] %v2475_v53 }
 0x962   :  { %v2442_v49 = vpop.f32.mrf.mxu1 }
 0x963   :  { %v2443_v28 = vadd.f32 %v2442_v49, %v6614_v21 }
 0x965   :  { %v2477_v36 = vpack.c.bf16 %v2443_v28, %v2443_v28 }
 0x967   :  { %2509 = vst [vmem:[#allocation2 + $0xa4] sm:$0xf] %v2477_v36 }
 0x96a   :  { %v2445_v50 = vpop.f32.mrf.mxu1 }
 0x96b   :  { %v2446_v62 = vadd.f32 %v2445_v50, %v6614_v21 }
 0x96d   :  { %v2479_v38 = vpack.c.bf16 %v2446_v62, %v2446_v62 }
 0x96f   :  { %2511 = vst [vmem:[#allocation2 + $0xb0] sm:$0xf] %v2479_v38 }
 0x972   :  { %v2447_v30 = vpop.f32.mrf.mxu1 }
 0x973   :  { %v2448_v27 = vadd.f32 %v2447_v30, %v6614_v21 }
 0x975   :  { %v2481_v34 = vpack.c.bf16 %v2448_v27, %v2448_v27 }
 0x977   :  { %2513 = vst [vmem:[#allocation2 + $0xbc] sm:$0xf] %v2481_v34  ;;  %v3022_v34 = vld [vmem:[#allocation2 + $0x38] sm:$0xf] }
 0x9bd   :  { %v3046_v17 = vpop.f32.mrf.mxu1 }
 0x9be   :  { %v3079_v3 = vadd.f32 %v3046_v17, %v3025_v37 }
 0x9c0   :  { %v4535_v5 = vmul.f32 -1.442695, %v3079_v3 }
 0x9c2   :  { %4915 = vpow2.f32 %v4535_v5 }
 0x9c3   :  { %v3060_v41 = vpop.f32.mrf.mxu2 }
 0x9c4   :  { %v3119_v61 = vadd.f32 %v3060_v41, %v3026_v25  ;;  %v3074_v36 = vpop.f32.mrf.mxu3 }
 0x9c5   :  { %v3048_v22 = vpop.f32.mrf.mxu1  ;;  %v3159_v25 = vadd.f32 %v6634_v51, %v3074_v36  ;;  %v3024_v36 = vld [vmem:[#allocation2 + $0x44] sm:$0xf] }
 0x9c6   :  { %v4537_v19 = vmul.f32 -1.442695, %v3119_v61  ;;  %v3080_v56 = vadd.f32 %v3048_v22, %v3028_v40  ;;  %v3027_v22 = vunpack.c.l.bf16 %v3022_v34 }
 0x9c8   :  { %v4916_v29 = vpop.eup %4915  ;;  %4917 = vpow2.f32 %v4537_v19  ;;  %v4536_v21 = vmul.f32 -1.442695, %v3080_v56 }
 0x9c9   :  { %v3087_v2 = vadd.f32 1.0, %v4916_v29 }
 0x9ca   :  { %4919 = vpow2.f32 %v4536_v21 }
 0x9cb   :  { %4921 = vrcp.f32 %v3087_v2  ;;  %v3062_v11 = vpop.f32.mrf.mxu2  ;;  %v3100_v49 = vand.u32 2147483648, %v3087_v2  ;;  %v3098_v24 = vand.u32 2147483647, %v3087_v2  ;;  %vm3094_vm4 = vweird.f32 %v3087_v2 }
 0x9cc   :  { %v3120_v16 = vadd.f32 %v3062_v11, %v3029_v18 }
 0x9cd   :  { %v3101_v37 = vor.u32 1.1754944e-38, %v3100_v49  ;;  %vm3099_vm6 = vcmp.eq.f32.partialorder %v3098_v24, 8.507059e+37 }
 0x9ce   :  { %v4918_v60 = vpop.eup %4917  ;;  %v4538_v8 = vmul.f32 -1.442695, %v3120_v16 }
 0x9cf   :  { %v3127_v52 = vadd.f32 1.0, %v4918_v60 }
 0x9d0   :  { %v4920_v10 = vpop.eup %4919  ;;  %4923 = vpow2.f32 %v4538_v8 }
 0x9d1   :  { %v4922_v7 = vpop.eup %4921  ;;  %4925 = vrcp.f32 %v3127_v52  ;;  %v3088_v55 = vadd.f32 1.0, %v4920_v10  ;;  %vm3134_vm8 = vweird.f32 %v3127_v52  ;;  %v3140_v56 = vand.u32 2147483648, %v3127_v52 }
 0x9d2   :  { %v3090_v20 = vmul.f32 %v4922_v7, %v3087_v2  ;;  %vm3095_vm3 = vweird.f32 %v4922_v7  ;;  %v3138_v2 = vand.u32 2147483647, %v3127_v52 }
 0x9d3   :  { %4927 = vrcp.f32 %v3088_v55  ;;  %vm3096_vm5 = vmor %vm3094_vm4, %vm3095_vm3  ;;  %v3115_v11 = vand.u32 2147483648, %v3088_v55  ;;  %v3113_v10 = vand.u32 2147483647, %v3088_v55  ;;  %v3141_v49 = vor.u32 1.1754944e-38, %v3140_v56 }
 0x9d4   :  { %v3091_v53 = vsub.f32 1.0, %v3090_v20  ;;  %vm3109_vm11 = vweird.f32 %v3088_v55  ;;  %vm3139_vm12 = vcmp.eq.f32.partialorder %v3138_v2, 8.507059e+37 }
 0x9d5   :  { %vm3114_vm14 = vcmp.eq.f32.partialorder %v3113_v10, 8.507059e+37 }
 0x9d6   :  { %v4924_v28 = vpop.eup %4923  ;;  %v3092_v50 = vmul.f32 %v4922_v7, %v3091_v53  ;;  %v3076_v53 = vpop.f32.mrf.mxu3 }
 0x9d7   :  { %v4926_v62 = vpop.eup %4925  ;;  %v6805_v38 = vadd.f32 1.0, %v4924_v28 }
 0x9d8   :  { %v3130_v30 = vmul.f32 %v4926_v62, %v3127_v52  ;;  %v3093_v27 = vadd.f32 %v4922_v7, %v3092_v50  ;;  %vm3135_vm7 = vweird.f32 %v4926_v62  ;;  %v3116_v50 = vor.u32 1.1754944e-38, %v3115_v11 }
 0x9d9   :  { %4929 = vrcp.f32 %v6805_v38  ;;  %v4928_v17 = vpop.eup %4927  ;;  %vm6809_vm9 = vmor %vm3134_vm8, %vm3135_vm7  ;;  %vm3149_vm0 = vweird.f32 %v6805_v38 }
 0x9da   :  { %v3131_v3 = vsub.f32 1.0, %v3130_v30  ;;  %v3097_v5 = vsel %vm3096_vm5, %v4922_v7, %v3093_v27  ;;  %v3105_v61 = vmul.f32 %v4928_v17, %v3088_v55  ;;  %vm3110_vm10 = vweird.f32 %v4928_v17 }
 0x9db   :  { %v3102_v41 = vsel %vm3099_vm6, %v3101_v37, %v3097_v5  ;;  %vm3111_vm13 = vmor %vm3109_vm11, %vm3110_vm10  ;;  %v3160_v27 = vadd.f32 %v6634_v51, %v3076_v53  ;;  %v3155_v37 = vand.u32 2147483648, %v6805_v38 }
 0x9dc   :  { %v3132_v40 = vmul.f32 %v4926_v62, %v3131_v3  ;;  %v3161_v19 = vmul.f32 %v3159_v25, %v3102_v41  ;;  %v3106_v29 = vsub.f32 1.0, %v3105_v61  ;;  %v3030_v3 = vunpack.c.l.bf16 %v3024_v36 }
 0x9dd   :  { %v3153_v61 = vand.u32 2147483647, %v6805_v38 }
 0x9de   :  { %v3133_v21 = vadd.f32 %v4926_v62, %v3132_v40  ;;  %v3163_v18 = vadd.f32 %v3161_v19, %v3027_v22  ;;  %v3107_v8 = vmul.f32 %v4928_v17, %v3106_v29  ;;  %v3156_v19 = vor.u32 1.1754944e-38, %v3155_v37 }
 0x9df   :  { %v4930_v16 = vpop.eup %4929  ;;  %vm3154_vm2 = vcmp.eq.f32.partialorder %v3153_v61, 8.507059e+37  ;;  %v3203_v37 = vunpack.c.h.bf16 %v6689_v33 }
 0x9e0   :  { %v3137_v7 = vsel %vm6809_vm9, %v4926_v62, %v3133_v21  ;;  %4931 = vtanh.f32 %v3163_v18  ;;  %v3145_v20 = vmul.f32 %v4930_v16, %v6805_v38  ;;  %v3108_v28 = vadd.f32 %v4928_v17, %v3107_v8  ;;  %v3183_v21 = vpop.permute.xlu2 %3182  ;;  %v3186_v8 = vpop.permute.xlu0 %3185 }
 0x9e1   :  { %v3142_v24 = vsel %vm3139_vm12, %v3141_v49, %v3137_v7  ;;  %vm3150_vm15 = vweird.f32 %v4930_v16  ;;  %vm3187_vm3 = vcmp.eq.s32.totalorder %v3183_v21, 1  ;;  %vm3188_vm4 = vcmp.eq.s32.totalorder %v3186_v8, 1 }
 0x9e2   :  { %v3146_v52 = vsub.f32 1.0, %v3145_v20  ;;  %v3112_v30 = vsel %vm3111_vm13, %v4928_v17, %v3108_v28  ;;  %v3167_v41 = vsub.f32 1.0, %v3142_v24  ;;  %vm3151_vm1 = vmor %vm3149_vm0, %vm3150_vm15  ;;  %v3171_v51 = vmul.f32 %v3142_v24, %v6757_v14 }
 0x9e3   :  { %v3117_v62 = vsel %vm3114_vm14, %v3116_v50, %v3112_v30 }
 0x9e4   :  { %v3147_v34 = vmul.f32 %v4930_v16, %v3146_v52  ;;  %v3162_v5 = vmul.f32 %v3160_v27, %v3117_v62  ;;  %v3200_v52 = vunpack.c.h.bf16 %v6679_v45  ;;  %v3202_v62 = vunpack.c.l.bf16 %v6689_v33 }
 0x9e6   :  { %v4932_v25 = vpop.eup %4931  ;;  %v3148_v55 = vadd.f32 %v4930_v16, %v3147_v34  ;;  %v3164_v40 = vadd.f32 %v3162_v5, %v3030_v3 }
 0x9e7   :  { %v3169_v17 = vmul.f32 %v4932_v25, %v3167_v41 }
 0x9e8   :  { %v3152_v22 = vsel %vm3151_vm1, %v4930_v16, %v3148_v55  ;;  %4933 = vtanh.f32 %v3164_v40 }
 0x9e9   :  { %v3157_v56 = vsel %vm3154_vm2, %v3156_v19, %v3152_v22  ;;  %v3173_v29 = vadd.f32 %v3171_v51, %v3169_v17 }
 0x9ea   :  { %v3168_v2 = vsub.f32 1.0, %v3157_v56  ;;  %v3172_v60 = vmul.f32 %v3157_v56, %v6762_v9 }
 0x9eb   :  { %v6823_v38 = vsel %vm3187_vm3, %v3173_v29, %v6757_v14 }
 0x9ec   :  { %v3191_v16 = vpack.c.bf16 %v6823_v38, %v6823_v38 }
 0x9ee   :  { %v4934_v18 = vpop.eup %4933  ;;  %v3207_v49 = vunpack.c.l.b16 %v3191_v16 }
 0x9ef   :  { %v3170_v11 = vmul.f32 %v4934_v18, %v3168_v2 }
 0x9f1   :  { %v3174_v10 = vadd.f32 %v3172_v60, %v3170_v11 }
 0x9f3   :  { %v6828_v7 = vsel %vm3188_vm4, %v3174_v10, %v6762_v9  ;;  %v3199_v9 = vunpack.c.l.bf16 %v6679_v45 }
 0x9f4   :  { %v3192_v20 = vpack.c.bf16 %v6828_v7, %v6828_v7  ;;  %v4660_v53 = vpack.c.bf16 %v6828_v7, %v6823_v38 }
 0x9f6   :  { %4688 = vst [vmem:[#allocation12 + $0x10] sm:$0xff] %v4660_v53   ;;  %v3208_v28 = vunpack.c.l.b16 %v3192_v20 }
 0x9f8   :  { %v3209_v14 = vpack.c.b16 %v3208_v28, %v3207_v49 }
 0x9fa   :  { %3219 = vmatmul.bf16.vlgmr.msrb.gmra.mxu0 %v3209_v14  ;;  %3233 = vmatmul.bf16.vlgmr.msrb.gmra.mxu1 %v3209_v14 }
 0x9fb   :  { %3247 = vmatmul.bf16.vlgmr.msra.gmra.mxu2 %v3209_v14  ;;  %3587 = vmatpush.bf16.msrb.mxu0 %v6479_v13  ;;  %v3196_v14 = vld [vmem:[#allocation2 + $0x50] sm:$0xf] }
 0x9fc   :  { %3733 = vmatpush.bf16.msrb.mxu1 %v6405_v31  ;;  %3747 = vmatpush.bf16.msra.mxu2 %v6423_v4 }
 0x9ff   :  { %3588 = vmatpush.bf16.msrb.mxu0 %v6485_v12 }
 0xa00   :  { %3734 = vmatpush.bf16.msrb.mxu1 %v6408_v44  ;;  %3748 = vmatpush.bf16.msra.mxu2 %v6432_v32 }
 0xa03   :  { %3589 = vmatpush.bf16.msrb.mxu0 %v6489_v39 }
 0xa04   :  { %3735 = vmatpush.bf16.msrb.mxu1 %v6411_v43  ;;  %3749 = vmatpush.bf16.msra.mxu2 %v6438_v59 }
 0xa07   :  { %3590 = vmatpush.bf16.msrb.mxu0 %v6493_v57 }
 0xa08   :  { %3736 = vmatpush.bf16.msrb.mxu1 %v6414_v0  ;;  %3750 = vmatpush.bf16.msra.mxu2 %v6447_v1 }
 0xa0b   :  { %3591 = vmatpush.bf16.msrb.mxu0 %v6497_v42 }
 0xa0c   :  { %3737 = vmatpush.bf16.msrb.mxu1 %v6420_v23  ;;  %3751 = vmatpush.bf16.msra.mxu2 %v6463_v58 }
 0xa0f   :  { %3592 = vmatpush.bf16.msrb.mxu0 %v6505_v63 }
 0xa10   :  { %3738 = vmatpush.bf16.msrb.mxu1 %v6425_v54  ;;  %3752 = vmatpush.bf16.msra.mxu2 %v6466_v35 }
 0xa13   :  { %3593 = vmatpush.bf16.msrb.mxu0 %v6512_v47 }
 0xa14   :  { %3739 = vmatpush.bf16.msrb.mxu1 %v6435_v48  ;;  %3753 = vmatpush.bf16.msra.mxu2 %v6473_v15 }
 0xa17   :  { %3594 = vmatpush.bf16.msrb.mxu0 %v6525_v6 }
 0xa18   :  { %3740 = vmatpush.bf16.msrb.mxu1 %v6441_v46  ;;  %3754 = vmatpush.bf16.msra.mxu2 %v6477_v26 }
 0xa77   :  { %v3220_v36 = vpop.f32.mrf.mxu0  ;;  %v3234_v50 = vpop.f32.mrf.mxu1 }
 0xa78   :  { %v3253_v24 = vadd.f32 %v3220_v36, %v3199_v9  ;;  %v3293_v30 = vadd.f32 %v3234_v50, %v3200_v52  ;;  %v6868_v36 = vld [vmem:[%s7083_s17] ss:$0 sm:$0xff] }
 0xa7a   :  { %v4539_v27 = vmul.f32 -1.442695, %v3253_v24  ;;  %v4541_v34 = vmul.f32 -1.442695, %v3293_v30 }
 0xa7c   :  { %4935 = vpow2.f32 %v4539_v27 }
 0xa7d   :  { %4937 = vpow2.f32 %v4541_v34 }
 0xa7e   :  { %v3248_v8 = vpop.f32.mrf.mxu2 }
 0xa7f   :  { %v3222_v3 = vpop.f32.mrf.mxu0  ;;  %v3236_v5 = vpop.f32.mrf.mxu1  ;;  %v3333_v50 = vadd.f32 %v6868_v36, %v3248_v8 }
 0xa80   :  { %v3254_v25 = vadd.f32 %v3222_v3, %v3202_v62  ;;  %v3294_v41 = vadd.f32 %v3236_v5, %v3203_v37  ;;  %v3201_v37 = vunpack.c.l.bf16 %v3196_v14 }
 0xa82   :  { %v4936_v55 = vpop.eup %4935  ;;  %v4540_v61 = vmul.f32 -1.442695, %v3254_v25  ;;  %v4542_v17 = vmul.f32 -1.442695, %v3294_v41 }
 0xa83   :  { %v4938_v40 = vpop.eup %4937  ;;  %v3261_v45 = vadd.f32 1.0, %v4936_v55 }
 0xa84   :  { %v3301_v22 = vadd.f32 1.0, %v4938_v40  ;;  %4939 = vpow2.f32 %v4540_v61  ;;  %v3360_v61 = vpop.permute.xlu2 %3359 }
 0xa85   :  { %4941 = vrcp.f32 %v3261_v45  ;;  %v3274_v10 = vand.u32 2147483648, %v3261_v45  ;;  %v3272_v20 = vand.u32 2147483647, %v3261_v45  ;;  %vm3268_vm6 = vweird.f32 %v3261_v45 }
 0xa86   :  { %4943 = vrcp.f32 %v3301_v22  ;;  %v3314_v62 = vand.u32 2147483648, %v3301_v22  ;;  %vm3308_vm10 = vweird.f32 %v3301_v22  ;;  %v3312_v25 = vand.u32 2147483647, %v3301_v22 }
 0xa87   :  { %4945 = vpow2.f32 %v4542_v17  ;;  %v3275_v9 = vor.u32 1.1754944e-38, %v3274_v10  ;;  %vm3273_vm8 = vcmp.eq.f32.partialorder %v3272_v20, 8.507059e+37 }
 0xa88   :  { %vm3313_vm14 = vcmp.eq.f32.partialorder %v3312_v25, 8.507059e+37 }
 0xa8a   :  { %v4940_v19 = vpop.eup %4939 }
 0xa8b   :  { %v4942_v51 = vpop.eup %4941  ;;  %v3262_v56 = vadd.f32 1.0, %v4940_v19 }
 0xa8c   :  { %v4944_v29 = vpop.eup %4943  ;;  %v3264_v21 = vmul.f32 %v4942_v51, %v3261_v45  ;;  %vm3269_vm5 = vweird.f32 %v4942_v51 }
 0xa8d   :  { %v4946_v33 = vpop.eup %4945  ;;  %v3304_v2 = vmul.f32 %v4944_v29, %v3301_v22  ;;  %4947 = vrcp.f32 %v3262_v56  ;;  %vm3270_vm7 = vmor %vm3268_vm6, %vm3269_vm5  ;;  %vm3309_vm9 = vweird.f32 %v4944_v29  ;;  %v3289_v55 = vand.u32 2147483648, %v3262_v56 }
 0xa8e   :  { %v3265_v18 = vsub.f32 1.0, %v3264_v21  ;;  %v6862_v11 = vadd.f32 1.0, %v4946_v33  ;;  %vm6872_vm11 = vmor %vm3308_vm10, %vm3309_vm9  ;;  %v3287_v17 = vand.u32 2147483647, %v3262_v56  ;;  %v3250_v21 = vpop.f32.mrf.mxu2  ;;  %v3315_v33 = vor.u32 1.1754944e-38, %v3314_v62 }
 0xa8f   :  { %v3305_v60 = vsub.f32 1.0, %v3304_v2  ;;  %vm3283_vm13 = vweird.f32 %v3262_v56  ;;  %vm3362_vm6 = vcmp.eq.s32.totalorder %v3360_v61, 1 }
 0xa90   :  { %v3266_v16 = vmul.f32 %v4942_v51, %v3265_v18  ;;  %4949 = vrcp.f32 %v6862_v11  ;;  %v3198_v18 = vld [vmem:[#allocation2 + $0x5c] sm:$0xf]  ;;  %vm3288_vm0 = vcmp.eq.f32.partialorder %v3287_v17, 8.507059e+37  ;;  %vm3323_vm2 = vweird.f32 %v6862_v11 }
 0xa91   :  { %v3306_v53 = vmul.f32 %v4944_v29, %v3305_v60  ;;  %v3290_v60 = vor.u32 1.1754944e-38, %v3289_v55 }
 0xa92   :  { %v3267_v49 = vadd.f32 %v4942_v51, %v3266_v16  ;;  %v3334_v16 = vadd.f32 %v6868_v36, %v3250_v21 }
 0xa93   :  { %v4948_v28 = vpop.eup %4947  ;;  %v3307_v30 = vadd.f32 %v4944_v29, %v3306_v53 }
 0xa94   :  { %v3271_v52 = vsel %vm3270_vm7, %v4942_v51, %v3267_v49  ;;  %v3279_v24 = vmul.f32 %v4948_v28, %v3262_v56  ;;  %vm3284_vm12 = vweird.f32 %v4948_v28  ;;  %v3204_v49 = vunpack.c.l.bf16 %v3198_v18 }
 0xa95   :  { %v3276_v27 = vsel %vm3273_vm8, %v3275_v9, %v3271_v52  ;;  %v3311_v19 = vsel %vm6872_vm11, %v4944_v29, %v3307_v30  ;;  %vm3285_vm15 = vmor %vm3283_vm13, %vm3284_vm12  ;;  %v3329_v29 = vand.u32 2147483648, %v6862_v11  ;;  %v3327_v56 = vand.u32 2147483647, %v6862_v11 }
 0xa96   :  { %v4950_v34 = vpop.eup %4949  ;;  %v3335_v3 = vmul.f32 %v3333_v50, %v3276_v27  ;;  %v3280_v5 = vsub.f32 1.0, %v3279_v24  ;;  %v3316_v8 = vsel %vm3313_vm14, %v3315_v33, %v3311_v19 }
 0xa97   :  { %v3319_v41 = vmul.f32 %v4950_v34, %v6862_v11  ;;  %vm3324_vm1 = vweird.f32 %v4950_v34  ;;  %v3341_v9 = vsub.f32 1.0, %v3316_v8  ;;  %v3330_v30 = vor.u32 1.1754944e-38, %v3329_v29 }
 0xa98   :  { %v3337_v40 = vadd.f32 %v3335_v3, %v3201_v37  ;;  %v3281_v45 = vmul.f32 %v4948_v28, %v3280_v5  ;;  %vm3325_vm3 = vmor %vm3323_vm2, %vm3324_vm1  ;;  %v3345_v27 = vmul.f32 %v3316_v8, %v6823_v38  ;;  %vm3328_vm4 = vcmp.eq.f32.partialorder %v3327_v56, 8.507059e+37  ;;  %v3357_v3 = vpop.permute.xlu1 %3356 }
 0xa99   :  { %v3320_v51 = vsub.f32 1.0, %v3319_v41  ;;  %vm3361_vm5 = vcmp.eq.s32.totalorder %v3357_v3, 1 }
 0xa9a   :  { %4951 = vtanh.f32 %v3337_v40  ;;  %v3282_v2 = vadd.f32 %v4948_v28, %v3281_v45 }
 0xa9b   :  { %v3321_v22 = vmul.f32 %v4950_v34, %v3320_v51 }
 0xa9c   :  { %v3286_v10 = vsel %vm3285_vm15, %v4948_v28, %v3282_v2 }
 0xa9d   :  { %v3322_v20 = vadd.f32 %v4950_v34, %v3321_v22  ;;  %v3291_v53 = vsel %vm3288_vm0, %v3290_v60, %v3286_v10 }
 0xa9e   :  { %v3336_v14 = vmul.f32 %v3334_v16, %v3291_v53 }
 0xa9f   :  { %v3326_v28 = vsel %vm3325_vm3, %v4950_v34, %v3322_v20 }
 0xaa0   :  { %v4952_v52 = vpop.eup %4951  ;;  %v3338_v50 = vadd.f32 %v3336_v14, %v3204_v49  ;;  %v3331_v62 = vsel %vm3328_vm4, %v3330_v30, %v3326_v28 }
 0xaa1   :  { %v3343_v24 = vmul.f32 %v4952_v52, %v3341_v9  ;;  %v3342_v5 = vsub.f32 1.0, %v3331_v62  ;;  %v3346_v55 = vmul.f32 %v3331_v62, %v6828_v7 }
 0xaa2   :  { %4953 = vtanh.f32 %v3338_v50 }
 0xaa3   :  { %v3347_v37 = vadd.f32 %v3345_v27, %v3343_v24 }
 0xaa5   :  { %v6885_v11 = vsel %vm3361_vm5, %v3347_v37, %v6823_v38 }
 0xaa6   :  { %v3365_v34 = vpack.c.bf16 %v6885_v11, %v6885_v11 }
 0xaa8   :  { %v4954_v25 = vpop.eup %4953  ;;  %v3381_v51 = vunpack.c.l.b16 %v3365_v34 }
 0xaa9   :  { %v3344_v41 = vmul.f32 %v4954_v25, %v3342_v5  ;;  %v3370_v5 = vld [vmem:[#allocation2 + $0x68] sm:$0xf] }
 0xaab   :  { %v3348_v40 = vadd.f32 %v3346_v55, %v3344_v41 }
 0xaad   :  { %v6890_v45 = vsel %vm3362_vm6, %v3348_v40, %v6828_v7 }
 0xaae   :  { %v3366_v17 = vpack.c.bf16 %v6890_v45, %v6890_v45  ;;  %v4665_v19 = vpack.c.bf16 %v6890_v45, %v6885_v11 }
 0xab0   :  { %4689 = vst [vmem:[#allocation12 + $0x18] sm:$0xff] %v4665_v19   ;;  %v3382_v21 = vunpack.c.l.b16 %v3366_v17 }
 0xab2   :  { %v3383_v38 = vpack.c.b16 %v3382_v21, %v3381_v51  ;;  %v3375_v51 = vunpack.c.l.bf16 %v3370_v5 }
 0xab4   :  { %3393 = vmatmul.bf16.vlgmr.msra.gmra.mxu3 %v3383_v38  ;;  %3407 = vmatmul.bf16.vlgmr.msra.gmra.mxu0 %v3383_v38 }
 0xab5   :  { %3421 = vmatmul.bf16.vlgmr.msra.gmra.mxu1 %v3383_v38  ;;  %3761 = vmatpush.bf16.msra.mxu3 %v6479_v13 }
 0xab6   :  { %3907 = vmatpush.bf16.msra.mxu0 %v6405_v31  ;;  %3921 = vmatpush.bf16.msra.mxu1 %v6423_v4  ;;  %v3369_v31 = vld [vmem:[#allocation2 + $0x60] sm:$0xff]  ;;  %v3371_v4 = vld [vmem:[#allocation2 + $0x6c] sm:$0xff] }
 0xab9   :  { %3762 = vmatpush.bf16.msra.mxu3 %v6485_v12 }
 0xaba   :  { %3908 = vmatpush.bf16.msra.mxu0 %v6408_v44  ;;  %3922 = vmatpush.bf16.msra.mxu1 %v6432_v32  ;;  %v3374_v44 = vunpack.c.h.bf16 %v3369_v31 }
 0xabd   :  { %3763 = vmatpush.bf16.msra.mxu3 %v6489_v39 }
 0xabe   :  { %3909 = vmatpush.bf16.msra.mxu0 %v6411_v43  ;;  %3923 = vmatpush.bf16.msra.mxu1 %v6438_v59 }
 0xac1   :  { %3764 = vmatpush.bf16.msra.mxu3 %v6493_v57 }
 0xac2   :  { %3910 = vmatpush.bf16.msra.mxu0 %v6414_v0  ;;  %3924 = vmatpush.bf16.msra.mxu1 %v6447_v1  ;;  %v3377_v1 = vunpack.c.h.bf16 %v3371_v4 }
 0xac5   :  { %3765 = vmatpush.bf16.msra.mxu3 %v6497_v42 }
 0xac6   :  { %3911 = vmatpush.bf16.msra.mxu0 %v6420_v23  ;;  %3925 = vmatpush.bf16.msra.mxu1 %v6463_v58 }
 0xac9   :  { %3766 = vmatpush.bf16.msra.mxu3 %v6505_v63 }
 0xaca   :  { %3912 = vmatpush.bf16.msra.mxu0 %v6425_v54  ;;  %3926 = vmatpush.bf16.msra.mxu1 %v6466_v35  ;;  %v3373_v54 = vunpack.c.l.bf16 %v3369_v31 }
 0xacd   :  { %3767 = vmatpush.bf16.msra.mxu3 %v6512_v47 }
 0xace   :  { %3913 = vmatpush.bf16.msra.mxu0 %v6435_v48  ;;  %3927 = vmatpush.bf16.msra.mxu1 %v6473_v15 }
 0xad1   :  { %3768 = vmatpush.bf16.msra.mxu3 %v6525_v6 }
 0xad2   :  { %3914 = vmatpush.bf16.msra.mxu0 %v6441_v46  ;;  %3928 = vmatpush.bf16.msra.mxu1 %v6477_v26  ;;  %v3376_v26 = vunpack.c.l.bf16 %v3371_v4 }
 0xb31   :  { %v3408_v43 = vpop.f32.mrf.mxu0 }
 0xb32   :  { %v3467_v0 = vadd.f32 %v3408_v43, %v3374_v44  ;;  %v3422_v50 = vpop.f32.mrf.mxu1 }
 0xb33   :  { %v3507_v41 = vadd.f32 %v6868_v36, %v3422_v50  ;;  %v3531_v50 = vpop.permute.xlu0 %3530 }
 0xb34   :  { %v4545_v23 = vmul.f32 -1.442695, %v3467_v0 }
 0xb36   :  { %4955 = vpow2.f32 %v4545_v23 }
 0xb37   :  { %v3394_v32 = vpop.f32.mrf.mxu3 }
 0xb38   :  { %v3427_v59 = vadd.f32 %v3394_v32, %v3373_v54 }
 0xb39   :  { %v3410_v48 = vpop.f32.mrf.mxu0 }
 0xb3a   :  { %v4543_v58 = vmul.f32 -1.442695, %v3427_v59  ;;  %v3468_v35 = vadd.f32 %v3410_v48, %v3377_v1  ;;  %v3424_v59 = vpop.f32.mrf.mxu1 }
 0xb3c   :  { %v4956_v15 = vpop.eup %4955  ;;  %4957 = vpow2.f32 %v4543_v58  ;;  %v4546_v7 = vmul.f32 -1.442695, %v3468_v35  ;;  %v3372_v58 = vld [vmem:[#allocation2 + $0x74] sm:$0xf] }
 0xb3d   :  { %v6920_v46 = vadd.f32 1.0, %v4956_v15 }
 0xb3e   :  { %4959 = vpow2.f32 %v4546_v7  ;;  %v3508_v7 = vadd.f32 %v6868_v36, %v3424_v59 }
 0xb3f   :  { %v3396_v33 = vpop.f32.mrf.mxu3  ;;  %4961 = vrcp.f32 %v6920_v46  ;;  %v3488_v19 = vand.u32 2147483648, %v6920_v46  ;;  %vm3482_vm12 = vweird.f32 %v6920_v46  ;;  %v3486_v31 = vand.u32 2147483647, %v6920_v46 }
 0xb40   :  { %v3428_v2 = vadd.f32 %v3396_v33, %v3376_v26 }
 0xb41   :  { %v3489_v1 = vor.u32 1.1754944e-38, %v3488_v19  ;;  %vm3487_vm0 = vcmp.eq.f32.partialorder %v3486_v31, 8.507059e+37 }
 0xb42   :  { %v4958_v22 = vpop.eup %4957  ;;  %v4544_v18 = vmul.f32 -1.442695, %v3428_v2 }
 0xb43   :  { %v3435_v60 = vadd.f32 1.0, %v4958_v22  ;;  %v3378_v22 = vunpack.c.l.bf16 %v3372_v58 }
 0xb44   :  { %v4960_v8 = vpop.eup %4959  ;;  %4963 = vpow2.f32 %v4544_v18 }
 0xb45   :  { %4965 = vrcp.f32 %v3435_v60  ;;  %v4962_v10 = vpop.eup %4961  ;;  %v6923_v16 = vadd.f32 1.0, %v4960_v8  ;;  %v3448_v24 = vand.u32 2147483648, %v3435_v60  ;;  %v3446_v30 = vand.u32 2147483647, %v3435_v60 }
 0xb46   :  { %v3478_v20 = vmul.f32 %v4962_v10, %v6920_v46  ;;  %vm3442_vm8 = vweird.f32 %v3435_v60  ;;  %vm3483_vm11 = vweird.f32 %v4962_v10 }
 0xb47   :  { %4967 = vrcp.f32 %v6923_v16  ;;  %v3449_v25 = vor.u32 1.1754944e-38, %v3448_v24  ;;  %vm3447_vm10 = vcmp.eq.f32.partialorder %v3446_v30, 8.507059e+37  ;;  %vm6935_vm13 = vmor %vm3482_vm12, %vm3483_vm11  ;;  %v3503_v2 = vand.u32 2147483648, %v6923_v16 }
 0xb48   :  { %v3479_v9 = vsub.f32 1.0, %v3478_v20  ;;  %vm3497_vm4 = vweird.f32 %v6923_v16  ;;  %v3501_v8 = vand.u32 2147483647, %v6923_v16 }
 0xb4a   :  { %v4964_v53 = vpop.eup %4963  ;;  %v3480_v27 = vmul.f32 %v4962_v10, %v3479_v9  ;;  %vm3502_vm6 = vcmp.eq.f32.partialorder %v3501_v8, 8.507059e+37  ;;  %v3544_v8 = vld [vmem:[#allocation2 + $0x80] sm:$0xf] }
 0xb4b   :  { %v4966_v29 = vpop.eup %4965  ;;  %v3436_v49 = vadd.f32 1.0, %v4964_v53 }
 0xb4c   :  { %v3438_v14 = vmul.f32 %v4966_v29, %v3435_v60  ;;  %vm3443_vm7 = vweird.f32 %v4966_v29  ;;  %v3481_v40 = vadd.f32 %v4962_v10, %v3480_v27 }
 0xb4d   :  { %4969 = vrcp.f32 %v3436_v49  ;;  %v6927_v56 = vpop.eup %4967  ;;  %vm3444_vm9 = vmor %vm3442_vm8, %vm3443_vm7  ;;  %v3463_v44 = vand.u32 2147483648, %v3436_v49  ;;  %v3461_v4 = vand.u32 2147483647, %v3436_v49  ;;  %vm3457_vm15 = vweird.f32 %v3436_v49 }
 0xb4e   :  { %v3439_v52 = vsub.f32 1.0, %v3438_v14  ;;  %v3493_v62 = vmul.f32 %v6927_v56, %v6923_v16  ;;  %v3485_v54 = vsel %vm6935_vm13, %v4962_v10, %v3481_v40  ;;  %vm3498_vm3 = vweird.f32 %v6927_v56 }
 0xb4f   :  { %v3464_v35 = vor.u32 1.1754944e-38, %v3463_v44  ;;  %v3490_v15 = vsel %vm3487_vm0, %v3489_v1, %v3485_v54  ;;  %vm3462_vm2 = vcmp.eq.f32.partialorder %v3461_v4, 8.507059e+37  ;;  %vm3499_vm5 = vmor %vm3497_vm4, %vm3498_vm3  ;;  %vm3535_vm7 = vcmp.eq.s32.totalorder %v3531_v50, 1 }
 0xb50   :  { %v3440_v28 = vmul.f32 %v4966_v29, %v3439_v52  ;;  %v3494_v17 = vsub.f32 1.0, %v3493_v62  ;;  %v3515_v60 = vsub.f32 1.0, %v3490_v15  ;;  %v3519_v14 = vmul.f32 %v3490_v15, %v6885_v11  ;;  %v3534_v62 = vpop.permute.xlu1 %3533 }
 0xb51   :  { %vm3536_vm8 = vcmp.eq.s32.totalorder %v3534_v62, 1 }
 0xb52   :  { %v3441_v37 = vadd.f32 %v4966_v29, %v3440_v28  ;;  %v3495_v32 = vmul.f32 %v6927_v56, %v3494_v17 }
 0xb53   :  { %v4970_v3 = vpop.eup %4969 }
 0xb54   :  { %v3445_v55 = vsel %vm3444_vm9, %v4966_v29, %v3441_v37  ;;  %v3453_v61 = vmul.f32 %v4970_v3, %v3436_v49  ;;  %vm3458_vm14 = vweird.f32 %v4970_v3  ;;  %v3496_v26 = vadd.f32 %v6927_v56, %v3495_v32 }
 0xb55   :  { %v3450_v34 = vsel %vm3447_vm10, %v3449_v25, %v3445_v55  ;;  %vm3459_vm1 = vmor %vm3457_vm15, %vm3458_vm14  ;;  %v3504_v49 = vor.u32 1.1754944e-38, %v3503_v2 }
 0xb56   :  { %v3509_v21 = vmul.f32 %v3507_v41, %v3450_v34  ;;  %v3454_v38 = vsub.f32 1.0, %v3453_v61  ;;  %v3500_v53 = vsel %vm3499_vm5, %v6927_v56, %v3496_v26 }
 0xb57   :  { %v3505_v9 = vsel %vm3502_vm6, %v3504_v49, %v3500_v53 }
 0xb58   :  { %v3511_v0 = vadd.f32 %v3509_v21, %v3375_v51  ;;  %v3455_v23 = vmul.f32 %v4970_v3, %v3454_v38  ;;  %v3516_v24 = vsub.f32 1.0, %v3505_v9  ;;  %v3520_v30 = vmul.f32 %v3505_v9, %v6890_v45 }
 0xb5a   :  { %4971 = vtanh.f32 %v3511_v0  ;;  %v3456_v48 = vadd.f32 %v4970_v3, %v3455_v23 }
 0xb5c   :  { %v3460_v46 = vsel %vm3459_vm1, %v4970_v3, %v3456_v48 }
 0xb5d   :  { %v3465_v33 = vsel %vm3462_vm2, %v3464_v35, %v3460_v46 }
 0xb5e   :  { %v3510_v18 = vmul.f32 %v3508_v7, %v3465_v33 }
 0xb60   :  { %v4972_v10 = vpop.eup %4971  ;;  %v3512_v20 = vadd.f32 %v3510_v18, %v3378_v22 }
 0xb61   :  { %v3517_v29 = vmul.f32 %v4972_v10, %v3515_v60 }
 0xb62   :  { %4973 = vtanh.f32 %v3512_v20 }
 0xb63   :  { %v3521_v52 = vadd.f32 %v3519_v14, %v3517_v29 }
 0xb65   :  { %v6952_v27 = vsel %vm3535_vm7, %v3521_v52, %v6885_v11  ;;  %v3549_v52 = vunpack.c.l.bf16 %v3544_v8 }
 0xb66   :  { %v3539_v37 = vpack.c.bf16 %v6952_v27, %v6952_v27 }
 0xb68   :  { %v4974_v28 = vpop.eup %4973  ;;  %v3555_v41 = vunpack.c.l.b16 %v3539_v37 }
 0xb69   :  { %v3518_v16 = vmul.f32 %v4974_v28, %v3516_v24 }
 0xb6b   :  { %v3522_v56 = vadd.f32 %v3520_v30, %v3518_v16 }
 0xb6d   :  { %v6957_v3 = vsel %vm3536_vm8, %v3522_v56, %v6890_v45  ;;  %v3543_v45 = vld [vmem:[#allocation2 + $0x78] sm:$0xff] }
 0xb6e   :  { %v3540_v5 = vpack.c.bf16 %v6957_v3, %v6957_v3  ;;  %v4670_v25 = vpack.c.bf16 %v6957_v3, %v6952_v27  ;;  %v3547_v61 = vunpack.c.l.bf16 %v3543_v45  ;;  %v3548_v40 = vunpack.c.h.bf16 %v3543_v45 }
 0xb70   :  { %4690 = vst [vmem:[#allocation12 + $0x20] sm:$0xff] %v4670_v25   ;;  %v3556_v55 = vunpack.c.l.b16 %v3540_v5 }
 0xb72   :  { %v3557_v11 = vpack.c.b16 %v3556_v55, %v3555_v41 }
 0xb74   :  { %3567 = vmatmul.bf16.vlgmr.msrb.gmra.mxu2 %v3557_v11  ;;  %3581 = vmatmul.bf16.vlgmr.msrb.gmra.mxu3 %v3557_v11 }
 0xb75   :  { %3595 = vmatmul.bf16.vlgmr.msrb.gmra.mxu0 %v3557_v11  ;;  %3935 = vmatpush.bf16.msrb.mxu2 %v6479_v13 }
 0xb79   :  { %3936 = vmatpush.bf16.msrb.mxu2 %v6485_v12 }
 0xb7d   :  { %3937 = vmatpush.bf16.msrb.mxu2 %v6489_v39  ;;  %v3545_v39 = vld [vmem:[#allocation2 + $0x84] sm:$0xff] }
 0xb81   :  { %3938 = vmatpush.bf16.msrb.mxu2 %v6493_v57  ;;  %v3550_v57 = vunpack.c.l.bf16 %v3545_v39 }
 0xb85   :  { %3939 = vmatpush.bf16.msrb.mxu2 %v6497_v42  ;;  %v3551_v42 = vunpack.c.h.bf16 %v3545_v39 }
 0xb89   :  { %3940 = vmatpush.bf16.msrb.mxu2 %v6505_v63 }
 0xb8d   :  { %3941 = vmatpush.bf16.msrb.mxu2 %v6512_v47 }
 0xb91   :  { %3942 = vmatpush.bf16.msrb.mxu2 %v6525_v6 }
 0xbf2   :  { %v3596_v7 = vpop.f32.mrf.mxu0 }
 0xbf3   :  { %v3681_v20 = vadd.f32 %v6868_v36, %v3596_v7 }
 0xbf7   :  { %v3568_v34 = vpop.f32.mrf.mxu2  ;;  %v3582_v17 = vpop.f32.mrf.mxu3 }
 0xbf8   :  { %v3601_v13 = vadd.f32 %v3568_v34, %v3547_v61  ;;  %v3641_v19 = vadd.f32 %v3582_v17, %v3548_v40  ;;  %v3546_v40 = vld [vmem:[#allocation2 + $0x8c] sm:$0xf] }
 0xbfa   :  { %v4547_v12 = vmul.f32 -1.442695, %v3601_v13  ;;  %v4549_v51 = vmul.f32 -1.442695, %v3641_v19  ;;  %v3598_v55 = vpop.f32.mrf.mxu0 }
 0xbfb   :  { %v3682_v19 = vadd.f32 %v6868_v36, %v3598_v55 }
 0xbfc   :  { %4975 = vpow2.f32 %v4547_v12 }
 0xbfd   :  { %4977 = vpow2.f32 %v4549_v51 }
 0xbff   :  { %v3570_v21 = vpop.f32.mrf.mxu2  ;;  %v3584_v63 = vpop.f32.mrf.mxu3 }
 0xc00   :  { %v3602_v38 = vadd.f32 %v3570_v21, %v3550_v57  ;;  %v3642_v47 = vadd.f32 %v3584_v63, %v3551_v42  ;;  %v3552_v57 = vunpack.c.l.bf16 %v3546_v40 }
 0xc02   :  { %v4976_v31 = vpop.eup %4975  ;;  %v4548_v6 = vmul.f32 -1.442695, %v3602_v38  ;;  %v4550_v0 = vmul.f32 -1.442695, %v3642_v47 }
 0xc03   :  { %v4978_v44 = vpop.eup %4977  ;;  %v3609_v43 = vadd.f32 1.0, %v4976_v31 }
 0xc04   :  { %v3649_v23 = vadd.f32 1.0, %v4978_v44  ;;  %4979 = vpow2.f32 %v4548_v6 }
 0xc05   :  { %4981 = vrcp.f32 %v3609_v43  ;;  %v3622_v46 = vand.u32 2147483648, %v3609_v43  ;;  %v3620_v2 = vand.u32 2147483647, %v3609_v43  ;;  %vm3616_vm10 = vweird.f32 %v3609_v43 }
 0xc06   :  { %4983 = vrcp.f32 %v3649_v23  ;;  %v3662_v24 = vand.u32 2147483648, %v3649_v23  ;;  %vm3656_vm14 = vweird.f32 %v3649_v23  ;;  %v3660_v30 = vand.u32 2147483647, %v3649_v23 }
 0xc07   :  { %4985 = vpow2.f32 %v4550_v0  ;;  %v3623_v10 = vor.u32 1.1754944e-38, %v3622_v46  ;;  %vm3621_vm12 = vcmp.eq.f32.partialorder %v3620_v2, 8.507059e+37 }
 0xc08   :  { %v3663_v45 = vor.u32 1.1754944e-38, %v3662_v24  ;;  %vm3661_vm2 = vcmp.eq.f32.partialorder %v3660_v30, 8.507059e+37 }
 0xc0a   :  { %v4980_v4 = vpop.eup %4979 }
 0xc0b   :  { %v4982_v54 = vpop.eup %4981  ;;  %v3610_v32 = vadd.f32 1.0, %v4980_v4 }
 0xc0c   :  { %v4984_v59 = vpop.eup %4983  ;;  %v3612_v1 = vmul.f32 %v4982_v54, %v3609_v43  ;;  %vm3617_vm9 = vweird.f32 %v4982_v54 }
 0xc0d   :  { %v4986_v48 = vpop.eup %4985  ;;  %v3652_v58 = vmul.f32 %v4984_v59, %v3649_v23  ;;  %4987 = vrcp.f32 %v3610_v32  ;;  %vm3618_vm11 = vmor %vm3616_vm10, %vm3617_vm9  ;;  %vm3657_vm13 = vweird.f32 %v4984_v59  ;;  %v3637_v16 = vand.u32 2147483648, %v3610_v32 }
 0xc0e   :  { %v3613_v35 = vsub.f32 1.0, %v3612_v1  ;;  %v6971_v15 = vadd.f32 1.0, %v4986_v48  ;;  %vm6976_vm15 = vmor %vm3656_vm14, %vm3657_vm13  ;;  %v3635_v25 = vand.u32 2147483647, %v3610_v32  ;;  %vm3631_vm1 = vweird.f32 %v3610_v32 }
 0xc0f   :  { %v3653_v26 = vsub.f32 1.0, %v3652_v58  ;;  %v3638_v34 = vor.u32 1.1754944e-38, %v3637_v16 }
 0xc10   :  { %v3614_v33 = vmul.f32 %v4982_v54, %v3613_v35  ;;  %4989 = vrcp.f32 %v6971_v15  ;;  %vm3636_vm4 = vcmp.eq.f32.partialorder %v3635_v25, 8.507059e+37  ;;  %v3677_v21 = vand.u32 2147483648, %v6971_v15  ;;  %v3708_v35 = vpop.permute.xlu0 %3707 }
 0xc11   :  { %v3654_v22 = vmul.f32 %v4984_v59, %v3653_v26  ;;  %vm3671_vm6 = vweird.f32 %v6971_v15  ;;  %v3675_v38 = vand.u32 2147483647, %v6971_v15  ;;  %vm3710_vm10 = vcmp.eq.s32.totalorder %v3708_v35, 1 }
 0xc12   :  { %v3615_v18 = vadd.f32 %v4982_v54, %v3614_v33  ;;  %v3678_v43 = vor.u32 1.1754944e-38, %v3677_v21 }
 0xc13   :  { %v4988_v60 = vpop.eup %4987  ;;  %v3655_v14 = vadd.f32 %v4984_v59, %v3654_v22  ;;  %vm3676_vm8 = vcmp.eq.f32.partialorder %v3675_v38, 8.507059e+37 }
 0xc14   :  { %v3619_v53 = vsel %vm3618_vm11, %v4982_v54, %v3615_v18  ;;  %v3627_v29 = vmul.f32 %v4988_v60, %v3610_v32  ;;  %vm3632_vm0 = vweird.f32 %v4988_v60  ;;  %v3705_v54 = vpop.permute.xlu2 %3704  ;;  %v3717_v18 = vld [vmem:[#allocation2 + $0x90] sm:$0xff] }
 0xc15   :  { %v3624_v49 = vsel %vm3621_vm12, %v3623_v10, %v3619_v53  ;;  %v3659_v41 = vsel %vm6976_vm15, %v4984_v59, %v3655_v14  ;;  %vm3633_vm3 = vmor %vm3631_vm1, %vm3632_vm0  ;;  %vm3709_vm9 = vcmp.eq.s32.totalorder %v3705_v54, 1  ;;  %v3722_v53 = vunpack.c.h.bf16 %v3717_v18 }
 0xc16   :  { %v4990_v9 = vpop.eup %4989  ;;  %v3683_v50 = vmul.f32 %v3681_v20, %v3624_v49  ;;  %v3628_v28 = vsub.f32 1.0, %v3627_v29  ;;  %v3664_v13 = vsel %vm3661_vm2, %v3663_v45, %v3659_v41 }
 0xc17   :  { %v3667_v62 = vmul.f32 %v4990_v9, %v6971_v15  ;;  %vm3672_vm5 = vweird.f32 %v4990_v9  ;;  %v3689_v63 = vsub.f32 1.0, %v3664_v13  ;;  %v3693_v0 = vmul.f32 %v3664_v13, %v6952_v27 }
 0xc18   :  { %v3685_v56 = vadd.f32 %v3683_v50, %v3549_v52  ;;  %v3629_v5 = vmul.f32 %v4988_v60, %v3628_v28  ;;  %vm3673_vm7 = vmor %vm3671_vm6, %vm3672_vm5 }
 0xc19   :  { %v3668_v11 = vsub.f32 1.0, %v3667_v62 }
 0xc1a   :  { %4991 = vtanh.f32 %v3685_v56  ;;  %v3630_v61 = vadd.f32 %v4988_v60, %v3629_v5 }
 0xc1b   :  { %v3669_v17 = vmul.f32 %v4990_v9, %v3668_v11 }
 0xc1c   :  { %v3634_v12 = vsel %vm3633_vm3, %v4988_v60, %v3630_v61  ;;  %v3721_v60 = vunpack.c.l.bf16 %v3717_v18 }
 0xc1d   :  { %v3639_v51 = vsel %vm3636_vm4, %v3638_v34, %v3634_v12  ;;  %v3670_v39 = vadd.f32 %v4990_v9, %v3669_v17 }
 0xc1e   :  { %v3684_v42 = vmul.f32 %v3682_v19, %v3639_v51 }
 0xc1f   :  { %v3674_v44 = vsel %vm3673_vm7, %v4990_v9, %v3670_v39 }
 0xc20   :  { %v4992_v47 = vpop.eup %4991  ;;  %v3686_v31 = vadd.f32 %v3684_v42, %v3552_v57  ;;  %v3679_v23 = vsel %vm3676_vm8, %v3678_v43, %v3674_v44  ;;  %v3718_v42 = vld [vmem:[#allocation2 + $0x98] sm:$0xf] }
 0xc21   :  { %v3691_v6 = vmul.f32 %v4992_v47, %v3689_v63  ;;  %v3690_v32 = vsub.f32 1.0, %v3679_v23  ;;  %v3694_v48 = vmul.f32 %v3679_v23, %v6957_v3 }
 0xc22   :  { %4993 = vtanh.f32 %v3686_v31 }
 0xc23   :  { %v3695_v4 = vadd.f32 %v3693_v0, %v3691_v6  ;;  %v3723_v0 = vunpack.c.l.bf16 %v3718_v42 }
 0xc25   :  { %v6989_v58 = vsel %vm3709_vm9, %v3695_v4, %v6952_v27 }
 0xc26   :  { %v3713_v7 = vpack.c.bf16 %v6989_v58, %v6989_v58 }
 0xc28   :  { %v4994_v59 = vpop.eup %4993  ;;  %v3729_v2 = vunpack.c.l.b16 %v3713_v7 }
 0xc29   :  { %v3692_v1 = vmul.f32 %v4994_v59, %v3690_v32 }
 0xc2b   :  { %v3696_v15 = vadd.f32 %v3694_v48, %v3692_v1 }
 0xc2d   :  { %v6994_v46 = vsel %vm3710_vm10, %v3696_v15, %v6957_v3  ;;  %v3719_v3 = vld [vmem:[#allocation2 + $0x9c] sm:$0xff] }
 0xc2e   :  { %v3714_v26 = vpack.c.bf16 %v6994_v46, %v6994_v46  ;;  %v4675_v33 = vpack.c.bf16 %v6994_v46, %v6989_v58  ;;  %v3724_v14 = vunpack.c.l.bf16 %v3719_v3  ;;  %v3725_v16 = vunpack.c.h.bf16 %v3719_v3 }
 0xc30   :  { %4691 = vst [vmem:[#allocation12 + $0x28] sm:$0xff] %v4675_v33   ;;  %v3730_v22 = vunpack.c.l.b16 %v3714_v26 }
 0xc32   :  { %v3731_v27 = vpack.c.b16 %v3730_v22, %v3729_v2 }
 0xc34   :  { %3741 = vmatmul.bf16.vlgmr.msrb.gmra.mxu1 %v3731_v27  ;;  %3755 = vmatmul.bf16.vlgmr.msra.gmra.mxu2 %v3731_v27 }
 0xc35   :  { %3769 = vmatmul.bf16.vlgmr.msra.gmra.mxu3 %v3731_v27 }
 0xcb1   :  { %v3742_v8 = vpop.f32.mrf.mxu1 }
 0xcb2   :  { %v3775_v10 = vadd.f32 %v3742_v8, %v3721_v60  ;;  %v3720_v8 = vld [vmem:[#allocation2 + $0xa4] sm:$0xf] }
 0xcb4   :  { %v4551_v20 = vmul.f32 -1.442695, %v3775_v10 }
 0xcb6   :  { %4995 = vpow2.f32 %v4551_v20 }
 0xcb7   :  { %v3756_v29 = vpop.f32.mrf.mxu2 }
 0xcb8   :  { %v3815_v49 = vadd.f32 %v3756_v29, %v3722_v53  ;;  %v3770_v17 = vpop.f32.mrf.mxu3 }
 0xcb9   :  { %v3744_v9 = vpop.f32.mrf.mxu1  ;;  %v3855_v31 = vadd.f32 %v6868_v36, %v3770_v17 }
 0xcba   :  { %v4553_v52 = vmul.f32 -1.442695, %v3815_v49  ;;  %v3776_v50 = vadd.f32 %v3744_v9, %v3724_v14  ;;  %v3726_v9 = vunpack.c.l.bf16 %v3720_v8 }
 0xcbc   :  { %v4996_v24 = vpop.eup %4995  ;;  %4997 = vpow2.f32 %v4553_v52  ;;  %v4552_v28 = vmul.f32 -1.442695, %v3776_v50 }
 0xcbd   :  { %v3783_v30 = vadd.f32 1.0, %v4996_v24 }
 0xcbe   :  { %4999 = vpow2.f32 %v4552_v28 }
 0xcbf   :  { %5001 = vrcp.f32 %v3783_v30  ;;  %v3758_v62 = vpop.f32.mrf.mxu2  ;;  %v3796_v40 = vand.u32 2147483648, %v3783_v30  ;;  %v3794_v19 = vand.u32 2147483647, %v3783_v30  ;;  %vm3790_vm12 = vweird.f32 %v3783_v30 }
 0xcc0   :  { %v3816_v56 = vadd.f32 %v3758_v62, %v3725_v16  ;;  %v3772_v22 = vpop.f32.mrf.mxu3 }
 0xcc1   :  { %v3797_v21 = vor.u32 1.1754944e-38, %v3796_v40  ;;  %vm3795_vm14 = vcmp.eq.f32.partialorder %v3794_v19, 8.507059e+37  ;;  %v3856_v53 = vadd.f32 %v6868_v36, %v3772_v22 }
 0xcc2   :  { %v4998_v37 = vpop.eup %4997  ;;  %v4554_v5 = vmul.f32 -1.442695, %v3816_v56 }
 0xcc3   :  { %v3823_v25 = vadd.f32 1.0, %v4998_v37 }
 0xcc4   :  { %v5000_v41 = vpop.eup %4999  ;;  %5003 = vpow2.f32 %v4554_v5 }
 0xcc5   :  { %v5002_v55 = vpop.eup %5001  ;;  %5005 = vrcp.f32 %v3823_v25  ;;  %v3784_v45 = vadd.f32 1.0, %v5000_v41  ;;  %vm3830_vm0 = vweird.f32 %v3823_v25  ;;  %v3836_v4 = vand.u32 2147483648, %v3823_v25  ;;  %v3879_v41 = vpop.permute.xlu1 %3878 }
 0xcc6   :  { %v3786_v11 = vmul.f32 %v5002_v55, %v3783_v30  ;;  %vm3791_vm11 = vweird.f32 %v5002_v55  ;;  %v3834_v59 = vand.u32 2147483647, %v3823_v25 }
 0xcc7   :  { %5007 = vrcp.f32 %v3784_v45  ;;  %vm3792_vm13 = vmor %vm3790_vm12, %vm3791_vm11  ;;  %v3811_v48 = vand.u32 2147483648, %v3784_v45  ;;  %v3809_v26 = vand.u32 2147483647, %v3784_v45  ;;  %v3837_v27 = vor.u32 1.1754944e-38, %v3836_v4 }
 0xcc8   :  { %v3787_v61 = vsub.f32 1.0, %v3786_v11  ;;  %vm3805_vm3 = vweird.f32 %v3784_v45  ;;  %vm3835_vm4 = vcmp.eq.f32.partialorder %v3834_v59, 8.507059e+37  ;;  %vm3883_vm11 = vcmp.eq.s32.totalorder %v3879_v41, 1 }
 0xcc9   :  { %v3812_v10 = vor.u32 1.1754944e-38, %v3811_v48  ;;  %vm3810_vm6 = vcmp.eq.f32.partialorder %v3809_v26, 8.507059e+37 }
 0xcca   :  { %v5004_v34 = vpop.eup %5003  ;;  %v3788_v13 = vmul.f32 %v5002_v55, %v3787_v61 }
 0xccb   :  { %v5006_v12 = vpop.eup %5005  ;;  %v7000_v51 = vadd.f32 1.0, %v5004_v34 }
 0xccc   :  { %v3826_v39 = vmul.f32 %v5006_v12, %v3823_v25  ;;  %v3789_v57 = vadd.f32 %v5002_v55, %v3788_v13  ;;  %vm3831_vm15 = vweird.f32 %v5006_v12 }
 0xccd   :  { %5009 = vrcp.f32 %v7000_v51  ;;  %v5008_v63 = vpop.eup %5007  ;;  %vm7004_vm1 = vmor %vm3830_vm0, %vm3831_vm15  ;;  %v3851_v14 = vand.u32 2147483648, %v7000_v51  ;;  %vm3845_vm8 = vweird.f32 %v7000_v51  ;;  %v3849_v30 = vand.u32 2147483647, %v7000_v51 }
 0xcce   :  { %v3827_v38 = vsub.f32 1.0, %v3826_v39  ;;  %v3793_v47 = vsel %vm3792_vm13, %v5002_v55, %v3789_v57  ;;  %v3801_v44 = vmul.f32 %v5008_v63, %v3784_v45  ;;  %vm3806_vm2 = vweird.f32 %v5008_v63  ;;  %v3882_v45 = vpop.permute.xlu2 %3881 }
 0xccf   :  { %v3798_v6 = vsel %vm3795_vm14, %v3797_v21, %v3793_v47  ;;  %vm3807_vm5 = vmor %vm3805_vm3, %vm3806_vm2  ;;  %v3852_v37 = vor.u32 1.1754944e-38, %v3851_v14  ;;  %vm3850_vm10 = vcmp.eq.f32.partialorder %v3849_v30, 8.507059e+37  ;;  %vm3884_vm12 = vcmp.eq.s32.totalorder %v3882_v45, 1  ;;  %v5038_v30 = vld [vmem:[%s7083_s17] ss:$0 sm:$0xff]  ;;  %s5201_s17 = smov [#allocation12]  }
 0xcd0   :  { %v3828_v43 = vmul.f32 %v5006_v12, %v3827_v38  ;;  %v3857_v23 = vmul.f32 %v3855_v31, %v3798_v6  ;;  %v3802_v54 = vsub.f32 1.0, %v3801_v44  ;;  %s4069_s1 = sshll.u32 %s5201_s17, 4  ;;  %s4070_s1 = int_to_ptr.vmem [resolvable:$true] %s4069_s1 }
 0xcd2   :  { %v3829_v32 = vadd.f32 %v5006_v12, %v3828_v43  ;;  %v3859_v1 = vadd.f32 %v3857_v23, %v3723_v0  ;;  %v3803_v7 = vmul.f32 %v5008_v63, %v3802_v54  ;;  %v3893_v43 = vld [vmem:[#allocation2 + $0xb4] sm:$0xff] }
 0xcd3   :  { %v5010_v35 = vpop.eup %5009  ;;  %v3898_v0 = vunpack.c.l.bf16 %v3893_v43  ;;  %v3899_v23 = vunpack.c.h.bf16 %v3893_v43 }
 0xcd4   :  { %v3833_v33 = vsel %vm7004_vm1, %v5006_v12, %v3829_v32  ;;  %5011 = vtanh.f32 %v3859_v1  ;;  %v3841_v2 = vmul.f32 %v5010_v35, %v7000_v51  ;;  %v3804_v18 = vadd.f32 %v5008_v63, %v3803_v7 }
 0xcd5   :  { %v3838_v20 = vsel %vm3835_vm4, %v3837_v27, %v3833_v33  ;;  %vm3846_vm7 = vweird.f32 %v5010_v35 }
 0xcd6   :  { %v3842_v60 = vsub.f32 1.0, %v3841_v2  ;;  %v3808_v3 = vsel %vm3807_vm5, %v5008_v63, %v3804_v18  ;;  %v3863_v24 = vsub.f32 1.0, %v3838_v20  ;;  %vm3847_vm9 = vmor %vm3845_vm8, %vm3846_vm7  ;;  %v3867_v36 = vmul.f32 %v3838_v20, %v6989_v58 }
 0xcd7   :  { %v3813_v49 = vsel %vm3810_vm6, %v3812_v10, %v3808_v3 }
 0xcd8   :  { %v3843_v29 = vmul.f32 %v5010_v35, %v3842_v60  ;;  %v3858_v52 = vmul.f32 %v3856_v53, %v3813_v49 }
 0xcda   :  { %v5012_v50 = vpop.eup %5011  ;;  %v3844_v28 = vadd.f32 %v5010_v35, %v3843_v29  ;;  %v3860_v16 = vadd.f32 %v3858_v52, %v3726_v9 }
 0xcdb   :  { %v3865_v62 = vmul.f32 %v5012_v50, %v3863_v24  ;;  %v3892_v50 = vld [vmem:[#allocation2 + $0xb0] sm:$0xf] }
 0xcdc   :  { %v3848_v56 = vsel %vm3847_vm9, %v5010_v35, %v3844_v28  ;;  %5013 = vtanh.f32 %v3860_v16 }
 0xcdd   :  { %v3853_v5 = vsel %vm3850_vm10, %v3852_v37, %v3848_v56  ;;  %v3869_v25 = vadd.f32 %v3867_v36, %v3865_v62 }
 0xcde   :  { %v3864_v55 = vsub.f32 1.0, %v3853_v5  ;;  %v3868_v40 = vmul.f32 %v3853_v5, %v6994_v46  ;;  %v3897_v5 = vunpack.c.l.bf16 %v3892_v50 }
 0xcdf   :  { %v7018_v34 = vsel %vm3883_vm11, %v3869_v25, %v6989_v58  ;;  %v3891_v58 = vld [vmem:[#allocation2 + $0xa8] sm:$0xff] }
 0xce0   :  { %v3887_v13 = vpack.c.bf16 %v7018_v34, %v7018_v34  ;;  %v3895_v21 = vunpack.c.l.bf16 %v3891_v58  ;;  %v3896_v63 = vunpack.c.h.bf16 %v3891_v58  ;;  %v3894_v58 = vld [vmem:[#allocation2 + $0xbc] sm:$0xf] }
 0xce2   :  { %v5014_v11 = vpop.eup %5013  ;;  %v3903_v39 = vunpack.c.l.b16 %v3887_v13 }
 0xce3   :  { %v3866_v61 = vmul.f32 %v5014_v11, %v3864_v55 }
 0xce5   :  { %v3870_v17 = vadd.f32 %v3868_v40, %v3866_v61 }
 0xce7   :  { %v7023_v19 = vsel %vm3884_vm12, %v3870_v17, %v6994_v46 }
 0xce8   :  { %v3888_v12 = vpack.c.bf16 %v7023_v19, %v7023_v19  ;;  %v4680_v51 = vpack.c.bf16 %v7023_v19, %v7018_v34 }
 0xcea   :  { %4692 = vst [vmem:[#allocation12 + $0x30] sm:$0xff] %v4680_v51   ;;  %v3904_v57 = vunpack.c.l.b16 %v3888_v12 }
 0xcec   :  { %v3905_v42 = vpack.c.b16 %v3904_v57, %v3903_v39 }
 0xcee   :  { %3915 = vmatmul.bf16.vlgmr.msra.gmra.mxu0 %v3905_v42  ;;  %3929 = vmatmul.bf16.vlgmr.msra.gmra.mxu1 %v3905_v42 }
 0xcef   :  { %3943 = vmatmul.bf16.vlgmr.msrb.gmra.mxu2 %v3905_v42 }
 0xd6b   :  { %v3916_v38 = vpop.f32.mrf.mxu0  ;;  %v3930_v47 = vpop.f32.mrf.mxu1 }
 0xd6c   :  { %v3949_v46 = vadd.f32 %v3916_v38, %v3895_v21  ;;  %v3989_v31 = vadd.f32 %v3930_v47, %v3896_v63 }
 0xd6e   :  { %v4555_v6 = vmul.f32 -1.442695, %v3949_v46  ;;  %v4557_v44 = vmul.f32 -1.442695, %v3989_v31 }
 0xd70   :  { %5015 = vpow2.f32 %v4555_v6 }
 0xd71   :  { %5017 = vpow2.f32 %v4557_v44 }
 0xd72   :  { %v3944_v3 = vpop.f32.mrf.mxu2 }
 0xd73   :  { %v3918_v4 = vpop.f32.mrf.mxu0  ;;  %v3932_v54 = vpop.f32.mrf.mxu1  ;;  %v4029_v16 = vadd.f32 %v5038_v30, %v3944_v3 }
 0xd74   :  { %v3950_v32 = vadd.f32 %v3918_v4, %v3898_v0  ;;  %v3990_v59 = vadd.f32 %v3932_v54, %v3899_v23  ;;  %v3900_v0 = vunpack.c.l.bf16 %v3894_v58 }
 0xd76   :  { %v5016_v1 = vpop.eup %5015  ;;  %v4556_v48 = vmul.f32 -1.442695, %v3950_v32  ;;  %v4558_v7 = vmul.f32 -1.442695, %v3990_v59 }
 0xd77   :  { %v5018_v35 = vpop.eup %5017  ;;  %v3957_v15 = vadd.f32 1.0, %v5016_v1 }
 0xd78   :  { %v7029_v26 = vadd.f32 1.0, %v5018_v35  ;;  %5019 = vpow2.f32 %v4556_v48 }
 0xd79   :  { %5021 = vrcp.f32 %v3957_v15  ;;  %v3970_v53 = vand.u32 2147483648, %v3957_v15  ;;  %v3968_v49 = vand.u32 2147483647, %v3957_v15  ;;  %vm3964_vm14 = vweird.f32 %v3957_v15 }
 0xd7a   :  { %5023 = vrcp.f32 %v7029_v26  ;;  %v3946_v12 = vpop.f32.mrf.mxu2  ;;  %v4010_v51 = vand.u32 2147483648, %v7029_v26  ;;  %vm4004_vm4 = vweird.f32 %v7029_v26  ;;  %v4008_v57 = vand.u32 2147483647, %v7029_v26 }
 0xd7b   :  { %5025 = vpow2.f32 %v4558_v7  ;;  %v3971_v24 = vor.u32 1.1754944e-38, %v3970_v53  ;;  %vm3969_vm0 = vcmp.eq.f32.partialorder %v3968_v49, 8.507059e+37  ;;  %v4030_v47 = vadd.f32 %v5038_v30, %v3946_v12 }
 0xd7c   :  { %v4011_v44 = vor.u32 1.1754944e-38, %v4010_v51  ;;  %vm4009_vm9 = vcmp.eq.f32.partialorder %v4008_v57, 8.507059e+37 }
 0xd7e   :  { %v5020_v33 = vpop.eup %5019 }
 0xd7f   :  { %v5022_v2 = vpop.eup %5021  ;;  %v3958_v22 = vadd.f32 1.0, %v5020_v33 }
 0xd80   :  { %v7032_v27 = vpop.eup %5023  ;;  %v3960_v18 = vmul.f32 %v5022_v2, %v3957_v15  ;;  %vm3965_vm13 = vweird.f32 %v5022_v2 }
 0xd81   :  { %v5026_v60 = vpop.eup %5025  ;;  %v4000_v8 = vmul.f32 %v7032_v27, %v7029_v26  ;;  %5027 = vrcp.f32 %v3958_v22  ;;  %vm3966_vm15 = vmor %vm3964_vm14, %vm3965_vm13  ;;  %v3985_v11 = vand.u32 2147483648, %v3958_v22  ;;  %v3983_v40 = vand.u32 2147483647, %v3958_v22 }
 0xd82   :  { %v3961_v10 = vsub.f32 1.0, %v3960_v18  ;;  %v7036_v20 = vadd.f32 1.0, %v5026_v60  ;;  %vm4005_vm2 = vweird.f32 %v7032_v27  ;;  %vm3979_vm3 = vweird.f32 %v3958_v22 }
 0xd83   :  { %v4001_v14 = vsub.f32 1.0, %v4000_v8  ;;  %v3986_v21 = vor.u32 1.1754944e-38, %v3985_v11  ;;  %vm7049_vm6 = vmor %vm4004_vm4, %vm4005_vm2  ;;  %vm3984_vm7 = vcmp.eq.f32.partialorder %v3983_v40, 8.507059e+37 }
 0xd84   :  { %v3962_v29 = vmul.f32 %v5022_v2, %v3961_v10  ;;  %5029 = vrcp.f32 %v7036_v20  ;;  %v4025_v43 = vand.u32 2147483648, %v7036_v20  ;;  %vm4019_vm10 = vweird.f32 %v7036_v20 }
 0xd85   :  { %v4002_v56 = vmul.f32 %v7032_v27, %v4001_v14  ;;  %v4023_v4 = vand.u32 2147483647, %v7036_v20 }
 0xd86   :  { %v3963_v9 = vadd.f32 %v5022_v2, %v3962_v29  ;;  %v4026_v48 = vor.u32 1.1754944e-38, %v4025_v43 }
 0xd87   :  { %v5028_v52 = vpop.eup %5027  ;;  %v4003_v17 = vadd.f32 %v7032_v27, %v4002_v56  ;;  %vm4024_vm12 = vcmp.eq.f32.partialorder %v4023_v4, 8.507059e+37 }
 0xd88   :  { %v3967_v28 = vsel %vm3966_vm15, %v5022_v2, %v3963_v9  ;;  %v3975_v62 = vmul.f32 %v5028_v52, %v3958_v22  ;;  %vm3980_vm1 = vweird.f32 %v5028_v52  ;;  %v4053_v22 = vpop.permute.xlu0 %4052 }
 0xd89   :  { %v3972_v37 = vsel %vm3969_vm0, %v3971_v24, %v3967_v28  ;;  %vm3981_vm5 = vmor %vm3979_vm3, %vm3980_vm1  ;;  %v4007_v46 = vsel %vm7049_vm6, %v7032_v27, %v4003_v17  ;;  %v4056_v27 = vpop.permute.xlu1 %4055  ;;  %vm4057_vm13 = vcmp.eq.s32.totalorder %v4053_v22, 1 }
 0xd8a   :  { %v5030_v36 = vpop.eup %5029  ;;  %v4031_v25 = vmul.f32 %v4029_v16, %v3972_v37  ;;  %v3976_v41 = vsub.f32 1.0, %v3975_v62  ;;  %v4012_v54 = vsel %vm4009_vm9, %v4011_v44, %v4007_v46  ;;  %vm4058_vm14 = vcmp.eq.s32.totalorder %v4056_v27, 1 }
 0xd8b   :  { %v4015_v55 = vmul.f32 %v5030_v36, %v7036_v20  ;;  %vm4020_vm8 = vweird.f32 %v5030_v36  ;;  %v4037_v35 = vsub.f32 1.0, %v4012_v54  ;;  %v4041_v26 = vmul.f32 %v4012_v54, %v7018_v34 }
 0xd8c   :  { %v4033_v45 = vadd.f32 %v4031_v25, %v3897_v5  ;;  %v3977_v61 = vmul.f32 %v5028_v52, %v3976_v41  ;;  %vm4021_vm11 = vmor %vm4019_vm10, %vm4020_vm8 }
 0xd8d   :  { %v4016_v13 = vsub.f32 1.0, %v4015_v55 }
 0xd8e   :  { %v3978_v39 = vadd.f32 %v5028_v52, %v3977_v61  ;;  %5031 = vtanh.f32 %v4033_v45 }
 0xd8f   :  { %v4017_v42 = vmul.f32 %v5030_v36, %v4016_v13 }
 0xd90   :  { %v3982_v38 = vsel %vm3981_vm5, %v5028_v52, %v3978_v39 }
 0xd91   :  { %v4018_v31 = vadd.f32 %v5030_v36, %v4017_v42  ;;  %v3987_v6 = vsel %vm3984_vm7, %v3986_v21, %v3982_v38 }
 0xd92   :  { %v4032_v23 = vmul.f32 %v4030_v47, %v3987_v6 }
 0xd93   :  { %v4022_v59 = vsel %vm4021_vm11, %v5030_v36, %v4018_v31 }
 0xd94   :  { %v4034_v32 = vadd.f32 %v4032_v23, %v3900_v0  ;;  %v5032_v1 = vpop.eup %5031  ;;  %v4027_v15 = vsel %vm4024_vm12, %v4026_v48, %v4022_v59 }
 0xd95   :  { %v4039_v7 = vmul.f32 %v5032_v1, %v4037_v35  ;;  %v4038_v33 = vsub.f32 1.0, %v4027_v15  ;;  %v4042_v8 = vmul.f32 %v4027_v15, %v7023_v19 }
 0xd96   :  { %5033 = vtanh.f32 %v4034_v32 }
 0xd97   :  { %v4043_v18 = vadd.f32 %v4041_v26, %v4039_v7 }
 0xd99   :  { %v4059_v20 = vsel %vm4057_vm13, %v4043_v18, %v7018_v34 }
 0xd9c   :  { %v5034_v2 = vpop.eup %5033 }
 0xd9d   :  { %v4040_v60 = vmul.f32 %v5034_v2, %v4038_v33 }
 0xd9f   :  { %v4044_v10 = vadd.f32 %v4042_v8, %v4040_v60 }
 0xda1   :  { %v4060_v3 = vsel %vm4058_vm14, %v4044_v10, %v7023_v19 }
 0xda2   :  { %v4685_v53 = vpack.c.bf16 %v4060_v3, %v4059_v20 }
 0xda4   :  { %4693 = vst [vmem:[#allocation12 + $0x38] sm:$0xff] %v4685_v53  }
 0xda5   :  { %4077 = dma.vmem_to_hbm [thread:$0]  %s4070_s1, 1024, %s4072_s10, [#allocation5], %s5202_s27, %s5202_s27, %s5203_s19  }
 0xda6   :  { %5189 = dma.done.wait [#allocation5], 1024  }
 0xda7   :  { %5190 = vsyncadd [#allocation5], 4294966272 }
 0xda8   :  { %4082 = vsyncpa [#allocation4], 1 }
 0xda9   :  { %4083 = vsyncpa [#allocation7], 1 }
 0xdaa   :  { %4084 = vsyncpa [#allocation10], 1 }
 0xdab   :  { %4085 = vsyncpa [#allocation5], 1 }

</bundles_post_ra>
